<compile_context>
chip_gen: v5e
topology: v5e:2x2
jax: 0.10.0
libtpu: 0.0.40
codegen_flags: <defaults>
</compile_context>

<pallas_src>
import numpy as np
import jax
import jax.numpy as jnp
from jax.experimental import pallas as pl
from jax.experimental.pallas import tpu as pltpu


# ----------------------------------------------------------------------------
# Model hyper-parameters (PyTorch defaults of the module).
OUT_CHANNELS = 4
AUG_MULT = 5                                  # augmented_channels_multiplier
CONVLAYERS = 4
FINAL_NODES = 7
CHANNELS = OUT_CHANNELS * AUG_MULT            # 20
HIDDEN = 2 ** (CONVLAYERS - 1)                # 8
OUT_DIM = HIDDEN * CHANNELS                   # 160 = channels after conv3
T_STACK = 4                                   # graphs stacked per grid step


def _gelu(v):
    # TODO(synk): torch F.gelu default is the exact erf form; the tanh
    # approximation is used because tanh has a guaranteed Mosaic/EUP lowering.
    c = 0.7978845608028654  # sqrt(2/pi)
    return 0.5 * v * (1.0 + jnp.tanh(c * (v + 0.044715 * v * v * v)))


# ----------------------------------------------------------------------------
# Fused per-grid-step kernel: T_STACK graphs, everything resident in VMEM.
def _debruijn_kernel(x_ref, src_ref, dst_ref,
                     w0_ref, b0_ref,
                     w1_ref, b1_ref, w2_ref, b2_ref,
                     w3_ref, b3_ref, w4_ref, b4_ref,
                     m_ref, sel_ref, blin_ref, out_ref):
    f32, bf16 = jnp.float32, jnp.bfloat16
    n_nodes = x_ref.shape[0]      # T_STACK * N   (256)
    n_edges = src_ref.shape[1]    # T_STACK * E   (512)

    # --- adjacency on the MXU ----------------------------------------------
    # Both one-hots are (n_nodes, n_edges): fully lane-dense compares against
    # one broadcasted iota.  A[i, j] = #edges j->i via a single contraction
    # over the (already node-offset -> block-diagonal) edge axis.
    node_iota = jax.lax.broadcasted_iota(jnp.int32, (n_nodes, n_edges), 0)
    dst_oh = (node_iota == dst_ref[...]).astype(bf16)          # (N, E)
    src_oh = (node_iota == src_ref[...]).astype(bf16)          # (N, E)
    adj = jax.lax.dot_general(dst_oh, src_oh, (((1,), (1,)), ((), ())),
                              preferred_element_type=f32).astype(bf16)

    def graph_conv(h, wcat_ref, b_ref):
        # GraphConv: lin_rel(sum_{j->i} h_j) + lin_root(h_i); rel/root fused
        # into a single matmul against the pre-stacked [w_rel; w_root].
        agg = jnp.dot(adj, h.astype(bf16), preferred_element_type=f32)
        cat = jnp.concatenate([agg, h], axis=-1).astype(bf16)   # (N, 2*din)
        return jnp.dot(cat, wcat_ref[...], preferred_element_type=f32) + b_ref[...]

    # dense_input with an empty edge set: aggregation term == lin_rel bias.
    h = _gelu(jnp.dot(x_ref[...], w0_ref[...], preferred_element_type=f32)
              + b0_ref[...])
    h = _gelu(graph_conv(h, w1_ref, b1_ref))
    h = _gelu(graph_conv(h, w2_ref, b2_ref))
    h = _gelu(graph_conv(h, w3_ref, b3_ref))
    h = _gelu(graph_conv(h, w4_ref, b4_ref))

    # Readout (reshape(N,C)->(C,N) + AdaptiveAvgPool1d(7) + Flatten + Linear)
    # is pre-folded into m_ref; per-graph totals via one selector matmul plus
    # a single lane reduce.
    weighted = (m_ref[...] * h).astype(bf16)                    # (T*N, C)
    per_graph = jnp.dot(sel_ref[...], weighted,
                        preferred_element_type=f32)             # (T, C)
    out_ref[...] = jnp.sum(per_graph, axis=1, keepdims=True) + blin_ref[...]


# ----------------------------------------------------------------------------
# Readout folding: reshape + AdaptiveAvgPool1d + Flatten + Linear -> one matrix.
def _pool_matrix(n_nodes, final_nodes=FINAL_NODES):
    """AdaptiveAvgPool1d(final_nodes) over a length-n_nodes axis as a matrix."""
    b = np.arange(final_nodes)
    start = (b * n_nodes) // final_nodes
    end = ((b + 1) * n_nodes + final_nodes - 1) // final_nodes  # ceil
    n = np.arange(n_nodes)
    member = (n[None, :] >= start[:, None]) & (n[None, :] < end[:, None])
    pool = member.astype(np.float32) / (end - start)[:, None].astype(np.float32)
    return jnp.asarray(pool)                                    # (7, N)


def _readout_matrix(w_lin, n_nodes):
    """out = sum(M * h) + b_lin  reproduces exactly
    Linear(Flatten(Flatten(AdaptiveAvgPool1d(7)(h.reshape(C, N)[:, None]))))."""
    pool = _pool_matrix(n_nodes)                                # (7, N)
    coeff = jnp.dot(w_lin.reshape(OUT_DIM, FINAL_NODES), pool)  # (C, N)
    # h.reshape(C, N)[c, n] == h.reshape(-1)[c*N + n]; reinterpreting coeff's
    # row-major buffer as (N, C) aligns coefficients with h's (N, C) layout.
    return coeff.reshape(n_nodes, OUT_DIM)


# ----------------------------------------------------------------------------
# One-time parameter packing — hoisted out of the per-call path.
def prepare_params(params, n_nodes, t_stack=T_STACK):
    bf16 = jnp.bfloat16
    prep = {
        "w0": params["w0_root"].astype(bf16),
        "b0": params["b0"],
        "m": jnp.tile(_readout_matrix(params["w_lin"], n_nodes), (t_stack, 1)),
        "sel": jnp.repeat(jnp.eye(t_stack, dtype=jnp.float32),
                          n_nodes, axis=1).astype(bf16),        # (T, T*N)
        "b_lin": params["b_lin"],
    }
    for i in range(1, 5):
        prep[f"wcat{i}"] = jnp.concatenate(
            [params[f"w{i}_rel"], params[f"w{i}_root"]], axis=0).astype(bf16)
        prep[f"b{i}"] = params[f"b{i}"]
    return prep


# ----------------------------------------------------------------------------
# Batched wrapper: grid over groups of T_STACK graphs.
@jax.jit
def debruijn_forward(x, src, dst, prep):
    B, N, F = x.shape
    E = src.shape[1]
    T = prep["sel"].shape[0]
    assert B % T == 0, "batch must be a multiple of the per-step graph stack"
    G = B // T
    NT, ET = T * N, T * E

    # Stack T graphs per grid step; node-id offsets make the per-step
    # adjacency block-diagonal, so one 256-row matmul covers all T graphs.
    offs = (jnp.arange(T, dtype=jnp.int32) * N)[None, :, None]
    xg = x.astype(jnp.bfloat16).reshape(G, NT, F)
    srcg = (src.astype(jnp.int32).reshape(G, T, E) + offs).reshape(G, 1, ET)
    dstg = (dst.astype(jnp.int32).reshape(G, T, E) + offs).reshape(G, 1, ET)

    inputs = (xg, srcg, dstg,
              prep["w0"], prep["b0"],
              prep["wcat1"], prep["b1"], prep["wcat2"], prep["b2"],
              prep["wcat3"], prep["b3"], prep["wcat4"], prep["b4"],
              prep["m"], prep["sel"], prep["b_lin"])

    def const_spec(shape):
        # Full-array block, constant index_map -> loaded once, VMEM-resident.
        return pl.BlockSpec(shape, lambda g, _z=(0,) * len(shape): _z)

    in_specs = [
        pl.BlockSpec((None, NT, F), lambda g: (g, 0, 0)),
        pl.BlockSpec((None, 1, ET), lambda g: (g, 0, 0)),
        pl.BlockSpec((None, 1, ET), lambda g: (g, 0, 0)),
    ] + [const_spec(a.shape) for a in inputs[3:]]

    out = pl.pallas_call(
        _debruijn_kernel,
        out_shape=jax.ShapeDtypeStruct((G, T, 1), jnp.float32),
        grid_spec=pltpu.PrefetchScalarGridSpec(
            num_scalar_prefetch=0,
            grid=(G,),
            in_specs=in_specs,
            out_specs=pl.BlockSpec((None, T, 1), lambda g: (g, 0, 0)),
        ),
        compiler_params=pltpu.CompilerParams(
            dimension_semantics=("parallel",)),
    )(*inputs)
    return out.reshape(B)   # one scalar per graph (torch output shape (1,))


# ----------------------------------------------------------------------------
# Parameter init (mimics torch.nn.Linear default: U(+-1/sqrt(fan_in))).
def init_params(key, num_node_features):
    dims = [num_node_features, AUG_MULT, CHANNELS,
            2 * CHANNELS, 4 * CHANNELS, 8 * CHANNELS]

    def linear(k, fan_in, fan_out):
        bound = 1.0 / np.sqrt(fan_in)
        kw, kb = jax.random.split(k)
        w = jax.random.uniform(kw, (fan_in, fan_out), jnp.float32, -bound, bound)
        b = jax.random.uniform(kb, (1, fan_out), jnp.float32, -bound, bound)
        return w, b

    keys = jax.random.split(key, 12)
    params = {}
    w0_root, _ = linear(keys[0], dims[0], dims[1])
    _, b0 = linear(keys[1], dims[0], dims[1])
    params["w0_root"], params["b0"] = w0_root, b0
    for i, (din, dout) in enumerate(zip(dims[1:-1], dims[2:]), start=1):
        w_rel, b_rel = linear(keys[2 * i], din, dout)
        w_root, _ = linear(keys[2 * i + 1], din, dout)
        params[f"w{i}_rel"], params[f"w{i}_root"], params[f"b{i}"] = w_rel, w_root, b_rel
    in_lin = FINAL_NODES * CHANNELS * HIDDEN   # 1120
    bound = 1.0 / np.sqrt(in_lin)
    params["w_lin"] = jax.random.uniform(keys[10], (in_lin,), jnp.float32, -bound, bound)
    params["b_lin"] = jax.random.uniform(keys[11], (1, 1), jnp.float32, -bound, bound)
    return params


# ----------------------------------------------------------------------------
# Pure-JAX f32 reference that mirrors the PyTorch forward literally for a
# single graph (including the row-major reshape(N,C)->(C,N) quirk).
def reference_forward(x, src, dst, params):
    f32 = jnp.float32
    n = x.shape[0]
    node = jnp.arange(n)
    s_onehot = (src[None, :] == node[:, None]).astype(f32)   # (N, E)
    d_onehot = (dst[None, :] == node[:, None]).astype(f32)   # (N, E)
    adj = d_onehot @ s_onehot.T                              # (N, N)

    h = _gelu(x @ params["w0_root"] + params["b0"])
    for i in range(1, 5):
        h = _gelu(adj @ h @ params[f"w{i}_rel"]
                  + h @ params[f"w{i}_root"] + params[f"b{i}"])

    c = h.shape[1]
    y = h.reshape(-1).reshape(c, n)            # torch: x.reshape(x.size(1), x.size(0))
    pooled = y @ _pool_matrix(n).T             # AdaptiveAvgPool1d(7) -> (C, 7)
    out = pooled.reshape(-1) @ params["w_lin"] + params["b_lin"].reshape(())
    return out.reshape(1)


if __name__ == "__main__":
    key = jax.random.PRNGKey(0)
    k_x, k_src, k_dst, k_params = jax.random.split(key, 4)

    # 8 graphs, 64 nodes / 4 features / 128 edges each; stacked 4-per-step.
    B, N, F, E = 8, 64, 4, 128
    x = jax.random.normal(k_x, (B, N, F), jnp.float32)
    src = jax.random.randint(k_src, (B, E), 0, N, dtype=jnp.int32)
    dst = jax.random.randint(k_dst, (B, E), 0, N, dtype=jnp.int32)
    params = init_params(k_params, F)
    prep = prepare_params(params, N, T_STACK)   # hoisted one-time packing

    y = debruijn_forward(x, src, dst, prep)
    jax.block_until_ready(y)

    ref = jnp.stack([reference_forward(x[b], src[b], dst[b], params)[0]
                     for b in range(B)])
    assert y.shape == (B,) and y.dtype == jnp.float32, (y.shape, y.dtype)
    assert jnp.allclose(y, ref, rtol=2e-2, atol=2e-2), (y, ref)

    print("KERNEL_OK")
</pallas_src>

<mosaic_0001>
module attributes {stable_mosaic.version = 11 : i64} {
  func.func @_debruijn_kernel(%arg0: i32, %arg1: memref<1x256x4xbf16, #tpu.memory_space<vmem>>, %arg2: memref<1x1x512xi32, #tpu.memory_space<vmem>>, %arg3: memref<1x1x512xi32, #tpu.memory_space<vmem>>, %arg4: memref<4x5xbf16, #tpu.memory_space<vmem>>, %arg5: memref<1x5xf32, #tpu.memory_space<vmem>>, %arg6: memref<10x20xbf16, #tpu.memory_space<vmem>>, %arg7: memref<1x20xf32, #tpu.memory_space<vmem>>, %arg8: memref<40x40xbf16, #tpu.memory_space<vmem>>, %arg9: memref<1x40xf32, #tpu.memory_space<vmem>>, %arg10: memref<80x80xbf16, #tpu.memory_space<vmem>>, %arg11: memref<1x80xf32, #tpu.memory_space<vmem>>, %arg12: memref<160x160xbf16, #tpu.memory_space<vmem>>, %arg13: memref<1x160xf32, #tpu.memory_space<vmem>>, %arg14: memref<256x160xf32, #tpu.memory_space<vmem>>, %arg15: memref<4x256xbf16, #tpu.memory_space<vmem>>, %arg16: memref<1x1xf32, #tpu.memory_space<vmem>>, %arg17: memref<1x4x1xf32, #tpu.memory_space<vmem>>) attributes {dimension_semantics = [#tpu.dimension_semantics<parallel>], iteration_bounds = array<i64: 2>, scalar_prefetch = 0 : i64, scratch_operands = 0 : i64, tpu.core_type = #tpu.core_type<tc>, window_params = [{transform_indices = @transform_0, window_bounds = array<i64: 1, 256, 4>}, {transform_indices = @transform_1, window_bounds = array<i64: 1, 1, 512>}, {transform_indices = @transform_2, window_bounds = array<i64: 1, 1, 512>}, {pipeline_mode = #tpu.pipeline_mode<synchronous>, transform_indices = @transform_3, window_bounds = array<i64: 4, 5>}, {pipeline_mode = #tpu.pipeline_mode<synchronous>, transform_indices = @transform_4, window_bounds = array<i64: 1, 5>}, {pipeline_mode = #tpu.pipeline_mode<synchronous>, transform_indices = @transform_5, window_bounds = array<i64: 10, 20>}, {pipeline_mode = #tpu.pipeline_mode<synchronous>, transform_indices = @transform_6, window_bounds = array<i64: 1, 20>}, {pipeline_mode = #tpu.pipeline_mode<synchronous>, transform_indices = @transform_7, window_bounds = array<i64: 40, 40>}, {pipeline_mode = #tpu.pipeline_mode<synchronous>, transform_indices = @transform_8, window_bounds = array<i64: 1, 40>}, {pipeline_mode = #tpu.pipeline_mode<synchronous>, transform_indices = @transform_9, window_bounds = array<i64: 80, 80>}, {pipeline_mode = #tpu.pipeline_mode<synchronous>, transform_indices = @transform_10, window_bounds = array<i64: 1, 80>}, {pipeline_mode = #tpu.pipeline_mode<synchronous>, transform_indices = @transform_11, window_bounds = array<i64: 160, 160>}, {pipeline_mode = #tpu.pipeline_mode<synchronous>, transform_indices = @transform_12, window_bounds = array<i64: 1, 160>}, {pipeline_mode = #tpu.pipeline_mode<synchronous>, transform_indices = @transform_13, window_bounds = array<i64: 256, 160>}, {pipeline_mode = #tpu.pipeline_mode<synchronous>, transform_indices = @transform_14, window_bounds = array<i64: 4, 256>}, {pipeline_mode = #tpu.pipeline_mode<synchronous>, transform_indices = @transform_15, window_bounds = array<i64: 1, 1>}, {transform_indices = @transform_16, window_bounds = array<i64: 1, 4, 1>}]} {
    %0 = tpu.iota {dimensions = array<i32: 0>} : vector<256x512xi32>
    %c0 = arith.constant 0 : index
    %c0_0 = arith.constant 0 : index
    %c0_1 = arith.constant 0 : index
    %1 = vector.load %arg3[%c0, %c0_0, %c0_1] : memref<1x1x512xi32, #tpu.memory_space<vmem>>, vector<1x1x512xi32>
    %2 = vector.shape_cast %1 : vector<1x1x512xi32> to vector<1x512xi32>
    %3 = vector.broadcast %2 : vector<1x512xi32> to vector<256x512xi32>
    %4 = arith.cmpi eq, %0, %3 : vector<256x512xi32>
    %5 = arith.extui %4 : vector<256x512xi1> to vector<256x512xi32>
    %6 = arith.sitofp %5 : vector<256x512xi32> to vector<256x512xf32>
    %7 = arith.truncf %6 : vector<256x512xf32> to vector<256x512xbf16>
    %c0_2 = arith.constant 0 : index
    %c0_3 = arith.constant 0 : index
    %c0_4 = arith.constant 0 : index
    %8 = vector.load %arg2[%c0_2, %c0_3, %c0_4] : memref<1x1x512xi32, #tpu.memory_space<vmem>>, vector<1x1x512xi32>
    %9 = vector.shape_cast %8 : vector<1x1x512xi32> to vector<1x512xi32>
    %10 = vector.broadcast %9 : vector<1x512xi32> to vector<256x512xi32>
    %11 = arith.cmpi eq, %0, %10 : vector<256x512xi32>
    %12 = arith.extui %11 : vector<256x512xi1> to vector<256x512xi32>
    %13 = arith.sitofp %12 : vector<256x512xi32> to vector<256x512xf32>
    %14 = arith.truncf %13 : vector<256x512xf32> to vector<256x512xbf16>
    %cst = arith.constant dense<0.000000e+00> : vector<256x256xf32>
    %15 = tpu.matmul %7, %14, %cst {dimension_numbers = #tpu.dot_dimension_numbers<[1], [1], [0], [0], [0, 0, 1, 0], [], []>} : vector<256x512xbf16>, vector<256x512xbf16>, vector<256x256xf32> -> vector<256x256xf32>
    %16 = arith.truncf %15 : vector<256x256xf32> to vector<256x256xbf16>
    %c0_5 = arith.constant 0 : index
    %c0_6 = arith.constant 0 : index
    %c0_7 = arith.constant 0 : index
    %17 = vector.load %arg1[%c0_5, %c0_6, %c0_7] : memref<1x256x4xbf16, #tpu.memory_space<vmem>>, vector<1x256x4xbf16>
    %18 = vector.shape_cast %17 : vector<1x256x4xbf16> to vector<256x4xbf16>
    %c0_8 = arith.constant 0 : index
    %c0_9 = arith.constant 0 : index
    %19 = vector.load %arg4[%c0_8, %c0_9] : memref<4x5xbf16, #tpu.memory_space<vmem>>, vector<4x5xbf16>
    %cst_10 = arith.constant dense<0.000000e+00> : vector<256x5xf32>
    %20 = tpu.matmul %18, %19, %cst_10 {dimension_numbers = #tpu.dot_dimension_numbers<[1], [0], [0], [1], [0, 0, 1, 1], [], []>} : vector<256x4xbf16>, vector<4x5xbf16>, vector<256x5xf32> -> vector<256x5xf32>
    %c0_11 = arith.constant 0 : index
    %c0_12 = arith.constant 0 : index
    %21 = vector.load %arg5[%c0_11, %c0_12] : memref<1x5xf32, #tpu.memory_space<vmem>>, vector<1x5xf32>
    %22 = vector.broadcast %21 : vector<1x5xf32> to vector<256x5xf32>
    %23 = arith.addf %20, %22 : vector<256x5xf32>
    %cst_13 = arith.constant 5.000000e-01 : f32
    %24 = vector.broadcast %cst_13 : f32 to vector<256x5xf32>
    %25 = arith.mulf %24, %23 : vector<256x5xf32>
    %cst_14 = arith.constant 4.471500e-02 : f32
    %26 = vector.broadcast %cst_14 : f32 to vector<256x5xf32>
    %27 = arith.mulf %26, %23 : vector<256x5xf32>
    %28 = arith.mulf %27, %23 : vector<256x5xf32>
    %29 = arith.mulf %28, %23 : vector<256x5xf32>
    %30 = arith.addf %23, %29 : vector<256x5xf32>
    %cst_15 = arith.constant 0.797884583 : f32
    %31 = vector.broadcast %cst_15 : f32 to vector<256x5xf32>
    %32 = arith.mulf %31, %30 : vector<256x5xf32>
    %33 = math.tanh %32 : vector<256x5xf32>
    %cst_16 = arith.constant 1.000000e+00 : f32
    %34 = vector.broadcast %cst_16 : f32 to vector<256x5xf32>
    %35 = arith.addf %34, %33 : vector<256x5xf32>
    %36 = arith.mulf %25, %35 : vector<256x5xf32>
    %37 = arith.truncf %36 : vector<256x5xf32> to vector<256x5xbf16>
    %cst_17 = arith.constant dense<0.000000e+00> : vector<256x5xf32>
    %38 = tpu.matmul %16, %37, %cst_17 {dimension_numbers = #tpu.dot_dimension_numbers<[1], [0], [0], [1], [0, 0, 1, 1], [], []>} : vector<256x256xbf16>, vector<256x5xbf16>, vector<256x5xf32> -> vector<256x5xf32>
    %39 = tpu.concatenate %38, %36 in 1 : vector<256x5xf32>, vector<256x5xf32> -> vector<256x10xf32>
    %40 = arith.truncf %39 : vector<256x10xf32> to vector<256x10xbf16>
    %c0_18 = arith.constant 0 : index
    %c0_19 = arith.constant 0 : index
    %41 = vector.load %arg6[%c0_18, %c0_19] : memref<10x20xbf16, #tpu.memory_space<vmem>>, vector<10x20xbf16>
    %cst_20 = arith.constant dense<0.000000e+00> : vector<256x20xf32>
    %42 = tpu.matmul %40, %41, %cst_20 {dimension_numbers = #tpu.dot_dimension_numbers<[1], [0], [0], [1], [0, 0, 1, 1], [], []>} : vector<256x10xbf16>, vector<10x20xbf16>, vector<256x20xf32> -> vector<256x20xf32>
    %c0_21 = arith.constant 0 : index
    %c0_22 = arith.constant 0 : index
    %43 = vector.load %arg7[%c0_21, %c0_22] : memref<1x20xf32, #tpu.memory_space<vmem>>, vector<1x20xf32>
    %44 = vector.broadcast %43 : vector<1x20xf32> to vector<256x20xf32>
    %45 = arith.addf %42, %44 : vector<256x20xf32>
    %cst_23 = arith.constant 5.000000e-01 : f32
    %46 = vector.broadcast %cst_23 : f32 to vector<256x20xf32>
    %47 = arith.mulf %46, %45 : vector<256x20xf32>
    %cst_24 = arith.constant 4.471500e-02 : f32
    %48 = vector.broadcast %cst_24 : f32 to vector<256x20xf32>
    %49 = arith.mulf %48, %45 : vector<256x20xf32>
    %50 = arith.mulf %49, %45 : vector<256x20xf32>
    %51 = arith.mulf %50, %45 : vector<256x20xf32>
    %52 = arith.addf %45, %51 : vector<256x20xf32>
    %cst_25 = arith.constant 0.797884583 : f32
    %53 = vector.broadcast %cst_25 : f32 to vector<256x20xf32>
    %54 = arith.mulf %53, %52 : vector<256x20xf32>
    %55 = math.tanh %54 : vector<256x20xf32>
    %cst_26 = arith.constant 1.000000e+00 : f32
    %56 = vector.broadcast %cst_26 : f32 to vector<256x20xf32>
    %57 = arith.addf %56, %55 : vector<256x20xf32>
    %58 = arith.mulf %47, %57 : vector<256x20xf32>
    %59 = arith.truncf %58 : vector<256x20xf32> to vector<256x20xbf16>
    %cst_27 = arith.constant dense<0.000000e+00> : vector<256x20xf32>
    %60 = tpu.matmul %16, %59, %cst_27 {dimension_numbers = #tpu.dot_dimension_numbers<[1], [0], [0], [1], [0, 0, 1, 1], [], []>} : vector<256x256xbf16>, vector<256x20xbf16>, vector<256x20xf32> -> vector<256x20xf32>
    %61 = tpu.concatenate %60, %58 in 1 : vector<256x20xf32>, vector<256x20xf32> -> vector<256x40xf32>
    %62 = arith.truncf %61 : vector<256x40xf32> to vector<256x40xbf16>
    %c0_28 = arith.constant 0 : index
    %c0_29 = arith.constant 0 : index
    %63 = vector.load %arg8[%c0_28, %c0_29] : memref<40x40xbf16, #tpu.memory_space<vmem>>, vector<40x40xbf16>
    %cst_30 = arith.constant dense<0.000000e+00> : vector<256x40xf32>
    %64 = tpu.matmul %62, %63, %cst_30 {dimension_numbers = #tpu.dot_dimension_numbers<[1], [0], [0], [1], [0, 0, 1, 1], [], []>} : vector<256x40xbf16>, vector<40x40xbf16>, vector<256x40xf32> -> vector<256x40xf32>
    %c0_31 = arith.constant 0 : index
    %c0_32 = arith.constant 0 : index
    %65 = vector.load %arg9[%c0_31, %c0_32] : memref<1x40xf32, #tpu.memory_space<vmem>>, vector<1x40xf32>
    %66 = vector.broadcast %65 : vector<1x40xf32> to vector<256x40xf32>
    %67 = arith.addf %64, %66 : vector<256x40xf32>
    %cst_33 = arith.constant 5.000000e-01 : f32
    %68 = vector.broadcast %cst_33 : f32 to vector<256x40xf32>
    %69 = arith.mulf %68, %67 : vector<256x40xf32>
    %cst_34 = arith.constant 4.471500e-02 : f32
    %70 = vector.broadcast %cst_34 : f32 to vector<256x40xf32>
    %71 = arith.mulf %70, %67 : vector<256x40xf32>
    %72 = arith.mulf %71, %67 : vector<256x40xf32>
    %73 = arith.mulf %72, %67 : vector<256x40xf32>
    %74 = arith.addf %67, %73 : vector<256x40xf32>
    %cst_35 = arith.constant 0.797884583 : f32
    %75 = vector.broadcast %cst_35 : f32 to vector<256x40xf32>
    %76 = arith.mulf %75, %74 : vector<256x40xf32>
    %77 = math.tanh %76 : vector<256x40xf32>
    %cst_36 = arith.constant 1.000000e+00 : f32
    %78 = vector.broadcast %cst_36 : f32 to vector<256x40xf32>
    %79 = arith.addf %78, %77 : vector<256x40xf32>
    %80 = arith.mulf %69, %79 : vector<256x40xf32>
    %81 = arith.truncf %80 : vector<256x40xf32> to vector<256x40xbf16>
    %cst_37 = arith.constant dense<0.000000e+00> : vector<256x40xf32>
    %82 = tpu.matmul %16, %81, %cst_37 {dimension_numbers = #tpu.dot_dimension_numbers<[1], [0], [0], [1], [0, 0, 1, 1], [], []>} : vector<256x256xbf16>, vector<256x40xbf16>, vector<256x40xf32> -> vector<256x40xf32>
    %83 = tpu.concatenate %82, %80 in 1 : vector<256x40xf32>, vector<256x40xf32> -> vector<256x80xf32>
    %84 = arith.truncf %83 : vector<256x80xf32> to vector<256x80xbf16>
    %c0_38 = arith.constant 0 : index
    %c0_39 = arith.constant 0 : index
    %85 = vector.load %arg10[%c0_38, %c0_39] : memref<80x80xbf16, #tpu.memory_space<vmem>>, vector<80x80xbf16>
    %cst_40 = arith.constant dense<0.000000e+00> : vector<256x80xf32>
    %86 = tpu.matmul %84, %85, %cst_40 {dimension_numbers = #tpu.dot_dimension_numbers<[1], [0], [0], [1], [0, 0, 1, 1], [], []>} : vector<256x80xbf16>, vector<80x80xbf16>, vector<256x80xf32> -> vector<256x80xf32>
    %c0_41 = arith.constant 0 : index
    %c0_42 = arith.constant 0 : index
    %87 = vector.load %arg11[%c0_41, %c0_42] : memref<1x80xf32, #tpu.memory_space<vmem>>, vector<1x80xf32>
    %88 = vector.broadcast %87 : vector<1x80xf32> to vector<256x80xf32>
    %89 = arith.addf %86, %88 : vector<256x80xf32>
    %cst_43 = arith.constant 5.000000e-01 : f32
    %90 = vector.broadcast %cst_43 : f32 to vector<256x80xf32>
    %91 = arith.mulf %90, %89 : vector<256x80xf32>
    %cst_44 = arith.constant 4.471500e-02 : f32
    %92 = vector.broadcast %cst_44 : f32 to vector<256x80xf32>
    %93 = arith.mulf %92, %89 : vector<256x80xf32>
    %94 = arith.mulf %93, %89 : vector<256x80xf32>
    %95 = arith.mulf %94, %89 : vector<256x80xf32>
    %96 = arith.addf %89, %95 : vector<256x80xf32>
    %cst_45 = arith.constant 0.797884583 : f32
    %97 = vector.broadcast %cst_45 : f32 to vector<256x80xf32>
    %98 = arith.mulf %97, %96 : vector<256x80xf32>
    %99 = math.tanh %98 : vector<256x80xf32>
    %cst_46 = arith.constant 1.000000e+00 : f32
    %100 = vector.broadcast %cst_46 : f32 to vector<256x80xf32>
    %101 = arith.addf %100, %99 : vector<256x80xf32>
    %102 = arith.mulf %91, %101 : vector<256x80xf32>
    %103 = arith.truncf %102 : vector<256x80xf32> to vector<256x80xbf16>
    %cst_47 = arith.constant dense<0.000000e+00> : vector<256x80xf32>
    %104 = tpu.matmul %16, %103, %cst_47 {dimension_numbers = #tpu.dot_dimension_numbers<[1], [0], [0], [1], [0, 0, 1, 1], [], []>} : vector<256x256xbf16>, vector<256x80xbf16>, vector<256x80xf32> -> vector<256x80xf32>
    %105 = tpu.concatenate %104, %102 in 1 : vector<256x80xf32>, vector<256x80xf32> -> vector<256x160xf32>
    %106 = arith.truncf %105 : vector<256x160xf32> to vector<256x160xbf16>
    %c0_48 = arith.constant 0 : index
    %c0_49 = arith.constant 0 : index
    %107 = vector.load %arg12[%c0_48, %c0_49] : memref<160x160xbf16, #tpu.memory_space<vmem>>, vector<160x160xbf16>
    %cst_50 = arith.constant dense<0.000000e+00> : vector<256x160xf32>
    %108 = tpu.matmul %106, %107, %cst_50 {dimension_numbers = #tpu.dot_dimension_numbers<[1], [0], [0], [1], [0, 0, 1, 1], [], []>} : vector<256x160xbf16>, vector<160x160xbf16>, vector<256x160xf32> -> vector<256x160xf32>
    %c0_51 = arith.constant 0 : index
    %c0_52 = arith.constant 0 : index
    %109 = vector.load %arg13[%c0_51, %c0_52] : memref<1x160xf32, #tpu.memory_space<vmem>>, vector<1x160xf32>
    %110 = vector.broadcast %109 : vector<1x160xf32> to vector<256x160xf32>
    %111 = arith.addf %108, %110 : vector<256x160xf32>
    %cst_53 = arith.constant 5.000000e-01 : f32
    %112 = vector.broadcast %cst_53 : f32 to vector<256x160xf32>
    %113 = arith.mulf %112, %111 : vector<256x160xf32>
    %cst_54 = arith.constant 4.471500e-02 : f32
    %114 = vector.broadcast %cst_54 : f32 to vector<256x160xf32>
    %115 = arith.mulf %114, %111 : vector<256x160xf32>
    %116 = arith.mulf %115, %111 : vector<256x160xf32>
    %117 = arith.mulf %116, %111 : vector<256x160xf32>
    %118 = arith.addf %111, %117 : vector<256x160xf32>
    %cst_55 = arith.constant 0.797884583 : f32
    %119 = vector.broadcast %cst_55 : f32 to vector<256x160xf32>
    %120 = arith.mulf %119, %118 : vector<256x160xf32>
    %121 = math.tanh %120 : vector<256x160xf32>
    %cst_56 = arith.constant 1.000000e+00 : f32
    %122 = vector.broadcast %cst_56 : f32 to vector<256x160xf32>
    %123 = arith.addf %122, %121 : vector<256x160xf32>
    %124 = arith.mulf %113, %123 : vector<256x160xf32>
    %c0_57 = arith.constant 0 : index
    %c0_58 = arith.constant 0 : index
    %125 = vector.load %arg14[%c0_57, %c0_58] : memref<256x160xf32, #tpu.memory_space<vmem>>, vector<256x160xf32>
    %126 = arith.mulf %125, %124 : vector<256x160xf32>
    %127 = arith.truncf %126 : vector<256x160xf32> to vector<256x160xbf16>
    %c0_59 = arith.constant 0 : index
    %c0_60 = arith.constant 0 : index
    %128 = vector.load %arg15[%c0_59, %c0_60] : memref<4x256xbf16, #tpu.memory_space<vmem>>, vector<4x256xbf16>
    %cst_61 = arith.constant dense<0.000000e+00> : vector<4x160xf32>
    %129 = tpu.matmul %128, %127, %cst_61 {dimension_numbers = #tpu.dot_dimension_numbers<[1], [0], [0], [1], [0, 0, 1, 1], [], []>} : vector<4x256xbf16>, vector<256x160xbf16>, vector<4x160xf32> -> vector<4x160xf32>
    %cst_62 = arith.constant dense<0.000000e+00> : vector<4xf32>
    %130 = vector.multi_reduction <add>, %129, %cst_62 [1] : vector<4x160xf32> to vector<4xf32>
    %131 = vector.shape_cast %130 : vector<4xf32> to vector<4x1xf32>
    %c0_63 = arith.constant 0 : index
    %c0_64 = arith.constant 0 : index
    %132 = vector.load %arg16[%c0_63, %c0_64] : memref<1x1xf32, #tpu.memory_space<vmem>>, vector<1x1xf32>
    %133 = vector.broadcast %132 : vector<1x1xf32> to vector<4x1xf32>
    %134 = arith.addf %131, %133 : vector<4x1xf32>
    %c0_65 = arith.constant 0 : index
    %c0_66 = arith.constant 0 : index
    %c0_67 = arith.constant 0 : index
    %135 = vector.load %arg17[%c0_65, %c0_66, %c0_67] : memref<1x4x1xf32, #tpu.memory_space<vmem>>, vector<1x4x1xf32>
    %136 = vector.shape_cast %135 : vector<1x4x1xf32> to vector<4x1xf32>
    %137 = vector.shape_cast %134 : vector<4x1xf32> to vector<1x4x1xf32>
    tpu.vector_store %arg17[%c0_65, %c0_66, %c0_67], %137 {strides = array<i32>} : memref<1x4x1xf32, #tpu.memory_space<vmem>>, vector<1x4x1xf32>,
    return
  }
  func.func @transform_0(%arg0: i32) -> (i32, i32, i32) {
    %c0_i32 = arith.constant 0 : i32
    %c0_i32_0 = arith.constant 0 : i32
    %c0_i32_1 = arith.constant 0 : i32
    return %arg0, %c0_i32, %c0_i32_0 : i32, i32, i32
  }
  func.func @transform_1(%arg0: i32) -> (i32, i32, i32) {
    %c0_i32 = arith.constant 0 : i32
    %c0_i32_0 = arith.constant 0 : i32
    %c0_i32_1 = arith.constant 0 : i32
    return %arg0, %c0_i32, %c0_i32_0 : i32, i32, i32
  }
  func.func @transform_2(%arg0: i32) -> (i32, i32, i32) {
    %c0_i32 = arith.constant 0 : i32
    %c0_i32_0 = arith.constant 0 : i32
    %c0_i32_1 = arith.constant 0 : i32
    return %arg0, %c0_i32, %c0_i32_0 : i32, i32, i32
  }
  func.func @transform_3(%arg0: i32) -> (i32, i32) {
    %c0_i32 = arith.constant 0 : i32
    %c0_i32_0 = arith.constant 0 : i32
    %c0_i32_1 = arith.constant 0 : i32
    return %c0_i32, %c0_i32_0 : i32, i32
  }
  func.func @transform_4(%arg0: i32) -> (i32, i32) {
    %c0_i32 = arith.constant 0 : i32
    %c0_i32_0 = arith.constant 0 : i32
    %c0_i32_1 = arith.constant 0 : i32
    return %c0_i32, %c0_i32_0 : i32, i32
  }
  func.func @transform_5(%arg0: i32) -> (i32, i32) {
    %c0_i32 = arith.constant 0 : i32
    %c0_i32_0 = arith.constant 0 : i32
    %c0_i32_1 = arith.constant 0 : i32
    return %c0_i32, %c0_i32_0 : i32, i32
  }
  func.func @transform_6(%arg0: i32) -> (i32, i32) {
    %c0_i32 = arith.constant 0 : i32
    %c0_i32_0 = arith.constant 0 : i32
    %c0_i32_1 = arith.constant 0 : i32
    return %c0_i32, %c0_i32_0 : i32, i32
  }
  func.func @transform_7(%arg0: i32) -> (i32, i32) {
    %c0_i32 = arith.constant 0 : i32
    %c0_i32_0 = arith.constant 0 : i32
    %c0_i32_1 = arith.constant 0 : i32
    return %c0_i32, %c0_i32_0 : i32, i32
  }
  func.func @transform_8(%arg0: i32) -> (i32, i32) {
    %c0_i32 = arith.constant 0 : i32
    %c0_i32_0 = arith.constant 0 : i32
    %c0_i32_1 = arith.constant 0 : i32
    return %c0_i32, %c0_i32_0 : i32, i32
  }
  func.func @transform_9(%arg0: i32) -> (i32, i32) {
    %c0_i32 = arith.constant 0 : i32
    %c0_i32_0 = arith.constant 0 : i32
    %c0_i32_1 = arith.constant 0 : i32
    return %c0_i32, %c0_i32_0 : i32, i32
  }
  func.func @transform_10(%arg0: i32) -> (i32, i32) {
    %c0_i32 = arith.constant 0 : i32
    %c0_i32_0 = arith.constant 0 : i32
    %c0_i32_1 = arith.constant 0 : i32
    return %c0_i32, %c0_i32_0 : i32, i32
  }
  func.func @transform_11(%arg0: i32) -> (i32, i32) {
    %c0_i32 = arith.constant 0 : i32
    %c0_i32_0 = arith.constant 0 : i32
    %c0_i32_1 = arith.constant 0 : i32
    return %c0_i32, %c0_i32_0 : i32, i32
  }
  func.func @transform_12(%arg0: i32) -> (i32, i32) {
    %c0_i32 = arith.constant 0 : i32
    %c0_i32_0 = arith.constant 0 : i32
    %c0_i32_1 = arith.constant 0 : i32
    return %c0_i32, %c0_i32_0 : i32, i32
  }
  func.func @transform_13(%arg0: i32) -> (i32, i32) {
    %c0_i32 = arith.constant 0 : i32
    %c0_i32_0 = arith.constant 0 : i32
    %c0_i32_1 = arith.constant 0 : i32
    return %c0_i32, %c0_i32_0 : i32, i32
  }
  func.func @transform_14(%arg0: i32) -> (i32, i32) {
    %c0_i32 = arith.constant 0 : i32
    %c0_i32_0 = arith.constant 0 : i32
    %c0_i32_1 = arith.constant 0 : i32
    return %c0_i32, %c0_i32_0 : i32, i32
  }
  func.func @transform_15(%arg0: i32) -> (i32, i32) {
    %c0_i32 = arith.constant 0 : i32
    %c0_i32_0 = arith.constant 0 : i32
    %c0_i32_1 = arith.constant 0 : i32
    return %c0_i32, %c0_i32_0 : i32, i32
  }
  func.func @transform_16(%arg0: i32) -> (i32, i32, i32) {
    %c0_i32 = arith.constant 0 : i32
    %c0_i32_0 = arith.constant 0 : i32
    %c0_i32_1 = arith.constant 0 : i32
    return %arg0, %c0_i32, %c0_i32_0 : i32, i32, i32
  }
}

</mosaic_0001>

<bundles_post_ra>
// kernel: debruijn_forward.1
= control target key start
LH: loop header
LB: loop body
LE: loop exit
PB: predicated region body
PF: predicated region fallthrough
CT: control target
= control target key end

     0   :  { %s8859_s23 = smov 0   ;;  %s12908_s0 = inlined_call_operand.vmem [shape: bf16[2,256,4], index: 0, kind: input, shape index: {}]   ;;  %s12909_s1 = inlined_call_operand.vmem [shape: s32[2,1,512], index: 1, kind: input, shape index: {}]   ;;  %s12910_s2 = inlined_call_operand.vmem [shape: s32[2,1,512], index: 2, kind: input, shape index: {}]   ;;  %s12911_s3 = inlined_call_operand.vmem [shape: bf16[4,5], index: 3, kind: input, shape index: {}]   ;;  %s12912_s4 = inlined_call_operand.vmem [shape: f32[1,5], index: 4, kind: input, shape index: {}]   ;;  %s12913_s5 = inlined_call_operand.vmem [shape: bf16[10,20], index: 5, kind: input, shape index: {}]   ;;  %s12914_s6 = inlined_call_operand.vmem [shape: f32[1,20], index: 6, kind: input, shape index: {}]   ;;  %s12915_s7 = inlined_call_operand.vmem [shape: bf16[40,40], index: 7, kind: input, shape index: {}]   ;;  %s12916_s8 = inlined_call_operand.vmem [shape: f32[1,40], index: 8, kind: input, shape index: {}]   ;;  %s12917_s9 = inlined_call_operand.vmem [shape: bf16[80,80], index: 9, kind: input, shape index: {}]   ;;  %s12918_s10 = inlined_call_operand.vmem [shape: f32[1,80], index: 10, kind: input, shape index: {}]   ;;  %s12919_s11 = inlined_call_operand.vmem [shape: bf16[160,160], index: 11, kind: input, shape index: {}]   ;;  %s12920_s12 = inlined_call_operand.vmem [shape: f32[1,160], index: 12, kind: input, shape index: {}]   ;;  %s12921_s13 = inlined_call_operand.vmem [shape: f32[256,160], index: 13, kind: input, shape index: {}]   ;;  %s12922_s14 = inlined_call_operand.vmem [shape: bf16[4,256], index: 14, kind: input, shape index: {}]   ;;  %s12923_s15 = inlined_call_operand.<no memory space> [shape: f32[1,1], index: 15, kind: input, shape index: {}]   ;;  %s12924_s16 = inlined_call_operand.vmem [shape: f32[2,4,1], index: 16, kind: output, shape index: {}]  }
   0x1   :  { %13060 = sst [smem:[#allocation27_spill]] %s12908_s0  ;;  %v21_v0 = vstv %s12923_s15 }
   0x2   :  { %22 = vst [vmem:[#allocation2] sm:$0x1] %v21_v0 }
   0x3 LB: > { %s7066_s24 = sadd.s32 4294967295, %s8764_s23   ;;  %p7070_p0 = scmp.ge.s32.totalorder %s8764_s23, 1  ;;  %s8764_s23 = sphi %s8859_s23, %s28_s23  }
   0x4   : > { %p482_p1 = scmp.lt.s32.totalorder %s8764_s23, 3 }
   0x6   : > { %p483_p2 = pnand %p7070_p0, %p482_p1 }
   0x8   : > { %486 = sbr.rel (%p483_p2) target bundleno = 3703 (0xe77), region = 84 }
   0xd   : > { %p539_p3 = scmp.lt.s32.totalorder %s7066_s24, 1  ;;  %v557_v1 = vlaneseq  ;;  %v12960_v12 = vmov 1.0|1.0   ;;  %v13061_v29 = vmov 0  ;;  %v13063_v30 = vmov 0  ;;  %s13302_s21 = sld [smem:[#allocation27_spill]] }
   0xe   : > { %v13065_v31 = vmov 0  ;;  %v13067_v32 = vmov 0  ;;  %v13069_v33 = vmov 0  ;;  %v13071_v34 = vmov 0  ;;  %s8767_s26 = smov 5   ;;  %s8769_s28 = smov 40  }
   0xf   : > { %s13422_s24 = smov (!%p539_p3, %s7066_s24), 1  ;;  %v8869_v2 = vshrl.u32 %v557_v1, 7  ;;  %v13073_v35 = vmov 0  ;;  %v13075_v36 = vmov 0  ;;  %v13077_v37 = vmov 0 }
  0x10   : > { %s8872_s15 = sshll.u32 %s13422_s24, 2  ;;  %v13079_v38 = vmov 0  ;;  %v13081_v39 = vmov 0  ;;  %v13083_v40 = vmov 0  ;;  %v13085_v41 = vmov 0  ;;  %s7990_s18 = sshll.u32 %s13422_s24, 7 }
  0x11   : > { %s547_s27 = scalar_lea.vmem %s12909_s1, %s8872_s15  ;;  %v8879_v3 = vadd.s32 112, %v8869_v2  ;;  %v8882_v4 = vadd.s32 120, %v8869_v2  ;;  %v8893_v10 = vadd.s32 96, %v8869_v2  ;;  %v8896_v11 = vadd.s32 104, %v8869_v2  ;;  %s551_s30 = scalar_lea.vmem %s12910_s2, %s8872_s15 }
  0x12   : > { %v1043_v5 = vld [vmem:[%s547_s27] sm:$0xf]  ;;  %v8935_v13 = vadd.s32 80, %v8869_v2  ;;  %v8938_v14 = vadd.s32 88, %v8869_v2  ;;  %v8961_v15 = vadd.s32 64, %v8869_v2  ;;  %v8964_v16 = vadd.s32 72, %v8869_v2  ;;  %s555_s19 = scalar_lea.vmem %s12924_s16, %s8872_s15 }
  0x13   : > { %v8884_v6 = vperm.slane %v1043_v5, 0  ;;  %v8886_v7 = vperm.slane %v1043_v5, 1  ;;  %v8888_v8 = vperm.slane %v1043_v5, 2  ;;  %v8890_v9 = vperm.slane %v1043_v5, 3  ;;  %v590_v24 = vld [vmem:[%s551_s30] sm:$0xf]  ;;  %s10297_s22 = scalar_lea.vmem %s13302_s21, %s7990_s18 }
  0x14   : > { %v8987_v17 = vadd.s32 48, %v8869_v2  ;;  %v8990_v18 = vadd.s32 56, %v8869_v2  ;;  %v9013_v19 = vadd.s32 32, %v8869_v2  ;;  %v9016_v20 = vadd.s32 40, %v8869_v2  ;;  %s8768_s18 = smov 20   ;;  %s8770_s27 = smov 80  }
  0x15   : > { %vm1104_vm0 = vcmp.eq.s32.totalorder %v8879_v3, %v8884_v6  ;;  %vm1108_vm1 = vcmp.eq.s32.totalorder %v8882_v4, %v8884_v6  ;;  %vm1105_vm2 = vcmp.eq.s32.totalorder %v8879_v3, %v8886_v7  ;;  %vm1109_vm3 = vcmp.eq.s32.totalorder %v8882_v4, %v8886_v7 }
  0x16   : > { %vm7332_vm4 = vmpackc.low %vm1108_vm1, %vm1104_vm0  ;;  %vm1106_vm5 = vcmp.eq.s32.totalorder %v8879_v3, %v8888_v8  ;;  %vm1110_vm6 = vcmp.eq.s32.totalorder %v8882_v4, %v8888_v8  ;;  %vm1107_vm7 = vcmp.eq.s32.totalorder %v8879_v3, %v8890_v9  ;;  %vm1111_vm8 = vcmp.eq.s32.totalorder %v8882_v4, %v8890_v9 }
  0x17   : > { %7333 = vmatpush.bf16.xpose.msk.msra.mxu0 %vm7332_vm4, %v12960_v12  ;;  %vm7380_vm9 = vmpackc.low %vm1109_vm3, %vm1105_vm2  ;;  %vm1096_vm12 = vcmp.eq.s32.totalorder %v8893_v10, %v8884_v6  ;;  %vm1100_vm13 = vcmp.eq.s32.totalorder %v8896_v11, %v8884_v6  ;;  %vm1097_vm14 = vcmp.eq.s32.totalorder %v8893_v10, %v8886_v7  ;;  %vm1101_vm15 = vcmp.eq.s32.totalorder %v8896_v11, %v8886_v7 }
  0x18   : > { %7381 = vmatpush.bf16.xpose.msk.msra.mxu1 %vm7380_vm9, %v12960_v12  ;;  %vm7428_vm10 = vmpackc.low %vm1110_vm6, %vm1106_vm5  ;;  %vm1098_vm0 = vcmp.eq.s32.totalorder %v8893_v10, %v8888_v8  ;;  %vm1102_vm1 = vcmp.eq.s32.totalorder %v8896_v11, %v8888_v8  ;;  %vm1099_vm3 = vcmp.eq.s32.totalorder %v8893_v10, %v8890_v9  ;;  %vm1103_vm4 = vcmp.eq.s32.totalorder %v8896_v11, %v8890_v9 }
  0x19   : > { %7429 = vmatpush.bf16.xpose.msk.msra.mxu2 %vm7428_vm10, %v12960_v12  ;;  %vm7476_vm11 = vmpackc.low %vm1111_vm8, %vm1107_vm7  ;;  %vm1088_vm8 = vcmp.eq.s32.totalorder %v8935_v13, %v8884_v6  ;;  %vm1092_vm9 = vcmp.eq.s32.totalorder %v8938_v14, %v8884_v6  ;;  %vm1089_vm10 = vcmp.eq.s32.totalorder %v8935_v13, %v8886_v7  ;;  %v9039_v21 = vadd.s32 16, %v8869_v2 }
  0x1a   : > { %7477 = vmatpush.bf16.xpose.msk.msra.mxu3 %vm7476_vm11, %v12960_v12  ;;  %vm7334_vm2 = vmpackc.low %vm1100_vm13, %vm1096_vm12  ;;  %vm1093_vm11 = vcmp.eq.s32.totalorder %v8938_v14, %v8886_v7  ;;  %vm1090_vm12 = vcmp.eq.s32.totalorder %v8935_v13, %v8888_v8  ;;  %vm1094_vm13 = vcmp.eq.s32.totalorder %v8938_v14, %v8888_v8  ;;  %v9042_v22 = vadd.s32 24, %v8869_v2 }
  0x1b   : > { %vm7382_vm5 = vmpackc.low %vm1101_vm15, %vm1097_vm14  ;;  %vm1091_vm15 = vcmp.eq.s32.totalorder %v8935_v13, %v8890_v9  ;;  %v559_v23 = vadd.s32 8, %v8869_v2  ;;  %v9085_v25 = vperm.slane %v590_v24, 0  ;;  %v9087_v26 = vperm.slane %v590_v24, 1 }
  0x1c   : > { %vm7430_vm6 = vmpackc.low %vm1102_vm1, %vm1098_vm0  ;;  %vm1095_vm0 = vcmp.eq.s32.totalorder %v8938_v14, %v8890_v9  ;;  %v9089_v27 = vperm.slane %v590_v24, 2  ;;  %v9092_v28 = vperm.slane %v590_v24, 3  ;;  %v13087_v42 = vmov 0 }
  0x1d   : > { %vm7478_vm7 = vmpackc.low %vm1103_vm4, %vm1099_vm3  ;;  %vm1080_vm4 = vcmp.eq.s32.totalorder %v8961_v15, %v8884_v6  ;;  %v13089_v43 = vmov 0  ;;  %v13091_v44 = vmov 0  ;;  %v13093_v45 = vmov 0 }
  0x1e   : > { %vm7336_vm14 = vmpackc.low %vm1092_vm9, %vm1088_vm8  ;;  %vm1082_vm8 = vcmp.eq.s32.totalorder %v8961_v15, %v8888_v8  ;;  %vm1086_vm9 = vcmp.eq.s32.totalorder %v8964_v16, %v8888_v8  ;;  %v13095_v46 = vmov 0  ;;  %v13097_v47 = vmov 0 }
  0x1f   : > { %7335 = vmatpush.bf16.xpose.msk.msra.mxu0 %vm7334_vm2, %v12960_v12  ;;  %vm7384_vm1 = vmpackc.low %vm1093_vm11, %vm1089_vm10  ;;  %vm1083_vm11 = vcmp.eq.s32.totalorder %v8961_v15, %v8890_v9  ;;  %v13099_v48 = vmov 0  ;;  %v13101_v49 = vmov 0  ;;  %v13103_v50 = vmov 0 }
  0x20   : > { %7383 = vmatpush.bf16.xpose.msk.msra.mxu1 %vm7382_vm5, %v12960_v12  ;;  %vm7432_vm2 = vmpackc.low %vm1094_vm13, %vm1090_vm12  ;;  %vm1084_vm5 = vcmp.eq.s32.totalorder %v8964_v16, %v8884_v6  ;;  %vm1087_vm12 = vcmp.eq.s32.totalorder %v8964_v16, %v8890_v9  ;;  %v13105_v51 = vmov 0  ;;  %v13107_v52 = vmov 0 }
  0x21   : > { %7431 = vmatpush.bf16.xpose.msk.msra.mxu2 %vm7430_vm6, %v12960_v12  ;;  %vm7480_vm3 = vmpackc.low %vm1095_vm0, %vm1091_vm15  ;;  %vm1081_vm6 = vcmp.eq.s32.totalorder %v8961_v15, %v8886_v7  ;;  %vm1072_vm0 = vcmp.eq.s32.totalorder %v8987_v17, %v8884_v6  ;;  %v13109_v53 = vmov 0  ;;  %v13111_v54 = vmov 0 }
  0x22   : > { %7479 = vmatpush.bf16.xpose.msk.msra.mxu3 %vm7478_vm7, %v12960_v12  ;;  %vm1085_vm7 = vcmp.eq.s32.totalorder %v8964_v16, %v8886_v7  ;;  %vm7338_vm10 = vmpackc.low %vm1084_vm5, %vm1080_vm4  ;;  %vm1074_vm4 = vcmp.eq.s32.totalorder %v8987_v17, %v8888_v8  ;;  %vm1078_vm5 = vcmp.eq.s32.totalorder %v8990_v18, %v8888_v8  ;;  %v13113_v55 = vmov 0 }
  0x23   : > { %vm7386_vm13 = vmpackc.low %vm1085_vm7, %vm1081_vm6  ;;  %vm1075_vm7 = vcmp.eq.s32.totalorder %v8987_v17, %v8890_v9  ;;  %v13115_v56 = vmov 0  ;;  %v13117_v57 = vmov 0  ;;  %v13120_v58 = vmov 0 }
  0x24   : > { %vm7482_vm15 = vmpackc.low %vm1087_vm12, %vm1083_vm11  ;;  %vm1064_vm12 = vcmp.eq.s32.totalorder %v9013_v19, %v8884_v6  ;;  %v13123_v59 = vmov 0  ;;  %v13126_v60 = vmov 0  ;;  %v9446_v61 = vadd.s32 128, %v8869_v2 }
  0x25   : > { %v9449_v62 = vadd.s32 136, %v8869_v2  ;;  %v13129_v0 = vmov 0  ;;  %v13135_v5 = vmov 0 }
  0x27   : > { %7337 = vmatpush.bf16.xpose.msk.msra.mxu0 %vm7336_vm14, %v12960_v12  ;;  %vm7434_vm14 = vmpackc.low %vm1086_vm9, %vm1082_vm8  ;;  %vm1079_vm8 = vcmp.eq.s32.totalorder %v8990_v18, %v8890_v9 }
  0x28   : > { %7385 = vmatpush.bf16.xpose.msk.msra.mxu1 %vm7384_vm1, %v12960_v12  ;;  %vm1076_vm1 = vcmp.eq.s32.totalorder %v8990_v18, %v8884_v6  ;;  %vm7484_vm11 = vmpackc.low %vm1079_vm8, %vm1075_vm7  ;;  %vm1056_vm8 = vcmp.eq.s32.totalorder %v9039_v21, %v8884_v6 }
  0x29   : > { %7433 = vmatpush.bf16.xpose.msk.msra.mxu2 %vm7432_vm2, %v12960_v12  ;;  %vm1073_vm2 = vcmp.eq.s32.totalorder %v8987_v17, %v8886_v7  ;;  %vm7340_vm6 = vmpackc.low %vm1076_vm1, %vm1072_vm0  ;;  %vm1066_vm0 = vcmp.eq.s32.totalorder %v9013_v19, %v8888_v8  ;;  %vm1070_vm1 = vcmp.eq.s32.totalorder %v9016_v20, %v8888_v8 }
  0x2a   : > { %7481 = vmatpush.bf16.xpose.msk.msra.mxu3 %vm7480_vm3, %v12960_v12  ;;  %vm1077_vm3 = vcmp.eq.s32.totalorder %v8990_v18, %v8886_v7 }
  0x2b   : > { %vm7388_vm9 = vmpackc.low %vm1077_vm3, %vm1073_vm2  ;;  %vm1067_vm3 = vcmp.eq.s32.totalorder %v9013_v19, %v8890_v9 }
  0x2f   : > { %7339 = vmatpush.bf16.xpose.msk.msra.mxu0 %vm7338_vm10, %v12960_v12  ;;  %vm7436_vm10 = vmpackc.low %vm1078_vm5, %vm1074_vm4  ;;  %vm1071_vm4 = vcmp.eq.s32.totalorder %v9016_v20, %v8890_v9 }
  0x30   : > { %7387 = vmatpush.bf16.xpose.msk.msra.mxu1 %vm7386_vm13, %v12960_v12  ;;  %vm1068_vm13 = vcmp.eq.s32.totalorder %v9016_v20, %v8884_v6  ;;  %vm7486_vm7 = vmpackc.low %vm1071_vm4, %vm1067_vm3  ;;  %vm1048_vm4 = vcmp.eq.s32.totalorder %v8869_v2, %v8884_v6 }
  0x31   : > { %7435 = vmatpush.bf16.xpose.msk.msra.mxu2 %vm7434_vm14, %v12960_v12  ;;  %vm1065_vm14 = vcmp.eq.s32.totalorder %v9013_v19, %v8886_v7  ;;  %vm7342_vm2 = vmpackc.low %vm1068_vm13, %vm1064_vm12  ;;  %vm1058_vm12 = vcmp.eq.s32.totalorder %v9039_v21, %v8888_v8  ;;  %vm1062_vm13 = vcmp.eq.s32.totalorder %v9042_v22, %v8888_v8 }
  0x32   : > { %7483 = vmatpush.bf16.xpose.msk.msra.mxu3 %vm7482_vm15, %v12960_v12  ;;  %vm1069_vm15 = vcmp.eq.s32.totalorder %v9016_v20, %v8886_v7 }
  0x33   : > { %vm7390_vm5 = vmpackc.low %vm1069_vm15, %vm1065_vm14  ;;  %vm1059_vm15 = vcmp.eq.s32.totalorder %v9039_v21, %v8890_v9 }
  0x37   : > { %7341 = vmatpush.bf16.xpose.msk.msra.mxu0 %vm7340_vm6, %v12960_v12  ;;  %vm7438_vm6 = vmpackc.low %vm1070_vm1, %vm1066_vm0  ;;  %vm1063_vm0 = vcmp.eq.s32.totalorder %v9042_v22, %v8890_v9 }
  0x38   : > { %7389 = vmatpush.bf16.xpose.msk.msra.mxu1 %vm7388_vm9, %v12960_v12  ;;  %vm1060_vm9 = vcmp.eq.s32.totalorder %v9042_v22, %v8884_v6  ;;  %vm7488_vm3 = vmpackc.low %vm1063_vm0, %vm1059_vm15  ;;  %vm595_vm0 = vcmp.eq.s32.totalorder %v8869_v2, %v9085_v25 }
  0x39   : > { %7437 = vmatpush.bf16.xpose.msk.msra.mxu2 %vm7436_vm10, %v12960_v12  ;;  %vm1057_vm10 = vcmp.eq.s32.totalorder %v9039_v21, %v8886_v7  ;;  %vm7344_vm14 = vmpackc.low %vm1060_vm9, %vm1056_vm8  ;;  %vm1050_vm8 = vcmp.eq.s32.totalorder %v8869_v2, %v8888_v8  ;;  %vm1054_vm9 = vcmp.eq.s32.totalorder %v559_v23, %v8888_v8 }
  0x3a   : > { %7485 = vmatpush.bf16.xpose.msk.msra.mxu3 %vm7484_vm11, %v12960_v12  ;;  %vm1061_vm11 = vcmp.eq.s32.totalorder %v9042_v22, %v8886_v7 }
  0x3b   : > { %vm7392_vm1 = vmpackc.low %vm1061_vm11, %vm1057_vm10  ;;  %vm1051_vm11 = vcmp.eq.s32.totalorder %v8869_v2, %v8890_v9 }
  0x3f   : > { %7343 = vmatpush.bf16.xpose.msk.msra.mxu0 %vm7342_vm2, %v12960_v12  ;;  %vm7440_vm2 = vmpackc.low %vm1062_vm13, %vm1058_vm12  ;;  %vm1055_vm12 = vcmp.eq.s32.totalorder %v559_v23, %v8890_v9 }
  0x40   : > { %7391 = vmatpush.bf16.xpose.msk.msra.mxu1 %vm7390_vm5, %v12960_v12  ;;  %vm1052_vm5 = vcmp.eq.s32.totalorder %v559_v23, %v8884_v6  ;;  %vm7490_vm15 = vmpackc.low %vm1055_vm12, %vm1051_vm11  ;;  %vm603_vm12 = vcmp.eq.s32.totalorder %v9039_v21, %v9085_v25 }
  0x41   : > { %7439 = vmatpush.bf16.xpose.msk.msra.mxu2 %vm7438_vm6, %v12960_v12  ;;  %vm1049_vm6 = vcmp.eq.s32.totalorder %v8869_v2, %v8886_v7  ;;  %vm7346_vm10 = vmpackc.low %vm1052_vm5, %vm1048_vm4  ;;  %vm597_vm4 = vcmp.eq.s32.totalorder %v8869_v2, %v9089_v27  ;;  %vm601_vm5 = vcmp.eq.s32.totalorder %v559_v23, %v9089_v27 }
  0x42   : > { %7487 = vmatpush.bf16.xpose.msk.msra.mxu3 %vm7486_vm7, %v12960_v12  ;;  %vm1053_vm7 = vcmp.eq.s32.totalorder %v559_v23, %v8886_v7 }
  0x43   : > { %vm7394_vm13 = vmpackc.low %vm1053_vm7, %vm1049_vm6  ;;  %vm598_vm7 = vcmp.eq.s32.totalorder %v8869_v2, %v9092_v28 }
  0x47   : > { %7345 = vmatpush.bf16.xpose.msk.msra.mxu0 %vm7344_vm14, %v12960_v12  ;;  %vm7442_vm14 = vmpackc.low %vm1054_vm9, %vm1050_vm8  ;;  %vm602_vm8 = vcmp.eq.s32.totalorder %v559_v23, %v9092_v28 }
  0x48   : > { %7393 = vmatpush.bf16.xpose.msk.msra.mxu1 %vm7392_vm1, %v12960_v12  ;;  %vm599_vm1 = vcmp.eq.s32.totalorder %v559_v23, %v9085_v25  ;;  %vm9124_vm11 = vmpackc.low %vm602_vm8, %vm598_vm7 }
  0x49   : > { %7441 = vmatpush.bf16.xpose.msk.msra.mxu2 %vm7440_vm2, %v12960_v12  ;;  %vm596_vm2 = vcmp.eq.s32.totalorder %v8869_v2, %v9087_v26  ;;  %vm9106_vm6 = vmpackc.low %vm599_vm1, %vm595_vm0  ;;  %v13068_v32 = vsel %vm9124_vm11, 4294967295, %v13067_v32  ;;  %vm605_vm0 = vcmp.eq.s32.totalorder %v9039_v21, %v9089_v27  ;;  %vm609_vm1 = vcmp.eq.s32.totalorder %v9042_v22, %v9089_v27 }
  0x4a   : > { %7489 = vmatpush.bf16.xpose.msk.msra.mxu3 %vm7488_vm3, %v12960_v12  ;;  %vm600_vm3 = vcmp.eq.s32.totalorder %v559_v23, %v9087_v26  ;;  %v13062_v29 = vsel %vm9106_vm6, 4294967295, %v13061_v29  ;;  %vm9161_vm7 = vmpackc.low %vm609_vm1, %vm605_vm0  ;;  %vm613_vm0 = vcmp.eq.s32.totalorder %v9013_v19, %v9089_v27  ;;  %vm617_vm1 = vcmp.eq.s32.totalorder %v9016_v20, %v9089_v27 }
  0x4b   : > { %vm9113_vm9 = vmpackc.low %vm600_vm3, %vm596_vm2  ;;  %vm606_vm3 = vcmp.eq.s32.totalorder %v9039_v21, %v9092_v28  ;;  %v13074_v35 = vsel %vm9161_vm7, 4294967295, %v13073_v35  ;;  %v13141_v23 = vmov 0 }
  0x4c   : > { %v13064_v30 = vsel %vm9113_vm9, 4294967295, %v13063_v30 }
  0x4f   : > { %7347 = vmatpush.bf16.xpose.msk.msra.mxu0 %vm7346_vm10, %v12960_v12  ;;  %vm9117_vm10 = vmpackc.low %vm601_vm5, %vm597_vm4  ;;  %vm610_vm4 = vcmp.eq.s32.totalorder %v9042_v22, %v9092_v28 }
  0x50   : > { %7395 = vmatpush.bf16.xpose.msk.msra.mxu1 %vm7394_vm13, %v12960_v12  ;;  %v13066_v31 = vsel %vm9117_vm10, 4294967295, %v13065_v31  ;;  %vm607_vm13 = vcmp.eq.s32.totalorder %v9042_v22, %v9085_v25  ;;  %vm9168_vm8 = vmpackc.low %vm610_vm4, %vm606_vm3  ;;  %vm614_vm4 = vcmp.eq.s32.totalorder %v9013_v19, %v9092_v28 }
  0x51   : > { %7443 = vmatpush.bf16.xpose.msk.msra.mxu2 %vm7442_vm14, %v12960_v12  ;;  %vm604_vm14 = vcmp.eq.s32.totalorder %v9039_v21, %v9087_v26  ;;  %vm9149_vm2 = vmpackc.low %vm607_vm13, %vm603_vm12  ;;  %v13076_v36 = vsel %vm9168_vm8, 4294967295, %v13075_v36  ;;  %vm611_vm12 = vcmp.eq.s32.totalorder %v9013_v19, %v9085_v25  ;;  %vm615_vm13 = vcmp.eq.s32.totalorder %v9016_v20, %v9085_v25 }
  0x52   : > { %7491 = vmatpush.bf16.xpose.msk.msra.mxu3 %vm7490_vm15, %v12960_v12  ;;  %vm608_vm15 = vcmp.eq.s32.totalorder %v9042_v22, %v9087_v26  ;;  %v13070_v33 = vsel %vm9149_vm2, 4294967295, %v13069_v33  ;;  %vm9193_vm3 = vmpackc.low %vm615_vm13, %vm611_vm12  ;;  %vm619_vm13 = vcmp.eq.s32.totalorder %v8987_v17, %v9085_v25 }
  0x53   : > { %vm9157_vm5 = vmpackc.low %vm608_vm15, %vm604_vm14  ;;  %vm612_vm14 = vcmp.eq.s32.totalorder %v9013_v19, %v9087_v26  ;;  %vm616_vm15 = vcmp.eq.s32.totalorder %v9016_v20, %v9087_v26  ;;  %v13078_v37 = vsel %vm9193_vm3, 4294967295, %v13077_v37 }
  0x54   : > { %v13072_v34 = vsel %vm9157_vm5, 4294967295, %v13071_v34 }
  0x56   : > { %7349 = vmatmul.msk.bf16.vlgmr.msra.gmra.mxu0 %vm9106_vm6, %v12960_v12 }
  0x57   : > { %7397 = vmatmul.msk.bf16.vlgmr.msra.gmra.mxu1 %vm9113_vm9, %v12960_v12 }
  0x58   : > { %7445 = vmatmul.msk.bf16.vlgmr.msra.gmra.mxu2 %vm9117_vm10, %v12960_v12 }
  0x59   : > { %7493 = vmatmul.msk.bf16.vlgmr.msra.gmra.mxu3 %vm9124_vm11, %v12960_v12 }
  0x66   : > { %7351 = vmatmul.msk.bf16.gmra.mxu0 %vm9149_vm2, %v12960_v12 }
  0x67   : > { %7399 = vmatmul.msk.bf16.gmra.mxu1 %vm9157_vm5, %v12960_v12  ;;  %vm9205_vm5 = vmpackc.low %vm617_vm1, %vm613_vm0  ;;  %vm621_vm0 = vcmp.eq.s32.totalorder %v8987_v17, %v9089_v27  ;;  %vm625_vm1 = vcmp.eq.s32.totalorder %v8990_v18, %v9089_v27 }
  0x68   : > { %7447 = vmatmul.msk.bf16.gmra.mxu2 %vm9161_vm7, %v12960_v12  ;;  %vm9201_vm7 = vmpackc.low %vm616_vm15, %vm612_vm14  ;;  %v13082_v39 = vsel %vm9205_vm5, 4294967295, %v13081_v39  ;;  %vm620_vm14 = vcmp.eq.s32.totalorder %v8987_v17, %v9087_v26  ;;  %vm624_vm15 = vcmp.eq.s32.totalorder %v8990_v18, %v9087_v26 }
  0x69   : > { %7495 = vmatmul.msk.bf16.gmra.mxu3 %vm9168_vm8, %v12960_v12  ;;  %vm618_vm8 = vcmp.eq.s32.totalorder %v9016_v20, %v9092_v28  ;;  %v13080_v38 = vsel %vm9201_vm7, 4294967295, %v13079_v38 }
  0x6a   : > { %vm9212_vm12 = vmpackc.low %vm618_vm8, %vm614_vm4  ;;  %vm623_vm8 = vcmp.eq.s32.totalorder %v8990_v18, %v9085_v25 }
  0x6b   : > { %v13084_v40 = vsel %vm9212_vm12, 4294967295, %v13083_v40  ;;  %vm9237_vm4 = vmpackc.low %vm623_vm8, %vm619_vm13  ;;  %vm627_vm8 = vcmp.eq.s32.totalorder %v8961_v15, %v9085_v25 }
  0x6c   : > { %v13086_v41 = vsel %vm9237_vm4, 4294967295, %v13085_v41 }
  0x76   : > { %7353 = vmatmul.msk.bf16.gmra.mxu0 %vm9193_vm3, %v12960_v12  ;;  %vm9249_vm3 = vmpackc.low %vm625_vm1, %vm621_vm0  ;;  %vm633_vm0 = vcmp.eq.s32.totalorder %v8964_v16, %v9089_v27 }
  0x77   : > { %7401 = vmatmul.msk.bf16.gmra.mxu1 %vm9201_vm7, %v12960_v12  ;;  %vm9245_vm7 = vmpackc.low %vm624_vm15, %vm620_vm14  ;;  %v13090_v43 = vsel %vm9249_vm3, 4294967295, %v13089_v43  ;;  %vm632_vm14 = vcmp.eq.s32.totalorder %v8964_v16, %v9087_v26  ;;  %vm629_vm15 = vcmp.eq.s32.totalorder %v8961_v15, %v9089_v27 }
  0x78   : > { %7449 = vmatmul.msk.bf16.gmra.mxu2 %vm9205_vm5, %v12960_v12  ;;  %vm626_vm5 = vcmp.eq.s32.totalorder %v8990_v18, %v9092_v28  ;;  %v13088_v42 = vsel %vm9245_vm7, 4294967295, %v13087_v42  ;;  %v9499_v18 = vadd.s32 152, %v8869_v2 }
  0x79   : > { %7497 = vmatmul.msk.bf16.gmra.mxu3 %vm9212_vm12, %v12960_v12  ;;  %vm622_vm12 = vcmp.eq.s32.totalorder %v8987_v17, %v9092_v28  ;;  %v9496_v17 = vadd.s32 144, %v8869_v2 }
  0x7a   : > { %vm9256_vm13 = vmpackc.low %vm626_vm5, %vm622_vm12  ;;  %vm631_vm5 = vcmp.eq.s32.totalorder %v8964_v16, %v9085_v25  ;;  %vm628_vm12 = vcmp.eq.s32.totalorder %v8961_v15, %v9087_v26 }
  0x7b   : > { %v13092_v44 = vsel %vm9256_vm13, 4294967295, %v13091_v44  ;;  %vm9281_vm1 = vmpackc.low %vm631_vm5, %vm627_vm8  ;;  %vm635_vm5 = vcmp.eq.s32.totalorder %v8935_v13, %v9085_v25 }
  0x7c   : > { %v13094_v45 = vsel %vm9281_vm1, 4294967295, %v13093_v45 }
  0x86   : > { %7355 = vmatmul.msk.bf16.gmra.mxu0 %vm9237_vm4, %v12960_v12  ;;  %vm9293_vm4 = vmpackc.low %vm633_vm0, %vm629_vm15  ;;  %vm641_vm15 = vcmp.eq.s32.totalorder %v8938_v14, %v9089_v27 }
  0x87   : > { %7403 = vmatmul.msk.bf16.gmra.mxu1 %vm9245_vm7, %v12960_v12  ;;  %vm9289_vm7 = vmpackc.low %vm632_vm14, %vm628_vm12  ;;  %v13098_v47 = vsel %vm9293_vm4, 4294967295, %v13097_v47  ;;  %vm640_vm12 = vcmp.eq.s32.totalorder %v8938_v14, %v9087_v26  ;;  %vm637_vm14 = vcmp.eq.s32.totalorder %v8935_v13, %v9089_v27 }
  0x88   : > { %7451 = vmatmul.msk.bf16.gmra.mxu2 %vm9249_vm3, %v12960_v12  ;;  %vm634_vm3 = vcmp.eq.s32.totalorder %v8964_v16, %v9092_v28  ;;  %v13096_v46 = vsel %vm9289_vm7, 4294967295, %v13095_v46 }
  0x89   : > { %7499 = vmatmul.msk.bf16.gmra.mxu3 %vm9256_vm13, %v12960_v12  ;;  %vm630_vm13 = vcmp.eq.s32.totalorder %v8961_v15, %v9092_v28 }
  0x8a   : > { %vm9300_vm8 = vmpackc.low %vm634_vm3, %vm630_vm13  ;;  %vm639_vm3 = vcmp.eq.s32.totalorder %v8938_v14, %v9085_v25  ;;  %vm636_vm13 = vcmp.eq.s32.totalorder %v8935_v13, %v9087_v26 }
  0x8b   : > { %v13100_v48 = vsel %vm9300_vm8, 4294967295, %v13099_v48  ;;  %vm9325_vm0 = vmpackc.low %vm639_vm3, %vm635_vm5  ;;  %vm643_vm3 = vcmp.eq.s32.totalorder %v8893_v10, %v9085_v25 }
  0x8c   : > { %v13102_v49 = vsel %vm9325_vm0, 4294967295, %v13101_v49 }
  0x96   : > { %7357 = vmatmul.msk.bf16.gmra.mxu0 %vm9281_vm1, %v12960_v12  ;;  %vm9337_vm1 = vmpackc.low %vm641_vm15, %vm637_vm14  ;;  %vm649_vm14 = vcmp.eq.s32.totalorder %v8896_v11, %v9089_v27 }
  0x97   : > { %7405 = vmatmul.msk.bf16.gmra.mxu1 %vm9289_vm7, %v12960_v12  ;;  %vm9333_vm7 = vmpackc.low %vm640_vm12, %vm636_vm13  ;;  %v13106_v51 = vsel %vm9337_vm1, 4294967295, %v13105_v51  ;;  %vm648_vm13 = vcmp.eq.s32.totalorder %v8896_v11, %v9087_v26  ;;  %vm645_vm12 = vcmp.eq.s32.totalorder %v8893_v10, %v9089_v27 }
  0x98   : > { %7453 = vmatmul.msk.bf16.gmra.mxu2 %vm9293_vm4, %v12960_v12  ;;  %vm642_vm4 = vcmp.eq.s32.totalorder %v8938_v14, %v9092_v28  ;;  %v13104_v50 = vsel %vm9333_vm7, 4294967295, %v13103_v50 }
  0x99   : > { %7501 = vmatmul.msk.bf16.gmra.mxu3 %vm9300_vm8, %v12960_v12  ;;  %vm638_vm8 = vcmp.eq.s32.totalorder %v8935_v13, %v9092_v28 }
  0x9a   : > { %vm9344_vm5 = vmpackc.low %vm642_vm4, %vm638_vm8  ;;  %vm647_vm4 = vcmp.eq.s32.totalorder %v8896_v11, %v9085_v25  ;;  %vm644_vm8 = vcmp.eq.s32.totalorder %v8893_v10, %v9087_v26 }
  0x9b   : > { %v13108_v52 = vsel %vm9344_vm5, 4294967295, %v13107_v52  ;;  %vm9369_vm15 = vmpackc.low %vm647_vm4, %vm643_vm3  ;;  %vm651_vm4 = vcmp.eq.s32.totalorder %v8879_v3, %v9085_v25 }
  0x9c   : > { %v13110_v53 = vsel %vm9369_vm15, 4294967295, %v13109_v53 }
  0xa6   : > { %7359 = vmatmul.msk.bf16.gmra.mxu0 %vm9325_vm0, %v12960_v12  ;;  %vm9381_vm0 = vmpackc.low %vm649_vm14, %vm645_vm12  ;;  %vm657_vm12 = vcmp.eq.s32.totalorder %v8882_v4, %v9089_v27 }
  0xa7   : > { %7407 = vmatmul.msk.bf16.gmra.mxu1 %vm9333_vm7, %v12960_v12  ;;  %vm9377_vm7 = vmpackc.low %vm648_vm13, %vm644_vm8  ;;  %v13114_v55 = vsel %vm9381_vm0, 4294967295, %v13113_v55  ;;  %vm656_vm8 = vcmp.eq.s32.totalorder %v8882_v4, %v9087_v26  ;;  %vm653_vm13 = vcmp.eq.s32.totalorder %v8879_v3, %v9089_v27 }
  0xa8   : > { %7455 = vmatmul.msk.bf16.gmra.mxu2 %vm9337_vm1, %v12960_v12  ;;  %vm650_vm1 = vcmp.eq.s32.totalorder %v8896_v11, %v9092_v28  ;;  %v13112_v54 = vsel %vm9377_vm7, 4294967295, %v13111_v54 }
  0xa9   : > { %7503 = vmatmul.msk.bf16.gmra.mxu3 %vm9344_vm5, %v12960_v12  ;;  %vm646_vm5 = vcmp.eq.s32.totalorder %v8893_v10, %v9092_v28  ;;  %v13138_v10 = vmov 0 }
  0xaa   : > { %vm9388_vm3 = vmpackc.low %vm650_vm1, %vm646_vm5  ;;  %vm655_vm1 = vcmp.eq.s32.totalorder %v8882_v4, %v9085_v25  ;;  %vm652_vm5 = vcmp.eq.s32.totalorder %v8879_v3, %v9087_v26 }
  0xab   : > { %v13116_v56 = vsel %vm9388_vm3, 4294967295, %v13115_v56  ;;  %vm9413_vm14 = vmpackc.low %vm655_vm1, %vm651_vm4  ;;  %vm660_vm1 = vcmp.eq.s32.totalorder %v9446_v61, %v9087_v26 }
  0xac   : > { %v13118_v57 = vsel %vm9413_vm14, 4294967295, %v13117_v57 }
  0xad   : > { %13119 = vst [vmem:[#allocation3_spill] sm:$0xff] %v13118_v57  ;;  %v13189_v57 = vmov 0 }
  0xb6   : > { %7361 = vmatmul.msk.bf16.gmra.mxu0 %vm9369_vm15, %v12960_v12  ;;  %vm9425_vm15 = vmpackc.low %vm657_vm12, %vm653_vm13  ;;  %vm665_vm13 = vcmp.eq.s32.totalorder %v9449_v62, %v9089_v27 }
  0xb7   : > { %7409 = vmatmul.msk.bf16.gmra.mxu1 %vm9377_vm7, %v12960_v12  ;;  %vm9421_vm7 = vmpackc.low %vm656_vm8, %vm652_vm5  ;;  %v13124_v59 = vsel %vm9425_vm15, 4294967295, %v13123_v59  ;;  %vm664_vm5 = vcmp.eq.s32.totalorder %v9449_v62, %v9087_v26  ;;  %vm661_vm8 = vcmp.eq.s32.totalorder %v9446_v61, %v9089_v27 }
  0xb8   : > { %7457 = vmatmul.msk.bf16.gmra.mxu2 %vm9381_vm0, %v12960_v12  ;;  %vm658_vm0 = vcmp.eq.s32.totalorder %v8882_v4, %v9092_v28  ;;  %v13121_v58 = vsel %vm9421_vm7, 4294967295, %v13120_v58  ;;  %13125 = vst [vmem:[#allocation5_spill] sm:$0xff] %v13124_v59  ;;  %v9693_v59 = vadd.s32 216, %v8869_v2 }
  0xb9   : > { %7505 = vmatmul.msk.bf16.gmra.mxu3 %vm9388_vm3, %v12960_v12  ;;  %vm654_vm3 = vcmp.eq.s32.totalorder %v8879_v3, %v9092_v28  ;;  %13122 = vst [vmem:[#allocation4_spill] sm:$0xff] %v13121_v58  ;;  %v13132_v3 = vmov 0 }
  0xba   : > { %vm9432_vm4 = vmpackc.low %vm658_vm0, %vm654_vm3  ;;  %vm659_vm0 = vcmp.eq.s32.totalorder %v9446_v61, %v9085_v25  ;;  %vm663_vm3 = vcmp.eq.s32.totalorder %v9449_v62, %v9085_v25 }
  0xbb   : > { %v13127_v60 = vsel %vm9432_vm4, 4294967295, %v13126_v60  ;;  %vm9463_vm12 = vmpackc.low %vm663_vm3, %vm659_vm0  ;;  %vm668_vm3 = vcmp.eq.s32.totalorder %v9496_v17, %v9087_v26 }
  0xbc   : > { %13128 = vst [vmem:[#allocation6_spill] sm:$0xff] %v13127_v60  ;;  %v13130_v0 = vsel %vm9463_vm12, 4294967295, %v13129_v0  ;;  %v9690_v60 = vadd.s32 208, %v8869_v2 }
  0xbd   : > { %13131 = vst [vmem:[#allocation7_spill] sm:$0xff] %v13130_v0 }
  0xc6   : > { %7363 = vmatmul.msk.bf16.gmra.mxu0 %vm9413_vm14, %v12960_v12  ;;  %vm9475_vm14 = vmpackc.low %vm665_vm13, %vm661_vm8  ;;  %vm673_vm8 = vcmp.eq.s32.totalorder %v9499_v18, %v9089_v27 }
  0xc7   : > { %7411 = vmatmul.msk.bf16.gmra.mxu1 %vm9421_vm7, %v12960_v12  ;;  %vm9471_vm7 = vmpackc.low %vm664_vm5, %vm660_vm1  ;;  %v13136_v5 = vsel %vm9475_vm14, 4294967295, %v13135_v5  ;;  %vm672_vm1 = vcmp.eq.s32.totalorder %v9499_v18, %v9087_v26  ;;  %vm669_vm5 = vcmp.eq.s32.totalorder %v9496_v17, %v9089_v27 }
  0xc8   : > { %7459 = vmatmul.msk.bf16.gmra.mxu2 %vm9425_vm15, %v12960_v12  ;;  %vm666_vm15 = vcmp.eq.s32.totalorder %v9449_v62, %v9092_v28  ;;  %v13133_v3 = vsel %vm9471_vm7, 4294967295, %v13132_v3  ;;  %13137 = vst [vmem:[#allocation9_spill] sm:$0xff] %v13136_v5  ;;  %v13163_v5 = vmov 1.0|1.0  }
  0xc9   : > { %7507 = vmatmul.msk.bf16.gmra.mxu3 %vm9432_vm4, %v12960_v12  ;;  %vm662_vm4 = vcmp.eq.s32.totalorder %v9446_v61, %v9092_v28  ;;  %13134 = vst [vmem:[#allocation8_spill] sm:$0xff] %v13133_v3 }
  0xca   : > { %vm9482_vm0 = vmpackc.low %vm666_vm15, %vm662_vm4  ;;  %vm667_vm15 = vcmp.eq.s32.totalorder %v9496_v17, %v9085_v25  ;;  %vm671_vm4 = vcmp.eq.s32.totalorder %v9499_v18, %v9085_v25 }
  0xcb   : > { %v13139_v10 = vsel %vm9482_vm0, 4294967295, %v13138_v10  ;;  %vm9513_vm13 = vmpackc.low %vm671_vm4, %vm667_vm15 }
  0xcc   : > { %13140 = vst [vmem:[#allocation10_spill] sm:$0xff] %v13139_v10  ;;  %v13142_v23 = vsel %vm9513_vm13, 4294967295, %v13141_v23 }
  0xcd   : > { %13143 = vst [vmem:[#allocation11_spill] sm:$0xff] %v13142_v23  ;;  %v9585_v23 = vadd.s32 248, %v8869_v2 }
  0xd3   : > { %v1505_v63 = vpop.f32.mrf.mxu0 }
  0xd4   : > { %v1594_v1 = vpop.f32.mrf.mxu1 }
  0xd5   : > { %v1595_v4 = vadd.f32 %v1594_v1, %v1505_v63 }
  0xd6   : > { %7365 = vmatmul.msk.bf16.gmra.mxu0 %vm9463_vm12, %v12960_v12  ;;  %vm9525_vm12 = vmpackc.low %vm673_vm8, %vm669_vm5 }
  0xd7   : > { %7413 = vmatmul.msk.bf16.gmra.mxu1 %vm9471_vm7, %v12960_v12  ;;  %vm9521_vm7 = vmpackc.low %vm672_vm1, %vm668_vm3 }
  0xd8   : > { %7461 = vmatmul.msk.bf16.gmra.mxu2 %vm9475_vm14, %v12960_v12  ;;  %vm674_vm14 = vcmp.eq.s32.totalorder %v9499_v18, %v9092_v28 }
  0xd9   : > { %7509 = vmatmul.msk.bf16.gmra.mxu3 %vm9482_vm0, %v12960_v12  ;;  %vm670_vm0 = vcmp.eq.s32.totalorder %v9496_v17, %v9092_v28 }
  0xda   : > { %vm9532_vm15 = vmpackc.low %vm674_vm14, %vm670_vm0 }
  0xdb   : > { %v1683_v11 = vpop.f32.mrf.mxu2  ;;  %v1507_v13 = vpop.f32.mrf.mxu0 }
  0xdc   : > { %v1684_v14 = vadd.f32 %v1683_v11, %v1595_v4  ;;  %v1596_v15 = vpop.f32.mrf.mxu1  ;;  %v1772_v16 = vpop.f32.mrf.mxu3  ;;  %v13144_v4 = vmov 0 }
  0xdd   : > { %v1597_v19 = vadd.f32 %v1596_v15, %v1507_v13  ;;  %v13145_v4 = vsel %vm9521_vm7, 4294967295, %v13144_v4  ;;  %v13147_v13 = vmov 0  ;;  %v13150_v15 = vmov 0 }
  0xde   : > { %v1773_v20 = vadd.f32 %v1772_v16, %v1684_v14  ;;  %13146 = vst [vmem:[#allocation12_spill] sm:$0xff] %v13145_v4  ;;  %v13148_v13 = vsel %vm9525_vm12, 4294967295, %v13147_v13  ;;  %v13151_v15 = vsel %vm9532_vm15, 4294967295, %v13150_v15  ;;  %v9551_v4 = vadd.s32 168, %v8869_v2 }
  0xdf   : > { %13149 = vst [vmem:[#allocation13_spill] sm:$0xff] %v13148_v13  ;;  %v9582_v13 = vadd.s32 240, %v8869_v2 }
  0xe0   : > { %13152 = vst [vmem:[#allocation14_spill] sm:$0xff] %v13151_v15  ;;  %vm679_vm0 = vcmp.eq.s32.totalorder %v9551_v4, %v9085_v25  ;;  %vm680_vm3 = vcmp.eq.s32.totalorder %v9551_v4, %v9087_v26  ;;  %vm681_vm5 = vcmp.eq.s32.totalorder %v9551_v4, %v9089_v27  ;;  %v13160_v15 = vmov 0 }
  0xe3   : > { %v1685_v21 = vpop.f32.mrf.mxu2  ;;  %v1510_v22 = vpop.f32.mrf.mxu0 }
  0xe4   : > { %v1686_v24 = vadd.f32 %v1685_v21, %v1597_v19  ;;  %v1599_v63 = vpop.f32.mrf.mxu1  ;;  %v1774_v1 = vpop.f32.mrf.mxu3 }
  0xe5   : > { %v1600_v11 = vadd.f32 %v1599_v63, %v1510_v22 }
  0xe6   : > { %v1775_v14 = vadd.f32 %v1774_v1, %v1686_v24  ;;  %7367 = vmatmul.msk.bf16.gmra.mxu0 %vm9513_vm13, %v12960_v12  ;;  %v9548_v1 = vadd.s32 160, %v8869_v2 }
  0xe7   : > { %7415 = vmatmul.msk.bf16.gmra.mxu1 %vm9521_vm7, %v12960_v12 }
  0xe8   : > { %v9539_v16 = vpack.c.bf16 %v1775_v14, %v1773_v20  ;;  %7463 = vmatmul.msk.bf16.gmra.mxu2 %vm9525_vm12, %v12960_v12  ;;  %vm675_vm14 = vcmp.eq.s32.totalorder %v9548_v1, %v9085_v25  ;;  %vm676_vm4 = vcmp.eq.s32.totalorder %v9548_v1, %v9087_v26  ;;  %vm677_vm1 = vcmp.eq.s32.totalorder %v9548_v1, %v9089_v27 }
  0xe9   : > { %7511 = vmatmul.msk.bf16.gmra.mxu3 %vm9532_vm15, %v12960_v12  ;;  %vm9565_vm8 = vmpackc.low %vm679_vm0, %vm675_vm14  ;;  %vm678_vm15 = vcmp.eq.s32.totalorder %v9548_v1, %v9092_v28  ;;  %vm682_vm12 = vcmp.eq.s32.totalorder %v9551_v4, %v9092_v28  ;;  %v13157_v12 = vmov 0  ;;  %vm1168_vm0 = vcmp.eq.s32.totalorder %v9582_v13, %v8884_v6 }
  0xea   : > { %13153 = vst [vmem:[#allocation15_spill] sm:$0xff] %v9539_v16  ;;  %vm9573_vm7 = vmpackc.low %vm680_vm3, %vm676_vm4  ;;  %vm1173_vm4 = vcmp.eq.s32.totalorder %v9585_v23, %v8886_v7 }
  0xeb   : > { %v1688_v19 = vpop.f32.mrf.mxu2  ;;  %v1512_v21 = vpop.f32.mrf.mxu0  ;;  %v13158_v12 = vsel %vm9573_vm7, 4294967295, %v13157_v12  ;;  %vm9577_vm13 = vmpackc.low %vm681_vm5, %vm677_vm1  ;;  %vm1174_vm1 = vcmp.eq.s32.totalorder %v9585_v23, %v8888_v8 }
  0xec   : > { %v1689_v22 = vadd.f32 %v1688_v19, %v1600_v11  ;;  %v1601_v24 = vpop.f32.mrf.mxu1  ;;  %v1777_v63 = vpop.f32.mrf.mxu3  ;;  %13159 = vst [vmem:[#allocation17_spill] sm:$0xff] %v13158_v12  ;;  %v13161_v15 = vsel %vm9577_vm13, 4294967295, %v13160_v15  ;;  %vm9590_vm14 = vmpackc.low %vm682_vm12, %vm678_vm15  ;;  %vm1172_vm12 = vcmp.eq.s32.totalorder %v9585_v23, %v8884_v6  ;;  %vm1169_vm15 = vcmp.eq.s32.totalorder %v9582_v13, %v8886_v7 }
  0xed   : > { %v1602_v20 = vadd.f32 %v1601_v24, %v1512_v21  ;;  %v13154_v21 = vmov 0  ;;  %13162 = vst [vmem:[#allocation18_spill] sm:$0xff] %v13161_v15  ;;  %vm7524_vm5 = vmpackc.low %vm1172_vm12, %vm1168_vm0  ;;  %vm13168_vm12 = vcmp.eq.s32.totalorder %v9582_v13, %v8888_v8  ;;  %v9638_v15 = vadd.s32 224, %v8869_v2 }
  0xee   : > { %v1778_v14 = vadd.f32 %v1777_v63, %v1689_v22  ;;  %v13155_v21 = vsel %vm9565_vm8, 4294967295, %v13154_v21  ;;  %7525 = vmatpush.bf16.xpose.msk.msrb.mxu0 %vm7524_vm5, %v13163_v5  ;;  %v13169_v12 = vmov 0 }
  0xef   : > { %13156 = vst [vmem:[#allocation16_spill] sm:$0xff] %v13155_v21  ;;  %vm1163_vm2 = vcmp.eq.s32.totalorder %v9638_v15, %v8890_v9 }
  0xf3   : > { %v1690_v11 = vpop.f32.mrf.mxu2  ;;  %v1515_v19 = vpop.f32.mrf.mxu0 }
  0xf4   : > { %v1691_v22 = vadd.f32 %v1690_v11, %v1602_v20  ;;  %v1604_v24 = vpop.f32.mrf.mxu1  ;;  %v1779_v63 = vpop.f32.mrf.mxu3  ;;  %v13164_v20 = vmov 0  ;;  %v9598_v11 = vadd.s32 176, %v8869_v2 }
  0xf5   : > { %v1605_v16 = vadd.f32 %v1604_v24, %v1515_v19  ;;  %v13165_v20 = vsel %vm9590_vm14, 4294967295, %v13164_v20  ;;  %v9601_v19 = vadd.s32 184, %v8869_v2 }
  0xf6   : > { %v1780_v10 = vadd.f32 %v1779_v63, %v1691_v22  ;;  %7369 = vmatmul.msk.bf16.gmra.mxu0 %vm9565_vm8, %v13163_v5  ;;  %13166 = vst [vmem:[#allocation19_spill] sm:$0xff] %v13165_v20  ;;  %vm1175_vm8 = vcmp.eq.s32.totalorder %v9585_v23, %v8890_v9  ;;  %vm683_vm3 = vcmp.eq.s32.totalorder %v9598_v11, %v9085_v25 }
  0xf7   : > { %7417 = vmatmul.msk.bf16.gmra.mxu1 %vm9573_vm7, %v13163_v5  ;;  %vm1171_vm7 = vcmp.eq.s32.totalorder %v9582_v13, %v8890_v9  ;;  %vm687_vm0 = vcmp.eq.s32.totalorder %v9601_v19, %v9085_v25  ;;  %vm685_vm10 = vcmp.eq.s32.totalorder %v9598_v11, %v9089_v27  ;;  %vm689_vm9 = vcmp.eq.s32.totalorder %v9601_v19, %v9089_v27 }
  0xf8   : > { %v9605_v22 = vpack.c.bf16 %v1780_v10, %v1778_v14  ;;  %7465 = vmatmul.msk.bf16.gmra.mxu2 %vm9577_vm13, %v13163_v5  ;;  %vm7572_vm13 = vmpackc.low %vm1173_vm4, %vm1169_vm15 }
  0xf9   : > { %7513 = vmatmul.msk.bf16.gmra.mxu3 %vm9590_vm14, %v13163_v5  ;;  %7573 = vmatpush.bf16.xpose.msk.msrb.mxu1 %vm7572_vm13, %v13163_v5  ;;  %vm7620_vm15 = vmpackc.low %vm1174_vm1, %vm13168_vm12  ;;  %vm1160_vm13 = vcmp.eq.s32.totalorder %v9638_v15, %v8884_v6  ;;  %vm1161_vm12 = vcmp.eq.s32.totalorder %v9638_v15, %v8886_v7 }
  0xfa   : > { %13167 = vst [vmem:[#allocation20_spill] sm:$0xff] %v9605_v22  ;;  %7621 = vmatpush.bf16.xpose.msk.msrb.mxu2 %vm7620_vm15, %v13163_v5  ;;  %vm7668_vm4 = vmpackc.low %vm1175_vm8, %vm1171_vm7  ;;  %vm684_vm7 = vcmp.eq.s32.totalorder %v9598_v11, %v9087_v26  ;;  %vm688_vm8 = vcmp.eq.s32.totalorder %v9601_v19, %v9087_v26 }
  0xfb   : > { %v1693_v10 = vpop.f32.mrf.mxu2  ;;  %v1517_v14 = vpop.f32.mrf.mxu0  ;;  %vm9643_vm5 = vmpackc.low %vm687_vm0, %vm683_vm3  ;;  %7669 = vmatpush.bf16.xpose.msk.msrb.mxu3 %vm7668_vm4, %v13163_v5  ;;  %vm1162_vm0 = vcmp.eq.s32.totalorder %v9638_v15, %v8888_v8 }
  0xfc   : > { %v1694_v24 = vadd.f32 %v1693_v10, %v1605_v16  ;;  %v1606_v63 = vpop.f32.mrf.mxu1  ;;  %v1782_v22 = vpop.f32.mrf.mxu3  ;;  %v9641_v16 = vadd.s32 232, %v8869_v2  ;;  %v13170_v12 = vsel %vm9643_vm5, 4294967295, %v13169_v12 }
  0xfd   : > { %v1607_v20 = vadd.f32 %v1606_v63, %v1517_v14  ;;  %13171 = vst [vmem:[#allocation21_spill] sm:$0xff] %v13170_v12  ;;  %v13174_v63 = vmov 0 }
  0xfe   : > { %v1783_v10 = vadd.f32 %v1782_v22, %v1694_v24  ;;  %vm1164_vm1 = vcmp.eq.s32.totalorder %v9641_v16, %v8884_v6  ;;  %vm1165_vm15 = vcmp.eq.s32.totalorder %v9641_v16, %v8886_v7  ;;  %vm1166_vm4 = vcmp.eq.s32.totalorder %v9641_v16, %v8888_v8 }
  0xff   : > { %vm7526_vm3 = vmpackc.low %vm1164_vm1, %vm1160_vm13  ;;  %vm1167_vm11 = vcmp.eq.s32.totalorder %v9641_v16, %v8890_v9 }
 0x100   : > { %vm7574_vm14 = vmpackc.low %vm1165_vm15, %vm1161_vm12  ;;  %vm686_vm12 = vcmp.eq.s32.totalorder %v9598_v11, %v9092_v28  ;;  %vm690_vm15 = vcmp.eq.s32.totalorder %v9601_v19, %v9092_v28  ;;  %7527 = vmatpush.bf16.xpose.msk.msrb.mxu0 %vm7526_vm3, %v13163_v5 }
 0x101   : > { %vm9672_vm13 = vmpackc.low %vm1166_vm4, %vm1162_vm0  ;;  %7575 = vmatpush.bf16.xpose.msk.msrb.mxu1 %vm7574_vm14, %v13163_v5  ;;  %vm1157_vm14 = vcmp.eq.s32.totalorder %v9693_v59, %v8886_v7  ;;  %vm1158_vm0 = vcmp.eq.s32.totalorder %v9693_v59, %v8888_v8 }
 0x102   : > { %vm9676_vm1 = vmpackc.low %vm688_vm8, %vm684_vm7  ;;  %7623 = vmatpush.bf16.xpose.msk.msrb.mxu2 %vm9672_vm13, %v13163_v5 }
 0x103   : > { %v1695_v14 = vpop.f32.mrf.mxu2  ;;  %v1520_v24 = vpop.f32.mrf.mxu0  ;;  %v13175_v63 = vsel %vm9676_vm1, 4294967295, %v13174_v63  ;;  %vm7670_vm7 = vmpackc.low %vm1167_vm11, %vm1163_vm2  ;;  %vm1153_vm2 = vcmp.eq.s32.totalorder %v9690_v60, %v8886_v7 }
 0x104   : > { %13176 = vst [vmem:[#allocation22_spill] sm:$0xff] %v13175_v63  ;;  %v1696_v21 = vadd.f32 %v1695_v14, %v1607_v20  ;;  %v1609_v3 = vpop.f32.mrf.mxu1  ;;  %v1784_v0 = vpop.f32.mrf.mxu3  ;;  %vm9701_vm8 = vmpackc.low %vm689_vm9, %vm685_vm10  ;;  %v13177_v20 = vmov 0  ;;  %7671 = vmatpush.bf16.xpose.msk.msrb.mxu3 %vm7670_vm7, %v13163_v5  ;;  %vm1152_vm9 = vcmp.eq.s32.totalorder %v9690_v60, %v8884_v6  ;;  %vm1156_vm10 = vcmp.eq.s32.totalorder %v9693_v59, %v8884_v6 }
 0x105   : > { %v1610_v58 = vadd.f32 %v1609_v3, %v1520_v24  ;;  %v13178_v20 = vsel %vm9701_vm8, 4294967295, %v13177_v20  ;;  %vm9714_vm11 = vmpackc.low %vm690_vm15, %vm686_vm12  ;;  %v13180_v3 = vmov 0  ;;  %v9722_v24 = vadd.s32 192, %v8869_v2 }
 0x106   : > { %13179 = vst [vmem:[#allocation23_spill] sm:$0xff] %v13178_v20  ;;  %v1785_v14 = vadd.f32 %v1784_v0, %v1696_v21  ;;  %7371 = vmatmul.msk.bf16.gmra.mxu0 %vm9643_vm5, %v13163_v5  ;;  %v13181_v3 = vsel %vm9714_vm11, 4294967295, %v13180_v3  ;;  %v583_v0 = vadd.s32 200, %v8869_v2  ;;  %vm7528_vm4 = vmpackc.low %vm1156_vm10, %vm1152_vm9  ;;  %vm1155_vm12 = vcmp.eq.s32.totalorder %v9690_v60, %v8890_v9 }
 0x107   : > { %13182 = vst [vmem:[#allocation24_spill] sm:$0xff] %v13181_v3  ;;  %7419 = vmatmul.msk.bf16.gmra.mxu1 %vm9676_vm1, %v13163_v5  ;;  %vm7576_vm13 = vmpackc.low %vm1157_vm14, %vm1153_vm2  ;;  %vm1159_vm15 = vcmp.eq.s32.totalorder %v9693_v59, %v8890_v9  ;;  %vm691_vm7 = vcmp.eq.s32.totalorder %v9722_v24, %v9085_v25  ;;  %vm13184_vm9 = vcmp.eq.s32.totalorder %v9690_v60, %v8888_v8 }
 0x108   : > { %v9726_v21 = vpack.c.bf16 %v1785_v14, %v1783_v10  ;;  %7467 = vmatmul.msk.bf16.gmra.mxu2 %vm9701_vm8, %v13163_v5  ;;  %7529 = vmatpush.bf16.xpose.msk.msrb.mxu0 %vm7528_vm4, %v13163_v5  ;;  %vm695_vm3 = vcmp.eq.s32.totalorder %v583_v0, %v9085_v25  ;;  %vm7624_vm10 = vmpackc.low %vm1158_vm0, %vm13184_vm9  ;;  %vm1144_vm14 = vcmp.eq.s32.totalorder %v9722_v24, %v8884_v6 }
 0x109   : > { %7515 = vmatmul.msk.bf16.gmra.mxu3 %vm9714_vm11, %v13163_v5  ;;  %7577 = vmatpush.bf16.xpose.msk.msrb.mxu1 %vm7576_vm13, %v13163_v5  ;;  %vm7672_vm2 = vmpackc.low %vm1159_vm15, %vm1155_vm12  ;;  %vm1148_vm4 = vcmp.eq.s32.totalorder %v583_v0, %v8884_v6  ;;  %vm1145_vm11 = vcmp.eq.s32.totalorder %v9722_v24, %v8886_v7  ;;  %vm1149_vm0 = vcmp.eq.s32.totalorder %v583_v0, %v8886_v7 }
 0x10a   : > { %13183 = vst [vmem:[#allocation25_spill] sm:$0xff] %v9726_v21  ;;  %7625 = vmatpush.bf16.xpose.msk.msrb.mxu2 %vm7624_vm10, %v13163_v5  ;;  %vm9764_vm8 = vmpackc.low %vm695_vm3, %vm691_vm7  ;;  %vm1146_vm13 = vcmp.eq.s32.totalorder %v9722_v24, %v8888_v8  ;;  %vm1150_vm12 = vcmp.eq.s32.totalorder %v583_v0, %v8888_v8  ;;  %vm692_vm15 = vcmp.eq.s32.totalorder %v9722_v24, %v9087_v26 }
 0x10b   : > { %v1698_v2 = vpop.f32.mrf.mxu2  ;;  %v1522_v10 = vpop.f32.mrf.mxu0  ;;  %vm696_vm9 = vcmp.eq.s32.totalorder %v583_v0, %v9087_v26  ;;  %vm7530_vm10 = vmpackc.low %vm1148_vm4, %vm1144_vm14  ;;  %vm1147_vm3 = vcmp.eq.s32.totalorder %v9722_v24, %v8890_v9  ;;  %vm1151_vm7 = vcmp.eq.s32.totalorder %v583_v0, %v8890_v9  ;;  %vm697_vm5 = vcmp.eq.s32.totalorder %v583_v0, %v9089_v27 }
 0x10c   : > { %v1699_v22 = vadd.f32 %v1698_v2, %v1610_v58  ;;  %v1611_v14 = vpop.f32.mrf.mxu1  ;;  %v1787_v21 = vpop.f32.mrf.mxu3  ;;  %v13185_v58 = vmov 0  ;;  %7673 = vmatpush.bf16.xpose.msk.msrb.mxu3 %vm7672_vm2, %v13163_v5  ;;  %vm7578_vm1 = vmpackc.low %vm1149_vm0, %vm1145_vm11  ;;  %vm693_vm2 = vcmp.eq.s32.totalorder %v9722_v24, %v9089_v27  ;;  %vm694_vm11 = vcmp.eq.s32.totalorder %v9722_v24, %v9092_v28 }
 0x10d   : > { %v1612_v3 = vadd.f32 %v1611_v14, %v1522_v10  ;;  %v13186_v58 = vsel %vm9764_vm8, 4294967295, %v13185_v58  ;;  %vm7626_vm6 = vmpackc.low %vm1150_vm12, %vm1146_vm13  ;;  %v13187_v10 = vmov 0  ;;  %vm698_vm14 = vcmp.eq.s32.totalorder %v583_v0, %v9092_v28 }
 0x10e   : > { %v1788_v20 = vadd.f32 %v1787_v21, %v1699_v22  ;;  %vm9782_vm8 = vmpackc.low %vm696_vm9, %vm692_vm15  ;;  %vm13191_vm13 = vnez %v13186_v58  ;;  %vm1137_vm12 = vcmp.eq.s32.totalorder %v9598_v11, %v8886_v7  ;;  %vm1141_vm15 = vcmp.eq.s32.totalorder %v9601_v19, %v8886_v7 }
 0x10f   : > { %v13188_v10 = vsel %vm9782_vm8, 4294967295, %v13187_v10  ;;  %vm7674_vm4 = vmpackc.low %vm1151_vm7, %vm1147_vm3  ;;  %vm1138_vm9 = vcmp.eq.s32.totalorder %v9598_v11, %v8888_v8 }
 0x110   : > { %7531 = vmatpush.bf16.xpose.msk.msrb.mxu0 %vm7530_vm10, %v13163_v5  ;;  %vm9797_vm0 = vmpackc.low %vm697_vm5, %vm693_vm2  ;;  %vm1140_vm5 = vcmp.eq.s32.totalorder %v9601_v19, %v8884_v6  ;;  %vm1142_vm10 = vcmp.eq.s32.totalorder %v9601_v19, %v8888_v8  ;;  %vm1139_vm2 = vcmp.eq.s32.totalorder %v9598_v11, %v8890_v9 }
 0x111   : > { %7579 = vmatpush.bf16.xpose.msk.msrb.mxu1 %vm7578_vm1, %v13163_v5  ;;  %v13190_v57 = vsel %vm9797_vm0, 4294967295, %v13189_v57  ;;  %vm9805_vm1 = vmpackc.low %vm698_vm14, %vm694_vm11  ;;  %vm1143_vm11 = vcmp.eq.s32.totalorder %v9601_v19, %v8890_v9  ;;  %vm699_vm14 = vcmp.eq.s32.totalorder %v9690_v60, %v9085_v25 }
 0x112   : > { %7627 = vmatpush.bf16.xpose.msk.msrb.mxu2 %vm7626_vm6, %v13163_v5  ;;  %vm1136_vm6 = vcmp.eq.s32.totalorder %v9598_v11, %v8884_v6  ;;  %vm7580_vm7 = vmpackc.low %vm1141_vm15, %vm1137_vm12  ;;  %vm1128_vm12 = vcmp.eq.s32.totalorder %v9548_v1, %v8884_v6  ;;  %vm1132_vm15 = vcmp.eq.s32.totalorder %v9551_v4, %v8884_v6 }
 0x113   : > { %v1700_v21 = vpop.f32.mrf.mxu2  ;;  %v1525_v2 = vpop.f32.mrf.mxu0  ;;  %vm7532_vm3 = vmpackc.low %vm1140_vm5, %vm1136_vm6 }
 0x114   : > { %v1701_v22 = vadd.f32 %v1700_v21, %v1612_v3  ;;  %v1614_v14 = vpop.f32.mrf.mxu1  ;;  %v1789_v63 = vpop.f32.mrf.mxu3  ;;  %v13192_v3 = vmov 0  ;;  %7675 = vmatpush.bf16.xpose.msk.msrb.mxu3 %vm7674_vm4, %v13163_v5  ;;  %vm703_vm4 = vcmp.eq.s32.totalorder %v9693_v59, %v9085_v25  ;;  %vm7628_vm6 = vmpackc.low %vm1142_vm10, %vm1138_vm9  ;;  %vm1133_vm9 = vcmp.eq.s32.totalorder %v9551_v4, %v8886_v7 }
 0x115   : > { %v1615_v12 = vadd.f32 %v1614_v14, %v1525_v2  ;;  %v13193_v3 = vsel %vm9805_vm1, 4294967295, %v13192_v3  ;;  %vm7676_vm5 = vmpackc.low %vm1143_vm11, %vm1139_vm2  ;;  %vm1130_vm10 = vcmp.eq.s32.totalorder %v9548_v1, %v8888_v8  ;;  %vm700_vm2 = vcmp.eq.s32.totalorder %v9690_v60, %v9087_v26 }
 0x116   : > { %v1790_v0 = vadd.f32 %v1789_v63, %v1701_v22  ;;  %7373 = vmatmul.msk.bf16.gmra.mxu0 %vm13191_vm13, %v13163_v5  ;;  %vm704_vm11 = vcmp.eq.s32.totalorder %v9693_v59, %v9087_v26 }
 0x117   : > { %7421 = vmatmul.msk.bf16.gmra.mxu1 %vm9782_vm8, %v13163_v5  ;;  %vm705_vm8 = vcmp.eq.s32.totalorder %v9693_v59, %v9089_v27 }
 0x118   : > { %v9813_v24 = vpack.c.bf16 %v1790_v0, %v1788_v20  ;;  %7469 = vmatmul.msk.bf16.gmra.mxu2 %vm9797_vm0, %v13163_v5  ;;  %7533 = vmatpush.bf16.xpose.msk.msrb.mxu0 %vm7532_vm3, %v13163_v5  ;;  %vm1129_vm3 = vcmp.eq.s32.totalorder %v9548_v1, %v8886_v7  ;;  %vm701_vm0 = vcmp.eq.s32.totalorder %v9690_v60, %v9089_v27 }
 0x119   : > { %7517 = vmatmul.msk.bf16.gmra.mxu3 %vm9805_vm1, %v13163_v5  ;;  %7581 = vmatpush.bf16.xpose.msk.msrb.mxu1 %vm7580_vm7, %v13163_v5  ;;  %vm9853_vm1 = vmpackc.low %vm703_vm4, %vm699_vm14  ;;  %vm1134_vm7 = vcmp.eq.s32.totalorder %v9551_v4, %v8888_v8 }
 0x11a   : > { %7629 = vmatpush.bf16.xpose.msk.msrb.mxu2 %vm7628_vm6, %v13163_v5  ;;  %vm7534_vm14 = vmpackc.low %vm1132_vm15, %vm1128_vm12  ;;  %vm1131_vm6 = vcmp.eq.s32.totalorder %v9548_v1, %v8890_v9  ;;  %vm702_vm12 = vcmp.eq.s32.totalorder %v9690_v60, %v9092_v28  ;;  %vm706_vm15 = vcmp.eq.s32.totalorder %v9693_v59, %v9092_v28  ;;  %v13203_v60 = vmov 0 }
 0x11b   : > { %v1703_v63 = vpop.f32.mrf.mxu2  ;;  %v1527_v20 = vpop.f32.mrf.mxu0  ;;  %vm7582_vm4 = vmpackc.low %vm1133_vm9, %vm1129_vm3 }
 0x11c   : > { %v1704_v21 = vadd.f32 %v1703_v63, %v1615_v12  ;;  %v1616_v2 = vpop.f32.mrf.mxu1  ;;  %v1792_v22 = vpop.f32.mrf.mxu3  ;;  %v13194_v12 = vmov 0  ;;  %7677 = vmatpush.bf16.xpose.msk.msrb.mxu3 %vm7676_vm5, %v13163_v5  ;;  %vm1135_vm5 = vcmp.eq.s32.totalorder %v9551_v4, %v8890_v9  ;;  %vm7630_vm13 = vmpackc.low %vm1134_vm7, %vm1130_vm10  ;;  %v13196_v63 = vmov 0 }
 0x11d   : > { %v1617_v14 = vadd.f32 %v1616_v2, %v1527_v20  ;;  %v13195_v12 = vsel %vm9853_vm1, 4294967295, %v13194_v12  ;;  %vm9876_vm1 = vmpackc.low %vm704_vm11, %vm700_vm2  ;;  %vm715_vm2 = vcmp.eq.s32.totalorder %v9582_v13, %v9085_v25  ;;  %vm720_vm11 = vcmp.eq.s32.totalorder %v9585_v23, %v9087_v26 }
 0x11e   : > { %v1793_v0 = vadd.f32 %v1792_v22, %v1704_v21  ;;  %v13197_v63 = vsel %vm9876_vm1, 4294967295, %v13196_v63  ;;  %vm7678_vm3 = vmpackc.low %vm1135_vm5, %vm1131_vm6  ;;  %v13198_v22 = vmov 0  ;;  %vm13200_vm10 = vnez %v13195_v12 }
 0x11f   : > { %vm9892_vm9 = vmpackc.low %vm705_vm8, %vm701_vm0  ;;  %vm719_vm8 = vcmp.eq.s32.totalorder %v9585_v23, %v9085_v25  ;;  %vm716_vm0 = vcmp.eq.s32.totalorder %v9582_v13, %v9087_v26  ;;  %vm1120_vm5 = vcmp.eq.s32.totalorder %v9496_v17, %v8884_v6 }
 0x120   : > { %7535 = vmatpush.bf16.xpose.msk.msrb.mxu0 %vm7534_vm14, %v13163_v5  ;;  %v13199_v22 = vsel %vm9892_vm9, 4294967295, %v13198_v22  ;;  %vm9900_vm7 = vmpackc.low %vm706_vm15, %vm702_vm12  ;;  %vm717_vm14 = vcmp.eq.s32.totalorder %v9582_v13, %v9089_v27  ;;  %vm1124_vm12 = vcmp.eq.s32.totalorder %v9499_v18, %v8884_v6  ;;  %vm1121_vm15 = vcmp.eq.s32.totalorder %v9496_v17, %v8886_v7 }
 0x121   : > { %7583 = vmatpush.bf16.xpose.msk.msrb.mxu1 %vm7582_vm4, %v13163_v5  ;;  %vm721_vm4 = vcmp.eq.s32.totalorder %v9585_v23, %v9089_v27  ;;  %vm9929_vm6 = vmpackc.low %vm720_vm11, %vm716_vm0  ;;  %vm1126_vm0 = vcmp.eq.s32.totalorder %v9499_v18, %v8888_v8 }
 0x122   : > { %7631 = vmatpush.bf16.xpose.msk.msrb.mxu2 %vm7630_vm13, %v13163_v5  ;;  %vm9914_vm13 = vmpackc.low %vm719_vm8, %vm715_vm2  ;;  %vm1125_vm2 = vcmp.eq.s32.totalorder %v9499_v18, %v8886_v7  ;;  %vm1127_vm8 = vcmp.eq.s32.totalorder %v9499_v18, %v8890_v9 }
 0x123   : > { %v1705_v11 = vpop.f32.mrf.mxu2  ;;  %v1530_v19 = vpop.f32.mrf.mxu0  ;;  %v13204_v60 = vsel %vm9914_vm13, 4294967295, %v13203_v60  ;;  %vm7536_vm11 = vmpackc.low %vm1124_vm12, %vm1120_vm5  ;;  %vm707_vm5 = vcmp.eq.s32.totalorder %v9638_v15, %v9085_v25  ;;  %vm711_vm12 = vcmp.eq.s32.totalorder %v9641_v16, %v9085_v25  ;;  %v13211_v25 = vmov 0 }
 0x124   : > { %v1706_v4 = vadd.f32 %v1705_v11, %v1617_v14  ;;  %v1619_v20 = vpop.f32.mrf.mxu1  ;;  %v1794_v21 = vpop.f32.mrf.mxu3  ;;  %v13201_v14 = vmov 0  ;;  %7679 = vmatpush.bf16.xpose.msk.msrb.mxu3 %vm7678_vm3, %v13163_v5  ;;  %v13206_v11 = vmov 0  ;;  %vm9942_vm3 = vmpackc.low %vm721_vm4, %vm717_vm14  ;;  %vm1123_vm4 = vcmp.eq.s32.totalorder %v9496_v17, %v8890_v9 }
 0x125   : > { %v1620_v2 = vadd.f32 %v1619_v20, %v1530_v19  ;;  %v13202_v14 = vsel %vm9900_vm7, 4294967295, %v13201_v14  ;;  %v13207_v11 = vsel %vm9929_vm6, 4294967295, %v13206_v11  ;;  %vm7584_vm14 = vmpackc.low %vm1125_vm2, %vm1121_vm15  ;;  %vm13210_vm15 = vcmp.eq.s32.totalorder %v9496_v17, %v8888_v8 }
 0x126   : > { %v1795_v59 = vadd.f32 %v1794_v21, %v1706_v4  ;;  %7375 = vmatmul.msk.bf16.gmra.mxu0 %vm13200_vm10, %v13163_v5  ;;  %vm7632_vm2 = vmpackc.low %vm1126_vm0, %vm13210_vm15  ;;  %vm1116_vm0 = vcmp.eq.s32.totalorder %v9449_v62, %v8884_v6  ;;  %vm1113_vm15 = vcmp.eq.s32.totalorder %v9446_v61, %v8886_v7  ;;  %v13213_v17 = vmov 0 }
 0x127   : > { %7423 = vmatmul.msk.bf16.gmra.mxu1 %vm9876_vm1, %v13163_v5  ;;  %vm1112_vm1 = vcmp.eq.s32.totalorder %v9446_v61, %v8884_v6  ;;  %vm713_vm6 = vcmp.eq.s32.totalorder %v9641_v16, %v9089_v27 }
 0x128   : > { %v9924_v1 = vpack.c.bf16 %v1795_v59, %v1793_v0  ;;  %7471 = vmatmul.msk.bf16.gmra.mxu2 %vm9892_vm9, %v13163_v5  ;;  %v13208_v0 = vmov 0  ;;  %vm718_vm9 = vcmp.eq.s32.totalorder %v9582_v13, %v9092_v28  ;;  %7537 = vmatpush.bf16.xpose.msk.msrb.mxu0 %vm7536_vm11, %v13163_v5 }
 0x129   : > { %7519 = vmatmul.msk.bf16.gmra.mxu3 %vm9900_vm7, %v13163_v5  ;;  %v13209_v0 = vsel %vm9942_vm3, 4294967295, %v13208_v0  ;;  %vm722_vm7 = vcmp.eq.s32.totalorder %v9585_v23, %v9092_v28  ;;  %7585 = vmatpush.bf16.xpose.msk.msrb.mxu1 %vm7584_vm14, %v13163_v5  ;;  %vm7680_vm14 = vmpackc.low %vm1127_vm8, %vm1123_vm4  ;;  %vm1118_vm8 = vcmp.eq.s32.totalorder %v9449_v62, %v8888_v8  ;;  %vm708_vm4 = vcmp.eq.s32.totalorder %v9638_v15, %v9087_v26 }
 0x12a   : > { %13205 = vst [vmem:[#allocation26_spill] sm:$0xff] %v9924_v1  ;;  %7633 = vmatpush.bf16.xpose.msk.msrb.mxu2 %vm7632_vm2, %v13163_v5  ;;  %vm9979_vm11 = vmpackc.low %vm722_vm7, %vm718_vm9  ;;  %vm1117_vm9 = vcmp.eq.s32.totalorder %v9449_v62, %v8886_v7  ;;  %vm1114_vm7 = vcmp.eq.s32.totalorder %v9446_v61, %v8888_v8  ;;  %vm709_vm3 = vcmp.eq.s32.totalorder %v9638_v15, %v9089_v27 }
 0x12b   : > { %v1708_v19 = vpop.f32.mrf.mxu2  ;;  %v1532_v4 = vpop.f32.mrf.mxu0  ;;  %v13212_v25 = vsel %vm9979_vm11, 4294967295, %v13211_v25  ;;  %vm9989_vm2 = vmpackc.low %vm711_vm12, %vm707_vm5  ;;  %vm712_vm5 = vcmp.eq.s32.totalorder %v9641_v16, %v9087_v26  ;;  %vm1119_vm11 = vcmp.eq.s32.totalorder %v9449_v62, %v8890_v9 }
 0x12c   : > { %v1709_v20 = vadd.f32 %v1708_v19, %v1620_v2  ;;  %v1621_v21 = vpop.f32.mrf.mxu1  ;;  %v1797_v59 = vpop.f32.mrf.mxu3  ;;  %v13214_v17 = vsel %vm9989_vm2, 4294967295, %v13213_v17  ;;  %7681 = vmatpush.bf16.xpose.msk.msrb.mxu3 %vm7680_vm14, %v13163_v5  ;;  %vm7538_vm12 = vmpackc.low %vm1116_vm0, %vm1112_vm1  ;;  %vm1115_vm14 = vcmp.eq.s32.totalorder %v9446_v61, %v8890_v9  ;;  %vm710_vm1 = vcmp.eq.s32.totalorder %v9638_v15, %v9092_v28 }
 0x12d   : > { %v1622_v1 = vadd.f32 %v1621_v21, %v1532_v4  ;;  %vm7586_vm10 = vmpackc.low %vm1117_vm9, %vm1113_vm15  ;;  %vm714_vm0 = vcmp.eq.s32.totalorder %v9641_v16, %v9092_v28 }
 0x12e   : > { %v1798_v2 = vadd.f32 %v1797_v59, %v1709_v20  ;;  %vm7634_vm13 = vmpackc.low %vm1118_vm8, %vm1114_vm7  ;;  %vm13219_vm7 = vnez %v13214_v17  ;;  %vm13226_vm8 = vnez %v13062_v29 }
 0x12f   : > { %vm10012_vm2 = vmpackc.low %vm712_vm5, %vm708_vm4  ;;  %vm13227_vm4 = vnez %v13064_v30  ;;  %vm13228_vm5 = vnez %v13066_v31 }
 0x130   : > { %7539 = vmatpush.bf16.xpose.msk.msrb.mxu0 %vm7538_vm12, %v13163_v5  ;;  %vm7682_vm15 = vmpackc.low %vm1119_vm11, %vm1115_vm14  ;;  %vm13225_vm11 = vnez %v13212_v25  ;;  %vm13229_vm12 = vnez %v13068_v32  ;;  %vm13230_vm14 = vnez %v13070_v33 }
 0x131   : > { %7587 = vmatpush.bf16.xpose.msk.msrb.mxu1 %vm7586_vm10, %v13163_v5  ;;  %vm10028_vm9 = vmpackc.low %vm713_vm6, %vm709_vm3  ;;  %vm13223_vm6 = vnez %v13207_v11  ;;  %vm13224_vm3 = vnez %v13209_v0 }
 0x132   : > { %7635 = vmatpush.bf16.xpose.msk.msrb.mxu2 %vm7634_vm13, %v13163_v5  ;;  %vm10036_vm10 = vmpackc.low %vm714_vm0, %vm710_vm1  ;;  %vm13222_vm13 = vnez %v13204_v60  ;;  %vm13231_vm1 = vnez %v13072_v34  ;;  %vm13232_vm0 = vnez %v13074_v35 }
 0x133   : > { %v1710_v6 = vpop.f32.mrf.mxu2  ;;  %v1535_v7 = vpop.f32.mrf.mxu0 }
 0x134   : > { %v1711_v26 = vadd.f32 %v1710_v6, %v1622_v1  ;;  %v1624_v62 = vpop.f32.mrf.mxu1  ;;  %v1799_v18 = vpop.f32.mrf.mxu3  ;;  %7683 = vmatpush.bf16.xpose.msk.msrb.mxu3 %vm7682_vm15, %v13163_v5  ;;  %vm13233_vm15 = vnez %v13076_v36 }
 0x135   : > { %v1625_v23 = vadd.f32 %v1624_v62, %v1535_v7 }
 0x136   : > { %v1800_v28 = vadd.f32 %v1799_v18, %v1711_v26  ;;  %7377 = vmatmul.msk.bf16.gmra.mxu0 %vm13219_vm7, %v13163_v5 }
 0x137   : > { %7425 = vmatmul.msk.bf16.gmra.mxu1 %vm10012_vm2, %v13163_v5 }
 0x138   : > { %v10044_v9 = vpack.c.bf16 %v1800_v28, %v1798_v2  ;;  %7473 = vmatmul.msk.bf16.gmra.mxu2 %vm10028_vm9, %v13163_v5 }
 0x139   : > { %7521 = vmatmul.msk.bf16.gmra.mxu3 %vm10036_vm10, %v13163_v5 }
 0x13b   : > { %v1713_v27 = vpop.f32.mrf.mxu2  ;;  %v1537_v61 = vpop.f32.mrf.mxu0 }
 0x13c   : > { %v1714_v15 = vadd.f32 %v1713_v27, %v1625_v23  ;;  %v1626_v1 = vpop.f32.mrf.mxu1  ;;  %v1802_v19 = vpop.f32.mrf.mxu3 }
 0x13d   : > { %v1627_v4 = vadd.f32 %v1626_v1, %v1537_v61 }
 0x13e   : > { %v1803_v20 = vadd.f32 %v1802_v19, %v1714_v15 }
 0x143   : > { %v1715_v21 = vpop.f32.mrf.mxu2  ;;  %v1540_v59 = vpop.f32.mrf.mxu0 }
 0x144   : > { %v1716_v6 = vadd.f32 %v1715_v21, %v1627_v4  ;;  %v1629_v2 = vpop.f32.mrf.mxu1  ;;  %v1804_v7 = vpop.f32.mrf.mxu3 }
 0x145   : > { %v1630_v26 = vadd.f32 %v1629_v2, %v1540_v59 }
 0x146   : > { %v1805_v62 = vadd.f32 %v1804_v7, %v1716_v6  ;;  %7379 = vmatmul.msk.bf16.gmra.mxu0 %vm13222_vm13, %v13163_v5 }
 0x147   : > { %7427 = vmatmul.msk.bf16.gmra.mxu1 %vm13223_vm6, %v13163_v5 }
 0x148   : > { %v10058_v18 = vpack.c.bf16 %v1805_v62, %v1803_v20  ;;  %7475 = vmatmul.msk.bf16.gmra.mxu2 %vm13224_vm3, %v13163_v5 }
 0x149   : > { %7523 = vmatmul.msk.bf16.gmra.mxu3 %vm13225_vm11, %v13163_v5 }
 0x14b   : > { %v1718_v23 = vpop.f32.mrf.mxu2  ;;  %v1542_v28 = vpop.f32.mrf.mxu0 }
 0x14c   : > { %v1719_v27 = vadd.f32 %v1718_v23, %v1630_v26  ;;  %v1631_v61 = vpop.f32.mrf.mxu1  ;;  %v1807_v15 = vpop.f32.mrf.mxu3 }
 0x14d   : > { %v1632_v1 = vadd.f32 %v1631_v61, %v1542_v28 }
 0x14e   : > { %v1808_v19 = vadd.f32 %v1807_v15, %v1719_v27 }
 0x153   : > { %v1720_v4 = vpop.f32.mrf.mxu2  ;;  %v1545_v21 = vpop.f32.mrf.mxu0 }
 0x154   : > { %v1721_v59 = vadd.f32 %v1720_v4, %v1632_v1  ;;  %v1634_v20 = vpop.f32.mrf.mxu1  ;;  %v1809_v6 = vpop.f32.mrf.mxu3 }
 0x155   : > { %v1635_v2 = vadd.f32 %v1634_v20, %v1545_v21 }
 0x156   : > { %v1810_v7 = vadd.f32 %v1809_v6, %v1721_v59  ;;  %7541 = vmatmul.msk.bf16.vlgmr.msrb.gmra.mxu0 %vm13226_vm8, %v13163_v5  ;;  %vm13234_vm8 = vnez %v13078_v37 }
 0x157   : > { %7589 = vmatmul.msk.bf16.vlgmr.msrb.gmra.mxu1 %vm13227_vm4, %v13163_v5  ;;  %vm13235_vm4 = vnez %v13080_v38 }
 0x158   : > { %v10072_v26 = vpack.c.bf16 %v1810_v7, %v1808_v19  ;;  %7637 = vmatmul.msk.bf16.vlgmr.msrb.gmra.mxu2 %vm13228_vm5, %v13163_v5  ;;  %vm13236_vm5 = vnez %v13082_v39 }
 0x159   : > { %7685 = vmatmul.msk.bf16.vlgmr.msrb.gmra.mxu3 %vm13229_vm12, %v13163_v5  ;;  %vm13237_vm12 = vnez %v13084_v40 }
 0x15b   : > { %v1723_v62 = vpop.f32.mrf.mxu2  ;;  %v1547_v23 = vpop.f32.mrf.mxu0 }
 0x15c   : > { %v1724_v28 = vadd.f32 %v1723_v62, %v1635_v2  ;;  %v1636_v27 = vpop.f32.mrf.mxu1  ;;  %v1812_v29 = vpop.f32.mrf.mxu3 }
 0x15d   : > { %v1637_v61 = vadd.f32 %v1636_v27, %v1547_v23 }
 0x15e   : > { %v1813_v15 = vadd.f32 %v1812_v29, %v1724_v28 }
 0x163   : > { %v1725_v1 = vpop.f32.mrf.mxu2  ;;  %v1550_v30 = vpop.f32.mrf.mxu0 }
 0x164   : > { %v1726_v4 = vadd.f32 %v1725_v1, %v1637_v61  ;;  %v1639_v19 = vpop.f32.mrf.mxu1  ;;  %v1814_v21 = vpop.f32.mrf.mxu3 }
 0x165   : > { %v1640_v59 = vadd.f32 %v1639_v19, %v1550_v30 }
 0x166   : > { %v1815_v20 = vadd.f32 %v1814_v21, %v1726_v4  ;;  %7543 = vmatmul.msk.bf16.gmra.mxu0 %vm13230_vm14, %v13163_v5  ;;  %vm13238_vm14 = vnez %v13086_v41 }
 0x167   : > { %7591 = vmatmul.msk.bf16.gmra.mxu1 %vm13231_vm1, %v13163_v5  ;;  %vm13239_vm1 = vnez %v13088_v42 }
 0x168   : > { %v10086_v31 = vpack.c.bf16 %v1815_v20, %v1813_v15  ;;  %7639 = vmatmul.msk.bf16.gmra.mxu2 %vm13232_vm0, %v13163_v5  ;;  %vm13240_vm0 = vnez %v13090_v43 }
 0x169   : > { %7687 = vmatmul.msk.bf16.gmra.mxu3 %vm13233_vm15, %v13163_v5  ;;  %vm13241_vm15 = vnez %v13092_v44 }
 0x16b   : > { %v1728_v32 = vpop.f32.mrf.mxu2  ;;  %v1552_v6 = vpop.f32.mrf.mxu0 }
 0x16c   : > { %v1729_v2 = vadd.f32 %v1728_v32, %v1640_v59  ;;  %v1641_v7 = vpop.f32.mrf.mxu1  ;;  %v1817_v33 = vpop.f32.mrf.mxu3 }
 0x16d   : > { %v1642_v62 = vadd.f32 %v1641_v7, %v1552_v6 }
 0x16e   : > { %v1818_v23 = vadd.f32 %v1817_v33, %v1729_v2 }
 0x173   : > { %v1730_v28 = vpop.f32.mrf.mxu2  ;;  %v1555_v34 = vpop.f32.mrf.mxu0 }
 0x174   : > { %v1731_v27 = vadd.f32 %v1730_v28, %v1642_v62  ;;  %v1644_v29 = vpop.f32.mrf.mxu1  ;;  %v1819_v61 = vpop.f32.mrf.mxu3 }
 0x175   : > { %v1645_v15 = vadd.f32 %v1644_v29, %v1555_v34 }
 0x176   : > { %v1820_v1 = vadd.f32 %v1819_v61, %v1731_v27  ;;  %7545 = vmatmul.msk.bf16.gmra.mxu0 %vm13234_vm8, %v13163_v5  ;;  %vm13242_vm8 = vnez %v13094_v45 }
 0x177   : > { %7593 = vmatmul.msk.bf16.gmra.mxu1 %vm13235_vm4, %v13163_v5  ;;  %vm13243_vm4 = vnez %v13096_v46 }
 0x178   : > { %v10100_v35 = vpack.c.bf16 %v1820_v1, %v1818_v23  ;;  %7641 = vmatmul.msk.bf16.gmra.mxu2 %vm13236_vm5, %v13163_v5  ;;  %vm13244_vm5 = vnez %v13098_v47 }
 0x179   : > { %7689 = vmatmul.msk.bf16.gmra.mxu3 %vm13237_vm12, %v13163_v5  ;;  %vm13245_vm12 = vnez %v13100_v48 }
 0x17b   : > { %v1733_v36 = vpop.f32.mrf.mxu2  ;;  %v1557_v30 = vpop.f32.mrf.mxu0 }
 0x17c   : > { %v1734_v4 = vadd.f32 %v1733_v36, %v1645_v15  ;;  %v1646_v19 = vpop.f32.mrf.mxu1  ;;  %v1822_v37 = vpop.f32.mrf.mxu3 }
 0x17d   : > { %v1647_v21 = vadd.f32 %v1646_v19, %v1557_v30 }
 0x17e   : > { %v1823_v59 = vadd.f32 %v1822_v37, %v1734_v4 }
 0x183   : > { %v1735_v20 = vpop.f32.mrf.mxu2  ;;  %v1560_v38 = vpop.f32.mrf.mxu0 }
 0x184   : > { %v1736_v32 = vadd.f32 %v1735_v20, %v1647_v21  ;;  %v1649_v6 = vpop.f32.mrf.mxu1  ;;  %v1824_v2 = vpop.f32.mrf.mxu3 }
 0x185   : > { %v1650_v7 = vadd.f32 %v1649_v6, %v1560_v38 }
 0x186   : > { %v1825_v33 = vadd.f32 %v1824_v2, %v1736_v32  ;;  %7547 = vmatmul.msk.bf16.gmra.mxu0 %vm13238_vm14, %v13163_v5  ;;  %vm13246_vm14 = vnez %v13102_v49 }
 0x187   : > { %7595 = vmatmul.msk.bf16.gmra.mxu1 %vm13239_vm1, %v13163_v5  ;;  %vm13247_vm1 = vnez %v13104_v50 }
 0x188   : > { %v10114_v39 = vpack.c.bf16 %v1825_v33, %v1823_v59  ;;  %7643 = vmatmul.msk.bf16.gmra.mxu2 %vm13240_vm0, %v13163_v5  ;;  %vm13248_vm0 = vnez %v13106_v51 }
 0x189   : > { %7691 = vmatmul.msk.bf16.gmra.mxu3 %vm13241_vm15, %v13163_v5  ;;  %vm13249_vm15 = vnez %v13108_v52 }
 0x18b   : > { %v1738_v40 = vpop.f32.mrf.mxu2  ;;  %v1562_v62 = vpop.f32.mrf.mxu0 }
 0x18c   : > { %v1739_v23 = vadd.f32 %v1738_v40, %v1650_v7  ;;  %v1651_v28 = vpop.f32.mrf.mxu1  ;;  %v1827_v41 = vpop.f32.mrf.mxu3 }
 0x18d   : > { %v1652_v34 = vadd.f32 %v1651_v28, %v1562_v62 }
 0x18e   : > { %v1828_v27 = vadd.f32 %v1827_v41, %v1739_v23 }
 0x193   : > { %v1740_v29 = vpop.f32.mrf.mxu2  ;;  %v1565_v42 = vpop.f32.mrf.mxu0 }
 0x194   : > { %v1741_v61 = vadd.f32 %v1740_v29, %v1652_v34  ;;  %v1654_v15 = vpop.f32.mrf.mxu1  ;;  %v1829_v1 = vpop.f32.mrf.mxu3 }
 0x195   : > { %v1655_v36 = vadd.f32 %v1654_v15, %v1565_v42 }
 0x196   : > { %v1830_v30 = vadd.f32 %v1829_v1, %v1741_v61  ;;  %7549 = vmatmul.msk.bf16.gmra.mxu0 %vm13242_vm8, %v13163_v5  ;;  %vm13250_vm8 = vnez %v13110_v53 }
 0x197   : > { %7597 = vmatmul.msk.bf16.gmra.mxu1 %vm13243_vm4, %v13163_v5  ;;  %vm13251_vm4 = vnez %v13112_v54 }
 0x198   : > { %v10128_v43 = vpack.c.bf16 %v1830_v30, %v1828_v27  ;;  %7645 = vmatmul.msk.bf16.gmra.mxu2 %vm13244_vm5, %v13163_v5  ;;  %vm13252_vm5 = vnez %v13114_v55  ;;  %v13254_v55 = vld [vmem:[#allocation3_spill] sm:$0xff] }
 0x199   : > { %7693 = vmatmul.msk.bf16.gmra.mxu3 %vm13245_vm12, %v13163_v5  ;;  %vm13253_vm12 = vnez %v13116_v56  ;;  %v13256_v56 = vld [vmem:[#allocation4_spill] sm:$0xff] }
 0x19b   : > { %v1743_v44 = vpop.f32.mrf.mxu2  ;;  %v1567_v4 = vpop.f32.mrf.mxu0 }
 0x19c   : > { %v1744_v19 = vadd.f32 %v1743_v44, %v1655_v36  ;;  %v1656_v37 = vpop.f32.mrf.mxu1  ;;  %v1832_v45 = vpop.f32.mrf.mxu3 }
 0x19d   : > { %v1657_v21 = vadd.f32 %v1656_v37, %v1567_v4 }
 0x19e   : > { %v1833_v59 = vadd.f32 %v1832_v45, %v1744_v19 }
 0x1a3   : > { %v1745_v20 = vpop.f32.mrf.mxu2  ;;  %v1570_v46 = vpop.f32.mrf.mxu0 }
 0x1a4   : > { %v1746_v38 = vadd.f32 %v1745_v20, %v1657_v21  ;;  %v1659_v32 = vpop.f32.mrf.mxu1  ;;  %v1834_v6 = vpop.f32.mrf.mxu3 }
 0x1a5   : > { %v1660_v2 = vadd.f32 %v1659_v32, %v1570_v46  ;;  %v13258_v46 = vld [vmem:[#allocation5_spill] sm:$0xff] }
 0x1a6   : > { %v1835_v7 = vadd.f32 %v1834_v6, %v1746_v38  ;;  %7551 = vmatmul.msk.bf16.gmra.mxu0 %vm13246_vm14, %v13163_v5  ;;  %vm13255_vm14 = vnez %v13254_v55  ;;  %v13260_v38 = vld [vmem:[#allocation6_spill] sm:$0xff] }
 0x1a7   : > { %7599 = vmatmul.msk.bf16.gmra.mxu1 %vm13247_vm1, %v13163_v5  ;;  %vm13257_vm1 = vnez %v13256_v56  ;;  %v13270_v56 = vld [vmem:[#allocation11_spill] sm:$0xff] }
 0x1a8   : > { %v10142_v47 = vpack.c.bf16 %v1835_v7, %v1833_v59  ;;  %7647 = vmatmul.msk.bf16.gmra.mxu2 %vm13248_vm0, %v13163_v5  ;;  %vm13259_vm0 = vnez %v13258_v46  ;;  %v13272_v46 = vld [vmem:[#allocation12_spill] sm:$0xff] }
 0x1a9   : > { %7695 = vmatmul.msk.bf16.gmra.mxu3 %vm13249_vm15, %v13163_v5  ;;  %vm13261_vm15 = vnez %v13260_v38 }
 0x1ab   : > { %v1748_v48 = vpop.f32.mrf.mxu2  ;;  %v1572_v33 = vpop.f32.mrf.mxu0 }
 0x1ac   : > { %v1749_v40 = vadd.f32 %v1748_v48, %v1660_v2  ;;  %v1661_v62 = vpop.f32.mrf.mxu1  ;;  %v1837_v49 = vpop.f32.mrf.mxu3 }
 0x1ad   : > { %v1662_v23 = vadd.f32 %v1661_v62, %v1572_v33 }
 0x1ae   : > { %v1838_v28 = vadd.f32 %v1837_v49, %v1749_v40 }
 0x1b3   : > { %v1750_v41 = vpop.f32.mrf.mxu2  ;;  %v1575_v50 = vpop.f32.mrf.mxu0 }
 0x1b4   : > { %v1751_v34 = vadd.f32 %v1750_v41, %v1662_v23  ;;  %v1664_v27 = vpop.f32.mrf.mxu1  ;;  %v1839_v29 = vpop.f32.mrf.mxu3 }
 0x1b5   : > { %v1665_v42 = vadd.f32 %v1664_v27, %v1575_v50  ;;  %v13262_v27 = vld [vmem:[#allocation7_spill] sm:$0xff] }
 0x1b6   : > { %v1840_v61 = vadd.f32 %v1839_v29, %v1751_v34  ;;  %7553 = vmatmul.msk.bf16.gmra.mxu0 %vm13250_vm8, %v13163_v5  ;;  %vm13263_vm8 = vnez %v13262_v27  ;;  %v13264_v29 = vld [vmem:[#allocation8_spill] sm:$0xff] }
 0x1b7   : > { %7601 = vmatmul.msk.bf16.gmra.mxu1 %vm13251_vm4, %v13163_v5  ;;  %vm13265_vm4 = vnez %v13264_v29 }
 0x1b8   : > { %v10156_v51 = vpack.c.bf16 %v1840_v61, %v1838_v28  ;;  %7649 = vmatmul.msk.bf16.gmra.mxu2 %vm13252_vm5, %v13163_v5  ;;  %v13266_v61 = vld [vmem:[#allocation9_spill] sm:$0xff] }
 0x1b9   : > { %7697 = vmatmul.msk.bf16.gmra.mxu3 %vm13253_vm12, %v13163_v5  ;;  %vm13267_vm5 = vnez %v13266_v61  ;;  %v13278_v61 = vld [vmem:[#allocation16_spill] sm:$0xff] }
 0x1bb   : > { %v1753_v52 = vpop.f32.mrf.mxu2  ;;  %v1577_v15 = vpop.f32.mrf.mxu0 }
 0x1bc   : > { %v1754_v1 = vadd.f32 %v1753_v52, %v1665_v42  ;;  %v1666_v36 = vpop.f32.mrf.mxu1  ;;  %v1842_v53 = vpop.f32.mrf.mxu3  ;;  %v13268_v52 = vld [vmem:[#allocation10_spill] sm:$0xff] }
 0x1bd   : > { %v1667_v30 = vadd.f32 %v1666_v36, %v1577_v15  ;;  %vm13269_vm12 = vnez %v13268_v52  ;;  %v13280_v52 = vld [vmem:[#allocation17_spill] sm:$0xff] }
 0x1be   : > { %v1843_v44 = vadd.f32 %v1842_v53, %v1754_v1 }
 0x1c3   : > { %v1755_v4 = vpop.f32.mrf.mxu2  ;;  %v1580_v54 = vpop.f32.mrf.mxu0 }
 0x1c4   : > { %v1756_v19 = vadd.f32 %v1755_v4, %v1667_v30  ;;  %v1669_v37 = vpop.f32.mrf.mxu1  ;;  %v1844_v45 = vpop.f32.mrf.mxu3 }
 0x1c5   : > { %v1670_v21 = vadd.f32 %v1669_v37, %v1580_v54 }
 0x1c6   : > { %v1845_v59 = vadd.f32 %v1844_v45, %v1756_v19  ;;  %7555 = vmatmul.msk.bf16.gmra.mxu0 %vm13255_vm14, %v13163_v5  ;;  %vm13271_vm14 = vnez %v13270_v56 }
 0x1c7   : > { %7603 = vmatmul.msk.bf16.gmra.mxu1 %vm13257_vm1, %v13163_v5  ;;  %vm13273_vm1 = vnez %v13272_v46 }
 0x1c8   : > { %v10170_v20 = vpack.c.bf16 %v1845_v59, %v1843_v44  ;;  %7651 = vmatmul.msk.bf16.gmra.mxu2 %vm13259_vm0, %v13163_v5 }
 0x1c9   : > { %7699 = vmatmul.msk.bf16.gmra.mxu3 %vm13261_vm15, %v13163_v5 }
 0x1cb   : > { %v1758_v32 = vpop.f32.mrf.mxu2  ;;  %v1582_v6 = vpop.f32.mrf.mxu0 }
 0x1cc   : > { %v1759_v2 = vadd.f32 %v1758_v32, %v1670_v21  ;;  %v1671_v7 = vpop.f32.mrf.mxu1  ;;  %v1847_v48 = vpop.f32.mrf.mxu3  ;;  %v13274_v32 = vld [vmem:[#allocation13_spill] sm:$0xff] }
 0x1cd   : > { %v1672_v33 = vadd.f32 %v1671_v7, %v1582_v6  ;;  %vm13275_vm0 = vnez %v13274_v32  ;;  %v13276_v6 = vld [vmem:[#allocation14_spill] sm:$0xff] }
 0x1ce   : > { %v1848_v40 = vadd.f32 %v1847_v48, %v1759_v2  ;;  %vm13277_vm15 = vnez %v13276_v6  ;;  %v13286_v6 = vld [vmem:[#allocation21_spill] sm:$0xff] }
 0x1d3   : > { %v1760_v62 = vpop.f32.mrf.mxu2  ;;  %v1861_v49 = vpop.f32.mrf.mxu0 }
 0x1d4   : > { %v1761_v23 = vadd.f32 %v1760_v62, %v1672_v33  ;;  %v1849_v28 = vpop.f32.mrf.mxu3  ;;  %v1950_v41 = vpop.f32.mrf.mxu1 }
 0x1d5   : > { %v1951_v50 = vadd.f32 %v1950_v41, %v1861_v49 }
 0x1d6   : > { %v1850_v34 = vadd.f32 %v1849_v28, %v1761_v23  ;;  %7557 = vmatmul.msk.bf16.gmra.mxu0 %vm13263_vm8, %v13163_v5  ;;  %vm13279_vm8 = vnez %v13278_v61 }
 0x1d7   : > { %7605 = vmatmul.msk.bf16.gmra.mxu1 %vm13265_vm4, %v13163_v5  ;;  %vm13281_vm4 = vnez %v13280_v52 }
 0x1d8   : > { %v10184_v42 = vpack.c.bf16 %v1850_v34, %v1848_v40  ;;  %7653 = vmatmul.msk.bf16.gmra.mxu2 %vm13267_vm5, %v13163_v5 }
 0x1d9   : > { %7701 = vmatmul.msk.bf16.gmra.mxu3 %vm13269_vm12, %v13163_v5 }
 0x1db   : > { %v2039_v15 = vpop.f32.mrf.mxu2  ;;  %v1863_v1 = vpop.f32.mrf.mxu0 }
 0x1dc   : > { %v2040_v36 = vadd.f32 %v2039_v15, %v1951_v50  ;;  %v1952_v53 = vpop.f32.mrf.mxu1  ;;  %v2128_v30 = vpop.f32.mrf.mxu3 }
 0x1dd   : > { %v1953_v44 = vadd.f32 %v1952_v53, %v1863_v1  ;;  %v13282_v1 = vld [vmem:[#allocation18_spill] sm:$0xff] }
 0x1de   : > { %v2129_v4 = vadd.f32 %v2128_v30, %v2040_v36  ;;  %vm13283_vm5 = vnez %v13282_v1  ;;  %v13284_v36 = vld [vmem:[#allocation19_spill] sm:$0xff] }
 0x1df   : > { %vm13285_vm12 = vnez %v13284_v36 }
 0x1e3   : > { %v2041_v54 = vpop.f32.mrf.mxu2  ;;  %v1866_v19 = vpop.f32.mrf.mxu0 }
 0x1e4   : > { %v2042_v37 = vadd.f32 %v2041_v54, %v1953_v44  ;;  %v1955_v45 = vpop.f32.mrf.mxu1  ;;  %v2130_v21 = vpop.f32.mrf.mxu3 }
 0x1e5   : > { %v1956_v59 = vadd.f32 %v1955_v45, %v1866_v19 }
 0x1e6   : > { %v2131_v55 = vadd.f32 %v2130_v21, %v2042_v37  ;;  %7559 = vmatmul.msk.bf16.gmra.mxu0 %vm13271_vm14, %v13163_v5  ;;  %vm13287_vm14 = vnez %v13286_v6 }
 0x1e7   : > { %7607 = vmatmul.msk.bf16.gmra.mxu1 %vm13273_vm1, %v13163_v5 }
 0x1e8   : > { %v10198_v38 = vpack.c.bf16 %v2131_v55, %v2129_v4  ;;  %7655 = vmatmul.msk.bf16.gmra.mxu2 %vm13275_vm0, %v13163_v5 }
 0x1e9   : > { %7703 = vmatmul.msk.bf16.gmra.mxu3 %vm13277_vm15, %v13163_v5 }
 0x1eb   : > { %v2044_v2 = vpop.f32.mrf.mxu2  ;;  %v1868_v7 = vpop.f32.mrf.mxu0 }
 0x1ec   : > { %v2045_v48 = vadd.f32 %v2044_v2, %v1956_v59  ;;  %v1957_v33 = vpop.f32.mrf.mxu1  ;;  %v2133_v40 = vpop.f32.mrf.mxu3  ;;  %v13288_v2 = vld [vmem:[#allocation22_spill] sm:$0xff] }
 0x1ed   : > { %v1958_v62 = vadd.f32 %v1957_v33, %v1868_v7  ;;  %vm13289_vm1 = vnez %v13288_v2  ;;  %v13292_v33 = vld [vmem:[#allocation24_spill] sm:$0xff] }
 0x1ee   : > { %v2134_v49 = vadd.f32 %v2133_v40, %v2045_v48  ;;  %v13290_v48 = vld [vmem:[#allocation23_spill] sm:$0xff]  ;;  %vm13293_vm15 = vnez %v13292_v33 }
 0x1ef   : > { %vm13291_vm0 = vnez %v13290_v48 }
 0x1f3   : > { %v2046_v23 = vpop.f32.mrf.mxu2  ;;  %v1871_v28 = vpop.f32.mrf.mxu0 }
 0x1f4   : > { %v2047_v41 = vadd.f32 %v2046_v23, %v1958_v62  ;;  %v1960_v50 = vpop.f32.mrf.mxu1  ;;  %v2135_v34 = vpop.f32.mrf.mxu3 }
 0x1f5   : > { %v1961_v27 = vadd.f32 %v1960_v50, %v1871_v28 }
 0x1f6   : > { %v2136_v29 = vadd.f32 %v2135_v34, %v2047_v41  ;;  %7561 = vmatmul.msk.bf16.gmra.mxu0 %vm13279_vm8, %v13163_v5  ;;  %vm13294_vm8 = vnez %v13186_v58 }
 0x1f7   : > { %7609 = vmatmul.msk.bf16.gmra.mxu1 %vm13281_vm4, %v13163_v5  ;;  %vm13295_vm4 = vnez %v13188_v10 }
 0x1f8   : > { %v10212_v15 = vpack.c.bf16 %v2136_v29, %v2134_v49  ;;  %7657 = vmatmul.msk.bf16.gmra.mxu2 %vm13283_vm5, %v13163_v5  ;;  %vm13296_vm5 = vnez %v13190_v57 }
 0x1f9   : > { %7705 = vmatmul.msk.bf16.gmra.mxu3 %vm13285_vm12, %v13163_v5  ;;  %vm2406_vm12 = vcmask 1041408  }
 0x1fb   : > { %v2049_v53 = vpop.f32.mrf.mxu2  ;;  %v1873_v30 = vpop.f32.mrf.mxu0 }
 0x1fc   : > { %v2050_v44 = vadd.f32 %v2049_v53, %v1961_v27  ;;  %v1962_v4 = vpop.f32.mrf.mxu1  ;;  %v2138_v54 = vpop.f32.mrf.mxu3 }
 0x1fd   : > { %v1963_v19 = vadd.f32 %v1962_v4, %v1873_v30  ;;  %v2272_v30 = vld [vmem:[%s12911_s3] sm:$0x3] }
 0x1fe   : > { %v2139_v37 = vadd.f32 %v2138_v54, %v2050_v44  ;;  %v2408_v58 = vsel %vm2406_vm12, %v2272_v30, 0  ;;  %vm6987_vm12 = vcmask 3072  }
 0x1ff   : > { %2417 = vmatpush.bf16.msra.mxu0 %v2408_v58 }
 0x203   : > { %v2051_v45 = vpop.f32.mrf.mxu2  ;;  %v1876_v21 = vpop.f32.mrf.mxu0 }
 0x204   : > { %v2052_v59 = vadd.f32 %v2051_v45, %v1963_v19  ;;  %v1965_v55 = vpop.f32.mrf.mxu1  ;;  %v2140_v56 = vpop.f32.mrf.mxu3 }
 0x205   : > { %v1966_v46 = vadd.f32 %v1965_v55, %v1876_v21 }
 0x206   : > { %v2141_v32 = vadd.f32 %v2140_v56, %v2052_v59  ;;  %7563 = vmatmul.msk.bf16.gmra.mxu0 %vm13287_vm14, %v13163_v5  ;;  %vm13297_vm14 = vnez %v13193_v3 }
 0x207   : > { %7611 = vmatmul.msk.bf16.gmra.mxu1 %vm13289_vm1, %v13163_v5  ;;  %vm13298_vm1 = vnez %v13195_v12 }
 0x208   : > { %v10226_v7 = vpack.c.bf16 %v2141_v32, %v2139_v37  ;;  %7659 = vmatmul.msk.bf16.gmra.mxu2 %vm13291_vm0, %v13163_v5  ;;  %vm13299_vm0 = vnez %v13197_v63 }
 0x209   : > { %7707 = vmatmul.msk.bf16.gmra.mxu3 %vm13293_vm15, %v13163_v5  ;;  %vm13300_vm15 = vnez %v13199_v22 }
 0x20b   : > { %v2054_v40 = vpop.f32.mrf.mxu2  ;;  %v1878_v62 = vpop.f32.mrf.mxu0 }
 0x20c   : > { %v2055_v49 = vadd.f32 %v2054_v40, %v1966_v46  ;;  %v1967_v23 = vpop.f32.mrf.mxu1  ;;  %v2143_v28 = vpop.f32.mrf.mxu3 }
 0x20d   : > { %v1968_v41 = vadd.f32 %v1967_v23, %v1878_v62 }
 0x20e   : > { %v2144_v50 = vadd.f32 %v2143_v28, %v2055_v49 }
 0x213   : > { %v2056_v34 = vpop.f32.mrf.mxu2  ;;  %v1881_v27 = vpop.f32.mrf.mxu0 }
 0x214   : > { %v2057_v29 = vadd.f32 %v2056_v34, %v1968_v41  ;;  %v1970_v61 = vpop.f32.mrf.mxu1  ;;  %v2145_v52 = vpop.f32.mrf.mxu3 }
 0x215   : > { %v1971_v1 = vadd.f32 %v1970_v61, %v1881_v27 }
 0x216   : > { %v2146_v36 = vadd.f32 %v2145_v52, %v2057_v29  ;;  %7565 = vmatmul.msk.bf16.gmra.mxu0 %vm13294_vm8, %v13163_v5  ;;  %vm13301_vm8 = vnez %v13202_v14 }
 0x217   : > { %7613 = vmatmul.msk.bf16.gmra.mxu1 %vm13295_vm4, %v13163_v5  ;;  %vm5776_vm4 = vcmask 261120  }
 0x218   : > { %v10240_v53 = vpack.c.bf16 %v2146_v36, %v2144_v50  ;;  %7661 = vmatmul.msk.bf16.gmra.mxu2 %vm13296_vm5, %v13163_v5  ;;  %vm6977_vm5 = vcmask 257024  }
 0x219   : > { %7709 = vmatmul.msk.bf16.gmra.mxu3 %vm13297_vm14, %v13163_v5 }
 0x21b   : > { %v2059_v44 = vpop.f32.mrf.mxu2  ;;  %v1883_v10 = vpop.f32.mrf.mxu0 }
 0x21c   : > { %v2060_v4 = vadd.f32 %v2059_v44, %v1971_v1  ;;  %v1972_v54 = vpop.f32.mrf.mxu1  ;;  %v2148_v19 = vpop.f32.mrf.mxu3 }
 0x21d   : > { %v1973_v37 = vadd.f32 %v1972_v54, %v1883_v10 }
 0x21e   : > { %v2149_v46 = vadd.f32 %v2148_v19, %v2060_v4 }
 0x223   : > { %v2061_v45 = vpop.f32.mrf.mxu2  ;;  %v1886_v57 = vpop.f32.mrf.mxu0 }
 0x224   : > { %v2062_v21 = vadd.f32 %v2061_v45, %v1973_v37  ;;  %v1975_v59 = vpop.f32.mrf.mxu1  ;;  %v2150_v55 = vpop.f32.mrf.mxu3  ;;  %v7991_v45 = vld [vmem:[%s10297_s22] sm:$0xff] }
 0x225   : > { %v1976_v56 = vadd.f32 %v1975_v59, %v1886_v57 }
 0x226   : > { %v2151_v32 = vadd.f32 %v2150_v55, %v2062_v21  ;;  %7567 = vmatmul.msk.bf16.gmra.mxu0 %vm13298_vm1, %v13163_v5 }
 0x227   : > { %7615 = vmatmul.msk.bf16.gmra.mxu1 %vm13299_vm0, %v13163_v5 }
 0x228   : > { %v10257_v3 = vpack.c.bf16 %v2151_v32, %v2149_v46  ;;  %7663 = vmatmul.msk.bf16.gmra.mxu2 %vm13300_vm15, %v13163_v5 }
 0x229   : > { %7711 = vmatmul.msk.bf16.gmra.mxu3 %vm13301_vm8, %v13163_v5 }
 0x22b   : > { %v2064_v6 = vpop.f32.mrf.mxu2  ;;  %v1888_v2 = vpop.f32.mrf.mxu0 }
 0x22c   : > { %v2065_v48 = vadd.f32 %v2064_v6, %v1976_v56  ;;  %v1977_v33 = vpop.f32.mrf.mxu1  ;;  %v2153_v12 = vpop.f32.mrf.mxu3 }
 0x22d   : > { %v1978_v40 = vadd.f32 %v1977_v33, %v1888_v2 }
 0x22e   : > { %v2154_v50 = vadd.f32 %v2153_v12, %v2065_v48 }
 0x233   : > { %v2066_v62 = vpop.f32.mrf.mxu2  ;;  %v1891_v49 = vpop.f32.mrf.mxu0 }
 0x234   : > { %v2067_v63 = vadd.f32 %v2066_v62, %v1978_v40  ;;  %v1980_v23 = vpop.f32.mrf.mxu1  ;;  %v2155_v28 = vpop.f32.mrf.mxu3  ;;  %v7992_v40 = vld [vmem:[%s10297_s22 + $0x8] sm:$0xff] }
 0x235   : > { %v1981_v41 = vadd.f32 %v1980_v23, %v1891_v49 }
 0x236   : > { %v2156_v34 = vadd.f32 %v2155_v28, %v2067_v63  ;;  %7569 = vmatmul.msk.bf16.gmra.mxu0 %vm13219_vm7, %v13163_v5  ;;  %vm3109_vm7 = vcmask 39936  }
 0x237   : > { %7617 = vmatmul.msk.bf16.gmra.mxu1 %vm10012_vm2, %v13163_v5  ;;  %vm2357_vm2 = vcmask 31744  }
 0x238   : > { %v10271_v22 = vpack.c.bf16 %v2156_v34, %v2154_v50  ;;  %7665 = vmatmul.msk.bf16.gmra.mxu2 %vm10028_vm9, %v13163_v5  ;;  %vm3218_vm9 = vcmask 1044480  }
 0x239   : > { %7713 = vmatmul.msk.bf16.gmra.mxu3 %vm10036_vm10, %v13163_v5  ;;  %vm3169_vm10 = vcmask 80896  }
 0x23b   : > { %v2069_v14 = vpop.f32.mrf.mxu2  ;;  %v1893_v27 = vpop.f32.mrf.mxu0 }
 0x23c   : > { %v2070_v29 = vadd.f32 %v2069_v14, %v1981_v41  ;;  %v1982_v61 = vpop.f32.mrf.mxu1  ;;  %v2158_v17 = vpop.f32.mrf.mxu3 }
 0x23d   : > { %v1983_v52 = vadd.f32 %v1982_v61, %v1893_v27 }
 0x23e   : > { %v2159_v10 = vadd.f32 %v2158_v17, %v2070_v29 }
 0x243   : > { %v2071_v1 = vpop.f32.mrf.mxu2  ;;  %v1896_v36 = vpop.f32.mrf.mxu0 }
 0x244   : > { %v2072_v8 = vadd.f32 %v2071_v1, %v1983_v52  ;;  %v1985_v30 = vpop.f32.mrf.mxu1  ;;  %v2160_v58 = vpop.f32.mrf.mxu3 }
 0x245   : > { %v1986_v44 = vadd.f32 %v1985_v30, %v1896_v36  ;;  %v7993_v36 = vld [vmem:[%s10297_s22 + $0x10] sm:$0xff] }
 0x246   : > { %v2161_v13 = vadd.f32 %v2160_v58, %v2072_v8  ;;  %7571 = vmatmul.msk.bf16.gmra.mxu0 %vm13222_vm13, %v13163_v5  ;;  %vm4043_vm13 = vcmask 1043456  }
 0x247   : > { %7619 = vmatmul.msk.bf16.gmra.mxu1 %vm13223_vm6, %v13163_v5  ;;  %vm3921_vm6 = vcmask 162816  }
 0x248   : > { %v10285_v16 = vpack.c.bf16 %v2161_v13, %v2159_v10  ;;  %7667 = vmatmul.msk.bf16.gmra.mxu2 %vm13224_vm3, %v13163_v5  ;;  %vm3994_vm3 = vcmask 326656  }
 0x249   : > { %7715 = vmatmul.msk.bf16.gmra.mxu3 %vm13225_vm11, %v13163_v5  ;;  %vm4838_vm11 = vcmask 654336  }
 0x24b   : > { %v2074_v4 = vpop.f32.mrf.mxu2  ;;  %v1898_v54 = vpop.f32.mrf.mxu0 }
 0x24c   : > { %v2075_v19 = vadd.f32 %v2074_v4, %v1986_v44  ;;  %v1987_v37 = vpop.f32.mrf.mxu1  ;;  %v2163_v60 = vpop.f32.mrf.mxu3 }
 0x24d   : > { %v1988_v11 = vadd.f32 %v1987_v37, %v1898_v54 }
 0x24e   : > { %v2164_v55 = vadd.f32 %v2163_v60, %v2075_v19 }
 0x253   : > { %v2076_v0 = vpop.f32.mrf.mxu2  ;;  %v1901_v57 = vpop.f32.mrf.mxu0 }
 0x254   : > { %v2077_v25 = vadd.f32 %v2076_v0, %v1988_v11  ;;  %v1990_v5 = vpop.f32.mrf.mxu1  ;;  %v2165_v21 = vpop.f32.mrf.mxu3 }
 0x255   : > { %v1991_v59 = vadd.f32 %v1990_v5, %v1901_v57 }
 0x256   : > { %v2166_v56 = vadd.f32 %v2165_v21, %v2077_v25  ;;  %7780 = vmatmul.msk.bf16.vlgmr.msra.gmra.mxu0 %vm2357_vm2, %v7991_v45  ;;  %v7994_v25 = vld [vmem:[%s10297_s22 + $0x18] sm:$0xff] }
 0x258   : > { %v10301_v46 = vpack.c.bf16 %v2166_v56, %v2164_v55 }
 0x25b   : > { %v2079_v32 = vpop.f32.mrf.mxu2  ;;  %v1903_v6 = vpop.f32.mrf.mxu0 }
 0x25c   : > { %v2080_v2 = vadd.f32 %v2079_v32, %v1991_v59  ;;  %v1992_v48 = vpop.f32.mrf.mxu1  ;;  %v2168_v33 = vpop.f32.mrf.mxu3 }
 0x25d   : > { %v1993_v12 = vadd.f32 %v1992_v48, %v1903_v6 }
 0x25e   : > { %v2169_v50 = vadd.f32 %v2168_v33, %v2080_v2 }
 0x263   : > { %v2081_v62 = vpop.f32.mrf.mxu2  ;;  %v1906_v49 = vpop.f32.mrf.mxu0 }
 0x264   : > { %v2082_v63 = vadd.f32 %v2081_v62, %v1993_v12  ;;  %v1995_v23 = vpop.f32.mrf.mxu1  ;;  %v2170_v28 = vpop.f32.mrf.mxu3 }
 0x265   : > { %v1996_v41 = vadd.f32 %v1995_v23, %v1906_v49  ;;  %v7995_v23 = vld [vmem:[%s10297_s22 + $0x20] sm:$0xff] }
 0x266   : > { %v2171_v34 = vadd.f32 %v2170_v28, %v2082_v63  ;;  %7781 = vmatmul.msk.bf16.gmra.mxu0 %vm2357_vm2, %v7992_v40 }
 0x268   : > { %v10305_v14 = vpack.c.bf16 %v2171_v34, %v2169_v50 }
 0x26b   : > { %v2084_v27 = vpop.f32.mrf.mxu2  ;;  %v1908_v29 = vpop.f32.mrf.mxu0 }
 0x26c   : > { %v2085_v61 = vadd.f32 %v2084_v27, %v1996_v41  ;;  %v1997_v17 = vpop.f32.mrf.mxu1  ;;  %v2173_v52 = vpop.f32.mrf.mxu3 }
 0x26d   : > { %v1998_v1 = vadd.f32 %v1997_v17, %v1908_v29 }
 0x26e   : > { %v2174_v4 = vadd.f32 %v2173_v52, %v2085_v61 }
 0x273   : > { %v2086_v8 = vpop.f32.mrf.mxu2  ;;  %v1911_v30 = vpop.f32.mrf.mxu0 }
 0x274   : > { %v2087_v58 = vadd.f32 %v2086_v8, %v1998_v1  ;;  %v2000_v44 = vpop.f32.mrf.mxu1  ;;  %v2175_v10 = vpop.f32.mrf.mxu3 }
 0x275   : > { %v2001_v13 = vadd.f32 %v2000_v44, %v1911_v30 }
 0x276   : > { %v2176_v54 = vadd.f32 %v2175_v10, %v2087_v58  ;;  %7782 = vmatmul.msk.bf16.gmra.mxu0 %vm2357_vm2, %v7993_v36  ;;  %v7996_v10 = vld [vmem:[%s10297_s22 + $0x28] sm:$0xff] }
 0x278   : > { %v10309_v19 = vpack.c.bf16 %v2176_v54, %v2174_v4 }
 0x27a   : > { %13303 = vst [vmem:[#allocation3_spill] sm:$0xff] %v10309_v19 }
 0x27b   : > { %v2089_v37 = vpop.f32.mrf.mxu2  ;;  %v1913_v60 = vpop.f32.mrf.mxu0 }
 0x27c   : > { %v2090_v11 = vadd.f32 %v2089_v37, %v2001_v13  ;;  %v2002_v45 = vpop.f32.mrf.mxu1  ;;  %v2178_v0 = vpop.f32.mrf.mxu3 }
 0x27d   : > { %v2003_v57 = vadd.f32 %v2002_v45, %v1913_v60 }
 0x27e   : > { %v2179_v6 = vadd.f32 %v2178_v0, %v2090_v11 }
 0x283   : > { %v2091_v5 = vpop.f32.mrf.mxu2  ;;  %v1916_v21 = vpop.f32.mrf.mxu0 }
 0x284   : > { %v2092_v59 = vadd.f32 %v2091_v5, %v2003_v57  ;;  %v2005_v55 = vpop.f32.mrf.mxu1  ;;  %v2180_v56 = vpop.f32.mrf.mxu3 }
 0x285   : > { %v2006_v32 = vadd.f32 %v2005_v55, %v1916_v21 }
 0x286   : > { %v2181_v2 = vadd.f32 %v2180_v56, %v2092_v59  ;;  %7783 = vmatmul.msk.bf16.gmra.mxu0 %vm2357_vm2, %v7994_v25 }
 0x288   : > { %v10313_v48 = vpack.c.bf16 %v2181_v2, %v2179_v6 }
 0x28a   : > { %13304 = vst [vmem:[#allocation4_spill] sm:$0xff] %v10313_v48 }
 0x28b   : > { %v2094_v33 = vpop.f32.mrf.mxu2  ;;  %v1918_v12 = vpop.f32.mrf.mxu0 }
 0x28c   : > { %v2095_v40 = vadd.f32 %v2094_v33, %v2006_v32  ;;  %v2007_v62 = vpop.f32.mrf.mxu1  ;;  %v2183_v49 = vpop.f32.mrf.mxu3  ;;  %v7997_v32 = vld [vmem:[%s10297_s22 + $0x30] sm:$0xff] }
 0x28d   : > { %v2008_v63 = vadd.f32 %v2007_v62, %v1918_v12 }
 0x28e   : > { %v2184_v61 = vadd.f32 %v2183_v49, %v2095_v40 }
 0x293   : > { %v2096_v28 = vpop.f32.mrf.mxu2  ;;  %v1921_v41 = vpop.f32.mrf.mxu0 }
 0x294   : > { %v2097_v50 = vadd.f32 %v2096_v28, %v2008_v63  ;;  %v2010_v34 = vpop.f32.mrf.mxu1  ;;  %v2185_v27 = vpop.f32.mrf.mxu3 }
 0x295   : > { %v2011_v29 = vadd.f32 %v2010_v34, %v1921_v41 }
 0x296   : > { %v2186_v17 = vadd.f32 %v2185_v27, %v2097_v50  ;;  %7784 = vmatmul.msk.bf16.gmra.mxu0 %vm2357_vm2, %v7995_v23 }
 0x298   : > { %v10317_v52 = vpack.c.bf16 %v2186_v17, %v2184_v61  ;;  %v7998_v61 = vld [vmem:[%s10297_s22 + $0x38] sm:$0xff] }
 0x29a   : > { %13305 = vst [vmem:[#allocation5_spill] sm:$0xff] %v10317_v52 }
 0x29b   : > { %v2099_v1 = vpop.f32.mrf.mxu2  ;;  %v1923_v36 = vpop.f32.mrf.mxu0 }
 0x29c   : > { %v2100_v8 = vadd.f32 %v2099_v1, %v2011_v29  ;;  %v2012_v30 = vpop.f32.mrf.mxu1  ;;  %v2188_v58 = vpop.f32.mrf.mxu3 }
 0x29d   : > { %v2013_v44 = vadd.f32 %v2012_v30, %v1923_v36 }
 0x29e   : > { %v2189_v45 = vadd.f32 %v2188_v58, %v2100_v8 }
 0x2a3   : > { %v2101_v13 = vpop.f32.mrf.mxu2  ;;  %v1926_v4 = vpop.f32.mrf.mxu0 }
 0x2a4   : > { %v2102_v54 = vadd.f32 %v2101_v13, %v2013_v44  ;;  %v2015_v37 = vpop.f32.mrf.mxu1  ;;  %v2190_v60 = vpop.f32.mrf.mxu3 }
 0x2a5   : > { %v2016_v11 = vadd.f32 %v2015_v37, %v1926_v4 }
 0x2a6   : > { %v2191_v0 = vadd.f32 %v2190_v60, %v2102_v54  ;;  %7785 = vmatmul.msk.bf16.gmra.mxu0 %vm2357_vm2, %v7996_v10 }
 0x2a8   : > { %v10321_v57 = vpack.c.bf16 %v2191_v0, %v2189_v45  ;;  %v10334_v45 = vld [vmem:[%s12912_s4] ss:$0 sm:$0xff] }
 0x2aa   : > { %13306 = vst [vmem:[#allocation6_spill] sm:$0xff] %v10321_v57 }
 0x2ab   : > { %v2104_v25 = vpop.f32.mrf.mxu2  ;;  %v1928_v5 = vpop.f32.mrf.mxu0 }
 0x2ac   : > { %v2105_v21 = vadd.f32 %v2104_v25, %v2016_v11  ;;  %v2017_v59 = vpop.f32.mrf.mxu1  ;;  %v2193_v55 = vpop.f32.mrf.mxu3  ;;  %v7999_v25 = vld [vmem:[%s10297_s22 + $0x40] sm:$0xff] }
 0x2ad   : > { %v2018_v56 = vadd.f32 %v2017_v59, %v1928_v5 }
 0x2ae   : > { %v2194_v49 = vadd.f32 %v2193_v55, %v2105_v21 }
 0x2b3   : > { %v2106_v6 = vpop.f32.mrf.mxu2  ;;  %v1931_v2 = vpop.f32.mrf.mxu0 }
 0x2b4   : > { %v2107_v33 = vadd.f32 %v2106_v6, %v2018_v56  ;;  %v2020_v12 = vpop.f32.mrf.mxu1  ;;  %v2195_v40 = vpop.f32.mrf.mxu3 }
 0x2b5   : > { %v2021_v62 = vadd.f32 %v2020_v12, %v1931_v2 }
 0x2b6   : > { %v2196_v63 = vadd.f32 %v2195_v40, %v2107_v33  ;;  %7786 = vmatmul.msk.bf16.gmra.mxu0 %vm2357_vm2, %v7997_v32 }
 0x2b8   : > { %v10325_v23 = vpack.c.bf16 %v2196_v63, %v2194_v49 }
 0x2ba   : > { %13307 = vst [vmem:[#allocation7_spill] sm:$0xff] %v10325_v23 }
 0x2bb   : > { %v2109_v28 = vpop.f32.mrf.mxu2  ;;  %v1933_v41 = vpop.f32.mrf.mxu0 }
 0x2bc   : > { %v2110_v50 = vadd.f32 %v2109_v28, %v2021_v62  ;;  %v2022_v34 = vpop.f32.mrf.mxu1  ;;  %v2198_v27 = vpop.f32.mrf.mxu3 }
 0x2bd   : > { %v2023_v29 = vadd.f32 %v2022_v34, %v1933_v41  ;;  %v8000_v34 = vld [vmem:[%s10297_s22 + $0x48] sm:$0xff] }
 0x2be   : > { %v2199_v44 = vadd.f32 %v2198_v27, %v2110_v50 }
 0x2c3   : > { %v2111_v17 = vpop.f32.mrf.mxu2  ;;  %v1936_v1 = vpop.f32.mrf.mxu0 }
 0x2c4   : > { %v2112_v36 = vadd.f32 %v2111_v17, %v2023_v29  ;;  %v2025_v8 = vpop.f32.mrf.mxu1  ;;  %v2200_v30 = vpop.f32.mrf.mxu3 }
 0x2c5   : > { %v2026_v58 = vadd.f32 %v2025_v8, %v1936_v1 }
 0x2c6   : > { %v2201_v10 = vadd.f32 %v2200_v30, %v2112_v36  ;;  %7787 = vmatmul.msk.bf16.gmra.mxu0 %vm2357_vm2, %v7998_v61 }
 0x2c8   : > { %v10329_v13 = vpack.c.bf16 %v2201_v10, %v2199_v44 }
 0x2ca   : > { %13308 = vst [vmem:[#allocation8_spill] sm:$0xff] %v10329_v13 }
 0x2cb   : > { %v2114_v4 = vpop.f32.mrf.mxu2  ;;  %v1938_v54 = vpop.f32.mrf.mxu0 }
 0x2cc   : > { %v2115_v37 = vadd.f32 %v2114_v4, %v2026_v58  ;;  %v2203_v60 = vpop.f32.mrf.mxu3  ;;  %v2027_v11 = vpop.f32.mrf.mxu1 }
 0x2cd   : > { %v2028_v0 = vadd.f32 %v2027_v11, %v1938_v54 }
 0x2ce   : > { %v2204_v32 = vadd.f32 %v2203_v60, %v2115_v37 }
 0x2d3   : > { %v2116_v5 = vpop.f32.mrf.mxu2  ;;  %v2419_v21 = vpop.f32.mrf.mxu0 }
 0x2d4   : > { %v2117_v59 = vadd.f32 %v2116_v5, %v2028_v0  ;;  %v2205_v55 = vpop.f32.mrf.mxu3  ;;  %v2420_v56 = vadd.f32 %v10334_v45, %v2419_v21 }
 0x2d6   : > { %v2206_v6 = vadd.f32 %v2205_v55, %v2117_v59  ;;  %v2531_v2 = vmul.f32 0.044715, %v2420_v56  ;;  %7788 = vmatmul.msk.bf16.gmra.mxu0 %vm2357_vm2, %v7999_v25  ;;  %v2499_v11 = vmul.f32 0.5, %v2420_v56 }
 0x2d8   : > { %v10339_v33 = vpack.c.bf16 %v2206_v6, %v2204_v32  ;;  %v2563_v12 = vmul.f32 %v2531_v2, %v2420_v56  ;;  %v8001_v32 = vld [vmem:[%s10297_s22 + $0x50] sm:$0xff] }
 0x2da   : > { %13309 = vst [vmem:[#allocation9_spill] sm:$0xff] %v10339_v33  ;;  %v2595_v40 = vmul.f32 %v2563_v12, %v2420_v56 }
 0x2db   : > { %v2421_v62 = vpop.f32.mrf.mxu0 }
 0x2dc   : > { %v2422_v49 = vadd.f32 %v10334_v45, %v2421_v62  ;;  %v2627_v63 = vadd.f32 %v2595_v40, %v2420_v56 }
 0x2de   : > { %v2532_v28 = vmul.f32 0.044715, %v2422_v49  ;;  %v2659_v50 = vmul.f32 0.7978846, %v2627_v63  ;;  %v2500_v0 = vmul.f32 0.5, %v2422_v49 }
 0x2e0   : > { %v2564_v41 = vmul.f32 %v2532_v28, %v2422_v49  ;;  %8373 = vtanh.f32 %v2659_v50 }
 0x2e2   : > { %v2596_v27 = vmul.f32 %v2564_v41, %v2422_v49 }
 0x2e3   : > { %v2424_v29 = vpop.f32.mrf.mxu0 }
 0x2e4   : > { %v2425_v61 = vadd.f32 %v10334_v45, %v2424_v29  ;;  %v2628_v17 = vadd.f32 %v2596_v27, %v2422_v49 }
 0x2e6   : > { %v2533_v1 = vmul.f32 0.044715, %v2425_v61  ;;  %7789 = vmatmul.msk.bf16.gmra.mxu0 %vm2357_vm2, %v8000_v34  ;;  %v2660_v36 = vmul.f32 0.7978846, %v2628_v17  ;;  %v8374_v30 = vpop.eup %8373 }
 0x2e7   : > { %v2723_v54 = vadd.f32 1.0, %v8374_v30 }
 0x2e8   : > { %v2565_v8 = vmul.f32 %v2533_v1, %v2425_v61  ;;  %8375 = vtanh.f32 %v2660_v36 }
 0x2e9   : > { %v10346_v59 = vmul.f32 %v2723_v54, %v2499_v11 }
 0x2ea   : > { %v2597_v58 = vmul.f32 %v2565_v8, %v2425_v61  ;;  %v2501_v8 = vmul.f32 0.5, %v2425_v61 }
 0x2eb   : > { %v2426_v44 = vpop.f32.mrf.mxu0 }
 0x2ec   : > { %v2427_v10 = vadd.f32 %v10334_v45, %v2426_v44  ;;  %v2629_v4 = vadd.f32 %v2597_v58, %v2425_v61 }
 0x2ee   : > { %v8376_v37 = vpop.eup %8375  ;;  %v2534_v60 = vmul.f32 0.044715, %v2427_v10  ;;  %v2661_v21 = vmul.f32 0.7978846, %v2629_v4  ;;  %v2502_v30 = vmul.f32 0.5, %v2427_v10 }
 0x2ef   : > { %v2724_v25 = vadd.f32 1.0, %v8376_v37 }
 0x2f0   : > { %v2566_v5 = vmul.f32 %v2534_v60, %v2427_v10  ;;  %8377 = vtanh.f32 %v2661_v21  ;;  %v8002_v60 = vld [vmem:[%s10297_s22 + $0x58] sm:$0xff] }
 0x2f1   : > { %v10348_v55 = vmul.f32 %v2724_v25, %v2500_v0 }
 0x2f2   : > { %v2598_v6 = vmul.f32 %v2566_v5, %v2427_v10 }
 0x2f3   : > { %v2429_v2 = vpop.f32.mrf.mxu0  ;;  %v8048_v12 = vpack.i.bf16 %v10348_v55, %v10346_v59 }
 0x2f4   : > { %v2430_v62 = vadd.f32 %v10334_v45, %v2429_v2  ;;  %v2630_v56 = vadd.f32 %v2598_v6, %v2427_v10 }
 0x2f5   : > { %8049 = vrot.lane.b32.xlu0 %v8048_v12, %s8767_s26 }
 0x2f6   : > { %v2535_v49 = vmul.f32 0.044715, %v2430_v62  ;;  %7790 = vmatmul.msk.bf16.gmra.mxu0 %vm2357_vm2, %v8001_v32  ;;  %v2662_v63 = vmul.f32 0.7978846, %v2630_v56  ;;  %v8378_v41 = vpop.eup %8377 }
 0x2f7   : > { %v2725_v17 = vadd.f32 1.0, %v8378_v41 }
 0x2f8   : > { %8379 = vtanh.f32 %v2662_v63  ;;  %v2567_v28 = vmul.f32 %v2535_v49, %v2430_v62 }
 0x2f9   : > { %v10359_v54 = vmul.f32 %v2725_v17, %v2501_v8 }
 0x2fa   : > { %v2599_v50 = vmul.f32 %v2567_v28, %v2430_v62 }
 0x2fb   : > { %v2431_v34 = vpop.f32.mrf.mxu0 }
 0x2fc   : > { %v2432_v27 = vadd.f32 %v10334_v45, %v2431_v34  ;;  %v2631_v29 = vadd.f32 %v2599_v50, %v2430_v62  ;;  %v2503_v34 = vmul.f32 0.5, %v2430_v62 }
 0x2fe   : > { %v8380_v1 = vpop.eup %8379  ;;  %v2536_v36 = vmul.f32 0.044715, %v2432_v27  ;;  %v2663_v4 = vmul.f32 0.7978846, %v2631_v29  ;;  %v2504_v29 = vmul.f32 0.5, %v2432_v27 }
 0x2ff   : > { %v2726_v58 = vadd.f32 1.0, %v8380_v1 }
 0x300   : > { %v2568_v44 = vmul.f32 %v2536_v36, %v2432_v27  ;;  %8381 = vtanh.f32 %v2663_v4 }
 0x301   : > { %v10361_v37 = vmul.f32 %v2726_v58, %v2502_v30  ;;  %v8003_v58 = vld [vmem:[%s10297_s22 + $0x60] sm:$0xff] }
 0x302   : > { %v2600_v11 = vmul.f32 %v2568_v44, %v2432_v27 }
 0x303   : > { %v2434_v0 = vpop.f32.mrf.mxu0  ;;  %v8053_v25 = vpack.i.bf16 %v10361_v37, %v10359_v54 }
 0x304   : > { %v2435_v21 = vadd.f32 %v10334_v45, %v2434_v0  ;;  %v2632_v61 = vadd.f32 %v2600_v11, %v2432_v27 }
 0x305   : > { %8054 = vrot.lane.b32.xlu0 %v8053_v25, %s8767_s26 }
 0x306   : > { %v2537_v10 = vmul.f32 0.044715, %v2435_v21  ;;  %7791 = vmatmul.msk.bf16.gmra.mxu0 %vm2357_vm2, %v8002_v60  ;;  %v2664_v32 = vmul.f32 0.7978846, %v2632_v61  ;;  %v8382_v2 = vpop.eup %8381 }
 0x307   : > { %v2727_v28 = vadd.f32 1.0, %v8382_v2 }
 0x308   : > { %v2569_v6 = vmul.f32 %v2537_v10, %v2435_v21  ;;  %8383 = vtanh.f32 %v2664_v32 }
 0x309   : > { %v10372_v8 = vmul.f32 %v2727_v28, %v2503_v34 }
 0x30a   : > { %v2601_v12 = vmul.f32 %v2569_v6, %v2435_v21 }
 0x30b   : > { %v2436_v56 = vpop.f32.mrf.mxu0 }
 0x30c   : > { %v2437_v49 = vadd.f32 %v10334_v45, %v2436_v56  ;;  %v2633_v63 = vadd.f32 %v2601_v12, %v2435_v21 }
 0x30e   : > { %v8384_v41 = vpop.eup %8383  ;;  %v2538_v50 = vmul.f32 0.044715, %v2437_v49  ;;  %v2665_v36 = vmul.f32 0.7978846, %v2633_v63 }
 0x30f   : > { %v2728_v17 = vadd.f32 1.0, %v8384_v41  ;;  %v2505_v41 = vmul.f32 0.5, %v2435_v21 }
 0x310   : > { %v2570_v1 = vmul.f32 %v2538_v50, %v2437_v49  ;;  %8385 = vtanh.f32 %v2665_v36  ;;  %v2506_v50 = vmul.f32 0.5, %v2437_v49 }
 0x311   : > { %v10374_v30 = vmul.f32 %v2728_v17, %v2504_v29 }
 0x312   : > { %v2602_v44 = vmul.f32 %v2570_v1, %v2437_v49 }
 0x313   : > { %v2439_v4 = vpop.f32.mrf.mxu0  ;;  %v8058_v60 = vpack.i.bf16 %v10374_v30, %v10372_v8 }
 0x314   : > { %v2440_v0 = vadd.f32 %v10334_v45, %v2439_v4  ;;  %v2634_v62 = vadd.f32 %v2602_v44, %v2437_v49 }
 0x315   : > { %8059 = vrot.lane.b32.xlu1 %v8058_v60, %s8767_s26 }
 0x316   : > { %v2539_v27 = vmul.f32 0.044715, %v2440_v0  ;;  %7792 = vmatmul.msk.bf16.gmra.mxu0 %vm2357_vm2, %v8003_v58  ;;  %v2666_v25 = vmul.f32 0.7978846, %v2634_v62  ;;  %v8386_v10 = vpop.eup %8385  ;;  %v8004_v58 = vld [vmem:[%s10297_s22 + $0x68] sm:$0xff] }
 0x317   : > { %v2729_v56 = vadd.f32 1.0, %v8386_v10 }
 0x318   : > { %8387 = vtanh.f32 %v2666_v25  ;;  %v2571_v61 = vmul.f32 %v2539_v27, %v2440_v0 }
 0x319   : > { %v10385_v1 = vmul.f32 %v2729_v56, %v2505_v41 }
 0x31a   : > { %v2603_v32 = vmul.f32 %v2571_v61, %v2440_v0 }
 0x31b   : > { %v2441_v6 = vpop.f32.mrf.mxu0 }
 0x31c   : > { %v2442_v2 = vadd.f32 %v10334_v45, %v2441_v6  ;;  %v2635_v12 = vadd.f32 %v2603_v32, %v2440_v0 }
 0x31e   : > { %v8388_v63 = vpop.eup %8387  ;;  %v2540_v28 = vmul.f32 0.044715, %v2442_v2  ;;  %v2667_v17 = vmul.f32 0.7978846, %v2635_v12 }
 0x31f   : > { %v2730_v34 = vadd.f32 1.0, %v8388_v63 }
 0x320   : > { %v2572_v29 = vmul.f32 %v2540_v28, %v2442_v2  ;;  %8389 = vtanh.f32 %v2667_v17 }
 0x321   : > { %v10387_v36 = vmul.f32 %v2730_v34, %v2506_v50  ;;  %v2507_v50 = vmul.f32 0.5, %v2440_v0  ;;  %v2508_v34 = vmul.f32 0.5, %v2442_v2 }
 0x322   : > { %v2604_v44 = vmul.f32 %v2572_v29, %v2442_v2 }
 0x323   : > { %v2444_v4 = vpop.f32.mrf.mxu0  ;;  %v8063_v60 = vpack.i.bf16 %v10387_v36, %v10385_v1 }
 0x324   : > { %v2445_v27 = vadd.f32 %v10334_v45, %v2444_v4  ;;  %v2636_v21 = vadd.f32 %v2604_v44, %v2442_v2 }
 0x325   : > { %8064 = vrot.lane.b32.xlu1 %v8063_v60, %s8767_s26  ;;  %v8005_v60 = vld [vmem:[%s10297_s22 + $0x70] sm:$0xff] }
 0x326   : > { %v2541_v49 = vmul.f32 0.044715, %v2445_v27  ;;  %7793 = vmatmul.msk.bf16.gmra.mxu0 %vm2357_vm2, %v8004_v58  ;;  %v2668_v25 = vmul.f32 0.7978846, %v2636_v21  ;;  %v8390_v10 = vpop.eup %8389 }
 0x327   : > { %v2731_v63 = vadd.f32 1.0, %v8390_v10 }
 0x328   : > { %v2573_v61 = vmul.f32 %v2541_v49, %v2445_v27  ;;  %8391 = vtanh.f32 %v2668_v25 }
 0x329   : > { %v10398_v4 = vmul.f32 %v2731_v63, %v2507_v50 }
 0x32a   : > { %v2605_v32 = vmul.f32 %v2573_v61, %v2445_v27 }
 0x32b   : > { %v2446_v6 = vpop.f32.mrf.mxu0 }
 0x32c   : > { %v2447_v12 = vadd.f32 %v10334_v45, %v2446_v6  ;;  %v2637_v56 = vadd.f32 %v2605_v32, %v2445_v27 }
 0x32e   : > { %v8392_v28 = vpop.eup %8391  ;;  %v2542_v41 = vmul.f32 0.044715, %v2447_v12  ;;  %v2669_v44 = vmul.f32 0.7978846, %v2637_v56 }
 0x32f   : > { %v2732_v29 = vadd.f32 1.0, %v8392_v28 }
 0x330   : > { %v2574_v17 = vmul.f32 %v2542_v41, %v2447_v12  ;;  %8393 = vtanh.f32 %v2669_v44  ;;  %v2510_v44 = vmul.f32 0.5, %v2447_v12 }
 0x331   : > { %v10400_v58 = vmul.f32 %v2732_v29, %v2508_v34 }
 0x332   : > { %v2606_v21 = vmul.f32 %v2574_v17, %v2447_v12  ;;  %v2509_v17 = vmul.f32 0.5, %v2445_v27 }
 0x333   : > { %v2449_v49 = vpop.f32.mrf.mxu0  ;;  %v8068_v25 = vpack.i.bf16 %v10400_v58, %v10398_v4 }
 0x334   : > { %v2450_v61 = vadd.f32 %v10334_v45, %v2449_v49  ;;  %v2638_v10 = vadd.f32 %v2606_v21, %v2447_v12 }
 0x335   : > { %8069 = vrot.lane.b32.xlu2 %v8068_v25, %s8767_s26 }
 0x336   : > { %v2543_v0 = vmul.f32 0.044715, %v2450_v61  ;;  %7794 = vmatmul.msk.bf16.gmra.mxu0 %vm2357_vm2, %v8005_v60  ;;  %v2670_v2 = vmul.f32 0.7978846, %v2638_v10  ;;  %v8394_v6 = vpop.eup %8393  ;;  %v8006_v10 = vld [vmem:[%s10297_s22 + $0x78] sm:$0xff] }
 0x337   : > { %v2733_v50 = vadd.f32 1.0, %v8394_v6 }
 0x338   : > { %v2575_v32 = vmul.f32 %v2543_v0, %v2450_v61  ;;  %8395 = vtanh.f32 %v2670_v2 }
 0x339   : > { %v10409_v40 = vmul.f32 %v2733_v50, %v2509_v17 }
 0x33a   : > { %v2607_v56 = vmul.f32 %v2575_v32, %v2450_v61 }
 0x33b   : > { %v2451_v63 = vpop.f32.mrf.mxu0 }
 0x33c   : > { %v2452_v28 = vadd.f32 %v10334_v45, %v2451_v63  ;;  %v2639_v41 = vadd.f32 %v2607_v56, %v2450_v61 }
 0x33e   : > { %v8396_v34 = vpop.eup %8395  ;;  %v2544_v29 = vmul.f32 0.044715, %v2452_v28  ;;  %v2671_v25 = vmul.f32 0.7978846, %v2639_v41 }
 0x33f   : > { %v2734_v21 = vadd.f32 1.0, %v8396_v34 }
 0x340   : > { %v2576_v49 = vmul.f32 %v2544_v29, %v2452_v28  ;;  %8397 = vtanh.f32 %v2671_v25 }
 0x341   : > { %v10411_v60 = vmul.f32 %v2734_v21, %v2510_v44 }
 0x342   : > { %v2608_v0 = vmul.f32 %v2576_v49, %v2452_v28 }
 0x343   : > { %v2454_v2 = vpop.f32.mrf.mxu0  ;;  %v8073_v32 = vpack.i.bf16 %v10411_v60, %v10409_v40 }
 0x344   : > { %v2455_v56 = vadd.f32 %v10334_v45, %v2454_v2  ;;  %v2640_v6 = vadd.f32 %v2608_v0, %v2452_v28  ;;  %v2511_v2 = vmul.f32 0.5, %v2450_v61  ;;  %v2512_v0 = vmul.f32 0.5, %v2452_v28 }
 0x345   : > { %8074 = vrot.lane.b32.xlu2 %v8073_v32, %s8767_s26 }
 0x346   : > { %v2545_v27 = vmul.f32 0.044715, %v2455_v56  ;;  %7795 = vmatmul.msk.bf16.gmra.mxu0 %vm2357_vm2, %v8006_v10  ;;  %v2672_v12 = vmul.f32 0.7978846, %v2640_v6  ;;  %v8398_v41 = vpop.eup %8397 }
 0x347   : > { %v2735_v44 = vadd.f32 1.0, %v8398_v41 }
 0x348   : > { %v2577_v63 = vmul.f32 %v2545_v27, %v2455_v56  ;;  %8399 = vtanh.f32 %v2672_v12 }
 0x349   : > { %v2767_v11 = vmul.f32 %v2735_v44, %v2511_v2 }
 0x34a   : > { %v2609_v50 = vmul.f32 %v2577_v63, %v2455_v56 }
 0x34b   : > { %v2456_v34 = vpop.f32.mrf.mxu0 }
 0x34c   : > { %v2641_v29 = vadd.f32 %v2609_v50, %v2455_v56  ;;  %v2457_v17 = vadd.f32 %v10334_v45, %v2456_v34 }
 0x34e   : > { %v8400_v21 = vpop.eup %8399  ;;  %v2546_v49 = vmul.f32 0.044715, %v2457_v17  ;;  %v2673_v5 = vmul.f32 0.7978846, %v2641_v29 }
 0x34f   : > { %v2736_v25 = vadd.f32 1.0, %v8400_v21 }
 0x350   : > { %v2578_v32 = vmul.f32 %v2546_v49, %v2457_v17  ;;  %8401 = vtanh.f32 %v2673_v5 }
 0x351   : > { %v2768_v62 = vmul.f32 %v2736_v25, %v2512_v0  ;;  %v2513_v25 = vmul.f32 0.5, %v2455_v56 }
 0x352   : > { %v2610_v10 = vmul.f32 %v2578_v32, %v2457_v17  ;;  %v2514_v32 = vmul.f32 0.5, %v2457_v17 }
 0x353   : > { %v2459_v6 = vpop.f32.mrf.mxu0  ;;  %v8078_v27 = vpack.i.bf16 %v2768_v62, %v2767_v11  ;;  %v2793_v56 = vpack.c.bf16 %v2768_v62, %v2767_v11 }
 0x354   : > { %v2460_v12 = vadd.f32 %v10334_v45, %v2459_v6  ;;  %v2642_v63 = vadd.f32 %v2610_v10, %v2457_v17 }
 0x355   : > { %8079 = vrot.lane.b32.xlu0 %v8078_v27, %s8767_s26 }
 0x356   : > { %v2547_v50 = vmul.f32 0.044715, %v2460_v12  ;;  %v2674_v41 = vmul.f32 0.7978846, %v2642_v63  ;;  %v8402_v61 = vpop.eup %8401  ;;  %v2515_v11 = vmul.f32 0.5, %v2460_v12 }
 0x357   : > { %v2737_v49 = vadd.f32 1.0, %v8402_v61 }
 0x358   : > { %v2579_v34 = vmul.f32 %v2547_v50, %v2460_v12  ;;  %8403 = vtanh.f32 %v2674_v41 }
 0x359   : > { %v2769_v33 = vmul.f32 %v2737_v49, %v2513_v25 }
 0x35a   : > { %v2611_v28 = vmul.f32 %v2579_v34, %v2460_v12 }
 0x35b   : > { %v2461_v21 = vpop.f32.mrf.mxu0 }
 0x35c   : > { %v2462_v29 = vadd.f32 %v10334_v45, %v2461_v21  ;;  %v2643_v44 = vadd.f32 %v2611_v28, %v2460_v12  ;;  %v13310_v12 = vpack.c.bf16 %v10387_v36, %v10385_v1 }
 0x35e   : > { %v8404_v2 = vpop.eup %8403  ;;  %v2548_v0 = vmul.f32 0.044715, %v2462_v29  ;;  %v2675_v5 = vmul.f32 0.7978846, %v2643_v44  ;;  %v2516_v62 = vmul.f32 0.5, %v2462_v29 }
 0x35f   : > { %v2738_v6 = vadd.f32 1.0, %v8404_v2  ;;  %v2792_v2 = vpack.c.bf16 %v10411_v60, %v10409_v40 }
 0x360   : > { %v2580_v10 = vmul.f32 %v2548_v0, %v2462_v29  ;;  %8405 = vtanh.f32 %v2675_v5 }
 0x361   : > { %v2770_v27 = vmul.f32 %v2738_v6, %v2514_v32 }
 0x362   : > { %v2612_v13 = vmul.f32 %v2580_v10, %v2462_v29 }
 0x363   : > { %v2464_v63 = vpop.f32.mrf.mxu0  ;;  %v2794_v50 = vpack.c.bf16 %v2770_v27, %v2769_v33  ;;  %v8083_v41 = vpack.i.bf16 %v2770_v27, %v2769_v33 }
 0x364   : > { %v2465_v34 = vadd.f32 %v10334_v45, %v2464_v63  ;;  %v2644_v23 = vadd.f32 %v2612_v13, %v2462_v29 }
 0x365   : > { %2803 = vmatpush.bf16.msra.mxu1 %v2794_v50  ;;  %8084 = vrot.lane.b32.xlu1 %v8083_v41, %s8767_s26 }
 0x366   : > { %v2549_v61 = vmul.f32 0.044715, %v2465_v34  ;;  %v2676_v28 = vmul.f32 0.7978846, %v2644_v23  ;;  %v8406_v21 = vpop.eup %8405  ;;  %v2791_v23 = vpack.c.bf16 %v10400_v58, %v10398_v4 }
 0x367   : > { %v2739_v13 = vadd.f32 1.0, %v8406_v21 }
 0x368   : > { %v2581_v17 = vmul.f32 %v2549_v61, %v2465_v34  ;;  %8407 = vtanh.f32 %v2676_v28 }
 0x369   : > { %2804 = vmatpush.bf16.msra.mxu1 %v2793_v56  ;;  %v10430_v27 = vmul.f32 %v2739_v13, %v2515_v11  ;;  %v13311_v56 = vpack.c.bf16 %v10374_v30, %v10372_v8  ;;  %v13313_v8 = vpack.c.bf16 %v10348_v55, %v10346_v59 }
 0x36a   : > { %v2613_v44 = vmul.f32 %v2581_v17, %v2465_v34 }
 0x36b   : > { %v2466_v49 = vpop.f32.mrf.mxu0 }
 0x36c   : > { %v2467_v33 = vadd.f32 %v10334_v45, %v2466_v49  ;;  %v2645_v0 = vadd.f32 %v2613_v44, %v2465_v34 }
 0x36d   : > { %2805 = vmatpush.bf16.msra.mxu1 %v2792_v2 }
 0x36e   : > { %v8408_v25 = vpop.eup %8407  ;;  %v2550_v32 = vmul.f32 0.044715, %v2467_v33  ;;  %v2677_v5 = vmul.f32 0.7978846, %v2645_v0  ;;  %v13312_v0 = vpack.c.bf16 %v10361_v37, %v10359_v54 }
 0x36f   : > { %v2740_v6 = vadd.f32 1.0, %v8408_v25  ;;  %v2517_v25 = vmul.f32 0.5, %v2465_v34 }
 0x370   : > { %v2582_v10 = vmul.f32 %v2550_v32, %v2467_v33  ;;  %8409 = vtanh.f32 %v2677_v5  ;;  %v2518_v32 = vmul.f32 0.5, %v2467_v33 }
 0x371   : > { %2806 = vmatpush.bf16.msra.mxu1 %v2791_v23  ;;  %v10432_v63 = vmul.f32 %v2740_v6, %v2516_v62 }
 0x372   : > { %v2614_v40 = vmul.f32 %v2582_v10, %v2467_v33 }
 0x373   : > { %v2469_v60 = vpop.f32.mrf.mxu0  ;;  %v8088_v50 = vpack.i.bf16 %v10432_v63, %v10430_v27 }
 0x374   : > { %v2470_v4 = vadd.f32 %v10334_v45, %v2469_v60  ;;  %v2646_v58 = vadd.f32 %v2614_v40, %v2467_v33  ;;  %v13314_v33 = vld [vmem:[#allocation15_spill] sm:$0xff] }
 0x375   : > { %8089 = vrot.lane.b32.xlu2 %v8088_v50, %s8767_s26  ;;  %2807 = vmatpush.bf16.msra.mxu1 %v13310_v12 }
 0x376   : > { %v2551_v29 = vmul.f32 0.044715, %v2470_v4  ;;  %v2678_v61 = vmul.f32 0.7978846, %v2646_v58  ;;  %v8410_v17 = vpop.eup %8409 }
 0x377   : > { %v2741_v1 = vadd.f32 1.0, %v8410_v17 }
 0x378   : > { %v2583_v28 = vmul.f32 %v2551_v29, %v2470_v4  ;;  %8411 = vtanh.f32 %v2678_v61 }
 0x379   : > { %2808 = vmatpush.bf16.msra.mxu1 %v13311_v56  ;;  %v10453_v30 = vmul.f32 %v2741_v1, %v2517_v25 }
 0x37a   : > { %v2615_v21 = vmul.f32 %v2583_v28, %v2470_v4 }
 0x37b   : > { %v2471_v44 = vpop.f32.mrf.mxu0 }
 0x37c   : > { %v2472_v49 = vadd.f32 %v10334_v45, %v2471_v44  ;;  %v2647_v2 = vadd.f32 %v2615_v21, %v2470_v4  ;;  %v2519_v21 = vmul.f32 0.5, %v2470_v4 }
 0x37d   : > { %2809 = vmatpush.bf16.msra.mxu1 %v13312_v0 }
 0x37e   : > { %v8412_v36 = vpop.eup %8411  ;;  %v2552_v13 = vmul.f32 0.044715, %v2472_v49  ;;  %v2679_v62 = vmul.f32 0.7978846, %v2647_v2  ;;  %v2520_v44 = vmul.f32 0.5, %v2472_v49 }
 0x37f   : > { %v2742_v23 = vadd.f32 1.0, %v8412_v36 }
 0x380   : > { %v2584_v11 = vmul.f32 %v2552_v13, %v2472_v49  ;;  %8413 = vtanh.f32 %v2679_v62 }
 0x381   : > { %2810 = vmatpush.bf16.msra.mxu1 %v13313_v8  ;;  %v10455_v6 = vmul.f32 %v2742_v23, %v2518_v32  ;;  %v13315_v8 = vld [vmem:[#allocation20_spill] sm:$0xff] }
 0x382   : > { %v2616_v10 = vmul.f32 %v2584_v11, %v2472_v49 }
 0x383   : > { %v2474_v5 = vpop.f32.mrf.mxu0  ;;  %v8093_v54 = vpack.i.bf16 %v10455_v6, %v10453_v30 }
 0x384   : > { %v2475_v34 = vadd.f32 %v10334_v45, %v2474_v5  ;;  %2811 = vmatmul.bf16.vlgmr.msra.gmra.mxu1 %v13314_v33  ;;  %v2648_v40 = vadd.f32 %v2616_v10, %v2472_v49 }
 0x385   : > { %8094 = vrot.lane.b32.xlu0 %v8093_v54, %s8767_s26 }
 0x386   : > { %v2553_v59 = vmul.f32 0.044715, %v2475_v34  ;;  %v2680_v55 = vmul.f32 0.7978846, %v2648_v40  ;;  %v8414_v50 = vpop.eup %8413 }
 0x387   : > { %v2743_v28 = vadd.f32 1.0, %v8414_v50 }
 0x388   : > { %v2585_v60 = vmul.f32 %v2553_v59, %v2475_v34  ;;  %8415 = vtanh.f32 %v2680_v55 }
 0x389   : > { %v10465_v36 = vmul.f32 %v2743_v28, %v2519_v21 }
 0x38a   : > { %v2617_v58 = vmul.f32 %v2585_v60, %v2475_v34 }
 0x38b   : > { %v2476_v12 = vpop.f32.mrf.mxu0 }
 0x38c   : > { %v2477_v29 = vadd.f32 %v10334_v45, %v2476_v12  ;;  %v2649_v61 = vadd.f32 %v2617_v58, %v2475_v34 }
 0x38e   : > { %v8416_v56 = vpop.eup %8415  ;;  %v2554_v17 = vmul.f32 0.044715, %v2477_v29  ;;  %v2681_v1 = vmul.f32 0.7978846, %v2649_v61  ;;  %v2521_v61 = vmul.f32 0.5, %v2475_v34  ;;  %v2522_v28 = vmul.f32 0.5, %v2477_v29 }
 0x38f   : > { %v2744_v2 = vadd.f32 1.0, %v8416_v56 }
 0x390   : > { %v2586_v0 = vmul.f32 %v2554_v17, %v2477_v29  ;;  %8417 = vtanh.f32 %v2681_v1 }
 0x391   : > { %v10467_v13 = vmul.f32 %v2744_v2, %v2520_v44 }
 0x392   : > { %v2618_v25 = vmul.f32 %v2586_v0, %v2477_v29 }
 0x393   : > { %v2479_v32 = vpop.f32.mrf.mxu0  ;;  %v8098_v23 = vpack.i.bf16 %v10467_v13, %v10465_v36 }
 0x394   : > { %v2480_v62 = vadd.f32 %v10334_v45, %v2479_v32  ;;  %2816 = vmatmul.bf16.gmra.mxu1 %v13315_v8  ;;  %v2650_v4 = vadd.f32 %v2618_v25, %v2477_v29 }
 0x395   : > { %8099 = vrot.lane.b32.xlu1 %v8098_v23, %s8767_s26 }
 0x396   : > { %v2555_v49 = vmul.f32 0.044715, %v2480_v62  ;;  %v2682_v10 = vmul.f32 0.7978846, %v2650_v4  ;;  %v8418_v54 = vpop.eup %8417  ;;  %v13316_v4 = vld [vmem:[#allocation25_spill] sm:$0xff] }
 0x397   : > { %v2745_v50 = vadd.f32 1.0, %v8418_v54 }
 0x398   : > { %v2587_v5 = vmul.f32 %v2555_v49, %v2480_v62  ;;  %8419 = vtanh.f32 %v2682_v10 }
 0x399   : > { %v10477_v44 = vmul.f32 %v2745_v50, %v2521_v61  ;;  %v2523_v61 = vmul.f32 0.5, %v2480_v62 }
 0x39a   : > { %v2619_v40 = vmul.f32 %v2587_v5, %v2480_v62 }
 0x39b   : > { %v2481_v59 = vpop.f32.mrf.mxu0 }
 0x39c   : > { %v2482_v55 = vadd.f32 %v10334_v45, %v2481_v59  ;;  %v2651_v60 = vadd.f32 %v2619_v40, %v2480_v62 }
 0x39e   : > { %v8420_v58 = vpop.eup %8419  ;;  %v2556_v12 = vmul.f32 0.044715, %v2482_v55  ;;  %v2683_v21 = vmul.f32 0.7978846, %v2651_v60 }
 0x39f   : > { %v2746_v56 = vadd.f32 1.0, %v8420_v58 }
 0x3a0   : > { %v2588_v17 = vmul.f32 %v2556_v12, %v2482_v55  ;;  %8421 = vtanh.f32 %v2683_v21 }
 0x3a1   : > { %v10479_v2 = vmul.f32 %v2746_v56, %v2522_v28  ;;  %v2524_v28 = vmul.f32 0.5, %v2482_v55 }
 0x3a2   : > { %v2620_v0 = vmul.f32 %v2588_v17, %v2482_v55 }
 0x3a3   : > { %v2484_v1 = vpop.f32.mrf.mxu0  ;;  %v8103_v25 = vpack.i.bf16 %v10479_v2, %v10477_v44 }
 0x3a4   : > { %v2485_v23 = vadd.f32 %v10334_v45, %v2484_v1  ;;  %2821 = vmatmul.bf16.gmra.mxu1 %v13316_v4  ;;  %v2652_v34 = vadd.f32 %v2620_v0, %v2482_v55 }
 0x3a5   : > { %8104 = vrot.lane.b32.xlu2 %v8103_v25, %s8767_s26 }
 0x3a6   : > { %v2557_v29 = vmul.f32 0.044715, %v2485_v23  ;;  %v2684_v49 = vmul.f32 0.7978846, %v2652_v34  ;;  %v8422_v5 = vpop.eup %8421 }
 0x3a7   : > { %v2747_v50 = vadd.f32 1.0, %v8422_v5 }
 0x3a8   : > { %v2589_v10 = vmul.f32 %v2557_v29, %v2485_v23  ;;  %8423 = vtanh.f32 %v2684_v49 }
 0x3a9   : > { %v10489_v0 = vmul.f32 %v2747_v50, %v2523_v61 }
 0x3aa   : > { %v2621_v54 = vmul.f32 %v2589_v10, %v2485_v23 }
 0x3ab   : > { %v2486_v40 = vpop.f32.mrf.mxu0 }
 0x3ac   : > { %v2487_v59 = vadd.f32 %v10334_v45, %v2486_v40  ;;  %v2653_v60 = vadd.f32 %v2621_v54, %v2485_v23 }
 0x3ae   : > { %v8424_v58 = vpop.eup %8423  ;;  %v2558_v12 = vmul.f32 0.044715, %v2487_v59  ;;  %v2685_v21 = vmul.f32 0.7978846, %v2653_v60 }
 0x3af   : > { %v2748_v56 = vadd.f32 1.0, %v8424_v58 }
 0x3b0   : > { %v2590_v17 = vmul.f32 %v2558_v12, %v2487_v59  ;;  %8425 = vtanh.f32 %v2685_v21 }
 0x3b1   : > { %v10491_v1 = vmul.f32 %v2748_v56, %v2524_v28  ;;  %v2525_v56 = vmul.f32 0.5, %v2485_v23 }
 0x3b2   : > { %v2622_v25 = vmul.f32 %v2590_v17, %v2487_v59  ;;  %v2526_v17 = vmul.f32 0.5, %v2487_v59 }
 0x3b3   : > { %v2489_v34 = vpop.f32.mrf.mxu0  ;;  %v8108_v29 = vpack.i.bf16 %v10491_v1, %v10489_v0 }
 0x3b4   : > { %v2490_v49 = vadd.f32 %v10334_v45, %v2489_v34  ;;  %2826 = vmatmul.bf16.gmra.mxu1 %v9813_v24  ;;  %v2654_v10 = vadd.f32 %v2622_v25, %v2487_v59 }
 0x3b5   : > { %8109 = vrot.lane.b32.xlu0 %v8108_v29, %s8767_s26 }
 0x3b6   : > { %v2559_v62 = vmul.f32 0.044715, %v2490_v49  ;;  %v2686_v55 = vmul.f32 0.7978846, %v2654_v10  ;;  %v8426_v54 = vpop.eup %8425 }
 0x3b7   : > { %v2749_v12 = vadd.f32 1.0, %v8426_v54 }
 0x3b8   : > { %v2591_v5 = vmul.f32 %v2559_v62, %v2490_v49  ;;  %8427 = vtanh.f32 %v2686_v55 }
 0x3b9   : > { %v2781_v41 = vmul.f32 %v2749_v12, %v2525_v56 }
 0x3ba   : > { %v2623_v40 = vmul.f32 %v2591_v5, %v2490_v49  ;;  %v13317_v5 = vld [vmem:[#allocation26_spill] sm:$0xff] }
 0x3bb   : > { %v2491_v60 = vpop.f32.mrf.mxu0 }
 0x3bc   : > { %v2492_v50 = vadd.f32 %v10334_v45, %v2491_v60  ;;  %v2655_v58 = vadd.f32 %v2623_v40, %v2490_v49 }
 0x3be   : > { %v8428_v61 = vpop.eup %8427  ;;  %v2560_v28 = vmul.f32 0.044715, %v2492_v50  ;;  %v2687_v21 = vmul.f32 0.7978846, %v2655_v58 }
 0x3bf   : > { %v2750_v34 = vadd.f32 1.0, %v8428_v61 }
 0x3c0   : > { %v2592_v25 = vmul.f32 %v2560_v28, %v2492_v50  ;;  %8429 = vtanh.f32 %v2687_v21 }
 0x3c1   : > { %v2782_v29 = vmul.f32 %v2750_v34, %v2526_v17  ;;  %v2527_v34 = vmul.f32 0.5, %v2490_v49 }
 0x3c2   : > { %v2624_v37 = vmul.f32 %v2592_v25, %v2492_v50  ;;  %v2528_v25 = vmul.f32 0.5, %v2492_v50 }
 0x3c3   : > { %v2494_v10 = vpop.f32.mrf.mxu0  ;;  %v8113_v62 = vpack.i.bf16 %v2782_v29, %v2781_v41 }
 0x3c4   : > { %v2495_v55 = vadd.f32 %v10334_v45, %v2494_v10  ;;  %2831 = vmatmul.bf16.gmra.mxu1 %v13317_v5  ;;  %v2656_v11 = vadd.f32 %v2624_v37, %v2492_v50 }
 0x3c5   : > { %8114 = vrot.lane.b32.xlu1 %v8113_v62, %s8767_s26 }
 0x3c6   : > { %v2561_v54 = vmul.f32 0.044715, %v2495_v55  ;;  %v2688_v40 = vmul.f32 0.7978846, %v2656_v11  ;;  %v8430_v59 = vpop.eup %8429  ;;  %v2529_v49 = vmul.f32 0.5, %v2495_v55 }
 0x3c7   : > { %v2751_v28 = vadd.f32 1.0, %v8430_v59 }
 0x3c8   : > { %v2593_v23 = vmul.f32 %v2561_v54, %v2495_v55  ;;  %8431 = vtanh.f32 %v2688_v40 }
 0x3c9   : > { %v2783_v32 = vmul.f32 %v2751_v28, %v2527_v34  ;;  %v2799_v34 = vpack.c.bf16 %v10491_v1, %v10489_v0 }
 0x3ca   : > { %v2625_v60 = vmul.f32 %v2593_v23, %v2495_v55 }
 0x3cb   : > { %v2496_v58 = vpop.f32.mrf.mxu0 }
 0x3cc   : > { %v2657_v12 = vadd.f32 %v2625_v60, %v2495_v55  ;;  %v2497_v61 = vadd.f32 %v10334_v45, %v2496_v58  ;;  %v13318_v55 = vpack.c.bf16 %v10479_v2, %v10477_v44 }
 0x3ce   : > { %v8432_v56 = vpop.eup %8431  ;;  %v2562_v17 = vmul.f32 0.044715, %v2497_v61  ;;  %v2689_v37 = vmul.f32 0.7978846, %v2657_v12  ;;  %v2530_v50 = vmul.f32 0.5, %v2497_v61 }
 0x3cf   : > { %v2752_v10 = vadd.f32 1.0, %v8432_v56 }
 0x3d0   : > { %v2594_v21 = vmul.f32 %v2562_v17, %v2497_v61  ;;  %8433 = vtanh.f32 %v2689_v37  ;;  %v2800_v17 = vpack.c.bf16 %v2782_v29, %v2781_v41  ;;  %v13321_v41 = vpack.c.bf16 %v10432_v63, %v10430_v27  ;;  %v8050_v37 = vpop.permute.xlu0 %8049 }
 0x3d1   : > { %v2784_v62 = vmul.f32 %v2752_v10, %v2528_v25 }
 0x3d2   : > { %v2626_v5 = vmul.f32 %v2594_v21, %v2497_v61 }
 0x3d3   : > { %v8118_v11 = vpack.i.bf16 %v2784_v62, %v2783_v32 }
 0x3d4   : > { %2836 = vmatmul.bf16.gmra.mxu1 %v10044_v9  ;;  %v2658_v54 = vadd.f32 %v2626_v5, %v2497_v61  ;;  %v2801_v5 = vpack.c.bf16 %v2784_v62, %v2783_v32  ;;  %v13319_v61 = vpack.c.bf16 %v10467_v13, %v10465_v36  ;;  %v13320_v32 = vpack.c.bf16 %v10455_v6, %v10453_v30  ;;  %v7798_v6 = vld [vmem:[%s12913_s5] sm:$0xf]  ;;  %v8007_v13 = vld [vmem:[%s12913_s5] sm:$0x10] }
 0x3d5   : > { %8119 = vrot.lane.b32.xlu2 %v8118_v11, %s8767_s26  ;;  %v7799_v44 = vor.u32 %v8007_v13, %v7798_v6  ;;  %v8052_v11 = vunpack.i.h.bf16 %v8050_v37 }
 0x3d6   : > { %v2690_v40 = vmul.f32 0.7978846, %v2658_v54  ;;  %v8434_v45 = vpop.eup %8433  ;;  %v8051_v54 = vunpack.i.l.bf16 %v8050_v37 }
 0x3d7   : > { %v2753_v23 = vadd.f32 1.0, %v8434_v45  ;;  %v3220_v0 = vsel %vm3218_vm9, %v7799_v44, 0 }
 0x3d8   : > { %8435 = vtanh.f32 %v2690_v40  ;;  %3229 = vmatpush.bf16.msra.mxu3 %v3220_v0 }
 0x3d9   : > { %v2785_v58 = vmul.f32 %v2753_v23, %v2529_v49 }
 0x3de   : > { %v8436_v59 = vpop.eup %8435 }
 0x3df   : > { %v2754_v60 = vadd.f32 1.0, %v8436_v59 }
 0x3e1   : > { %v2786_v12 = vmul.f32 %v2754_v60, %v2530_v50  ;;  %v8055_v60 = vpop.permute.xlu0 %8054 }
 0x3e3   : > { %v2802_v28 = vpack.c.bf16 %v2786_v12, %v2785_v58  ;;  %v8123_v56 = vpack.i.bf16 %v2786_v12, %v2785_v58 }
 0x3e4   : > { %2841 = vmatmul.bf16.gmra.mxu1 %v10058_v18 }
 0x3e5   : > { %2892 = vmatpush.bf16.msra.mxu2 %v2802_v28  ;;  %8124 = vrot.lane.b32.xlu0 %v8123_v56, %s8767_s26  ;;  %v8057_v28 = vunpack.i.h.bf16 %v8055_v60  ;;  %v8056_v56 = vunpack.i.l.bf16 %v8055_v60 }
 0x3e9   : > { %2893 = vmatpush.bf16.msra.mxu2 %v2801_v5 }
 0x3ed   : > { %2894 = vmatpush.bf16.msra.mxu2 %v2800_v17 }
 0x3f1   : > { %2895 = vmatpush.bf16.msra.mxu2 %v2799_v34 }
 0x3f4   : > { %2846 = vmatmul.bf16.gmra.mxu1 %v10072_v26 }
 0x3f5   : > { %2896 = vmatpush.bf16.msra.mxu2 %v13318_v55 }
 0x3f9   : > { %2897 = vmatpush.bf16.msra.mxu2 %v13319_v61 }
 0x3fd   : > { %2898 = vmatpush.bf16.msra.mxu2 %v13320_v32 }
 0x401   : > { %2899 = vmatpush.bf16.msra.mxu2 %v13321_v41  ;;  %v2812_v36 = vpop.f32.mrf.mxu1  ;;  %v8060_v41 = vpop.permute.xlu1 %8059 }
 0x402   : > { %v8061_v13 = vunpack.i.l.bf16 %v8060_v41 }
 0x404   : > { %2851 = vmatmul.bf16.gmra.mxu1 %v10086_v31  ;;  %2900 = vmatmul.bf16.vlgmr.msra.gmra.mxu2 %v10198_v38 }
 0x409   : > { %v2814_v30 = vpop.f32.mrf.mxu1 }
 0x411   : > { %v2817_v27 = vpop.f32.mrf.mxu1 }
 0x414   : > { %2856 = vmatmul.bf16.gmra.mxu1 %v10100_v35  ;;  %2905 = vmatmul.bf16.gmra.mxu2 %v10212_v15 }
 0x419   : > { %v2819_v63 = vpop.f32.mrf.mxu1 }
 0x421   : > { %v2822_v2 = vpop.f32.mrf.mxu1 }
 0x424   : > { %2861 = vmatmul.bf16.gmra.mxu1 %v10114_v39  ;;  %2910 = vmatmul.bf16.gmra.mxu2 %v10226_v7 }
 0x429   : > { %v2824_v1 = vpop.f32.mrf.mxu1 }
 0x431   : > { %v2827_v29 = vpop.f32.mrf.mxu1 }
 0x434   : > { %2866 = vmatmul.bf16.gmra.mxu1 %v10128_v43  ;;  %2915 = vmatmul.bf16.gmra.mxu2 %v10240_v53 }
 0x439   : > { %v2829_v25 = vpop.f32.mrf.mxu1 }
 0x441   : > { %v2832_v50 = vpop.f32.mrf.mxu1 }
 0x444   : > { %2871 = vmatmul.bf16.gmra.mxu1 %v10142_v47  ;;  %2920 = vmatmul.bf16.gmra.mxu2 %v10257_v3 }
 0x449   : > { %v2834_v55 = vpop.f32.mrf.mxu1 }
 0x454   : > { %2876 = vmatmul.bf16.gmra.mxu1 %v10156_v51  ;;  %2925 = vmatmul.bf16.gmra.mxu2 %v10271_v22 }
 0x464   : > { %2881 = vmatmul.bf16.gmra.mxu1 %v10170_v20  ;;  %2930 = vmatmul.bf16.gmra.mxu2 %v10285_v16 }
 0x474   : > { %2886 = vmatmul.bf16.gmra.mxu1 %v10184_v42  ;;  %2935 = vmatmul.bf16.gmra.mxu2 %v10301_v46 }
 0x484   : > { %2940 = vmatmul.bf16.gmra.mxu2 %v10305_v14 }
 0x487   : > { %v2901_v10 = vpop.f32.mrf.mxu2 }
 0x488   : > { %v2902_v21 = vadd.f32 %v2901_v10, %v2812_v36  ;;  %v2837_v36 = vpop.f32.mrf.mxu1 }
 0x48a   : > { %v3110_v45 = vsel %vm3109_vm7, %v2902_v21, %v8051_v54 }
 0x48f   : > { %v2903_v62 = vpop.f32.mrf.mxu2 }
 0x490   : > { %v2904_v40 = vadd.f32 %v2903_v62, %v2814_v30  ;;  %v2839_v37 = vpop.f32.mrf.mxu1  ;;  %v8065_v62 = vpop.permute.xlu1 %8064 }
 0x492   : > { %v3111_v23 = vsel %vm3109_vm7, %v2904_v40, %v8052_v11  ;;  %v8067_v40 = vunpack.i.h.bf16 %v8065_v62 }
 0x493   : > { %v3142_v59 = vpack.c.bf16 %v3111_v23, %v3110_v45 }
 0x494   : > { %2945 = vmatmul.bf16.gmra.mxu2 %v10309_v19 }
 0x495   : > { %7800 = vmatmul.msk.bf16.vlgmr.msra.gmra.mxu3 %vm3169_vm10, %v3142_v59 }
 0x497   : > { %v2906_v49 = vpop.f32.mrf.mxu2 }
 0x498   : > { %v2907_v58 = vadd.f32 %v2906_v49, %v2817_v27  ;;  %v8062_v27 = vunpack.i.h.bf16 %v8060_v41  ;;  %v2842_v23 = vpop.f32.mrf.mxu1 }
 0x49a   : > { %v3112_v17 = vsel %vm3109_vm7, %v2907_v58, %v8056_v56 }
 0x49f   : > { %v2908_v12 = vpop.f32.mrf.mxu2 }
 0x4a0   : > { %v2909_v5 = vadd.f32 %v2908_v12, %v2819_v63  ;;  %v2844_v58 = vpop.f32.mrf.mxu1  ;;  %v8070_v12 = vpop.permute.xlu2 %8069 }
 0x4a2   : > { %v3113_v34 = vsel %vm3109_vm7, %v2909_v5, %v8057_v28  ;;  %v8071_v5 = vunpack.i.l.bf16 %v8070_v12 }
 0x4a3   : > { %v3143_v61 = vpack.c.bf16 %v3113_v34, %v3112_v17 }
 0x4a4   : > { %2950 = vmatmul.bf16.gmra.mxu2 %v10313_v48 }
 0x4a5   : > { %7801 = vmatmul.msk.bf16.gmra.mxu3 %vm3169_vm10, %v3143_v61 }
 0x4a7   : > { %v2911_v32 = vpop.f32.mrf.mxu2 }
 0x4a8   : > { %v2912_v30 = vadd.f32 %v2911_v32, %v2822_v2  ;;  %v8066_v2 = vunpack.i.l.bf16 %v8065_v62  ;;  %v13322_v32 = vld [vmem:[#allocation7_spill] sm:$0xff]  ;;  %v2847_v41 = vpop.f32.mrf.mxu1  ;;  %v13323_v62 = vld [vmem:[#allocation8_spill] sm:$0xff] }
 0x4aa   : > { %v3114_v63 = vsel %vm3109_vm7, %v2912_v30, %v8061_v13 }
 0x4af   : > { %v2913_v6 = vpop.f32.mrf.mxu2 }
 0x4b0   : > { %v2914_v44 = vadd.f32 %v2913_v6, %v2824_v1  ;;  %v8075_v6 = vpop.permute.xlu2 %8074  ;;  %v2849_v13 = vpop.f32.mrf.mxu1 }
 0x4b2   : > { %v3115_v0 = vsel %vm3109_vm7, %v2914_v44, %v8062_v27 }
 0x4b3   : > { %v3144_v10 = vpack.c.bf16 %v3115_v0, %v3114_v63  ;;  %v8076_v63 = vunpack.i.l.bf16 %v8075_v6 }
 0x4b4   : > { %2955 = vmatmul.bf16.gmra.mxu2 %v10317_v52 }
 0x4b5   : > { %7802 = vmatmul.msk.bf16.gmra.mxu3 %vm3169_vm10, %v3144_v10 }
 0x4b7   : > { %v2916_v21 = vpop.f32.mrf.mxu2 }
 0x4b8   : > { %v2917_v11 = vadd.f32 %v2916_v21, %v2827_v29  ;;  %v8072_v29 = vunpack.i.h.bf16 %v8070_v12 }
 0x4ba   : > { %v3116_v1 = vsel %vm3109_vm7, %v2917_v11, %v8066_v2 }
 0x4bf   : > { %v2918_v54 = vpop.f32.mrf.mxu2 }
 0x4c0   : > { %v2919_v45 = vadd.f32 %v2918_v54, %v2829_v25  ;;  %v2852_v54 = vpop.f32.mrf.mxu1 }
 0x4c2   : > { %v3117_v59 = vsel %vm3109_vm7, %v2919_v45, %v8067_v40  ;;  %v8080_v40 = vpop.permute.xlu0 %8079 }
 0x4c3   : > { %v3145_v49 = vpack.c.bf16 %v3117_v59, %v3116_v1  ;;  %v8081_v1 = vunpack.i.l.bf16 %v8080_v40 }
 0x4c4   : > { %2960 = vmatmul.bf16.gmra.mxu2 %v10321_v57 }
 0x4c5   : > { %7803 = vmatmul.msk.bf16.gmra.mxu3 %vm3169_vm10, %v3145_v49 }
 0x4c7   : > { %v2921_v60 = vpop.f32.mrf.mxu2 }
 0x4c8   : > { %v2922_v28 = vadd.f32 %v2921_v60, %v2832_v50  ;;  %v8077_v50 = vunpack.i.h.bf16 %v8075_v6  ;;  %v2854_v60 = vpop.f32.mrf.mxu1 }
 0x4ca   : > { %v3118_v25 = vsel %vm3109_vm7, %v2922_v28, %v8071_v5  ;;  %v13324_v28 = vld [vmem:[#allocation9_spill] sm:$0xff] }
 0x4cf   : > { %v2923_v56 = vpop.f32.mrf.mxu2 }
 0x4d0   : > { %v2924_v17 = vadd.f32 %v2923_v56, %v2834_v55  ;;  %v2857_v5 = vpop.f32.mrf.mxu1 }
 0x4d2   : > { %v3119_v34 = vsel %vm3109_vm7, %v2924_v17, %v8072_v29  ;;  %v8085_v29 = vpop.permute.xlu1 %8084 }
 0x4d3   : > { %v3146_v61 = vpack.c.bf16 %v3119_v34, %v3118_v25  ;;  %v8086_v34 = vunpack.i.l.bf16 %v8085_v29 }
 0x4d4   : > { %2965 = vmatmul.bf16.gmra.mxu2 %v13322_v32 }
 0x4d5   : > { %7804 = vmatmul.msk.bf16.gmra.mxu3 %vm3169_vm10, %v3146_v61 }
 0x4d7   : > { %v2926_v30 = vpop.f32.mrf.mxu2 }
 0x4d8   : > { %v2927_v27 = vadd.f32 %v2926_v30, %v2837_v36  ;;  %v8082_v36 = vunpack.i.h.bf16 %v8080_v40 }
 0x4da   : > { %v3120_v55 = vsel %vm3109_vm7, %v2927_v27, %v8076_v63  ;;  %v2859_v27 = vpop.f32.mrf.mxu1 }
 0x4df   : > { %v2928_v44 = vpop.f32.mrf.mxu2 }
 0x4e0   : > { %v2929_v0 = vadd.f32 %v2928_v44, %v2839_v37 }
 0x4e2   : > { %v3121_v10 = vsel %vm3109_vm7, %v2929_v0, %v8077_v50  ;;  %v8090_v50 = vpop.permute.xlu2 %8089 }
 0x4e3   : > { %v3147_v21 = vpack.c.bf16 %v3121_v10, %v3120_v55  ;;  %v8092_v55 = vunpack.i.h.bf16 %v8090_v50  ;;  %v8091_v10 = vunpack.i.l.bf16 %v8090_v50 }
 0x4e4   : > { %2970 = vmatmul.bf16.gmra.mxu2 %v13323_v62 }
 0x4e5   : > { %7805 = vmatmul.msk.bf16.gmra.mxu3 %vm3169_vm10, %v3147_v21 }
 0x4e7   : > { %v2931_v11 = vpop.f32.mrf.mxu2 }
 0x4e8   : > { %v2932_v2 = vadd.f32 %v2931_v11, %v2842_v23  ;;  %v8087_v23 = vunpack.i.h.bf16 %v8085_v29 }
 0x4ea   : > { %v3122_v49 = vsel %vm3109_vm7, %v2932_v2, %v8081_v1  ;;  %v10582_v2 = vld [vmem:[%s12914_s6] ss:$0 sm:$0xff] }
 0x4ef   : > { %v2933_v45 = vpop.f32.mrf.mxu2 }
 0x4f0   : > { %v2934_v59 = vadd.f32 %v2933_v45, %v2844_v58 }
 0x4f2   : > { %v3123_v37 = vsel %vm3109_vm7, %v2934_v59, %v8082_v36 }
 0x4f3   : > { %v3148_v12 = vpack.c.bf16 %v3123_v37, %v3122_v49  ;;  %v8095_v49 = vpop.permute.xlu0 %8094 }
 0x4f4   : > { %2975 = vmatmul.bf16.gmra.mxu2 %v13324_v28  ;;  %v8097_v29 = vunpack.i.h.bf16 %v8095_v49 }
 0x4f5   : > { %7806 = vmatmul.msk.bf16.gmra.mxu3 %vm3169_vm10, %v3148_v12 }
 0x4f7   : > { %v2936_v56 = vpop.f32.mrf.mxu2 }
 0x4f8   : > { %v2937_v17 = vadd.f32 %v2936_v56, %v2847_v41  ;;  %v2862_v41 = vpop.f32.mrf.mxu1 }
 0x4fa   : > { %v3124_v58 = vsel %vm3109_vm7, %v2937_v17, %v8086_v34  ;;  %v8096_v17 = vunpack.i.l.bf16 %v8095_v49 }
 0x4ff   : > { %v2938_v25 = vpop.f32.mrf.mxu2 }
 0x500   : > { %v2939_v61 = vadd.f32 %v2938_v25, %v2849_v13  ;;  %v2864_v1 = vpop.f32.mrf.mxu1 }
 0x502   : > { %v3125_v30 = vsel %vm3109_vm7, %v2939_v61, %v8087_v23 }
 0x503   : > { %v3149_v6 = vpack.c.bf16 %v3125_v30, %v3124_v58 }
 0x505   : > { %7807 = vmatmul.msk.bf16.gmra.mxu3 %vm3169_vm10, %v3149_v6 }
 0x507   : > { %v2941_v44 = vpop.f32.mrf.mxu2 }
 0x508   : > { %v2942_v63 = vadd.f32 %v2941_v44, %v2852_v54  ;;  %v2867_v50 = vpop.f32.mrf.mxu1 }
 0x50a   : > { %v3126_v11 = vsel %vm3109_vm7, %v2942_v63, %v8091_v10 }
 0x50f   : > { %v2943_v0 = vpop.f32.mrf.mxu2 }
 0x510   : > { %v2944_v21 = vadd.f32 %v2943_v0, %v2854_v60  ;;  %v2869_v49 = vpop.f32.mrf.mxu1 }
 0x512   : > { %v3127_v13 = vsel %vm3109_vm7, %v2944_v21, %v8092_v55 }
 0x513   : > { %v3150_v40 = vpack.c.bf16 %v3127_v13, %v3126_v11 }
 0x515   : > { %7808 = vmatmul.msk.bf16.gmra.mxu3 %vm3169_vm10, %v3150_v40  ;;  %v8100_v40 = vpop.permute.xlu1 %8099 }
 0x517   : > { %v2946_v45 = vpop.f32.mrf.mxu2 }
 0x518   : > { %v3231_v36 = vpop.f32.mrf.mxu3  ;;  %v2947_v60 = vadd.f32 %v2946_v45, %v2857_v5 }
 0x519   : > { %v3232_v54 = vadd.f32 %v10582_v2, %v3231_v36 }
 0x51a   : > { %v3128_v58 = vsel %vm3109_vm7, %v2947_v60, %v8096_v17 }
 0x51b   : > { %v3343_v59 = vmul.f32 0.044715, %v3232_v54 }
 0x51d   : > { %v3375_v37 = vmul.f32 %v3343_v59, %v3232_v54 }
 0x51f   : > { %v2948_v12 = vpop.f32.mrf.mxu2  ;;  %v3407_v56 = vmul.f32 %v3375_v37, %v3232_v54 }
 0x520   : > { %v2949_v25 = vadd.f32 %v2948_v12, %v2859_v27  ;;  %v3233_v23 = vpop.f32.mrf.mxu3  ;;  %v8102_v12 = vunpack.i.h.bf16 %v8100_v40 }
 0x521   : > { %v3234_v34 = vadd.f32 %v10582_v2, %v3233_v23  ;;  %v3439_v61 = vadd.f32 %v3407_v56, %v3232_v54  ;;  %v8101_v56 = vunpack.i.l.bf16 %v8100_v40 }
 0x522   : > { %v3129_v30 = vsel %vm3109_vm7, %v2949_v25, %v8097_v29 }
 0x523   : > { %v3151_v6 = vpack.c.bf16 %v3129_v30, %v3128_v58  ;;  %v3344_v44 = vmul.f32 0.044715, %v3234_v34  ;;  %v3471_v5 = vmul.f32 0.7978846, %v3439_v61 }
 0x525   : > { %v3376_v63 = vmul.f32 %v3344_v44, %v3234_v34  ;;  %7809 = vmatmul.msk.bf16.gmra.mxu3 %vm3169_vm10, %v3151_v6  ;;  %8437 = vtanh.f32 %v3471_v5  ;;  %v3312_v5 = vmul.f32 0.5, %v3234_v34 }
 0x527   : > { %v2951_v0 = vpop.f32.mrf.mxu2  ;;  %v3408_v55 = vmul.f32 %v3376_v63, %v3234_v34  ;;  %v3311_v63 = vmul.f32 0.5, %v3232_v54  ;;  %v2872_v54 = vpop.f32.mrf.mxu1 }
 0x528   : > { %v3236_v10 = vpop.f32.mrf.mxu3  ;;  %v2952_v36 = vadd.f32 %v2951_v0, %v2862_v41 }
 0x529   : > { %v10590_v27 = vadd.f32 %v10582_v2, %v3236_v10  ;;  %v3440_v21 = vadd.f32 %v3408_v55, %v3234_v34 }
 0x52a   : > { %v3130_v61 = vsel %vm3109_vm7, %v2952_v36, %v8101_v56 }
 0x52b   : > { %v3345_v11 = vmul.f32 0.044715, %v10590_v27  ;;  %v3472_v13 = vmul.f32 0.7978846, %v3440_v21  ;;  %v8438_v59 = vpop.eup %8437 }
 0x52c   : > { %v3535_v30 = vadd.f32 1.0, %v8438_v59 }
 0x52d   : > { %v3377_v45 = vmul.f32 %v3345_v11, %v10590_v27  ;;  %8439 = vtanh.f32 %v3472_v13 }
 0x52e   : > { %v10600_v10 = vmul.f32 %v3535_v30, %v3311_v63 }
 0x52f   : > { %v2953_v37 = vpop.f32.mrf.mxu2  ;;  %v3409_v60 = vmul.f32 %v3377_v45, %v10590_v27 }
 0x530   : > { %v2954_v29 = vadd.f32 %v2953_v37, %v2864_v1  ;;  %v3238_v17 = vpop.f32.mrf.mxu3 }
 0x531   : > { %v3239_v25 = vadd.f32 %v10582_v2, %v3238_v17  ;;  %v3441_v23 = vadd.f32 %v3409_v60, %v10590_v27 }
 0x532   : > { %v3131_v58 = vsel %vm3109_vm7, %v2954_v29, %v8102_v12  ;;  %v8105_v12 = vpop.permute.xlu2 %8104 }
 0x533   : > { %v8440_v6 = vpop.eup %8439  ;;  %v3152_v41 = vpack.c.bf16 %v3131_v58, %v3130_v61  ;;  %v3346_v44 = vmul.f32 0.044715, %v3239_v25  ;;  %v3473_v1 = vmul.f32 0.7978846, %v3441_v23  ;;  %v8107_v58 = vunpack.i.h.bf16 %v8105_v12 }
 0x534   : > { %v3536_v0 = vadd.f32 1.0, %v8440_v6  ;;  %v8106_v30 = vunpack.i.l.bf16 %v8105_v12 }
 0x535   : > { %v3378_v55 = vmul.f32 %v3346_v44, %v3239_v25  ;;  %7810 = vmatmul.msk.bf16.gmra.mxu3 %vm3169_vm10, %v3152_v41  ;;  %8441 = vtanh.f32 %v3473_v1 }
 0x536   : > { %v10602_v21 = vmul.f32 %v3536_v0, %v3312_v5 }
 0x537   : > { %v2956_v11 = vpop.f32.mrf.mxu2  ;;  %v3410_v13 = vmul.f32 %v3378_v55, %v3239_v25 }
 0x538   : > { %v3241_v40 = vpop.f32.mrf.mxu3  ;;  %v8128_v45 = vpack.i.bf16 %v10602_v21, %v10600_v10  ;;  %v2957_v29 = vadd.f32 %v2956_v11, %v2867_v50 }
 0x539   : > { %v10609_v34 = vadd.f32 %v10582_v2, %v3241_v40  ;;  %v3442_v59 = vadd.f32 %v3410_v13, %v3239_v25  ;;  %v2874_v13 = vpop.f32.mrf.mxu1  ;;  %v3313_v40 = vmul.f32 0.5, %v10590_v27 }
 0x53a   : > { %8129 = vrot.lane.b32.xlu1 %v8128_v45, %s8768_s18  ;;  %v3132_v5 = vsel %vm3109_vm7, %v2957_v29, %v8106_v30  ;;  %v3314_v45 = vmul.f32 0.5, %v3239_v25 }
 0x53b   : > { %v3347_v37 = vmul.f32 0.044715, %v10609_v34  ;;  %v3474_v60 = vmul.f32 0.7978846, %v3442_v59  ;;  %v8442_v17 = vpop.eup %8441 }
 0x53c   : > { %v3537_v55 = vadd.f32 1.0, %v8442_v17 }
 0x53d   : > { %v3379_v56 = vmul.f32 %v3347_v37, %v10609_v34  ;;  %8443 = vtanh.f32 %v3474_v60 }
 0x53e   : > { %v10621_v60 = vmul.f32 %v3537_v55, %v3313_v40 }
 0x53f   : > { %v2958_v23 = vpop.f32.mrf.mxu2  ;;  %v3411_v61 = vmul.f32 %v3379_v56, %v10609_v34 }
 0x540   : > { %v2959_v6 = vadd.f32 %v2958_v23, %v2869_v49  ;;  %v3243_v41 = vpop.f32.mrf.mxu3 }
 0x541   : > { %v3244_v44 = vadd.f32 %v10582_v2, %v3243_v41  ;;  %v3443_v63 = vadd.f32 %v3411_v61, %v10609_v34  ;;  %v2877_v41 = vpop.f32.mrf.mxu1 }
 0x542   : > { %v3133_v0 = vsel %vm3109_vm7, %v2959_v6, %v8107_v58  ;;  %v8110_v6 = vpop.permute.xlu0 %8109 }
 0x543   : > { %v8444_v1 = vpop.eup %8443  ;;  %v3153_v50 = vpack.c.bf16 %v3133_v0, %v3132_v5  ;;  %v3348_v11 = vmul.f32 0.044715, %v3244_v44  ;;  %v3475_v49 = vmul.f32 0.7978846, %v3443_v63 }
 0x544   : > { %v3538_v59 = vadd.f32 1.0, %v8444_v1 }
 0x545   : > { %v3380_v37 = vmul.f32 %v3348_v11, %v3244_v44  ;;  %7811 = vmatmul.msk.bf16.gmra.mxu3 %vm3169_vm10, %v3153_v50  ;;  %8445 = vtanh.f32 %v3475_v49  ;;  %v8112_v50 = vunpack.i.h.bf16 %v8110_v6  ;;  %v8111_v11 = vunpack.i.l.bf16 %v8110_v6 }
 0x546   : > { %v10623_v12 = vmul.f32 %v3538_v59, %v3314_v45 }
 0x547   : > { %v2961_v56 = vpop.f32.mrf.mxu2  ;;  %v3412_v29 = vmul.f32 %v3380_v37, %v3244_v44 }
 0x548   : > { %v3246_v23 = vpop.f32.mrf.mxu3  ;;  %v8133_v17 = vpack.i.bf16 %v10623_v12, %v10621_v60  ;;  %v2962_v5 = vadd.f32 %v2961_v56, %v2872_v54  ;;  %v3315_v56 = vmul.f32 0.5, %v10609_v34 }
 0x549   : > { %v10630_v27 = vadd.f32 %v10582_v2, %v3246_v23  ;;  %v3444_v25 = vadd.f32 %v3412_v29, %v3244_v44 }
 0x54a   : > { %8134 = vrot.lane.b32.xlu2 %v8133_v17, %s8768_s18  ;;  %v3134_v49 = vsel %vm3109_vm7, %v2962_v5, %v8111_v11 }
 0x54b   : > { %v3349_v58 = vmul.f32 0.044715, %v10630_v27  ;;  %v3476_v30 = vmul.f32 0.7978846, %v3444_v25  ;;  %v8446_v0 = vpop.eup %8445  ;;  %v3317_v36 = vmul.f32 0.5, %v10630_v27 }
 0x54c   : > { %v3539_v23 = vadd.f32 1.0, %v8446_v0 }
 0x54d   : > { %v3381_v63 = vmul.f32 %v3349_v58, %v10630_v27  ;;  %8447 = vtanh.f32 %v3476_v30  ;;  %v3316_v58 = vmul.f32 0.5, %v3244_v44 }
 0x54e   : > { %v10642_v6 = vmul.f32 %v3539_v23, %v3315_v56 }
 0x54f   : > { %v2963_v55 = vpop.f32.mrf.mxu2  ;;  %v3413_v1 = vmul.f32 %v3381_v63, %v10630_v27 }
 0x550   : > { %v2964_v40 = vadd.f32 %v2963_v55, %v2874_v13  ;;  %v3248_v45 = vpop.f32.mrf.mxu3 }
 0x551   : > { %v3249_v59 = vadd.f32 %v10582_v2, %v3248_v45  ;;  %v3445_v37 = vadd.f32 %v3413_v1, %v10630_v27  ;;  %v2879_v1 = vpop.f32.mrf.mxu1 }
 0x552   : > { %v3135_v29 = vsel %vm3109_vm7, %v2964_v40, %v8112_v50 }
 0x553   : > { %v8448_v17 = vpop.eup %8447  ;;  %v3154_v25 = vpack.c.bf16 %v3135_v29, %v3134_v49  ;;  %v3350_v54 = vmul.f32 0.044715, %v3249_v59  ;;  %v3477_v13 = vmul.f32 0.7978846, %v3445_v37  ;;  %v8115_v49 = vpop.permute.xlu1 %8114 }
 0x554   : > { %v3540_v30 = vadd.f32 1.0, %v8448_v17  ;;  %v8117_v56 = vunpack.i.h.bf16 %v8115_v49 }
 0x555   : > { %v3382_v63 = vmul.f32 %v3350_v54, %v3249_v59  ;;  %7812 = vmatmul.msk.bf16.gmra.mxu3 %vm3169_vm10, %v3154_v25  ;;  %8449 = vtanh.f32 %v3477_v13 }
 0x556   : > { %v10644_v55 = vmul.f32 %v3540_v30, %v3316_v58  ;;  %v8116_v58 = vunpack.i.l.bf16 %v8115_v49 }
 0x557   : > { %v2966_v5 = vpop.f32.mrf.mxu2  ;;  %v3414_v11 = vmul.f32 %v3382_v63, %v3249_v59 }
 0x558   : > { %v3251_v50 = vpop.f32.mrf.mxu3  ;;  %v8138_v0 = vpack.i.bf16 %v10644_v55, %v10642_v6  ;;  %v2967_v23 = vadd.f32 %v2966_v5, %v2877_v41 }
 0x559   : > { %v10651_v44 = vadd.f32 %v10582_v2, %v3251_v50  ;;  %v3446_v40 = vadd.f32 %v3414_v11, %v3249_v59  ;;  %v2882_v11 = vpop.f32.mrf.mxu1 }
 0x55a   : > { %8139 = vrot.lane.b32.xlu0 %v8138_v0, %s8768_s18  ;;  %v3136_v0 = vsel %vm3109_vm7, %v2967_v23, %v8116_v58 }
 0x55b   : > { %v3351_v45 = vmul.f32 0.044715, %v10651_v44  ;;  %v3478_v37 = vmul.f32 0.7978846, %v3446_v40  ;;  %v8450_v17 = vpop.eup %8449 }
 0x55d   : > { %v3383_v29 = vmul.f32 %v3351_v45, %v10651_v44  ;;  %8451 = vtanh.f32 %v3478_v37  ;;  %v3541_v45 = vadd.f32 1.0, %v8450_v17 }
 0x55f   : > { %v2968_v25 = vpop.f32.mrf.mxu2  ;;  %v3415_v54 = vmul.f32 %v3383_v29, %v10651_v44  ;;  %v3318_v29 = vmul.f32 0.5, %v3249_v59 }
 0x560   : > { %v2969_v30 = vadd.f32 %v2968_v25, %v2879_v1  ;;  %v3253_v63 = vpop.f32.mrf.mxu3  ;;  %v10663_v25 = vmul.f32 %v3541_v45, %v3317_v36 }
 0x561   : > { %v3254_v13 = vadd.f32 %v10582_v2, %v3253_v63  ;;  %v3447_v50 = vadd.f32 %v3415_v54, %v10651_v44  ;;  %v2884_v36 = vpop.f32.mrf.mxu1 }
 0x562   : > { %v3137_v40 = vsel %vm3109_vm7, %v2969_v30, %v8117_v56 }
 0x563   : > { %v8452_v37 = vpop.eup %8451  ;;  %v3155_v41 = vpack.c.bf16 %v3137_v40, %v3136_v0  ;;  %v3352_v5 = vmul.f32 0.044715, %v3254_v13  ;;  %v3479_v1 = vmul.f32 0.7978846, %v3447_v50  ;;  %v8120_v50 = vpop.permute.xlu2 %8119  ;;  %v3320_v56 = vmul.f32 0.5, %v3254_v13 }
 0x564   : > { %v3542_v61 = vadd.f32 1.0, %v8452_v37 }
 0x565   : > { %v3384_v49 = vmul.f32 %v3352_v5, %v3254_v13  ;;  %7813 = vmatmul.msk.bf16.gmra.mxu3 %vm3169_vm10, %v3155_v41  ;;  %8453 = vtanh.f32 %v3479_v1  ;;  %v8122_v5 = vunpack.i.h.bf16 %v8120_v50 }
 0x566   : > { %v10665_v63 = vmul.f32 %v3542_v61, %v3318_v29  ;;  %v8121_v29 = vunpack.i.l.bf16 %v8120_v50 }
 0x567   : > { %v2971_v54 = vpop.f32.mrf.mxu2  ;;  %v3416_v23 = vmul.f32 %v3384_v49, %v3254_v13 }
 0x568   : > { %v3256_v58 = vpop.f32.mrf.mxu3  ;;  %v8143_v17 = vpack.i.bf16 %v10665_v63, %v10663_v25  ;;  %v2972_v40 = vadd.f32 %v2971_v54, %v2882_v11  ;;  %v3319_v54 = vmul.f32 0.5, %v10651_v44 }
 0x569   : > { %v10672_v27 = vadd.f32 %v10582_v2, %v3256_v58  ;;  %v3448_v59 = vadd.f32 %v3416_v23, %v3254_v13  ;;  %v2887_v28 = vpop.f32.mrf.mxu1 }
 0x56a   : > { %8144 = vrot.lane.b32.xlu1 %v8143_v17, %s8768_s18  ;;  %v3138_v17 = vsel %vm3109_vm7, %v2972_v40, %v8121_v29 }
 0x56b   : > { %v3353_v61 = vmul.f32 0.044715, %v10672_v27  ;;  %v3480_v30 = vmul.f32 0.7978846, %v3448_v59  ;;  %v8454_v45 = vpop.eup %8453 }
 0x56c   : > { %v3543_v34 = vadd.f32 1.0, %v8454_v45 }
 0x56d   : > { %v3385_v0 = vmul.f32 %v3353_v61, %v10672_v27  ;;  %8455 = vtanh.f32 %v3480_v30 }
 0x56f   : > { %v2973_v37 = vpop.f32.mrf.mxu2  ;;  %v3417_v41 = vmul.f32 %v3385_v0, %v10672_v27 }
 0x570   : > { %v2974_v49 = vadd.f32 %v2973_v37, %v2884_v36  ;;  %v3258_v23 = vpop.f32.mrf.mxu3  ;;  %v10684_v37 = vmul.f32 %v3543_v34, %v3319_v54 }
 0x571   : > { %v3259_v1 = vadd.f32 %v10582_v2, %v3258_v23  ;;  %v3449_v58 = vadd.f32 %v3417_v41, %v10672_v27 }
 0x572   : > { %v3139_v59 = vsel %vm3109_vm7, %v2974_v49, %v8122_v5 }
 0x573   : > { %v8456_v61 = vpop.eup %8455  ;;  %v3156_v30 = vpack.c.bf16 %v3139_v59, %v3138_v17  ;;  %v3354_v11 = vmul.f32 0.044715, %v3259_v1  ;;  %v3481_v36 = vmul.f32 0.7978846, %v3449_v58  ;;  %v8125_v17 = vpop.permute.xlu0 %8124 }
 0x574   : > { %v3544_v0 = vadd.f32 1.0, %v8456_v61  ;;  %v2889_v59 = vpop.f32.mrf.mxu1  ;;  %v8126_v54 = vunpack.i.l.bf16 %v8125_v17 }
 0x575   : > { %v3386_v50 = vmul.f32 %v3354_v11, %v3259_v1  ;;  %7814 = vmatmul.msk.bf16.gmra.mxu3 %vm3169_vm10, %v3156_v30  ;;  %8457 = vtanh.f32 %v3481_v36  ;;  %v8127_v11 = vunpack.i.h.bf16 %v8125_v17 }
 0x576   : > { %v10686_v41 = vmul.f32 %v3544_v0, %v3320_v56 }
 0x577   : > { %v2976_v40 = vpop.f32.mrf.mxu2  ;;  %v3418_v29 = vmul.f32 %v3386_v50, %v3259_v1 }
 0x578   : > { %v3261_v5 = vpop.f32.mrf.mxu3  ;;  %v8148_v45 = vpack.i.bf16 %v10686_v41, %v10684_v37  ;;  %v2977_v34 = vadd.f32 %v2976_v40, %v2887_v28  ;;  %v3321_v28 = vmul.f32 0.5, %v10672_v27  ;;  %v3322_v40 = vmul.f32 0.5, %v3259_v1 }
 0x579   : > { %v3262_v49 = vadd.f32 %v10582_v2, %v3261_v5  ;;  %v3450_v44 = vadd.f32 %v3418_v29, %v3259_v1 }
 0x57a   : > { %8149 = vrot.lane.b32.xlu2 %v8148_v45, %s8768_s18  ;;  %v3140_v36 = vsel %vm3109_vm7, %v2977_v34, %v8126_v54 }
 0x57b   : > { %v3355_v13 = vmul.f32 0.044715, %v3262_v49  ;;  %v3482_v23 = vmul.f32 0.7978846, %v3450_v44  ;;  %v8458_v56 = vpop.eup %8457 }
 0x57c   : > { %v3545_v44 = vadd.f32 1.0, %v8458_v56 }
 0x57d   : > { %v3387_v58 = vmul.f32 %v3355_v13, %v3262_v49  ;;  %8459 = vtanh.f32 %v3482_v23 }
 0x57f   : > { %v2978_v61 = vpop.f32.mrf.mxu2  ;;  %v3419_v30 = vmul.f32 %v3387_v58, %v3262_v49 }
 0x580   : > { %v2979_v0 = vadd.f32 %v2978_v61, %v2889_v59  ;;  %v3263_v50 = vpop.f32.mrf.mxu3  ;;  %v10697_v59 = vmul.f32 %v3545_v44, %v3321_v28 }
 0x581   : > { %v3264_v5 = vadd.f32 %v10582_v2, %v3263_v50  ;;  %v3451_v29 = vadd.f32 %v3419_v30, %v3262_v49 }
 0x582   : > { %v3141_v45 = vsel %vm3109_vm7, %v2979_v0, %v8127_v11 }
 0x583   : > { %v8460_v62 = vpop.eup %8459  ;;  %v3157_v13 = vpack.c.bf16 %v3141_v45, %v3140_v36  ;;  %v3356_v23 = vmul.f32 0.044715, %v3264_v5  ;;  %v3483_v17 = vmul.f32 0.7978846, %v3451_v29  ;;  %v3324_v28 = vmul.f32 0.5, %v3264_v5 }
 0x584   : > { %v3546_v32 = vadd.f32 1.0, %v8460_v62 }
 0x585   : > { %v3388_v58 = vmul.f32 %v3356_v23, %v3264_v5  ;;  %7815 = vmatmul.msk.bf16.gmra.mxu3 %vm3169_vm10, %v3157_v13  ;;  %8461 = vtanh.f32 %v3483_v17  ;;  %v3323_v23 = vmul.f32 0.5, %v3262_v49 }
 0x586   : > { %v10699_v61 = vmul.f32 %v3546_v32, %v3322_v40 }
 0x587   : > { %v3420_v30 = vmul.f32 %v3388_v58, %v3264_v5 }
 0x588   : > { %v3266_v34 = vpop.f32.mrf.mxu3  ;;  %v8153_v56 = vpack.i.bf16 %v10699_v61, %v10697_v59 }
 0x589   : > { %v3267_v11 = vadd.f32 %v10582_v2, %v3266_v34  ;;  %v3452_v54 = vadd.f32 %v3420_v30, %v3264_v5 }
 0x58a   : > { %8154 = vrot.lane.b32.xlu0 %v8153_v56, %s8768_s18 }
 0x58b   : > { %v3357_v62 = vmul.f32 0.044715, %v3267_v11  ;;  %v3484_v27 = vmul.f32 0.7978846, %v3452_v54  ;;  %v8462_v0 = vpop.eup %8461 }
 0x58c   : > { %v3547_v45 = vadd.f32 1.0, %v8462_v0 }
 0x58d   : > { %v3389_v1 = vmul.f32 %v3357_v62, %v3267_v11  ;;  %8463 = vtanh.f32 %v3484_v27 }
 0x58e   : > { %v3579_v30 = vmul.f32 %v3547_v45, %v3323_v23 }
 0x58f   : > { %v3421_v50 = vmul.f32 %v3389_v1, %v3267_v11 }
 0x590   : > { %v3268_v29 = vpop.f32.mrf.mxu3 }
 0x591   : > { %v3269_v32 = vadd.f32 %v10582_v2, %v3268_v29  ;;  %v3453_v36 = vadd.f32 %v3421_v50, %v3267_v11 }
 0x593   : > { %v8464_v44 = vpop.eup %8463  ;;  %v3358_v13 = vmul.f32 0.044715, %v3269_v32  ;;  %v3485_v17 = vmul.f32 0.7978846, %v3453_v36 }
 0x594   : > { %v3548_v40 = vadd.f32 1.0, %v8464_v44 }
 0x595   : > { %v3390_v58 = vmul.f32 %v3358_v13, %v3269_v32  ;;  %8465 = vtanh.f32 %v3485_v17 }
 0x596   : > { %v3580_v34 = vmul.f32 %v3548_v40, %v3324_v28  ;;  %v3325_v40 = vmul.f32 0.5, %v3267_v11 }
 0x597   : > { %v3422_v56 = vmul.f32 %v3390_v58, %v3269_v32  ;;  %v3326_v58 = vmul.f32 0.5, %v3269_v32 }
 0x598   : > { %v3271_v54 = vpop.f32.mrf.mxu3  ;;  %v8158_v62 = vpack.i.bf16 %v3580_v34, %v3579_v30  ;;  %v3605_v11 = vpack.c.bf16 %v3580_v34, %v3579_v30 }
 0x599   : > { %v3272_v27 = vadd.f32 %v10582_v2, %v3271_v54  ;;  %v3454_v1 = vadd.f32 %v3422_v56, %v3269_v32 }
 0x59a   : > { %8159 = vrot.lane.b32.xlu1 %v8158_v62, %s8768_s18 }
 0x59b   : > { %v3359_v50 = vmul.f32 0.044715, %v3272_v27  ;;  %v3486_v0 = vmul.f32 0.7978846, %v3454_v1  ;;  %v8466_v49 = vpop.eup %8465  ;;  %v3327_v30 = vmul.f32 0.5, %v3272_v27 }
 0x59c   : > { %v3549_v13 = vadd.f32 1.0, %v8466_v49 }
 0x59d   : > { %v3391_v29 = vmul.f32 %v3359_v50, %v3272_v27  ;;  %8467 = vtanh.f32 %v3486_v0 }
 0x59e   : > { %v3581_v57 = vmul.f32 %v3549_v13, %v3325_v40 }
 0x59f   : > { %v3423_v5 = vmul.f32 %v3391_v29, %v3272_v27 }
 0x5a0   : > { %v3273_v44 = vpop.f32.mrf.mxu3 }
 0x5a1   : > { %v3274_v36 = vadd.f32 %v10582_v2, %v3273_v44  ;;  %v3455_v45 = vadd.f32 %v3423_v5, %v3272_v27  ;;  %v13325_v27 = vpack.c.bf16 %v10665_v63, %v10663_v25  ;;  %v13327_v25 = vpack.c.bf16 %v10623_v12, %v10621_v60 }
 0x5a3   : > { %v8468_v23 = vpop.eup %8467  ;;  %v3360_v28 = vmul.f32 0.044715, %v3274_v36  ;;  %v3487_v17 = vmul.f32 0.7978846, %v3455_v45  ;;  %v3328_v34 = vmul.f32 0.5, %v3274_v36 }
 0x5a4   : > { %v3550_v54 = vadd.f32 1.0, %v8468_v23  ;;  %v3604_v23 = vpack.c.bf16 %v10699_v61, %v10697_v59 }
 0x5a5   : > { %v3392_v56 = vmul.f32 %v3360_v28, %v3274_v36  ;;  %8469 = vtanh.f32 %v3487_v17 }
 0x5a6   : > { %v3582_v62 = vmul.f32 %v3550_v54, %v3326_v58 }
 0x5a7   : > { %v3424_v52 = vmul.f32 %v3392_v56, %v3274_v36 }
 0x5a8   : > { %v3276_v1 = vpop.f32.mrf.mxu3  ;;  %v8163_v50 = vpack.i.bf16 %v3582_v62, %v3581_v57  ;;  %v3606_v0 = vpack.c.bf16 %v3582_v62, %v3581_v57 }
 0x5a9   : > { %v3277_v29 = vadd.f32 %v10582_v2, %v3276_v1  ;;  %v3456_v48 = vadd.f32 %v3424_v52, %v3274_v36 }
 0x5aa   : > { %8164 = vrot.lane.b32.xlu2 %v8163_v50, %s8768_s18  ;;  %3615 = vmatpush.bf16.msrb.mxu0 %v3606_v0 }
 0x5ab   : > { %v3361_v49 = vmul.f32 0.044715, %v3277_v29  ;;  %v3488_v5 = vmul.f32 0.7978846, %v3456_v48  ;;  %v8470_v44 = vpop.eup %8469  ;;  %v3603_v48 = vpack.c.bf16 %v10686_v41, %v10684_v37 }
 0x5ac   : > { %v3551_v52 = vadd.f32 1.0, %v8470_v44 }
 0x5ad   : > { %v3393_v32 = vmul.f32 %v3361_v49, %v3277_v29  ;;  %8471 = vtanh.f32 %v3488_v5 }
 0x5ae   : > { %3616 = vmatpush.bf16.msrb.mxu0 %v3605_v11  ;;  %v10716_v62 = vmul.f32 %v3551_v52, %v3327_v30  ;;  %v13326_v11 = vpack.c.bf16 %v10644_v55, %v10642_v6  ;;  %v13328_v6 = vpack.c.bf16 %v10602_v21, %v10600_v10 }
 0x5af   : > { %v3425_v45 = vmul.f32 %v3393_v32, %v3277_v29 }
 0x5b0   : > { %v3278_v13 = vpop.f32.mrf.mxu3 }
 0x5b1   : > { %v3279_v57 = vadd.f32 %v10582_v2, %v3278_v13  ;;  %v3457_v28 = vadd.f32 %v3425_v45, %v3277_v29 }
 0x5b2   : > { %3617 = vmatpush.bf16.msrb.mxu0 %v3604_v23 }
 0x5b3   : > { %v8472_v40 = vpop.eup %8471  ;;  %v3362_v58 = vmul.f32 0.044715, %v3279_v57  ;;  %v3489_v17 = vmul.f32 0.7978846, %v3457_v28 }
 0x5b4   : > { %v3552_v54 = vadd.f32 1.0, %v8472_v40  ;;  %v3329_v40 = vmul.f32 0.5, %v3277_v29 }
 0x5b5   : > { %v3394_v56 = vmul.f32 %v3362_v58, %v3279_v57  ;;  %8473 = vtanh.f32 %v3489_v17  ;;  %v3330_v58 = vmul.f32 0.5, %v3279_v57 }
 0x5b6   : > { %3618 = vmatpush.bf16.msrb.mxu0 %v3603_v48  ;;  %v10718_v1 = vmul.f32 %v3552_v54, %v3328_v34 }
 0x5b7   : > { %v3426_v59 = vmul.f32 %v3394_v56, %v3279_v57 }
 0x5b8   : > { %v3281_v61 = vpop.f32.mrf.mxu3  ;;  %v8168_v50 = vpack.i.bf16 %v10718_v1, %v10716_v62 }
 0x5b9   : > { %v3282_v37 = vadd.f32 %v10582_v2, %v3281_v61  ;;  %v3458_v41 = vadd.f32 %v3426_v59, %v3279_v57 }
 0x5ba   : > { %3619 = vmatpush.bf16.msrb.mxu0 %v13325_v27  ;;  %8169 = vrot.lane.b32.xlu0 %v8168_v50, %s8768_s18 }
 0x5bb   : > { %v3363_v36 = vmul.f32 0.044715, %v3282_v37  ;;  %v3490_v49 = vmul.f32 0.7978846, %v3458_v41  ;;  %v8474_v32 = vpop.eup %8473 }
 0x5bc   : > { %v3553_v63 = vadd.f32 1.0, %v8474_v32  ;;  %v3331_v32 = vmul.f32 0.5, %v3282_v37 }
 0x5bd   : > { %v3395_v5 = vmul.f32 %v3363_v36, %v3282_v37  ;;  %8475 = vtanh.f32 %v3490_v49 }
 0x5be   : > { %3620 = vmatpush.bf16.msrb.mxu0 %v13326_v11  ;;  %v10739_v55 = vmul.f32 %v3553_v63, %v3329_v40 }
 0x5bf   : > { %v3427_v44 = vmul.f32 %v3395_v5, %v3282_v37 }
 0x5c0   : > { %v3283_v45 = vpop.f32.mrf.mxu3 }
 0x5c1   : > { %v3284_v13 = vadd.f32 %v10582_v2, %v3283_v45  ;;  %v3459_v23 = vadd.f32 %v3427_v44, %v3282_v37 }
 0x5c2   : > { %3621 = vmatpush.bf16.msrb.mxu0 %v13327_v25 }
 0x5c3   : > { %v8476_v28 = vpop.eup %8475  ;;  %v3364_v52 = vmul.f32 0.044715, %v3284_v13  ;;  %v3491_v34 = vmul.f32 0.7978846, %v3459_v23  ;;  %v3332_v44 = vmul.f32 0.5, %v3284_v13 }
 0x5c4   : > { %v3554_v48 = vadd.f32 1.0, %v8476_v28 }
 0x5c5   : > { %v3396_v30 = vmul.f32 %v3364_v52, %v3284_v13  ;;  %8477 = vtanh.f32 %v3491_v34 }
 0x5c6   : > { %3622 = vmatpush.bf16.msrb.mxu0 %v13328_v6  ;;  %v10741_v54 = vmul.f32 %v3554_v48, %v3330_v58 }
 0x5c7   : > { %v3428_v56 = vmul.f32 %v3396_v30, %v3284_v13 }
 0x5c8   : > { %v3286_v17 = vpop.f32.mrf.mxu3  ;;  %v8173_v60 = vpack.i.bf16 %v10741_v54, %v10739_v55 }
 0x5c9   : > { %v3287_v29 = vadd.f32 %v10582_v2, %v3286_v17  ;;  %3623 = vmatmul.bf16.vlgmr.msrb.gmra.mxu0 %v13314_v33  ;;  %v3460_v57 = vadd.f32 %v3428_v56, %v3284_v13 }
 0x5ca   : > { %8174 = vrot.lane.b32.xlu1 %v8173_v60, %s8768_s18 }
 0x5cb   : > { %v3365_v10 = vmul.f32 0.044715, %v3287_v29  ;;  %v3492_v21 = vmul.f32 0.7978846, %v3460_v57  ;;  %v8478_v61 = vpop.eup %8477 }
 0x5cc   : > { %v3555_v49 = vadd.f32 1.0, %v8478_v61 }
 0x5cd   : > { %v3397_v59 = vmul.f32 %v3365_v10, %v3287_v29  ;;  %8479 = vtanh.f32 %v3492_v21 }
 0x5ce   : > { %v10751_v63 = vmul.f32 %v3555_v49, %v3331_v32 }
 0x5cf   : > { %v3429_v50 = vmul.f32 %v3397_v59, %v3287_v29 }
 0x5d0   : > { %v3288_v41 = vpop.f32.mrf.mxu3 }
 0x5d1   : > { %v3289_v27 = vadd.f32 %v10582_v2, %v3288_v41  ;;  %v3461_v36 = vadd.f32 %v3429_v50, %v3287_v29  ;;  %v3333_v50 = vmul.f32 0.5, %v3287_v29 }
 0x5d3   : > { %v8480_v5 = vpop.eup %8479  ;;  %v3366_v11 = vmul.f32 0.044715, %v3289_v27  ;;  %v3493_v25 = vmul.f32 0.7978846, %v3461_v36  ;;  %v3334_v41 = vmul.f32 0.5, %v3289_v27 }
 0x5d4   : > { %v3556_v45 = vadd.f32 1.0, %v8480_v5 }
 0x5d5   : > { %v3398_v23 = vmul.f32 %v3366_v11, %v3289_v27  ;;  %8481 = vtanh.f32 %v3493_v25 }
 0x5d6   : > { %v10753_v28 = vmul.f32 %v3556_v45, %v3332_v44 }
 0x5d7   : > { %v3430_v52 = vmul.f32 %v3398_v23, %v3289_v27 }
 0x5d8   : > { %v3291_v40 = vpop.f32.mrf.mxu3  ;;  %v8178_v58 = vpack.i.bf16 %v10753_v28, %v10751_v63  ;;  %v3609_v48 = vpack.c.bf16 %v10753_v28, %v10751_v63 }
 0x5d9   : > { %v3292_v30 = vadd.f32 %v10582_v2, %v3291_v40  ;;  %3628 = vmatmul.bf16.gmra.mxu0 %v13315_v8  ;;  %v3462_v37 = vadd.f32 %v3430_v52, %v3289_v27 }
 0x5da   : > { %8179 = vrot.lane.b32.xlu2 %v8178_v58, %s8768_s18 }
 0x5db   : > { %v3367_v13 = vmul.f32 0.044715, %v3292_v30  ;;  %v3494_v34 = vmul.f32 0.7978846, %v3462_v37  ;;  %v8482_v56 = vpop.eup %8481 }
 0x5dc   : > { %v3557_v21 = vadd.f32 1.0, %v8482_v56 }
 0x5dd   : > { %v3399_v6 = vmul.f32 %v3367_v13, %v3292_v30  ;;  %8483 = vtanh.f32 %v3494_v34 }
 0x5de   : > { %v10763_v11 = vmul.f32 %v3557_v21, %v3333_v50  ;;  %v3335_v21 = vmul.f32 0.5, %v3292_v30 }
 0x5df   : > { %v3431_v17 = vmul.f32 %v3399_v6, %v3292_v30 }
 0x5e0   : > { %v3293_v60 = vpop.f32.mrf.mxu3 }
 0x5e1   : > { %v3294_v57 = vadd.f32 %v10582_v2, %v3293_v60  ;;  %v3463_v10 = vadd.f32 %v3431_v17, %v3292_v30 }
 0x5e3   : > { %v8484_v59 = vpop.eup %8483  ;;  %v3368_v61 = vmul.f32 0.044715, %v3294_v57  ;;  %v3495_v5 = vmul.f32 0.7978846, %v3463_v10 }
 0x5e4   : > { %v3558_v36 = vadd.f32 1.0, %v8484_v59  ;;  %v3336_v59 = vmul.f32 0.5, %v3294_v57 }
 0x5e5   : > { %v3400_v49 = vmul.f32 %v3368_v61, %v3294_v57  ;;  %8485 = vtanh.f32 %v3495_v5 }
 0x5e6   : > { %v10765_v32 = vmul.f32 %v3558_v36, %v3334_v41 }
 0x5e7   : > { %v3432_v44 = vmul.f32 %v3400_v49, %v3294_v57 }
 0x5e8   : > { %v3296_v45 = vpop.f32.mrf.mxu3  ;;  %v8183_v23 = vpack.i.bf16 %v10765_v32, %v10763_v11  ;;  %v3610_v25 = vpack.c.bf16 %v10765_v32, %v10763_v11 }
 0x5e9   : > { %v3297_v52 = vadd.f32 %v10582_v2, %v3296_v45  ;;  %3633 = vmatmul.bf16.gmra.mxu0 %v13316_v4  ;;  %v3464_v29 = vadd.f32 %v3432_v44, %v3294_v57 }
 0x5ea   : > { %8184 = vrot.lane.b32.xlu0 %v8183_v23, %s8768_s18 }
 0x5eb   : > { %v3369_v27 = vmul.f32 0.044715, %v3297_v52  ;;  %v3496_v40 = vmul.f32 0.7978846, %v3464_v29  ;;  %v8486_v37 = vpop.eup %8485 }
 0x5ec   : > { %v3559_v17 = vadd.f32 1.0, %v8486_v37 }
 0x5ed   : > { %v3401_v58 = vmul.f32 %v3369_v27, %v3297_v52  ;;  %8487 = vtanh.f32 %v3496_v40 }
 0x5ee   : > { %v10775_v36 = vmul.f32 %v3559_v17, %v3335_v21 }
 0x5ef   : > { %v3433_v13 = vmul.f32 %v3401_v58, %v3297_v52 }
 0x5f0   : > { %v3298_v34 = vpop.f32.mrf.mxu3 }
 0x5f1   : > { %v3299_v6 = vadd.f32 %v10582_v2, %v3298_v34  ;;  %v3465_v56 = vadd.f32 %v3433_v13, %v3297_v52 }
 0x5f3   : > { %v8488_v60 = vpop.eup %8487  ;;  %v3370_v10 = vmul.f32 0.044715, %v3299_v6  ;;  %v3497_v41 = vmul.f32 0.7978846, %v3465_v56  ;;  %v3338_v21 = vmul.f32 0.5, %v3299_v6 }
 0x5f4   : > { %v3560_v61 = vadd.f32 1.0, %v8488_v60 }
 0x5f5   : > { %v3402_v50 = vmul.f32 %v3370_v10, %v3299_v6  ;;  %8489 = vtanh.f32 %v3497_v41  ;;  %v3337_v10 = vmul.f32 0.5, %v3297_v52 }
 0x5f6   : > { %v10777_v49 = vmul.f32 %v3560_v61, %v3336_v59 }
 0x5f7   : > { %v3434_v5 = vmul.f32 %v3402_v50, %v3299_v6 }
 0x5f8   : > { %v3301_v44 = vpop.f32.mrf.mxu3  ;;  %v8188_v45 = vpack.i.bf16 %v10777_v49, %v10775_v36 }
 0x5f9   : > { %v3302_v23 = vadd.f32 %v10582_v2, %v3301_v44  ;;  %3638 = vmatmul.bf16.gmra.mxu0 %v9813_v24  ;;  %v3466_v29 = vadd.f32 %v3434_v5, %v3299_v6 }
 0x5fa   : > { %8189 = vrot.lane.b32.xlu1 %v8188_v45, %s8768_s18 }
 0x5fb   : > { %v3371_v30 = vmul.f32 0.044715, %v3302_v23  ;;  %v3498_v57 = vmul.f32 0.7978846, %v3466_v29  ;;  %v8490_v40 = vpop.eup %8489 }
 0x5fc   : > { %v3561_v56 = vadd.f32 1.0, %v8490_v40 }
 0x5fd   : > { %v3403_v27 = vmul.f32 %v3371_v30, %v3302_v23  ;;  %8491 = vtanh.f32 %v3498_v57  ;;  %v13329_v57 = vld [vmem:[#allocation26_spill] sm:$0xff] }
 0x5fe   : > { %v3593_v41 = vmul.f32 %v3561_v56, %v3337_v10 }
 0x5ff   : > { %v3435_v58 = vmul.f32 %v3403_v27, %v3302_v23 }
 0x600   : > { %v3303_v37 = vpop.f32.mrf.mxu3 }
 0x601   : > { %v3304_v13 = vadd.f32 %v10582_v2, %v3303_v37  ;;  %v3467_v34 = vadd.f32 %v3435_v58, %v3302_v23 }
 0x603   : > { %v8492_v17 = vpop.eup %8491  ;;  %v3372_v60 = vmul.f32 0.044715, %v3304_v13  ;;  %v3499_v50 = vmul.f32 0.7978846, %v3467_v34 }
 0x604   : > { %v3562_v59 = vadd.f32 1.0, %v8492_v17 }
 0x605   : > { %v3404_v61 = vmul.f32 %v3372_v60, %v3304_v13  ;;  %8493 = vtanh.f32 %v3499_v50 }
 0x606   : > { %v3594_v5 = vmul.f32 %v3562_v59, %v3338_v21  ;;  %v3339_v59 = vmul.f32 0.5, %v3302_v23 }
 0x607   : > { %v3436_v44 = vmul.f32 %v3404_v61, %v3304_v13  ;;  %v3340_v61 = vmul.f32 0.5, %v3304_v13 }
 0x608   : > { %v3306_v45 = vpop.f32.mrf.mxu3  ;;  %v8193_v29 = vpack.i.bf16 %v3594_v5, %v3593_v41 }
 0x609   : > { %v3307_v30 = vadd.f32 %v10582_v2, %v3306_v45  ;;  %3643 = vmatmul.bf16.gmra.mxu0 %v13329_v57  ;;  %v3468_v27 = vadd.f32 %v3436_v44, %v3304_v13 }
 0x60a   : > { %8194 = vrot.lane.b32.xlu2 %v8193_v29, %s8768_s18 }
 0x60b   : > { %v3373_v40 = vmul.f32 0.044715, %v3307_v30  ;;  %v3500_v58 = vmul.f32 0.7978846, %v3468_v27  ;;  %v8494_v6 = vpop.eup %8493  ;;  %v3341_v23 = vmul.f32 0.5, %v3307_v30 }
 0x60c   : > { %v3563_v60 = vadd.f32 1.0, %v8494_v6 }
 0x60d   : > { %v3405_v52 = vmul.f32 %v3373_v40, %v3307_v30  ;;  %8495 = vtanh.f32 %v3500_v58 }
 0x60e   : > { %v3595_v0 = vmul.f32 %v3563_v60, %v3339_v59  ;;  %v3611_v59 = vpack.c.bf16 %v10777_v49, %v10775_v36  ;;  %v8009_v36 = vld [vmem:[%s12915_s7 + $0x8] sm:$0xff] }
 0x60f   : > { %v3437_v37 = vmul.f32 %v3405_v52, %v3307_v30 }
 0x610   : > { %v3308_v34 = vpop.f32.mrf.mxu3 }
 0x611   : > { %v3309_v56 = vadd.f32 %v10582_v2, %v3308_v34  ;;  %v3469_v17 = vadd.f32 %v3437_v37, %v3307_v30 }
 0x613   : > { %v8496_v10 = vpop.eup %8495  ;;  %v3374_v21 = vmul.f32 0.044715, %v3309_v56  ;;  %v3501_v50 = vmul.f32 0.7978846, %v3469_v17  ;;  %v3342_v13 = vmul.f32 0.5, %v3309_v56 }
 0x614   : > { %v3564_v45 = vadd.f32 1.0, %v8496_v10 }
 0x615   : > { %v3406_v44 = vmul.f32 %v3374_v21, %v3309_v56  ;;  %8497 = vtanh.f32 %v3501_v50  ;;  %v3612_v21 = vpack.c.bf16 %v3594_v5, %v3593_v41  ;;  %v13331_v41 = vpack.c.bf16 %v10718_v1, %v10716_v62  ;;  %v3974_v1 = vld [vmem:[%s12915_s7 + $0x10] sm:$0xf]  ;;  %v8008_v5 = vld [vmem:[%s12915_s7] sm:$0xff] }
 0x616   : > { %v3596_v29 = vmul.f32 %v3564_v45, %v3340_v61  ;;  %v8130_v61 = vpop.permute.xlu1 %8129 }
 0x617   : > { %v3438_v12 = vmul.f32 %v3406_v44, %v3309_v56  ;;  %v8132_v50 = vunpack.i.h.bf16 %v8130_v61 }
 0x618   : > { %v8198_v27 = vpack.i.bf16 %v3596_v29, %v3595_v0 }
 0x619   : > { %3648 = vmatmul.bf16.gmra.mxu0 %v10044_v9  ;;  %v3470_v40 = vadd.f32 %v3438_v12, %v3309_v56  ;;  %v3613_v12 = vpack.c.bf16 %v3596_v29, %v3595_v0  ;;  %v13330_v0 = vpack.c.bf16 %v10741_v54, %v10739_v55  ;;  %v3988_v54 = vunpack.c.l.b16 %v3974_v1 }
 0x61a   : > { %8199 = vrot.lane.b32.xlu0 %v8198_v27, %s8768_s18  ;;  %v8131_v29 = vunpack.i.l.bf16 %v8130_v61 }
 0x61b   : > { %v3502_v2 = vmul.f32 0.7978846, %v3470_v40  ;;  %v8498_v58 = vpop.eup %8497 }
 0x61c   : > { %v3565_v52 = vadd.f32 1.0, %v8498_v58 }
 0x61d   : > { %8499 = vtanh.f32 %v3502_v2 }
 0x61e   : > { %v3597_v34 = vmul.f32 %v3565_v52, %v3341_v23  ;;  %v8135_v23 = vpop.permute.xlu2 %8134 }
 0x623   : > { %v8500_v6 = vpop.eup %8499 }
 0x624   : > { %v3566_v37 = vadd.f32 1.0, %v8500_v6 }
 0x626   : > { %v3598_v17 = vmul.f32 %v3566_v37, %v3342_v13 }
 0x628   : > { %v8203_v60 = vpack.i.bf16 %v3598_v17, %v3597_v34  ;;  %v3614_v10 = vpack.c.bf16 %v3598_v17, %v3597_v34  ;;  %v8137_v34 = vunpack.i.h.bf16 %v8135_v23  ;;  %v8136_v17 = vunpack.i.l.bf16 %v8135_v23 }
 0x629   : > { %3653 = vmatmul.bf16.gmra.mxu0 %v10058_v18 }
 0x62a   : > { %8204 = vrot.lane.b32.xlu1 %v8203_v60, %s8768_s18  ;;  %3704 = vmatpush.bf16.msrb.mxu1 %v3614_v10 }
 0x62e   : > { %3705 = vmatpush.bf16.msrb.mxu1 %v3613_v12 }
 0x632   : > { %3706 = vmatpush.bf16.msrb.mxu1 %v3612_v21 }
 0x636   : > { %3707 = vmatpush.bf16.msrb.mxu1 %v3611_v59 }
 0x639   : > { %3658 = vmatmul.bf16.gmra.mxu0 %v10072_v26 }
 0x63a   : > { %3708 = vmatpush.bf16.msrb.mxu1 %v3610_v25 }
 0x63e   : > { %3709 = vmatpush.bf16.msrb.mxu1 %v3609_v48  ;;  %v3991_v48 = vpack.c.b16 %v3988_v54, %v3988_v54 }
 0x640   : > { %v4045_v11 = vsel %vm4043_vm13, %v3991_v48, 0 }
 0x641   : > { %4052 = vmatpush.bf16.msrb.mxu2 %v4045_v11 }
 0x642   : > { %3710 = vmatpush.bf16.msrb.mxu1 %v13330_v0 }
 0x645   : > { %4053 = vmatpush.bf16.msrb.mxu2 %v8009_v36 }
 0x646   : > { %3711 = vmatpush.bf16.msrb.mxu1 %v13331_v41  ;;  %v3624_v63 = vpop.f32.mrf.mxu0  ;;  %v13332_v41 = vld [vmem:[#allocation4_spill] sm:$0xff] }
 0x649   : > { %3663 = vmatmul.bf16.gmra.mxu0 %v10086_v31  ;;  %3712 = vmatmul.bf16.vlgmr.msrb.gmra.mxu1 %v10198_v38 }
 0x64a   : > { %4054 = vmatpush.bf16.msrb.mxu2 %v8008_v5 }
 0x64e   : > { %v3626_v55 = vpop.f32.mrf.mxu0 }
 0x656   : > { %v3629_v62 = vpop.f32.mrf.mxu0 }
 0x659   : > { %3668 = vmatmul.bf16.gmra.mxu0 %v10100_v35  ;;  %3717 = vmatmul.bf16.gmra.mxu1 %v10212_v15 }
 0x65e   : > { %v3631_v28 = vpop.f32.mrf.mxu0 }
 0x666   : > { %v3634_v32 = vpop.f32.mrf.mxu0 }
 0x669   : > { %3673 = vmatmul.bf16.gmra.mxu0 %v10114_v39  ;;  %3722 = vmatmul.bf16.gmra.mxu1 %v10226_v7 }
 0x66e   : > { %v3636_v25 = vpop.f32.mrf.mxu0 }
 0x676   : > { %v3639_v49 = vpop.f32.mrf.mxu0 }
 0x679   : > { %3678 = vmatmul.bf16.gmra.mxu0 %v10128_v43  ;;  %3727 = vmatmul.bf16.gmra.mxu1 %v10240_v53 }
 0x67e   : > { %v3641_v30 = vpop.f32.mrf.mxu0 }
 0x686   : > { %v3644_v6 = vpop.f32.mrf.mxu0 }
 0x689   : > { %3683 = vmatmul.bf16.gmra.mxu0 %v10142_v47  ;;  %3732 = vmatmul.bf16.gmra.mxu1 %v10257_v3 }
 0x68e   : > { %v3646_v21 = vpop.f32.mrf.mxu0 }
 0x699   : > { %3688 = vmatmul.bf16.gmra.mxu0 %v10156_v51  ;;  %3737 = vmatmul.bf16.gmra.mxu1 %v10271_v22 }
 0x6a9   : > { %3693 = vmatmul.bf16.gmra.mxu0 %v10170_v20  ;;  %3742 = vmatmul.bf16.gmra.mxu1 %v10285_v16 }
 0x6b9   : > { %3698 = vmatmul.bf16.gmra.mxu0 %v10184_v42  ;;  %3747 = vmatmul.bf16.gmra.mxu1 %v10301_v46 }
 0x6c6   : > { %v3713_v56 = vpop.f32.mrf.mxu1 }
 0x6c7   : > { %v3714_v45 = vadd.f32 %v3713_v56, %v3624_v63  ;;  %v8140_v63 = vpop.permute.xlu0 %8139 }
 0x6c8   : > { %v8141_v48 = vunpack.i.l.bf16 %v8140_v63 }
 0x6c9   : > { %3752 = vmatmul.bf16.gmra.mxu1 %v10305_v14  ;;  %v3922_v40 = vsel %vm3921_vm6, %v3714_v45, %v8131_v29  ;;  %v13333_v45 = vld [vmem:[#allocation5_spill] sm:$0xff] }
 0x6ce   : > { %v3715_v44 = vpop.f32.mrf.mxu1 }
 0x6cf   : > { %v3716_v27 = vadd.f32 %v3715_v44, %v3626_v55  ;;  %v3649_v55 = vpop.f32.mrf.mxu0  ;;  %v8145_v44 = vpop.permute.xlu1 %8144 }
 0x6d1   : > { %v3923_v2 = vsel %vm3921_vm6, %v3716_v27, %v8132_v50  ;;  %v8147_v27 = vunpack.i.h.bf16 %v8145_v44 }
 0x6d2   : > { %v3954_v58 = vpack.c.bf16 %v3923_v2, %v3922_v40 }
 0x6d4   : > { %7824 = vmatmul.msk.bf16.vlgmr.msrb.gmra.mxu2 %vm3994_vm3, %v3954_v58 }
 0x6d6   : > { %v3718_v52 = vpop.f32.mrf.mxu1 }
 0x6d7   : > { %v3719_v13 = vadd.f32 %v3718_v52, %v3629_v62  ;;  %v8142_v62 = vunpack.i.h.bf16 %v8140_v63  ;;  %v3651_v56 = vpop.f32.mrf.mxu0 }
 0x6d9   : > { %3757 = vmatmul.bf16.gmra.mxu1 %v10309_v19  ;;  %v3924_v10 = vsel %vm3921_vm6, %v3719_v13, %v8136_v17  ;;  %v13334_v13 = vld [vmem:[#allocation6_spill] sm:$0xff] }
 0x6de   : > { %v3720_v37 = vpop.f32.mrf.mxu1 }
 0x6df   : > { %v3721_v60 = vadd.f32 %v3720_v37, %v3631_v28  ;;  %v3654_v2 = vpop.f32.mrf.mxu0 }
 0x6e1   : > { %v3925_v12 = vsel %vm3921_vm6, %v3721_v60, %v8137_v34  ;;  %v8150_v34 = vpop.permute.xlu2 %8149 }
 0x6e2   : > { %v3955_v59 = vpack.c.bf16 %v3925_v12, %v3924_v10  ;;  %v8151_v10 = vunpack.i.l.bf16 %v8150_v34 }
 0x6e4   : > { %7825 = vmatmul.msk.bf16.gmra.mxu2 %vm3994_vm3, %v3955_v59 }
 0x6e6   : > { %v3723_v0 = vpop.f32.mrf.mxu1 }
 0x6e7   : > { %v3724_v1 = vadd.f32 %v3723_v0, %v3634_v32  ;;  %v8146_v32 = vunpack.i.l.bf16 %v8145_v44  ;;  %v3656_v37 = vpop.f32.mrf.mxu0 }
 0x6e9   : > { %3762 = vmatmul.bf16.gmra.mxu1 %v13332_v41  ;;  %v3926_v28 = vsel %vm3921_vm6, %v3724_v1, %v8141_v48 }
 0x6ee   : > { %v3725_v54 = vpop.f32.mrf.mxu1 }
 0x6ef   : > { %v3726_v11 = vadd.f32 %v3725_v54, %v3636_v25  ;;  %v3659_v63 = vpop.f32.mrf.mxu0  ;;  %v13335_v54 = vld [vmem:[#allocation7_spill] sm:$0xff] }
 0x6f1   : > { %v3927_v36 = vsel %vm3921_vm6, %v3726_v11, %v8142_v62  ;;  %v8155_v62 = vpop.permute.xlu0 %8154 }
 0x6f2   : > { %v3956_v5 = vpack.c.bf16 %v3927_v36, %v3926_v28  ;;  %v8156_v36 = vunpack.i.l.bf16 %v8155_v62 }
 0x6f4   : > { %7826 = vmatmul.msk.bf16.gmra.mxu2 %vm3994_vm3, %v3956_v5 }
 0x6f6   : > { %v3728_v61 = vpop.f32.mrf.mxu1 }
 0x6f7   : > { %v3729_v50 = vadd.f32 %v3728_v61, %v3639_v49  ;;  %v8152_v49 = vunpack.i.h.bf16 %v8150_v34  ;;  %v3661_v11 = vpop.f32.mrf.mxu0 }
 0x6f9   : > { %3767 = vmatmul.bf16.gmra.mxu1 %v13333_v45  ;;  %v3928_v25 = vsel %vm3921_vm6, %v3729_v50, %v8146_v32  ;;  %v8160_v32 = vpop.permute.xlu1 %8159 }
 0x6fe   : > { %v3730_v29 = vpop.f32.mrf.mxu1 }
 0x6ff   : > { %v3731_v40 = vadd.f32 %v3730_v29, %v3641_v30  ;;  %v3664_v29 = vpop.f32.mrf.mxu0 }
 0x701   : > { %v3929_v58 = vsel %vm3921_vm6, %v3731_v40, %v8147_v27  ;;  %v13336_v27 = vld [vmem:[#allocation8_spill] sm:$0xff] }
 0x702   : > { %v3957_v52 = vpack.c.bf16 %v3929_v58, %v3928_v25  ;;  %v8161_v58 = vunpack.i.l.bf16 %v8160_v32 }
 0x704   : > { %7827 = vmatmul.msk.bf16.gmra.mxu2 %vm3994_vm3, %v3957_v52 }
 0x706   : > { %v3733_v23 = vpop.f32.mrf.mxu1 }
 0x707   : > { %v3734_v17 = vadd.f32 %v3733_v23, %v3644_v6  ;;  %v8157_v6 = vunpack.i.h.bf16 %v8155_v62  ;;  %v3666_v34 = vpop.f32.mrf.mxu0 }
 0x709   : > { %3772 = vmatmul.bf16.gmra.mxu1 %v13334_v13  ;;  %v3930_v30 = vsel %vm3921_vm6, %v3734_v17, %v8151_v10  ;;  %v8165_v10 = vpop.permute.xlu2 %8164 }
 0x70e   : > { %v3735_v60 = vpop.f32.mrf.mxu1 }
 0x70f   : > { %v3736_v12 = vadd.f32 %v3735_v60, %v3646_v21 }
 0x711   : > { %v3931_v59 = vsel %vm3921_vm6, %v3736_v12, %v8152_v49  ;;  %v13337_v49 = vld [vmem:[#allocation9_spill] sm:$0xff]  ;;  %v3669_v12 = vpop.f32.mrf.mxu0 }
 0x712   : > { %v3958_v0 = vpack.c.bf16 %v3931_v59, %v3930_v30 }
 0x714   : > { %7828 = vmatmul.msk.bf16.gmra.mxu2 %vm3994_vm3, %v3958_v0  ;;  %v8166_v0 = vunpack.i.l.bf16 %v8165_v10 }
 0x716   : > { %v3738_v1 = vpop.f32.mrf.mxu1 }
 0x717   : > { %v3739_v48 = vadd.f32 %v3738_v1, %v3649_v55  ;;  %v8162_v55 = vunpack.i.h.bf16 %v8160_v32 }
 0x719   : > { %3777 = vmatmul.bf16.gmra.mxu1 %v13335_v54  ;;  %v3932_v21 = vsel %vm3921_vm6, %v3739_v48, %v8156_v36  ;;  %v8170_v36 = vpop.permute.xlu0 %8169 }
 0x71e   : > { %v3740_v28 = vpop.f32.mrf.mxu1 }
 0x71f   : > { %v3741_v5 = vadd.f32 %v3740_v28, %v3651_v56  ;;  %v3671_v28 = vpop.f32.mrf.mxu0 }
 0x721   : > { %v3933_v61 = vsel %vm3921_vm6, %v3741_v5, %v8157_v6 }
 0x722   : > { %v3959_v44 = vpack.c.bf16 %v3933_v61, %v3932_v21  ;;  %v8172_v61 = vunpack.i.h.bf16 %v8170_v36 }
 0x724   : > { %7829 = vmatmul.msk.bf16.gmra.mxu2 %vm3994_vm3, %v3959_v44  ;;  %v8171_v44 = vunpack.i.l.bf16 %v8170_v36 }
 0x726   : > { %v3743_v50 = vpop.f32.mrf.mxu1 }
 0x727   : > { %v3744_v40 = vadd.f32 %v3743_v50, %v3654_v2  ;;  %v8167_v2 = vunpack.i.h.bf16 %v8165_v10 }
 0x729   : > { %3782 = vmatmul.bf16.gmra.mxu1 %v13336_v27  ;;  %v3934_v23 = vsel %vm3921_vm6, %v3744_v40, %v8161_v58 }
 0x72e   : > { %v3745_v25 = vpop.f32.mrf.mxu1 }
 0x72f   : > { %v3746_v52 = vadd.f32 %v3745_v25, %v3656_v37  ;;  %v10872_v25 = vld [vmem:[%s12916_s8] ss:$0 sm:$0xff] }
 0x731   : > { %v3935_v56 = vsel %vm3921_vm6, %v3746_v52, %v8162_v55 }
 0x732   : > { %v3960_v17 = vpack.c.bf16 %v3935_v56, %v3934_v23  ;;  %v8175_v56 = vpop.permute.xlu1 %8174 }
 0x734   : > { %7830 = vmatmul.msk.bf16.gmra.mxu2 %vm3994_vm3, %v3960_v17 }
 0x736   : > { %v3748_v60 = vpop.f32.mrf.mxu1 }
 0x737   : > { %v3749_v30 = vadd.f32 %v3748_v60, %v3659_v63  ;;  %v3674_v63 = vpop.f32.mrf.mxu0 }
 0x739   : > { %3787 = vmatmul.bf16.gmra.mxu1 %v13337_v49  ;;  %v3936_v37 = vsel %vm3921_vm6, %v3749_v30, %v8166_v0  ;;  %v8177_v30 = vunpack.i.h.bf16 %v8175_v56 }
 0x73e   : > { %v3750_v59 = vpop.f32.mrf.mxu1 }
 0x73f   : > { %v3751_v1 = vadd.f32 %v3750_v59, %v3661_v11  ;;  %v3676_v52 = vpop.f32.mrf.mxu0  ;;  %v8176_v59 = vunpack.i.l.bf16 %v8175_v56 }
 0x741   : > { %v3937_v62 = vsel %vm3921_vm6, %v3751_v1, %v8167_v2 }
 0x742   : > { %v3961_v48 = vpack.c.bf16 %v3937_v62, %v3936_v37 }
 0x744   : > { %7831 = vmatmul.msk.bf16.gmra.mxu2 %vm3994_vm3, %v3961_v48 }
 0x746   : > { %v3753_v6 = vpop.f32.mrf.mxu1 }
 0x747   : > { %v3754_v5 = vadd.f32 %v3753_v6, %v3664_v29 }
 0x749   : > { %v3938_v32 = vsel %vm3921_vm6, %v3754_v5, %v8171_v44  ;;  %v3679_v5 = vpop.f32.mrf.mxu0 }
 0x74e   : > { %v3755_v21 = vpop.f32.mrf.mxu1 }
 0x74f   : > { %v3756_v50 = vadd.f32 %v3755_v21, %v3666_v34 }
 0x751   : > { %v3939_v11 = vsel %vm3921_vm6, %v3756_v50, %v8172_v61 }
 0x752   : > { %v3962_v40 = vpack.c.bf16 %v3939_v11, %v3938_v32 }
 0x754   : > { %7832 = vmatmul.msk.bf16.gmra.mxu2 %vm3994_vm3, %v3962_v40 }
 0x756   : > { %v3758_v55 = vpop.f32.mrf.mxu1 }
 0x757   : > { %v4056_v58 = vpop.f32.mrf.mxu2  ;;  %v3759_v17 = vadd.f32 %v3758_v55, %v3669_v12  ;;  %v8180_v55 = vpop.permute.xlu2 %8179 }
 0x758   : > { %v4057_v29 = vadd.f32 %v10872_v25, %v4056_v58 }
 0x759   : > { %v3940_v62 = vsel %vm3921_vm6, %v3759_v17, %v8176_v59 }
 0x75a   : > { %v4168_v23 = vmul.f32 0.044715, %v4057_v29 }
 0x75c   : > { %v4200_v34 = vmul.f32 %v4168_v23, %v4057_v29 }
 0x75e   : > { %v3760_v60 = vpop.f32.mrf.mxu1  ;;  %v4232_v10 = vmul.f32 %v4200_v34, %v4057_v29  ;;  %v3681_v34 = vpop.f32.mrf.mxu0 }
 0x75f   : > { %v3761_v2 = vadd.f32 %v3760_v60, %v3671_v28  ;;  %v4058_v0 = vpop.f32.mrf.mxu2 }
 0x760   : > { %v4059_v1 = vadd.f32 %v10872_v25, %v4058_v0  ;;  %v4264_v37 = vadd.f32 %v4232_v10, %v4057_v29  ;;  %v8182_v10 = vunpack.i.h.bf16 %v8180_v55 }
 0x761   : > { %v3941_v48 = vsel %vm3921_vm6, %v3761_v2, %v8177_v30  ;;  %v8181_v30 = vunpack.i.l.bf16 %v8180_v55 }
 0x762   : > { %v3963_v6 = vpack.c.bf16 %v3941_v48, %v3940_v62  ;;  %v4169_v36 = vmul.f32 0.044715, %v4059_v1  ;;  %v4296_v12 = vmul.f32 0.7978846, %v4264_v37 }
 0x764   : > { %v4201_v21 = vmul.f32 %v4169_v36, %v4059_v1  ;;  %7833 = vmatmul.msk.bf16.gmra.mxu2 %vm3994_vm3, %v3963_v6  ;;  %8501 = vtanh.f32 %v4296_v12  ;;  %v4136_v12 = vmul.f32 0.5, %v4057_v29 }
 0x766   : > { %v3763_v61 = vpop.f32.mrf.mxu1  ;;  %v4233_v44 = vmul.f32 %v4201_v21, %v4059_v1  ;;  %v3684_v29 = vpop.f32.mrf.mxu0 }
 0x767   : > { %v4061_v50 = vpop.f32.mrf.mxu2  ;;  %v3764_v23 = vadd.f32 %v3763_v61, %v3674_v63  ;;  %v4137_v61 = vmul.f32 0.5, %v4059_v1 }
 0x768   : > { %v10880_v28 = vadd.f32 %v10872_v25, %v4061_v50  ;;  %v4265_v32 = vadd.f32 %v4233_v44, %v4059_v1 }
 0x769   : > { %v3942_v62 = vsel %vm3921_vm6, %v3764_v23, %v8181_v30  ;;  %v8185_v30 = vpop.permute.xlu0 %8184 }
 0x76a   : > { %v4170_v11 = vmul.f32 0.044715, %v10880_v28  ;;  %v4297_v40 = vmul.f32 0.7978846, %v4265_v32  ;;  %v8502_v56 = vpop.eup %8501 }
 0x76b   : > { %v4360_v6 = vadd.f32 1.0, %v8502_v56 }
 0x76c   : > { %v4202_v58 = vmul.f32 %v4170_v11, %v10880_v28  ;;  %8503 = vtanh.f32 %v4297_v40 }
 0x76d   : > { %v10890_v32 = vmul.f32 %v4360_v6, %v4136_v12  ;;  %v8187_v6 = vunpack.i.h.bf16 %v8185_v30 }
 0x76e   : > { %v3765_v17 = vpop.f32.mrf.mxu1  ;;  %v4234_v60 = vmul.f32 %v4202_v58, %v10880_v28 }
 0x76f   : > { %v3766_v59 = vadd.f32 %v3765_v17, %v3676_v52  ;;  %v4063_v2 = vpop.f32.mrf.mxu2 }
 0x770   : > { %v4064_v0 = vadd.f32 %v10872_v25, %v4063_v2  ;;  %v4266_v37 = vadd.f32 %v4234_v60, %v10880_v28 }
 0x771   : > { %v3943_v48 = vsel %vm3921_vm6, %v3766_v59, %v8182_v10 }
 0x772   : > { %v8504_v36 = vpop.eup %8503  ;;  %v3964_v63 = vpack.c.bf16 %v3943_v48, %v3942_v62  ;;  %v4171_v21 = vmul.f32 0.044715, %v4064_v0  ;;  %v4298_v52 = vmul.f32 0.7978846, %v4266_v37 }
 0x773   : > { %v4361_v44 = vadd.f32 1.0, %v8504_v36  ;;  %v8186_v36 = vunpack.i.l.bf16 %v8185_v30 }
 0x774   : > { %v4203_v50 = vmul.f32 %v4171_v21, %v4064_v0  ;;  %7834 = vmatmul.msk.bf16.gmra.mxu2 %vm3994_vm3, %v3964_v63  ;;  %8505 = vtanh.f32 %v4298_v52 }
 0x775   : > { %v10892_v11 = vmul.f32 %v4361_v44, %v4137_v61 }
 0x776   : > { %v3768_v40 = vpop.f32.mrf.mxu1  ;;  %v4235_v55 = vmul.f32 %v4203_v50, %v4064_v0 }
 0x777   : > { %v4066_v58 = vpop.f32.mrf.mxu2  ;;  %v8208_v23 = vpack.i.bf16 %v10892_v11, %v10890_v32  ;;  %v3769_v2 = vadd.f32 %v3768_v40, %v3679_v5 }
 0x778   : > { %v10899_v1 = vadd.f32 %v10872_v25, %v4066_v58  ;;  %v4267_v17 = vadd.f32 %v4235_v55, %v4064_v0  ;;  %v3686_v58 = vpop.f32.mrf.mxu0 }
 0x779   : > { %8209 = vrot.lane.b32.xlu2 %v8208_v23, %s8769_s28  ;;  %v3944_v44 = vsel %vm3921_vm6, %v3769_v2, %v8186_v36  ;;  %v4138_v23 = vmul.f32 0.5, %v10880_v28 }
 0x77a   : > { %v4172_v60 = vmul.f32 0.044715, %v10899_v1  ;;  %v4299_v10 = vmul.f32 0.7978846, %v4267_v17  ;;  %v8506_v37 = vpop.eup %8505  ;;  %v4139_v17 = vmul.f32 0.5, %v4064_v0 }
 0x77b   : > { %v4362_v52 = vadd.f32 1.0, %v8506_v37 }
 0x77c   : > { %v4204_v59 = vmul.f32 %v4172_v60, %v10899_v1  ;;  %8507 = vtanh.f32 %v4299_v10 }
 0x77d   : > { %v10911_v30 = vmul.f32 %v4362_v52, %v4138_v23 }
 0x77e   : > { %v3770_v62 = vpop.f32.mrf.mxu1  ;;  %v4236_v48 = vmul.f32 %v4204_v59, %v10899_v1 }
 0x77f   : > { %v3771_v63 = vadd.f32 %v3770_v62, %v3681_v34  ;;  %v4068_v21 = vpop.f32.mrf.mxu2 }
 0x780   : > { %v4069_v12 = vadd.f32 %v10872_v25, %v4068_v21  ;;  %v4268_v61 = vadd.f32 %v4236_v48, %v10899_v1  ;;  %v8190_v21 = vpop.permute.xlu1 %8189 }
 0x781   : > { %v3945_v50 = vsel %vm3921_vm6, %v3771_v63, %v8187_v6  ;;  %v8191_v23 = vunpack.i.l.bf16 %v8190_v21 }
 0x782   : > { %v8508_v55 = vpop.eup %8507  ;;  %v3965_v5 = vpack.c.bf16 %v3945_v50, %v3944_v44  ;;  %v4173_v40 = vmul.f32 0.044715, %v4069_v12  ;;  %v4300_v34 = vmul.f32 0.7978846, %v4268_v61  ;;  %v3689_v61 = vpop.f32.mrf.mxu0 }
 0x783   : > { %v4363_v60 = vadd.f32 1.0, %v8508_v55 }
 0x784   : > { %v4205_v10 = vmul.f32 %v4173_v40, %v4069_v12  ;;  %7835 = vmatmul.msk.bf16.gmra.mxu2 %vm3994_vm3, %v3965_v5  ;;  %8509 = vtanh.f32 %v4300_v34  ;;  %v8192_v40 = vunpack.i.h.bf16 %v8190_v21 }
 0x785   : > { %v10913_v59 = vmul.f32 %v4363_v60, %v4139_v17 }
 0x786   : > { %v3773_v2 = vpop.f32.mrf.mxu1  ;;  %v4237_v62 = vmul.f32 %v4205_v10, %v4069_v12 }
 0x787   : > { %v4071_v48 = vpop.f32.mrf.mxu2  ;;  %v8213_v37 = vpack.i.bf16 %v10913_v59, %v10911_v30  ;;  %v3774_v50 = vadd.f32 %v3773_v2, %v3684_v29  ;;  %v4140_v2 = vmul.f32 0.5, %v10899_v1 }
 0x788   : > { %v10920_v28 = vadd.f32 %v10872_v25, %v4071_v48  ;;  %v4269_v0 = vadd.f32 %v4237_v62, %v4069_v12 }
 0x789   : > { %8214 = vrot.lane.b32.xlu0 %v8213_v37, %s8769_s28  ;;  %v3946_v62 = vsel %vm3921_vm6, %v3774_v50, %v8191_v23 }
 0x78a   : > { %v4174_v36 = vmul.f32 0.044715, %v10920_v28  ;;  %v4301_v63 = vmul.f32 0.7978846, %v4269_v0  ;;  %v8510_v52 = vpop.eup %8509  ;;  %v4142_v6 = vmul.f32 0.5, %v10920_v28 }
 0x78b   : > { %v4364_v37 = vadd.f32 1.0, %v8510_v52 }
 0x78c   : > { %v4206_v44 = vmul.f32 %v4174_v36, %v10920_v28  ;;  %8511 = vtanh.f32 %v4301_v63  ;;  %v4141_v63 = vmul.f32 0.5, %v4069_v12 }
 0x78d   : > { %v10932_v21 = vmul.f32 %v4364_v37, %v4140_v2 }
 0x78e   : > { %v3775_v55 = vpop.f32.mrf.mxu1  ;;  %v4238_v5 = vmul.f32 %v4206_v44, %v10920_v28 }
 0x78f   : > { %v3776_v17 = vadd.f32 %v3775_v55, %v3686_v58  ;;  %v4073_v60 = vpop.f32.mrf.mxu2 }
 0x790   : > { %v4074_v10 = vadd.f32 %v10872_v25, %v4073_v60  ;;  %v4270_v34 = vadd.f32 %v4238_v5, %v10920_v28  ;;  %v3691_v5 = vpop.f32.mrf.mxu0 }
 0x791   : > { %v3947_v48 = vsel %vm3921_vm6, %v3776_v17, %v8192_v40 }
 0x792   : > { %v8512_v0 = vpop.eup %8511  ;;  %v3966_v36 = vpack.c.bf16 %v3947_v48, %v3946_v62  ;;  %v4175_v29 = vmul.f32 0.044715, %v4074_v10  ;;  %v4302_v58 = vmul.f32 0.7978846, %v4270_v34  ;;  %v8195_v62 = vpop.permute.xlu2 %8194 }
 0x793   : > { %v4365_v44 = vadd.f32 1.0, %v8512_v0  ;;  %v8196_v2 = vunpack.i.l.bf16 %v8195_v62 }
 0x794   : > { %v4207_v56 = vmul.f32 %v4175_v29, %v4074_v10  ;;  %7836 = vmatmul.msk.bf16.gmra.mxu2 %vm3994_vm3, %v3966_v36  ;;  %8513 = vtanh.f32 %v4302_v58  ;;  %v8197_v29 = vunpack.i.h.bf16 %v8195_v62 }
 0x795   : > { %v10934_v55 = vmul.f32 %v4365_v44, %v4141_v63 }
 0x796   : > { %v3778_v50 = vpop.f32.mrf.mxu1  ;;  %v4239_v23 = vmul.f32 %v4207_v56, %v4074_v10 }
 0x797   : > { %v4076_v40 = vpop.f32.mrf.mxu2  ;;  %v8218_v52 = vpack.i.bf16 %v10934_v55, %v10932_v21  ;;  %v3779_v48 = vadd.f32 %v3778_v50, %v3689_v61 }
 0x798   : > { %v10941_v12 = vadd.f32 %v10872_v25, %v4076_v40  ;;  %v4271_v17 = vadd.f32 %v4239_v23, %v4074_v10  ;;  %v3694_v23 = vpop.f32.mrf.mxu0 }
 0x799   : > { %8219 = vrot.lane.b32.xlu1 %v8218_v52, %s8769_s28  ;;  %v3948_v52 = vsel %vm3921_vm6, %v3779_v48, %v8196_v2 }
 0x79a   : > { %v4176_v60 = vmul.f32 0.044715, %v10941_v12  ;;  %v4303_v34 = vmul.f32 0.7978846, %v4271_v17  ;;  %v8514_v37 = vpop.eup %8513 }
 0x79c   : > { %v4208_v56 = vmul.f32 %v4176_v60, %v10941_v12  ;;  %8515 = vtanh.f32 %v4303_v34  ;;  %v4366_v60 = vadd.f32 1.0, %v8514_v37 }
 0x79e   : > { %v3780_v0 = vpop.f32.mrf.mxu1  ;;  %v4240_v36 = vmul.f32 %v4208_v56, %v10941_v12  ;;  %v4143_v56 = vmul.f32 0.5, %v4074_v10 }
 0x79f   : > { %v3781_v63 = vadd.f32 %v3780_v0, %v3691_v5  ;;  %v4078_v44 = vpop.f32.mrf.mxu2  ;;  %v10953_v0 = vmul.f32 %v4366_v60, %v4142_v6 }
 0x7a0   : > { %v4079_v58 = vadd.f32 %v10872_v25, %v4078_v44  ;;  %v4272_v40 = vadd.f32 %v4240_v36, %v10941_v12  ;;  %v3696_v6 = vpop.f32.mrf.mxu0 }
 0x7a1   : > { %v3949_v17 = vsel %vm3921_vm6, %v3781_v63, %v8197_v29 }
 0x7a2   : > { %v8516_v34 = vpop.eup %8515  ;;  %v3967_v61 = vpack.c.bf16 %v3949_v17, %v3948_v52  ;;  %v4177_v50 = vmul.f32 0.044715, %v4079_v58  ;;  %v4304_v5 = vmul.f32 0.7978846, %v4272_v40  ;;  %v8200_v40 = vpop.permute.xlu0 %8199  ;;  %v4145_v49 = vmul.f32 0.5, %v4079_v58 }
 0x7a3   : > { %v4367_v1 = vadd.f32 1.0, %v8516_v34 }
 0x7a4   : > { %v4209_v62 = vmul.f32 %v4177_v50, %v4079_v58  ;;  %7837 = vmatmul.msk.bf16.gmra.mxu2 %vm3994_vm3, %v3967_v61  ;;  %8517 = vtanh.f32 %v4304_v5  ;;  %v8202_v50 = vunpack.i.h.bf16 %v8200_v40 }
 0x7a5   : > { %v10955_v44 = vmul.f32 %v4367_v1, %v4143_v56  ;;  %v8201_v56 = vunpack.i.l.bf16 %v8200_v40 }
 0x7a6   : > { %v3783_v36 = vpop.f32.mrf.mxu1  ;;  %v4241_v48 = vmul.f32 %v4209_v62, %v4079_v58 }
 0x7a7   : > { %v4081_v2 = vpop.f32.mrf.mxu2  ;;  %v8223_v37 = vpack.i.bf16 %v10955_v44, %v10953_v0  ;;  %v3784_v17 = vadd.f32 %v3783_v36, %v3694_v23  ;;  %v4144_v36 = vmul.f32 0.5, %v10941_v12 }
 0x7a8   : > { %v10962_v28 = vadd.f32 %v10872_v25, %v4081_v2  ;;  %v4273_v10 = vadd.f32 %v4241_v48, %v4079_v58  ;;  %v3699_v27 = vpop.f32.mrf.mxu0 }
 0x7a9   : > { %8224 = vrot.lane.b32.xlu2 %v8223_v37, %s8769_s28  ;;  %v3950_v37 = vsel %vm3921_vm6, %v3784_v17, %v8201_v56 }
 0x7aa   : > { %v4178_v1 = vmul.f32 0.044715, %v10962_v28  ;;  %v4305_v63 = vmul.f32 0.7978846, %v4273_v10  ;;  %v8518_v60 = vpop.eup %8517 }
 0x7ab   : > { %v4368_v29 = vadd.f32 1.0, %v8518_v60 }
 0x7ac   : > { %v4210_v52 = vmul.f32 %v4178_v1, %v10962_v28  ;;  %8519 = vtanh.f32 %v4305_v63 }
 0x7ae   : > { %v3785_v34 = vpop.f32.mrf.mxu1  ;;  %v4242_v61 = vmul.f32 %v4210_v52, %v10962_v28 }
 0x7af   : > { %v3786_v62 = vadd.f32 %v3785_v34, %v3696_v6  ;;  %v4083_v48 = vpop.f32.mrf.mxu2  ;;  %v10974_v34 = vmul.f32 %v4368_v29, %v4144_v36 }
 0x7b0   : > { %v4084_v5 = vadd.f32 %v10872_v25, %v4083_v48  ;;  %v4274_v2 = vadd.f32 %v4242_v61, %v10962_v28 }
 0x7b1   : > { %v3951_v10 = vsel %vm3921_vm6, %v3786_v62, %v8202_v50 }
 0x7b2   : > { %v8520_v1 = vpop.eup %8519  ;;  %v3968_v63 = vpack.c.bf16 %v3951_v10, %v3950_v37  ;;  %v4179_v23 = vmul.f32 0.044715, %v4084_v5  ;;  %v4306_v6 = vmul.f32 0.7978846, %v4274_v2  ;;  %v8205_v37 = vpop.permute.xlu1 %8204 }
 0x7b3   : > { %v4369_v52 = vadd.f32 1.0, %v8520_v1  ;;  %v3701_v10 = vpop.f32.mrf.mxu0  ;;  %v8206_v36 = vunpack.i.l.bf16 %v8205_v37 }
 0x7b4   : > { %v4211_v40 = vmul.f32 %v4179_v23, %v4084_v5  ;;  %7838 = vmatmul.msk.bf16.gmra.mxu2 %vm3994_vm3, %v3968_v63  ;;  %8521 = vtanh.f32 %v4306_v6  ;;  %v8207_v23 = vunpack.i.h.bf16 %v8205_v37 }
 0x7b5   : > { %v10976_v61 = vmul.f32 %v4369_v52, %v4145_v49 }
 0x7b6   : > { %v3788_v17 = vpop.f32.mrf.mxu1  ;;  %v4243_v56 = vmul.f32 %v4211_v40, %v4084_v5 }
 0x7b7   : > { %v4086_v50 = vpop.f32.mrf.mxu2  ;;  %v8228_v60 = vpack.i.bf16 %v10976_v61, %v10974_v34  ;;  %v3789_v29 = vadd.f32 %v3788_v17, %v3699_v27  ;;  %v4146_v27 = vmul.f32 0.5, %v10962_v28  ;;  %v4147_v17 = vmul.f32 0.5, %v4084_v5 }
 0x7b8   : > { %v4087_v62 = vadd.f32 %v10872_v25, %v4086_v50  ;;  %v4275_v12 = vadd.f32 %v4243_v56, %v4084_v5 }
 0x7b9   : > { %8229 = vrot.lane.b32.xlu0 %v8228_v60, %s8769_s28  ;;  %v3952_v6 = vsel %vm3921_vm6, %v3789_v29, %v8206_v36 }
 0x7ba   : > { %v4180_v58 = vmul.f32 0.044715, %v4087_v62  ;;  %v4307_v48 = vmul.f32 0.7978846, %v4275_v12  ;;  %v8522_v49 = vpop.eup %8521 }
 0x7bb   : > { %v4370_v12 = vadd.f32 1.0, %v8522_v49 }
 0x7bc   : > { %v4212_v2 = vmul.f32 %v4180_v58, %v4087_v62  ;;  %8523 = vtanh.f32 %v4307_v48 }
 0x7be   : > { %v3790_v1 = vpop.f32.mrf.mxu1  ;;  %v4244_v63 = vmul.f32 %v4212_v2, %v4087_v62 }
 0x7bf   : > { %v3791_v52 = vadd.f32 %v3790_v1, %v3701_v10  ;;  %v4088_v40 = vpop.f32.mrf.mxu2  ;;  %v10987_v10 = vmul.f32 %v4370_v12, %v4146_v27 }
 0x7c0   : > { %v4089_v50 = vadd.f32 %v10872_v25, %v4088_v40  ;;  %v4276_v56 = vadd.f32 %v4244_v63, %v4087_v62 }
 0x7c1   : > { %v3953_v60 = vsel %vm3921_vm6, %v3791_v52, %v8207_v23 }
 0x7c2   : > { %v8524_v54 = vpop.eup %8523  ;;  %v3969_v58 = vpack.c.bf16 %v3953_v60, %v3952_v6  ;;  %v4181_v48 = vmul.f32 0.044715, %v4089_v50  ;;  %v4308_v37 = vmul.f32 0.7978846, %v4276_v56  ;;  %v4149_v27 = vmul.f32 0.5, %v4089_v50 }
 0x7c3   : > { %v4371_v13 = vadd.f32 1.0, %v8524_v54 }
 0x7c4   : > { %v4213_v2 = vmul.f32 %v4181_v48, %v4089_v50  ;;  %7839 = vmatmul.msk.bf16.gmra.mxu2 %vm3994_vm3, %v3969_v58  ;;  %8525 = vtanh.f32 %v4308_v37  ;;  %v4148_v48 = vmul.f32 0.5, %v4087_v62 }
 0x7c5   : > { %v10989_v1 = vmul.f32 %v4371_v13, %v4147_v17 }
 0x7c6   : > { %v4245_v63 = vmul.f32 %v4213_v2, %v4089_v50 }
 0x7c7   : > { %v4091_v29 = vpop.f32.mrf.mxu2  ;;  %v8233_v49 = vpack.i.bf16 %v10989_v1, %v10987_v10 }
 0x7c8   : > { %v4092_v23 = vadd.f32 %v10872_v25, %v4091_v29  ;;  %v4277_v36 = vadd.f32 %v4245_v63, %v4089_v50 }
 0x7c9   : > { %8234 = vrot.lane.b32.xlu1 %v8233_v49, %s8769_s28 }
 0x7ca   : > { %v4182_v54 = vmul.f32 0.044715, %v4092_v23  ;;  %v4309_v28 = vmul.f32 0.7978846, %v4277_v36  ;;  %v8526_v52 = vpop.eup %8525 }
 0x7cb   : > { %v4372_v60 = vadd.f32 1.0, %v8526_v52 }
 0x7cc   : > { %v4214_v5 = vmul.f32 %v4182_v54, %v4092_v23  ;;  %8527 = vtanh.f32 %v4309_v28 }
 0x7cd   : > { %v4404_v63 = vmul.f32 %v4372_v60, %v4148_v48 }
 0x7ce   : > { %v4246_v40 = vmul.f32 %v4214_v5, %v4092_v23 }
 0x7cf   : > { %v4093_v56 = vpop.f32.mrf.mxu2 }
 0x7d0   : > { %v4278_v13 = vadd.f32 %v4246_v40, %v4092_v23  ;;  %v4094_v6 = vadd.f32 %v10872_v25, %v4093_v56 }
 0x7d2   : > { %v8528_v12 = vpop.eup %8527  ;;  %v4183_v58 = vmul.f32 0.044715, %v4094_v6  ;;  %v4310_v2 = vmul.f32 0.7978846, %v4278_v13 }
 0x7d3   : > { %v4373_v17 = vadd.f32 1.0, %v8528_v12 }
 0x7d4   : > { %v4215_v37 = vmul.f32 %v4183_v58, %v4094_v6  ;;  %8529 = vtanh.f32 %v4310_v2 }
 0x7d5   : > { %v4405_v29 = vmul.f32 %v4373_v17, %v4149_v27  ;;  %v4150_v17 = vmul.f32 0.5, %v4092_v23 }
 0x7d6   : > { %v4247_v49 = vmul.f32 %v4215_v37, %v4094_v6  ;;  %v4151_v37 = vmul.f32 0.5, %v4094_v6 }
 0x7d7   : > { %v4096_v36 = vpop.f32.mrf.mxu2  ;;  %v8238_v54 = vpack.i.bf16 %v4405_v29, %v4404_v63  ;;  %v4430_v23 = vpack.c.bf16 %v4405_v29, %v4404_v63 }
 0x7d8   : > { %v4097_v28 = vadd.f32 %v10872_v25, %v4096_v36  ;;  %v4279_v5 = vadd.f32 %v4247_v49, %v4094_v6 }
 0x7d9   : > { %8239 = vrot.lane.b32.xlu2 %v8238_v54, %s8769_s28 }
 0x7da   : > { %v4184_v40 = vmul.f32 0.044715, %v4097_v28  ;;  %v4311_v52 = vmul.f32 0.7978846, %v4279_v5  ;;  %v8530_v62 = vpop.eup %8529  ;;  %v4152_v63 = vmul.f32 0.5, %v4097_v28 }
 0x7db   : > { %v4374_v58 = vadd.f32 1.0, %v8530_v62 }
 0x7dc   : > { %v4216_v56 = vmul.f32 %v4184_v40, %v4097_v28  ;;  %8531 = vtanh.f32 %v4311_v52 }
 0x7dd   : > { %v4406_v45 = vmul.f32 %v4374_v58, %v4150_v17 }
 0x7de   : > { %v4248_v50 = vmul.f32 %v4216_v56, %v4097_v28 }
 0x7df   : > { %v4098_v12 = vpop.f32.mrf.mxu2 }
 0x7e0   : > { %v4099_v13 = vadd.f32 %v10872_v25, %v4098_v12  ;;  %v4280_v60 = vadd.f32 %v4248_v50, %v4097_v28  ;;  %v13338_v28 = vpack.c.bf16 %v10955_v44, %v10953_v0  ;;  %v13340_v0 = vpack.c.bf16 %v10913_v59, %v10911_v30 }
 0x7e2   : > { %v8532_v48 = vpop.eup %8531  ;;  %v4185_v27 = vmul.f32 0.044715, %v4099_v13  ;;  %v4312_v2 = vmul.f32 0.7978846, %v4280_v60  ;;  %v4153_v29 = vmul.f32 0.5, %v4099_v13 }
 0x7e3   : > { %v4375_v36 = vadd.f32 1.0, %v8532_v48  ;;  %v4429_v48 = vpack.c.bf16 %v10989_v1, %v10987_v10 }
 0x7e4   : > { %v4217_v49 = vmul.f32 %v4185_v27, %v4099_v13  ;;  %8533 = vtanh.f32 %v4312_v2 }
 0x7e5   : > { %v4407_v54 = vmul.f32 %v4375_v36, %v4151_v37 }
 0x7e6   : > { %v4249_v41 = vmul.f32 %v4217_v49, %v4099_v13 }
 0x7e7   : > { %v4101_v5 = vpop.f32.mrf.mxu2  ;;  %v4431_v40 = vpack.c.bf16 %v4407_v54, %v4406_v45  ;;  %v8243_v52 = vpack.i.bf16 %v4407_v54, %v4406_v45 }
 0x7e8   : > { %v4102_v56 = vadd.f32 %v10872_v25, %v4101_v5  ;;  %v4281_v19 = vadd.f32 %v4249_v41, %v4099_v13 }
 0x7e9   : > { %4440 = vmatpush.bf16.msrb.mxu3 %v4431_v40  ;;  %8244 = vrot.lane.b32.xlu0 %v8243_v52, %s8769_s28 }
 0x7ea   : > { %v4186_v62 = vmul.f32 0.044715, %v4102_v56  ;;  %v4313_v50 = vmul.f32 0.7978846, %v4281_v19  ;;  %v8534_v12 = vpop.eup %8533  ;;  %v4428_v19 = vpack.c.bf16 %v10976_v61, %v10974_v34 }
 0x7eb   : > { %v4376_v41 = vadd.f32 1.0, %v8534_v12 }
 0x7ec   : > { %v4218_v6 = vmul.f32 %v4186_v62, %v4102_v56  ;;  %8535 = vtanh.f32 %v4313_v50 }
 0x7ed   : > { %4441 = vmatpush.bf16.msrb.mxu3 %v4430_v23  ;;  %v11006_v54 = vmul.f32 %v4376_v41, %v4152_v63  ;;  %v13339_v23 = vpack.c.bf16 %v10934_v55, %v10932_v21  ;;  %v13341_v21 = vpack.c.bf16 %v10892_v11, %v10890_v32 }
 0x7ee   : > { %v4250_v60 = vmul.f32 %v4218_v6, %v4102_v56 }
 0x7ef   : > { %v4103_v58 = vpop.f32.mrf.mxu2 }
 0x7f0   : > { %v4104_v45 = vadd.f32 %v10872_v25, %v4103_v58  ;;  %v4282_v27 = vadd.f32 %v4250_v60, %v4102_v56 }
 0x7f1   : > { %4442 = vmatpush.bf16.msrb.mxu3 %v4429_v48 }
 0x7f2   : > { %v8536_v17 = vpop.eup %8535  ;;  %v4187_v37 = vmul.f32 0.044715, %v4104_v45  ;;  %v4314_v2 = vmul.f32 0.7978846, %v4282_v27 }
 0x7f3   : > { %v4377_v36 = vadd.f32 1.0, %v8536_v17  ;;  %v4154_v17 = vmul.f32 0.5, %v4102_v56 }
 0x7f4   : > { %v4219_v49 = vmul.f32 %v4187_v37, %v4104_v45  ;;  %8537 = vtanh.f32 %v4314_v2  ;;  %v4155_v37 = vmul.f32 0.5, %v4104_v45 }
 0x7f5   : > { %4443 = vmatpush.bf16.msrb.mxu3 %v4428_v19  ;;  %v11008_v5 = vmul.f32 %v4377_v36, %v4153_v29 }
 0x7f6   : > { %v4251_v10 = vmul.f32 %v4219_v49, %v4104_v45 }
 0x7f7   : > { %v4106_v1 = vpop.f32.mrf.mxu2  ;;  %v8248_v40 = vpack.i.bf16 %v11008_v5, %v11006_v54 }
 0x7f8   : > { %v4107_v34 = vadd.f32 %v10872_v25, %v4106_v1  ;;  %v4283_v61 = vadd.f32 %v4251_v10, %v4104_v45 }
 0x7f9   : > { %4444 = vmatpush.bf16.msrb.mxu3 %v13338_v28  ;;  %8249 = vrot.lane.b32.xlu1 %v8248_v40, %s8769_s28 }
 0x7fa   : > { %v4188_v13 = vmul.f32 0.044715, %v4107_v34  ;;  %v4315_v62 = vmul.f32 0.7978846, %v4283_v61  ;;  %v8538_v6 = vpop.eup %8537 }
 0x7fb   : > { %v4378_v44 = vadd.f32 1.0, %v8538_v6  ;;  %v4156_v6 = vmul.f32 0.5, %v4107_v34 }
 0x7fc   : > { %v4220_v50 = vmul.f32 %v4188_v13, %v4107_v34  ;;  %8539 = vtanh.f32 %v4315_v62 }
 0x7fd   : > { %4445 = vmatpush.bf16.msrb.mxu3 %v13339_v23  ;;  %v11029_v55 = vmul.f32 %v4378_v44, %v4154_v17 }
 0x7fe   : > { %v4252_v12 = vmul.f32 %v4220_v50, %v4107_v34 }
 0x7ff   : > { %v4108_v60 = vpop.f32.mrf.mxu2 }
 0x800   : > { %v4109_v58 = vadd.f32 %v10872_v25, %v4108_v60  ;;  %v4284_v48 = vadd.f32 %v4252_v12, %v4107_v34 }
 0x801   : > { %4446 = vmatpush.bf16.msrb.mxu3 %v13340_v0 }
 0x802   : > { %v8540_v27 = vpop.eup %8539  ;;  %v4189_v41 = vmul.f32 0.044715, %v4109_v58  ;;  %v4316_v29 = vmul.f32 0.7978846, %v4284_v48  ;;  %v4157_v12 = vmul.f32 0.5, %v4109_v58 }
 0x803   : > { %v4379_v19 = vadd.f32 1.0, %v8540_v27 }
 0x804   : > { %v4221_v63 = vmul.f32 %v4189_v41, %v4109_v58  ;;  %8541 = vtanh.f32 %v4316_v29 }
 0x805   : > { %4447 = vmatpush.bf16.msrb.mxu3 %v13341_v21  ;;  %v11031_v36 = vmul.f32 %v4379_v19, %v4155_v37 }
 0x806   : > { %v4253_v49 = vmul.f32 %v4221_v63, %v4109_v58 }
 0x807   : > { %v4111_v2 = vpop.f32.mrf.mxu2  ;;  %v8253_v30 = vpack.i.bf16 %v11031_v36, %v11029_v55  ;;  %v4433_v59 = vpack.c.bf16 %v11031_v36, %v11029_v55  ;;  %v8014_v36 = vld [vmem:[%s12917_s9 + $0x20] sm:$0xff] }
 0x808   : > { %v4112_v56 = vadd.f32 %v10872_v25, %v4111_v2  ;;  %4448 = vmatmul.bf16.vlgmr.msrb.gmra.mxu3 %v13314_v33  ;;  %v4285_v45 = vadd.f32 %v4253_v49, %v4109_v58  ;;  %4890 = vmatpush.bf16.msra.mxu1 %v8014_v36 }
 0x809   : > { %8254 = vrot.lane.b32.xlu2 %v8253_v30, %s8769_s28 }
 0x80a   : > { %v4190_v32 = vmul.f32 0.044715, %v4112_v56  ;;  %v4317_v11 = vmul.f32 0.7978846, %v4285_v45  ;;  %v8542_v1 = vpop.eup %8541 }
 0x80b   : > { %v4380_v62 = vadd.f32 1.0, %v8542_v1 }
 0x80c   : > { %v4222_v10 = vmul.f32 %v4190_v32, %v4112_v56  ;;  %8543 = vtanh.f32 %v4317_v11 }
 0x80d   : > { %v11041_v44 = vmul.f32 %v4380_v62, %v4156_v6 }
 0x80e   : > { %v4254_v40 = vmul.f32 %v4222_v10, %v4112_v56 }
 0x80f   : > { %v4113_v61 = vpop.f32.mrf.mxu2 }
 0x810   : > { %v4114_v28 = vadd.f32 %v10872_v25, %v4113_v61  ;;  %v4286_v13 = vadd.f32 %v4254_v40, %v4112_v56  ;;  %v4158_v40 = vmul.f32 0.5, %v4112_v56 }
 0x812   : > { %v8544_v50 = vpop.eup %8543  ;;  %v4191_v23 = vmul.f32 0.044715, %v4114_v28  ;;  %v4318_v0 = vmul.f32 0.7978846, %v4286_v13  ;;  %v4159_v61 = vmul.f32 0.5, %v4114_v28 }
 0x813   : > { %v4381_v60 = vadd.f32 1.0, %v8544_v50 }
 0x814   : > { %v4223_v48 = vmul.f32 %v4191_v23, %v4114_v28  ;;  %8545 = vtanh.f32 %v4318_v0 }
 0x815   : > { %v11043_v27 = vmul.f32 %v4381_v60, %v4157_v12 }
 0x816   : > { %v4255_v41 = vmul.f32 %v4223_v48, %v4114_v28 }
 0x817   : > { %v4116_v17 = vpop.f32.mrf.mxu2  ;;  %v8258_v37 = vpack.i.bf16 %v11043_v27, %v11041_v44  ;;  %v4434_v19 = vpack.c.bf16 %v11043_v27, %v11041_v44  ;;  %v8013_v27 = vld [vmem:[%s12917_s9 + $0x18] sm:$0xff] }
 0x818   : > { %v4117_v63 = vadd.f32 %v10872_v25, %v4116_v17  ;;  %4453 = vmatmul.bf16.gmra.mxu3 %v13315_v8  ;;  %v4287_v34 = vadd.f32 %v4255_v41, %v4114_v28  ;;  %4891 = vmatpush.bf16.msra.mxu1 %v8013_v27 }
 0x819   : > { %8259 = vrot.lane.b32.xlu0 %v8258_v37, %s8769_s28 }
 0x81a   : > { %v4192_v58 = vmul.f32 0.044715, %v4117_v63  ;;  %v4319_v29 = vmul.f32 0.7978846, %v4287_v34  ;;  %v8546_v49 = vpop.eup %8545 }
 0x81b   : > { %v4382_v11 = vadd.f32 1.0, %v8546_v49 }
 0x81c   : > { %v4224_v21 = vmul.f32 %v4192_v58, %v4117_v63  ;;  %8547 = vtanh.f32 %v4319_v29 }
 0x81d   : > { %v11053_v23 = vmul.f32 %v4382_v11, %v4158_v40  ;;  %v4160_v11 = vmul.f32 0.5, %v4117_v63 }
 0x81e   : > { %v4256_v2 = vmul.f32 %v4224_v21, %v4117_v63 }
 0x81f   : > { %v4118_v30 = vpop.f32.mrf.mxu2 }
 0x820   : > { %v4119_v45 = vadd.f32 %v10872_v25, %v4118_v30  ;;  %v4288_v32 = vadd.f32 %v4256_v2, %v4117_v63 }
 0x822   : > { %v8548_v10 = vpop.eup %8547  ;;  %v4193_v1 = vmul.f32 0.044715, %v4119_v45  ;;  %v4320_v50 = vmul.f32 0.7978846, %v4288_v32 }
 0x823   : > { %v4383_v13 = vadd.f32 1.0, %v8548_v10  ;;  %v4161_v10 = vmul.f32 0.5, %v4119_v45 }
 0x824   : > { %v4225_v62 = vmul.f32 %v4193_v1, %v4119_v45  ;;  %8549 = vtanh.f32 %v4320_v50 }
 0x825   : > { %v11055_v6 = vmul.f32 %v4383_v13, %v4159_v61 }
 0x826   : > { %v4257_v12 = vmul.f32 %v4225_v62, %v4119_v45 }
 0x827   : > { %v4121_v60 = vpop.f32.mrf.mxu2  ;;  %v8263_v48 = vpack.i.bf16 %v11055_v6, %v11053_v23  ;;  %v4435_v0 = vpack.c.bf16 %v11055_v6, %v11053_v23  ;;  %v8012_v23 = vld [vmem:[%s12917_s9 + $0x10] sm:$0xff]  ;;  %v8011_v6 = vld [vmem:[%s12917_s9 + $0x8] sm:$0xff] }
 0x828   : > { %v4122_v41 = vadd.f32 %v10872_v25, %v4121_v60  ;;  %4458 = vmatmul.bf16.gmra.mxu3 %v13316_v4  ;;  %v4289_v56 = vadd.f32 %v4257_v12, %v4119_v45  ;;  %4892 = vmatpush.bf16.msra.mxu1 %v8012_v23 }
 0x829   : > { %8264 = vrot.lane.b32.xlu1 %v8263_v48, %s8769_s28 }
 0x82a   : > { %v4194_v28 = vmul.f32 0.044715, %v4122_v41  ;;  %v4321_v17 = vmul.f32 0.7978846, %v4289_v56  ;;  %v8550_v34 = vpop.eup %8549 }
 0x82b   : > { %v4384_v2 = vadd.f32 1.0, %v8550_v34 }
 0x82c   : > { %v4226_v37 = vmul.f32 %v4194_v28, %v4122_v41  ;;  %8551 = vtanh.f32 %v4321_v17  ;;  %4893 = vmatpush.bf16.msra.mxu1 %v8011_v6 }
 0x82d   : > { %v11065_v13 = vmul.f32 %v4384_v2, %v4160_v11 }
 0x82e   : > { %v4258_v58 = vmul.f32 %v4226_v37, %v4122_v41 }
 0x82f   : > { %v4123_v29 = vpop.f32.mrf.mxu2 }
 0x830   : > { %v4124_v21 = vadd.f32 %v10872_v25, %v4123_v29  ;;  %v4290_v49 = vadd.f32 %v4258_v58, %v4122_v41 }
 0x832   : > { %v8552_v30 = vpop.eup %8551  ;;  %v4195_v32 = vmul.f32 0.044715, %v4124_v21  ;;  %v4322_v61 = vmul.f32 0.7978846, %v4290_v49  ;;  %v4163_v11 = vmul.f32 0.5, %v4124_v21 }
 0x833   : > { %v4385_v1 = vadd.f32 1.0, %v8552_v30 }
 0x834   : > { %v4227_v40 = vmul.f32 %v4195_v32, %v4124_v21  ;;  %8553 = vtanh.f32 %v4322_v61  ;;  %v4162_v32 = vmul.f32 0.5, %v4122_v41 }
 0x835   : > { %v11067_v62 = vmul.f32 %v4385_v1, %v4161_v10 }
 0x836   : > { %v4259_v50 = vmul.f32 %v4227_v40, %v4124_v21 }
 0x837   : > { %v4126_v12 = vpop.f32.mrf.mxu2  ;;  %v8268_v60 = vpack.i.bf16 %v11067_v62, %v11065_v13 }
 0x838   : > { %v4127_v48 = vadd.f32 %v10872_v25, %v4126_v12  ;;  %4463 = vmatmul.bf16.gmra.mxu3 %v9813_v24  ;;  %v4291_v56 = vadd.f32 %v4259_v50, %v4124_v21 }
 0x839   : > { %8269 = vrot.lane.b32.xlu2 %v8268_v60, %s8769_s28 }
 0x83a   : > { %v4196_v63 = vmul.f32 0.044715, %v4127_v48  ;;  %v4323_v45 = vmul.f32 0.7978846, %v4291_v56  ;;  %v8554_v17 = vpop.eup %8553 }
 0x83b   : > { %v4386_v49 = vadd.f32 1.0, %v8554_v17 }
 0x83c   : > { %v4228_v28 = vmul.f32 %v4196_v63, %v4127_v48  ;;  %8555 = vtanh.f32 %v4323_v45 }
 0x83d   : > { %v4418_v61 = vmul.f32 %v4386_v49, %v4162_v32 }
 0x83e   : > { %v4260_v37 = vmul.f32 %v4228_v28, %v4127_v48 }
 0x83f   : > { %v4128_v34 = vpop.f32.mrf.mxu2 }
 0x840   : > { %v4129_v58 = vadd.f32 %v10872_v25, %v4128_v34  ;;  %v4292_v29 = vadd.f32 %v4260_v37, %v4127_v48 }
 0x842   : > { %v8556_v2 = vpop.eup %8555  ;;  %v4197_v30 = vmul.f32 0.044715, %v4129_v58  ;;  %v4324_v40 = vmul.f32 0.7978846, %v4292_v29 }
 0x843   : > { %v4387_v10 = vadd.f32 1.0, %v8556_v2 }
 0x844   : > { %v4229_v1 = vmul.f32 %v4197_v30, %v4129_v58  ;;  %8557 = vtanh.f32 %v4324_v40 }
 0x845   : > { %v4419_v50 = vmul.f32 %v4387_v10, %v4163_v11  ;;  %v4164_v11 = vmul.f32 0.5, %v4127_v48  ;;  %v4165_v10 = vmul.f32 0.5, %v4129_v58 }
 0x846   : > { %v4261_v12 = vmul.f32 %v4229_v1, %v4129_v58 }
 0x847   : > { %v4131_v60 = vpop.f32.mrf.mxu2  ;;  %v8273_v56 = vpack.i.bf16 %v4419_v50, %v4418_v61 }
 0x848   : > { %v4132_v63 = vadd.f32 %v10872_v25, %v4131_v60  ;;  %4468 = vmatmul.bf16.gmra.mxu3 %v13329_v57  ;;  %v4293_v45 = vadd.f32 %v4261_v12, %v4129_v58 }
 0x849   : > { %8274 = vrot.lane.b32.xlu0 %v8273_v56, %s8769_s28 }
 0x84a   : > { %v4198_v28 = vmul.f32 0.044715, %v4132_v63  ;;  %v4325_v17 = vmul.f32 0.7978846, %v4293_v45  ;;  %v8558_v21 = vpop.eup %8557  ;;  %v4166_v48 = vmul.f32 0.5, %v4132_v63 }
 0x84b   : > { %v4388_v2 = vadd.f32 1.0, %v8558_v21 }
 0x84c   : > { %v4230_v41 = vmul.f32 %v4198_v28, %v4132_v63  ;;  %8559 = vtanh.f32 %v4325_v17 }
 0x84d   : > { %v4420_v60 = vmul.f32 %v4388_v2, %v4164_v11  ;;  %v4436_v11 = vpack.c.bf16 %v11067_v62, %v11065_v13  ;;  %v8010_v13 = vld [vmem:[%s12917_s9] sm:$0xff] }
 0x84e   : > { %v4262_v37 = vmul.f32 %v4230_v41, %v4132_v63  ;;  %4894 = vmatpush.bf16.msra.mxu1 %v8010_v13 }
 0x84f   : > { %v4133_v34 = vpop.f32.mrf.mxu2 }
 0x850   : > { %v4294_v29 = vadd.f32 %v4262_v37, %v4132_v63  ;;  %v4134_v49 = vadd.f32 %v10872_v25, %v4133_v34  ;;  %v8210_v63 = vpop.permute.xlu2 %8209 }
 0x852   : > { %v8560_v30 = vpop.eup %8559  ;;  %v4199_v32 = vmul.f32 0.044715, %v4134_v49  ;;  %v4326_v12 = vmul.f32 0.7978846, %v4294_v29  ;;  %v4167_v58 = vmul.f32 0.5, %v4134_v49 }
 0x853   : > { %v4389_v1 = vadd.f32 1.0, %v8560_v30 }
 0x854   : > { %v4231_v40 = vmul.f32 %v4199_v32, %v4134_v49  ;;  %8561 = vtanh.f32 %v4326_v12  ;;  %v4437_v32 = vpack.c.bf16 %v4419_v50, %v4418_v61  ;;  %v13342_v61 = vpack.c.bf16 %v11008_v5, %v11006_v54 }
 0x855   : > { %v4421_v56 = vmul.f32 %v4389_v1, %v4165_v10  ;;  %v8212_v1 = vunpack.i.h.bf16 %v8210_v63  ;;  %v8211_v12 = vunpack.i.l.bf16 %v8210_v63 }
 0x856   : > { %v4263_v52 = vmul.f32 %v4231_v40, %v4134_v49 }
 0x857   : > { %v8278_v45 = vpack.i.bf16 %v4421_v56, %v4420_v60 }
 0x858   : > { %4473 = vmatmul.bf16.gmra.mxu3 %v10044_v9  ;;  %v4295_v28 = vadd.f32 %v4263_v52, %v4134_v49  ;;  %v4438_v52 = vpack.c.bf16 %v4421_v56, %v4420_v60 }
 0x859   : > { %8279 = vrot.lane.b32.xlu1 %v8278_v45, %s8769_s28 }
 0x85a   : > { %v4327_v17 = vmul.f32 0.7978846, %v4295_v28  ;;  %v8562_v25 = vpop.eup %8561 }
 0x85b   : > { %v4390_v41 = vadd.f32 1.0, %v8562_v25  ;;  %v13343_v25 = vld [vmem:[#allocation3_spill] sm:$0xff] }
 0x85c   : > { %8563 = vtanh.f32 %v4327_v17 }
 0x85d   : > { %v4422_v34 = vmul.f32 %v4390_v41, %v4166_v48  ;;  %v8215_v41 = vpop.permute.xlu0 %8214 }
 0x862   : > { %v8564_v21 = vpop.eup %8563 }
 0x863   : > { %v4391_v37 = vadd.f32 1.0, %v8564_v21 }
 0x865   : > { %v4423_v29 = vmul.f32 %v4391_v37, %v4167_v58  ;;  %v8217_v58 = vunpack.i.h.bf16 %v8215_v41  ;;  %v8216_v37 = vunpack.i.l.bf16 %v8215_v41 }
 0x867   : > { %v4439_v2 = vpack.c.bf16 %v4423_v29, %v4422_v34  ;;  %v8283_v30 = vpack.i.bf16 %v4423_v29, %v4422_v34 }
 0x868   : > { %4478 = vmatmul.bf16.gmra.mxu3 %v10058_v18 }
 0x869   : > { %4529 = vmatpush.bf16.msra.mxu0 %v4439_v2  ;;  %8284 = vrot.lane.b32.xlu2 %v8283_v30, %s8769_s28 }
 0x86d   : > { %4530 = vmatpush.bf16.msra.mxu0 %v4438_v52 }
 0x871   : > { %4531 = vmatpush.bf16.msra.mxu0 %v4437_v32 }
 0x875   : > { %4532 = vmatpush.bf16.msra.mxu0 %v4436_v11  ;;  %v13344_v11 = vld [vmem:[#allocation4_spill] sm:$0xff] }
 0x878   : > { %4483 = vmatmul.bf16.gmra.mxu3 %v10072_v26 }
 0x879   : > { %4533 = vmatpush.bf16.msra.mxu0 %v4435_v0 }
 0x87d   : > { %4534 = vmatpush.bf16.msra.mxu0 %v4434_v19 }
 0x881   : > { %4535 = vmatpush.bf16.msra.mxu0 %v4433_v59 }
 0x885   : > { %4536 = vmatpush.bf16.msra.mxu0 %v13342_v61  ;;  %v8220_v61 = vpop.permute.xlu1 %8219 }
 0x886   : > { %v8221_v27 = vunpack.i.l.bf16 %v8220_v61 }
 0x888   : > { %4488 = vmatmul.bf16.gmra.mxu3 %v10086_v31  ;;  %4537 = vmatmul.bf16.vlgmr.msra.gmra.mxu0 %v10198_v38 }
 0x88b   : > { %v4449_v44 = vpop.f32.mrf.mxu3 }
 0x893   : > { %v4451_v55 = vpop.f32.mrf.mxu3 }
 0x898   : > { %4493 = vmatmul.bf16.gmra.mxu3 %v10100_v35  ;;  %4542 = vmatmul.bf16.gmra.mxu0 %v10212_v15 }
 0x89b   : > { %v4454_v54 = vpop.f32.mrf.mxu3 }
 0x8a3   : > { %v4456_v5 = vpop.f32.mrf.mxu3 }
 0x8a8   : > { %4498 = vmatmul.bf16.gmra.mxu3 %v10114_v39  ;;  %4547 = vmatmul.bf16.gmra.mxu0 %v10226_v7 }
 0x8ab   : > { %v4459_v59 = vpop.f32.mrf.mxu3 }
 0x8b3   : > { %v4461_v19 = vpop.f32.mrf.mxu3 }
 0x8b8   : > { %4503 = vmatmul.bf16.gmra.mxu3 %v10128_v43  ;;  %4552 = vmatmul.bf16.gmra.mxu0 %v10240_v53 }
 0x8bb   : > { %v4464_v0 = vpop.f32.mrf.mxu3 }
 0x8c3   : > { %v4466_v62 = vpop.f32.mrf.mxu3 }
 0x8c8   : > { %4508 = vmatmul.bf16.gmra.mxu3 %v10142_v47  ;;  %4557 = vmatmul.bf16.gmra.mxu0 %v10257_v3 }
 0x8cb   : > { %v4469_v17 = vpop.f32.mrf.mxu3 }
 0x8d3   : > { %v4471_v30 = vpop.f32.mrf.mxu3 }
 0x8d8   : > { %4513 = vmatmul.bf16.gmra.mxu3 %v10156_v51  ;;  %4562 = vmatmul.bf16.gmra.mxu0 %v10271_v22 }
 0x8e8   : > { %4518 = vmatmul.bf16.gmra.mxu3 %v10170_v20  ;;  %4567 = vmatmul.bf16.gmra.mxu0 %v10285_v16 }
 0x8f8   : > { %4523 = vmatmul.bf16.gmra.mxu3 %v10184_v42  ;;  %4572 = vmatmul.bf16.gmra.mxu0 %v10301_v46 }
 0x905   : > { %v4538_v50 = vpop.f32.mrf.mxu0 }
 0x906   : > { %v4539_v49 = vadd.f32 %v4538_v50, %v4449_v44  ;;  %v4474_v44 = vpop.f32.mrf.mxu3 }
 0x908   : > { %4577 = vmatmul.bf16.gmra.mxu0 %v10305_v14  ;;  %v4746_v60 = vsel %vm3994_vm3, %v4539_v49, %v8211_v12  ;;  %v13345_v49 = vld [vmem:[#allocation5_spill] sm:$0xff] }
 0x90d   : > { %v4540_v10 = vpop.f32.mrf.mxu0 }
 0x90e   : > { %v4541_v40 = vadd.f32 %v4540_v10, %v4451_v55  ;;  %v4476_v50 = vpop.f32.mrf.mxu3  ;;  %v8225_v10 = vpop.permute.xlu2 %8224 }
 0x910   : > { %v4747_v56 = vsel %vm3994_vm3, %v4541_v40, %v8212_v1  ;;  %v8227_v40 = vunpack.i.h.bf16 %v8225_v10 }
 0x911   : > { %v4778_v45 = vpack.c.bf16 %v4747_v56, %v4746_v60 }
 0x913   : > { %7860 = vmatmul.msk.bf16.vlgmr.msra.gmra.mxu1 %vm4838_vm11, %v4778_v45 }
 0x915   : > { %v4543_v28 = vpop.f32.mrf.mxu0 }
 0x916   : > { %v4544_v21 = vadd.f32 %v4543_v28, %v4454_v54  ;;  %v8222_v54 = vunpack.i.h.bf16 %v8220_v61  ;;  %v4479_v56 = vpop.f32.mrf.mxu3 }
 0x918   : > { %4582 = vmatmul.bf16.gmra.mxu0 %v13343_v25  ;;  %v4748_v29 = vsel %vm3994_vm3, %v4544_v21, %v8216_v37  ;;  %v13346_v21 = vld [vmem:[#allocation6_spill] sm:$0xff] }
 0x91d   : > { %v4545_v48 = vpop.f32.mrf.mxu0 }
 0x91e   : > { %v4546_v34 = vadd.f32 %v4545_v48, %v4456_v5  ;;  %v4481_v48 = vpop.f32.mrf.mxu3 }
 0x920   : > { %v4749_v2 = vsel %vm3994_vm3, %v4546_v34, %v8217_v58  ;;  %v8230_v58 = vpop.permute.xlu0 %8229 }
 0x921   : > { %v4779_v52 = vpack.c.bf16 %v4749_v2, %v4748_v29  ;;  %v8231_v29 = vunpack.i.l.bf16 %v8230_v58 }
 0x923   : > { %7861 = vmatmul.msk.bf16.gmra.mxu1 %vm4838_vm11, %v4779_v52 }
 0x925   : > { %v4548_v32 = vpop.f32.mrf.mxu0 }
 0x926   : > { %v4549_v55 = vadd.f32 %v4548_v32, %v4459_v59  ;;  %v8226_v59 = vunpack.i.l.bf16 %v8225_v10  ;;  %v4484_v61 = vpop.f32.mrf.mxu3 }
 0x928   : > { %4587 = vmatmul.bf16.gmra.mxu0 %v13344_v11  ;;  %v4750_v5 = vsel %vm3994_vm3, %v4549_v55, %v8221_v27 }
 0x92d   : > { %v4550_v36 = vpop.f32.mrf.mxu0 }
 0x92e   : > { %v4551_v23 = vadd.f32 %v4550_v36, %v4461_v19  ;;  %v13347_v36 = vld [vmem:[#allocation7_spill] sm:$0xff] }
 0x930   : > { %v4751_v6 = vsel %vm3994_vm3, %v4551_v23, %v8222_v54  ;;  %v8235_v54 = vpop.permute.xlu1 %8234  ;;  %v4486_v23 = vpop.f32.mrf.mxu3 }
 0x931   : > { %v4780_v13 = vpack.c.bf16 %v4751_v6, %v4750_v5  ;;  %v8236_v6 = vunpack.i.l.bf16 %v8235_v54 }
 0x933   : > { %7862 = vmatmul.msk.bf16.gmra.mxu1 %vm4838_vm11, %v4780_v13 }
 0x935   : > { %v4553_v63 = vpop.f32.mrf.mxu0 }
 0x936   : > { %v4554_v1 = vadd.f32 %v4553_v63, %v4464_v0  ;;  %v8232_v0 = vunpack.i.h.bf16 %v8230_v58 }
 0x938   : > { %4592 = vmatmul.bf16.gmra.mxu0 %v13345_v49  ;;  %v4752_v19 = vsel %vm3994_vm3, %v4554_v1, %v8226_v59  ;;  %v8240_v59 = vpop.permute.xlu2 %8239 }
 0x93d   : > { %v4555_v12 = vpop.f32.mrf.mxu0 }
 0x93e   : > { %v4556_v60 = vadd.f32 %v4555_v12, %v4466_v62  ;;  %v4489_v12 = vpop.f32.mrf.mxu3 }
 0x940   : > { %v4753_v45 = vsel %vm3994_vm3, %v4556_v60, %v8227_v40  ;;  %v13348_v40 = vld [vmem:[#allocation8_spill] sm:$0xff] }
 0x941   : > { %v4781_v28 = vpack.c.bf16 %v4753_v45, %v4752_v19  ;;  %v8241_v45 = vunpack.i.l.bf16 %v8240_v59 }
 0x943   : > { %7863 = vmatmul.msk.bf16.gmra.mxu1 %vm4838_vm11, %v4781_v28 }
 0x945   : > { %v4558_v41 = vpop.f32.mrf.mxu0 }
 0x946   : > { %v4559_v37 = vadd.f32 %v4558_v41, %v4469_v17  ;;  %v8237_v17 = vunpack.i.h.bf16 %v8235_v54  ;;  %v4491_v58 = vpop.f32.mrf.mxu3 }
 0x948   : > { %4597 = vmatmul.bf16.gmra.mxu0 %v13346_v21  ;;  %v4754_v62 = vsel %vm3994_vm3, %v4559_v37, %v8231_v29  ;;  %v8245_v29 = vpop.permute.xlu0 %8244 }
 0x94d   : > { %v4560_v34 = vpop.f32.mrf.mxu0 }
 0x94e   : > { %v4561_v2 = vadd.f32 %v4560_v34, %v4471_v30 }
 0x950   : > { %v4755_v52 = vsel %vm3994_vm3, %v4561_v2, %v8232_v0  ;;  %v13349_v0 = vld [vmem:[#allocation9_spill] sm:$0xff]  ;;  %v4494_v2 = vpop.f32.mrf.mxu3 }
 0x951   : > { %v4782_v32 = vpack.c.bf16 %v4755_v52, %v4754_v62 }
 0x953   : > { %7864 = vmatmul.msk.bf16.gmra.mxu1 %vm4838_vm11, %v4782_v32  ;;  %v8246_v32 = vunpack.i.l.bf16 %v8245_v29 }
 0x955   : > { %v4563_v55 = vpop.f32.mrf.mxu0 }
 0x956   : > { %v4564_v27 = vadd.f32 %v4563_v55, %v4474_v44  ;;  %v8242_v44 = vunpack.i.h.bf16 %v8240_v59 }
 0x958   : > { %4602 = vmatmul.bf16.gmra.mxu0 %v13347_v36  ;;  %v4756_v30 = vsel %vm3994_vm3, %v4564_v27, %v8236_v6  ;;  %v8250_v6 = vpop.permute.xlu1 %8249 }
 0x95d   : > { %v4565_v5 = vpop.f32.mrf.mxu0 }
 0x95e   : > { %v4566_v13 = vadd.f32 %v4565_v5, %v4476_v50  ;;  %v4496_v5 = vpop.f32.mrf.mxu3 }
 0x960   : > { %v4757_v63 = vsel %vm3994_vm3, %v4566_v13, %v8237_v17 }
 0x961   : > { %v4783_v10 = vpack.c.bf16 %v4757_v63, %v4756_v30  ;;  %v8252_v63 = vunpack.i.h.bf16 %v8250_v6 }
 0x963   : > { %7865 = vmatmul.msk.bf16.gmra.mxu1 %vm4838_vm11, %v4783_v10  ;;  %v8251_v10 = vunpack.i.l.bf16 %v8250_v6 }
 0x965   : > { %v4568_v1 = vpop.f32.mrf.mxu0 }
 0x966   : > { %v4569_v60 = vadd.f32 %v4568_v1, %v4479_v56  ;;  %v8247_v56 = vunpack.i.h.bf16 %v8245_v29  ;;  %v4499_v1 = vpop.f32.mrf.mxu3 }
 0x968   : > { %4607 = vmatmul.bf16.gmra.mxu0 %v13348_v40  ;;  %v4758_v41 = vsel %vm3994_vm3, %v4569_v60, %v8241_v45 }
 0x96d   : > { %v4570_v19 = vpop.f32.mrf.mxu0 }
 0x96e   : > { %v4571_v28 = vadd.f32 %v4570_v19, %v4481_v48 }
 0x970   : > { %v4759_v50 = vsel %vm3994_vm3, %v4571_v28, %v8242_v44 }
 0x971   : > { %v4784_v37 = vpack.c.bf16 %v4759_v50, %v4758_v41 }
 0x973   : > { %7866 = vmatmul.msk.bf16.gmra.mxu1 %vm4838_vm11, %v4784_v37 }
 0x975   : > { %v4573_v34 = vpop.f32.mrf.mxu0 }
 0x976   : > { %v4574_v62 = vadd.f32 %v4573_v34, %v4484_v61  ;;  %v11164_v61 = vld [vmem:[%s12918_s10] ss:$0 sm:$0xff]  ;;  %v4501_v34 = vpop.f32.mrf.mxu3 }
 0x978   : > { %4612 = vmatmul.bf16.gmra.mxu0 %v13349_v0  ;;  %v4760_v48 = vsel %vm3994_vm3, %v4574_v62, %v8246_v32  ;;  %v8255_v62 = vpop.permute.xlu2 %8254 }
 0x97d   : > { %v4575_v52 = vpop.f32.mrf.mxu0 }
 0x97e   : > { %v4576_v55 = vadd.f32 %v4575_v52, %v4486_v23 }
 0x980   : > { %v4761_v54 = vsel %vm3994_vm3, %v4576_v55, %v8247_v56 }
 0x981   : > { %v4785_v27 = vpack.c.bf16 %v4761_v54, %v4760_v48  ;;  %v8257_v54 = vunpack.i.h.bf16 %v8255_v62 }
 0x983   : > { %7867 = vmatmul.msk.bf16.gmra.mxu1 %vm4838_vm11, %v4785_v27  ;;  %v8256_v27 = vunpack.i.l.bf16 %v8255_v62 }
 0x985   : > { %v4578_v17 = vpop.f32.mrf.mxu0 }
 0x986   : > { %v4579_v13 = vadd.f32 %v4578_v17, %v4489_v12 }
 0x988   : > { %v4762_v59 = vsel %vm3994_vm3, %v4579_v13, %v8251_v10 }
 0x98d   : > { %v4580_v30 = vpop.f32.mrf.mxu0 }
 0x98e   : > { %v4581_v23 = vadd.f32 %v4580_v30, %v4491_v58 }
 0x990   : > { %v4763_v60 = vsel %vm3994_vm3, %v4581_v23, %v8252_v63  ;;  %v4896_v19 = vpop.f32.mrf.mxu1 }
 0x991   : > { %v4786_v44 = vpack.c.bf16 %v4763_v60, %v4762_v59  ;;  %v4897_v45 = vadd.f32 %v11164_v61, %v4896_v19  ;;  %v4504_v60 = vpop.f32.mrf.mxu3 }
 0x993   : > { %v5008_v28 = vmul.f32 0.044715, %v4897_v45  ;;  %7868 = vmatmul.msk.bf16.gmra.mxu1 %vm4838_vm11, %v4786_v44 }
 0x995   : > { %v5040_v12 = vmul.f32 %v5008_v28, %v4897_v45  ;;  %v4583_v41 = vpop.f32.mrf.mxu0 }
 0x996   : > { %v4584_v56 = vadd.f32 %v4583_v41, %v4494_v2 }
 0x997   : > { %v5072_v50 = vmul.f32 %v5040_v12, %v4897_v45 }
 0x998   : > { %v4898_v37 = vpop.f32.mrf.mxu1  ;;  %v4764_v13 = vsel %vm3994_vm3, %v4584_v56, %v8256_v27 }
 0x999   : > { %v4899_v29 = vadd.f32 %v11164_v61, %v4898_v37  ;;  %v5104_v58 = vadd.f32 %v5072_v50, %v4897_v45 }
 0x99b   : > { %v5009_v52 = vmul.f32 0.044715, %v4899_v29  ;;  %v5136_v48 = vmul.f32 0.7978846, %v5104_v58  ;;  %v8260_v58 = vpop.permute.xlu0 %8259 }
 0x99c   : > { %v8262_v27 = vunpack.i.h.bf16 %v8260_v58 }
 0x99d   : > { %v5041_v32 = vmul.f32 %v5009_v52, %v4899_v29  ;;  %v4585_v55 = vpop.f32.mrf.mxu0  ;;  %8565 = vtanh.f32 %v5136_v48  ;;  %v4977_v48 = vmul.f32 0.5, %v4899_v29 }
 0x99e   : > { %v4586_v17 = vadd.f32 %v4585_v55, %v4496_v5  ;;  %v4976_v55 = vmul.f32 0.5, %v4897_v45 }
 0x99f   : > { %v5073_v6 = vmul.f32 %v5041_v32, %v4899_v29 }
 0x9a0   : > { %v4765_v30 = vsel %vm3994_vm3, %v4586_v17, %v8257_v54  ;;  %v4901_v63 = vpop.f32.mrf.mxu1  ;;  %v4506_v17 = vpop.f32.mrf.mxu3 }
 0x9a1   : > { %v4787_v10 = vpack.c.bf16 %v4765_v30, %v4764_v13  ;;  %v4902_v23 = vadd.f32 %v11164_v61, %v4901_v63  ;;  %v5105_v59 = vadd.f32 %v5073_v6, %v4899_v29  ;;  %v8261_v63 = vunpack.i.l.bf16 %v8260_v58 }
 0x9a3   : > { %v5010_v19 = vmul.f32 0.044715, %v4902_v23  ;;  %7869 = vmatmul.msk.bf16.gmra.mxu1 %vm4838_vm11, %v4787_v10  ;;  %v5137_v2 = vmul.f32 0.7978846, %v5105_v59  ;;  %v8566_v5 = vpop.eup %8565 }
 0x9a4   : > { %v5200_v62 = vadd.f32 1.0, %v8566_v5 }
 0x9a5   : > { %v5042_v44 = vmul.f32 %v5010_v19, %v4902_v23  ;;  %v4588_v28 = vpop.f32.mrf.mxu0  ;;  %8567 = vtanh.f32 %v5137_v2 }
 0x9a6   : > { %v4589_v32 = vadd.f32 %v4588_v28, %v4499_v1  ;;  %v11176_v59 = vmul.f32 %v5200_v62, %v4976_v55 }
 0x9a7   : > { %v5074_v12 = vmul.f32 %v5042_v44, %v4902_v23 }
 0x9a8   : > { %v4903_v41 = vpop.f32.mrf.mxu1  ;;  %v4766_v44 = vsel %vm3994_vm3, %v4589_v32, %v8261_v63 }
 0x9a9   : > { %v4904_v50 = vadd.f32 %v11164_v61, %v4903_v41  ;;  %v5106_v37 = vadd.f32 %v5074_v12, %v4902_v23 }
 0x9ab   : > { %v8568_v52 = vpop.eup %8567  ;;  %v5011_v56 = vmul.f32 0.044715, %v4904_v50  ;;  %v5138_v30 = vmul.f32 0.7978846, %v5106_v37 }
 0x9ac   : > { %v5201_v54 = vadd.f32 1.0, %v8568_v52 }
 0x9ad   : > { %v5043_v6 = vmul.f32 %v5011_v56, %v4904_v50  ;;  %v4590_v13 = vpop.f32.mrf.mxu0  ;;  %8569 = vtanh.f32 %v5138_v30  ;;  %v4509_v56 = vpop.f32.mrf.mxu3 }
 0x9ae   : > { %v4591_v10 = vadd.f32 %v4590_v13, %v4501_v34  ;;  %v11178_v19 = vmul.f32 %v5201_v54, %v4977_v48 }
 0x9af   : > { %v5075_v2 = vmul.f32 %v5043_v6, %v4904_v50 }
 0x9b0   : > { %v4767_v5 = vsel %vm3994_vm3, %v4591_v10, %v8262_v27  ;;  %v4906_v1 = vpop.f32.mrf.mxu1  ;;  %v8288_v45 = vpack.i.bf16 %v11178_v19, %v11176_v59  ;;  %v8265_v27 = vpop.permute.xlu1 %8264  ;;  %v4978_v10 = vmul.f32 0.5, %v4902_v23 }
 0x9b1   : > { %v4788_v28 = vpack.c.bf16 %v4767_v5, %v4766_v44  ;;  %v4907_v12 = vadd.f32 %v11164_v61, %v4906_v1  ;;  %v5107_v34 = vadd.f32 %v5075_v2, %v4904_v50  ;;  %v4979_v2 = vmul.f32 0.5, %v4904_v50 }
 0x9b2   : > { %8289 = vrot.lane.b32.xlu0 %v8288_v45, %s8770_s27  ;;  %v8267_v5 = vunpack.i.h.bf16 %v8265_v27 }
 0x9b3   : > { %v5012_v41 = vmul.f32 0.044715, %v4907_v12  ;;  %7870 = vmatmul.msk.bf16.gmra.mxu1 %vm4838_vm11, %v4788_v28  ;;  %v5139_v37 = vmul.f32 0.7978846, %v5107_v34  ;;  %v8570_v52 = vpop.eup %8569  ;;  %v8266_v34 = vunpack.i.l.bf16 %v8265_v27 }
 0x9b4   : > { %v5202_v6 = vadd.f32 1.0, %v8570_v52 }
 0x9b5   : > { %v5044_v58 = vmul.f32 %v5012_v41, %v4907_v12  ;;  %v4593_v62 = vpop.f32.mrf.mxu0  ;;  %8571 = vtanh.f32 %v5139_v37  ;;  %v4511_v50 = vpop.f32.mrf.mxu3 }
 0x9b6   : > { %v4594_v63 = vadd.f32 %v4593_v62, %v4504_v60  ;;  %v11190_v37 = vmul.f32 %v5202_v6, %v4978_v10 }
 0x9b7   : > { %v5076_v32 = vmul.f32 %v5044_v58, %v4907_v12 }
 0x9b8   : > { %v4908_v55 = vpop.f32.mrf.mxu1 }
 0x9b9   : > { %v4909_v48 = vadd.f32 %v11164_v61, %v4908_v55  ;;  %v5108_v54 = vadd.f32 %v5076_v32, %v4907_v12  ;;  %v4768_v32 = vsel %vm3994_vm3, %v4594_v63, %v8266_v34 }
 0x9bb   : > { %v8572_v13 = vpop.eup %8571  ;;  %v5013_v30 = vmul.f32 0.044715, %v4909_v48  ;;  %v5140_v28 = vmul.f32 0.7978846, %v5108_v54 }
 0x9bc   : > { %v5203_v44 = vadd.f32 1.0, %v8572_v13 }
 0x9bd   : > { %v5045_v1 = vmul.f32 %v5013_v30, %v4909_v48  ;;  %v4595_v45 = vpop.f32.mrf.mxu0  ;;  %8573 = vtanh.f32 %v5140_v28  ;;  %v4514_v34 = vpop.f32.mrf.mxu3 }
 0x9be   : > { %v4596_v41 = vadd.f32 %v4595_v45, %v4506_v17  ;;  %v11192_v58 = vmul.f32 %v5203_v44, %v4979_v2 }
 0x9bf   : > { %v5077_v55 = vmul.f32 %v5045_v1, %v4909_v48  ;;  %v8270_v1 = vpop.permute.xlu2 %8269 }
 0x9c0   : > { %v4769_v52 = vsel %vm3994_vm3, %v4596_v41, %v8267_v5  ;;  %v4911_v29 = vpop.f32.mrf.mxu1  ;;  %v8293_v23 = vpack.i.bf16 %v11192_v58, %v11190_v37 }
 0x9c1   : > { %v4789_v62 = vpack.c.bf16 %v4769_v52, %v4768_v32  ;;  %v4912_v17 = vadd.f32 %v11164_v61, %v4911_v29  ;;  %v5109_v54 = vadd.f32 %v5077_v55, %v4909_v48  ;;  %v4980_v55 = vmul.f32 0.5, %v4907_v12 }
 0x9c2   : > { %8294 = vrot.lane.b32.xlu1 %v8293_v23, %s8770_s27  ;;  %v4981_v32 = vmul.f32 0.5, %v4909_v48  ;;  %v8272_v23 = vunpack.i.h.bf16 %v8270_v1 }
 0x9c3   : > { %v5014_v27 = vmul.f32 0.044715, %v4912_v17  ;;  %7871 = vmatmul.msk.bf16.gmra.mxu1 %vm4838_vm11, %v4789_v62  ;;  %v5141_v6 = vmul.f32 0.7978846, %v5109_v54  ;;  %v8574_v63 = vpop.eup %8573 }
 0x9c4   : > { %v5204_v45 = vadd.f32 1.0, %v8574_v63 }
 0x9c5   : > { %v5046_v13 = vmul.f32 %v5014_v27, %v4912_v17  ;;  %v4598_v30 = vpop.f32.mrf.mxu0  ;;  %8575 = vtanh.f32 %v5141_v6  ;;  %v8271_v6 = vunpack.i.l.bf16 %v8270_v1 }
 0x9c6   : > { %v4599_v41 = vadd.f32 %v4598_v30, %v4509_v56 }
 0x9c7   : > { %v5078_v10 = vmul.f32 %v5046_v13, %v4912_v17  ;;  %v11204_v13 = vmul.f32 %v5204_v45, %v4980_v55  ;;  %v4516_v45 = vpop.f32.mrf.mxu3 }
 0x9c8   : > { %v4913_v2 = vpop.f32.mrf.mxu1  ;;  %v4770_v63 = vsel %vm3994_vm3, %v4599_v41, %v8271_v6  ;;  %v4982_v6 = vmul.f32 0.5, %v4912_v17 }
 0x9c9   : > { %v4914_v44 = vadd.f32 %v11164_v61, %v4913_v2  ;;  %v5110_v5 = vadd.f32 %v5078_v10, %v4912_v17 }
 0x9cb   : > { %v8576_v29 = vpop.eup %8575  ;;  %v5015_v28 = vmul.f32 0.044715, %v4914_v44  ;;  %v5142_v27 = vmul.f32 0.7978846, %v5110_v5 }
 0x9cc   : > { %v5205_v52 = vadd.f32 1.0, %v8576_v29 }
 0x9cd   : > { %v5047_v62 = vmul.f32 %v5015_v28, %v4914_v44  ;;  %v4600_v54 = vpop.f32.mrf.mxu0  ;;  %8577 = vtanh.f32 %v5142_v27 }
 0x9ce   : > { %v4601_v60 = vadd.f32 %v4600_v54, %v4511_v50  ;;  %v11206_v0 = vmul.f32 %v5205_v52, %v4981_v32 }
 0x9cf   : > { %v5079_v10 = vmul.f32 %v5047_v62, %v4914_v44 }
 0x9d0   : > { %v4771_v2 = vsel %vm3994_vm3, %v4601_v60, %v8272_v23  ;;  %v4916_v40 = vpop.f32.mrf.mxu1  ;;  %v8298_v12 = vpack.i.bf16 %v11206_v0, %v11204_v13  ;;  %v8275_v23 = vpop.permute.xlu0 %8274 }
 0x9d1   : > { %v4790_v48 = vpack.c.bf16 %v4771_v2, %v4770_v63  ;;  %v4917_v30 = vadd.f32 %v11164_v61, %v4916_v40  ;;  %v5111_v50 = vadd.f32 %v5079_v10, %v4914_v44  ;;  %v4983_v10 = vmul.f32 0.5, %v4914_v44 }
 0x9d2   : > { %8299 = vrot.lane.b32.xlu2 %v8298_v12, %s8770_s27  ;;  %v8277_v2 = vunpack.i.h.bf16 %v8275_v23 }
 0x9d3   : > { %v5016_v5 = vmul.f32 0.044715, %v4917_v30  ;;  %7872 = vmatmul.msk.bf16.gmra.mxu1 %vm4838_vm11, %v4790_v48  ;;  %v5143_v1 = vmul.f32 0.7978846, %v5111_v50  ;;  %v8578_v28 = vpop.eup %8577 }
 0x9d4   : > { %v5206_v40 = vadd.f32 1.0, %v8578_v28 }
 0x9d5   : > { %v5048_v60 = vmul.f32 %v5016_v5, %v4917_v30  ;;  %v4603_v29 = vpop.f32.mrf.mxu0  ;;  %8579 = vtanh.f32 %v5143_v1  ;;  %v8276_v5 = vunpack.i.l.bf16 %v8275_v23 }
 0x9d6   : > { %v4604_v27 = vadd.f32 %v4603_v29, %v4514_v34  ;;  %v11218_v56 = vmul.f32 %v5206_v40, %v4982_v6 }
 0x9d7   : > { %v5080_v41 = vmul.f32 %v5048_v60, %v4917_v30 }
 0x9d8   : > { %v4918_v55 = vpop.f32.mrf.mxu1  ;;  %v4772_v28 = vsel %vm3994_vm3, %v4604_v27, %v8276_v5 }
 0x9d9   : > { %v4919_v32 = vadd.f32 %v11164_v61, %v4918_v55  ;;  %v5112_v52 = vadd.f32 %v5080_v41, %v4917_v30  ;;  %v4519_v55 = vpop.f32.mrf.mxu3 }
 0x9db   : > { %v8580_v62 = vpop.eup %8579  ;;  %v5017_v54 = vmul.f32 0.044715, %v4919_v32  ;;  %v5144_v50 = vmul.f32 0.7978846, %v5112_v52 }
 0x9dc   : > { %v5207_v63 = vadd.f32 1.0, %v8580_v62 }
 0x9dd   : > { %v5049_v12 = vmul.f32 %v5017_v54, %v4919_v32  ;;  %v4605_v48 = vpop.f32.mrf.mxu0  ;;  %8581 = vtanh.f32 %v5144_v50 }
 0x9de   : > { %v4606_v1 = vadd.f32 %v4605_v48, %v4516_v45  ;;  %v11220_v60 = vmul.f32 %v5207_v63, %v4983_v10 }
 0x9df   : > { %v5081_v41 = vmul.f32 %v5049_v12, %v4919_v32  ;;  %v8280_v12 = vpop.permute.xlu1 %8279 }
 0x9e0   : > { %v4773_v36 = vsel %vm3994_vm3, %v4606_v1, %v8277_v2  ;;  %v4921_v34 = vpop.f32.mrf.mxu1  ;;  %v8303_v17 = vpack.i.bf16 %v11220_v60, %v11218_v56 }
 0x9e1   : > { %v4791_v29 = vpack.c.bf16 %v4773_v36, %v4772_v28  ;;  %v4922_v45 = vadd.f32 %v11164_v61, %v4921_v34  ;;  %v5113_v52 = vadd.f32 %v5081_v41, %v4919_v32  ;;  %v4521_v63 = vpop.f32.mrf.mxu3  ;;  %v4984_v41 = vmul.f32 0.5, %v4917_v30 }
 0x9e2   : > { %8304 = vrot.lane.b32.xlu0 %v8303_v17, %s8770_s27  ;;  %v4985_v28 = vmul.f32 0.5, %v4919_v32  ;;  %v8282_v17 = vunpack.i.h.bf16 %v8280_v12 }
 0x9e3   : > { %v5018_v23 = vmul.f32 0.044715, %v4922_v45  ;;  %7873 = vmatmul.msk.bf16.gmra.mxu1 %vm4838_vm11, %v4791_v29  ;;  %v5145_v40 = vmul.f32 0.7978846, %v5113_v52  ;;  %v8582_v27 = vpop.eup %8581 }
 0x9e4   : > { %v5208_v48 = vadd.f32 1.0, %v8582_v27 }
 0x9e5   : > { %v5050_v62 = vmul.f32 %v5018_v23, %v4922_v45  ;;  %v4608_v54 = vpop.f32.mrf.mxu0  ;;  %8583 = vtanh.f32 %v5145_v40  ;;  %v8281_v40 = vunpack.i.l.bf16 %v8280_v12 }
 0x9e6   : > { %v4609_v1 = vadd.f32 %v4608_v54, %v4519_v55 }
 0x9e7   : > { %v5082_v6 = vmul.f32 %v5050_v62, %v4922_v45  ;;  %v11232_v62 = vmul.f32 %v5208_v48, %v4984_v41 }
 0x9e8   : > { %v4923_v10 = vpop.f32.mrf.mxu1 }
 0x9e9   : > { %v4924_v2 = vadd.f32 %v11164_v61, %v4923_v10  ;;  %v5114_v36 = vadd.f32 %v5082_v6, %v4922_v45  ;;  %v4774_v6 = vsel %vm3994_vm3, %v4609_v1, %v8281_v40 }
 0x9eb   : > { %v8584_v5 = vpop.eup %8583  ;;  %v5019_v50 = vmul.f32 0.044715, %v4924_v2  ;;  %v5146_v23 = vmul.f32 0.7978846, %v5114_v36  ;;  %v4987_v40 = vmul.f32 0.5, %v4924_v2 }
 0x9ec   : > { %v5209_v34 = vadd.f32 1.0, %v8584_v5 }
 0x9ed   : > { %v5051_v29 = vmul.f32 %v5019_v50, %v4924_v2  ;;  %v4610_v52 = vpop.f32.mrf.mxu0  ;;  %8585 = vtanh.f32 %v5146_v23  ;;  %v4986_v23 = vmul.f32 0.5, %v4922_v45 }
 0x9ee   : > { %v4611_v44 = vadd.f32 %v4610_v52, %v4521_v63  ;;  %v11234_v21 = vmul.f32 %v5209_v34, %v4985_v28  ;;  %v4524_v63 = vpop.f32.mrf.mxu3  ;;  %v8285_v28 = vpop.permute.xlu2 %8284 }
 0x9ef   : > { %v5083_v10 = vmul.f32 %v5051_v29, %v4924_v2 }
 0x9f0   : > { %v4775_v27 = vsel %vm3994_vm3, %v4611_v44, %v8282_v17  ;;  %v4926_v49 = vpop.f32.mrf.mxu1  ;;  %v8308_v30 = vpack.i.bf16 %v11234_v21, %v11232_v62 }
 0x9f1   : > { %v4792_v32 = vpack.c.bf16 %v4775_v27, %v4774_v6  ;;  %v11241_v55 = vadd.f32 %v11164_v61, %v4926_v49  ;;  %v5115_v54 = vadd.f32 %v5083_v10, %v4924_v2  ;;  %v8287_v6 = vunpack.i.h.bf16 %v8285_v28 }
 0x9f2   : > { %8309 = vrot.lane.b32.xlu1 %v8308_v30, %s8770_s27 }
 0x9f3   : > { %v5020_v36 = vmul.f32 0.044715, %v11241_v55  ;;  %7874 = vmatmul.msk.bf16.gmra.mxu1 %vm4838_vm11, %v4792_v32  ;;  %v5147_v12 = vmul.f32 0.7978846, %v5115_v54  ;;  %v8586_v5 = vpop.eup %8585 }
 0x9f4   : > { %v5210_v34 = vadd.f32 1.0, %v8586_v5 }
 0x9f5   : > { %v5052_v44 = vmul.f32 %v5020_v36, %v11241_v55  ;;  %v4613_v48 = vpop.f32.mrf.mxu0  ;;  %8587 = vtanh.f32 %v5147_v12  ;;  %v8286_v36 = vunpack.i.l.bf16 %v8285_v28  ;;  %v8034_v28 = vld [vmem:[%s12919_s11 + $0x94] sm:$0xf0] }
 0x9f6   : > { %v4614_v52 = vadd.f32 %v4613_v48, %v4524_v63  ;;  %v4526_v27 = vpop.f32.mrf.mxu3 }
 0x9f7   : > { %v5084_v50 = vmul.f32 %v5052_v44, %v11241_v55  ;;  %v11250_v44 = vmul.f32 %v5210_v34, %v4986_v23  ;;  %v7942_v23 = vld [vmem:[%s12919_s11 + $0x80] sm:$0xf] }
 0x9f8   : > { %v4928_v1 = vpop.f32.mrf.mxu1  ;;  %v4776_v5 = vsel %vm3994_vm3, %v4614_v52, %v8286_v36 }
 0x9f9   : > { %v4929_v49 = vadd.f32 %v11164_v61, %v4928_v1  ;;  %v5116_v41 = vadd.f32 %v5084_v50, %v11241_v55 }
 0x9fb   : > { %v8588_v17 = vpop.eup %8587  ;;  %v5021_v29 = vmul.f32 0.044715, %v4929_v49  ;;  %v5148_v54 = vmul.f32 0.7978846, %v5116_v41  ;;  %v7950_v41 = vld [vmem:[%s12919_s11 + $0x90] sm:$0xf] }
 0x9fc   : > { %v5211_v10 = vadd.f32 1.0, %v8588_v17  ;;  %v7951_v34 = vor.u32 %v8034_v28, %v7950_v41 }
 0x9fd   : > { %v5053_v30 = vmul.f32 %v5021_v29, %v4929_v49  ;;  %v4615_v32 = vpop.f32.mrf.mxu0  ;;  %8589 = vtanh.f32 %v5148_v54 }
 0x9fe   : > { %v4616_v12 = vadd.f32 %v4615_v32, %v4526_v27  ;;  %v11252_v1 = vmul.f32 %v5211_v10, %v4987_v40  ;;  %5920 = vmatpush.bf16.msrb.mxu1 %v7951_v34  ;;  %v8032_v40 = vld [vmem:[%s12919_s11 + $0x84] sm:$0xf0] }
 0x9ff   : > { %v5085_v50 = vmul.f32 %v5053_v30, %v4929_v49  ;;  %v7943_v10 = vor.u32 %v8032_v40, %v7942_v23 }
 0xa00   : > { %v4777_v11 = vsel %vm3994_vm3, %v4616_v12, %v8287_v6  ;;  %v4931_v63 = vpop.f32.mrf.mxu1  ;;  %v8313_v45 = vpack.i.bf16 %v11252_v1, %v11250_v44 }
 0xa01   : > { %v4793_v2 = vpack.c.bf16 %v4777_v11, %v4776_v5  ;;  %v4932_v48 = vadd.f32 %v11164_v61, %v4931_v63  ;;  %v5117_v17 = vadd.f32 %v5085_v50, %v4929_v49  ;;  %v4988_v5 = vmul.f32 0.5, %v11241_v55 }
 0xa02   : > { %8314 = vrot.lane.b32.xlu2 %v8313_v45, %s8770_s27  ;;  %5921 = vmatpush.bf16.msrb.mxu1 %v7943_v10  ;;  %v4989_v63 = vmul.f32 0.5, %v4929_v49 }
 0xa03   : > { %v5022_v29 = vmul.f32 0.044715, %v4932_v48  ;;  %7875 = vmatmul.msk.bf16.gmra.mxu1 %vm4838_vm11, %v4793_v2  ;;  %v5149_v52 = vmul.f32 0.7978846, %v5117_v17  ;;  %v8590_v6 = vpop.eup %8589 }
 0xa04   : > { %v5212_v36 = vadd.f32 1.0, %v8590_v6 }
 0xa05   : > { %v5054_v11 = vmul.f32 %v5022_v29, %v4932_v48  ;;  %8591 = vtanh.f32 %v5149_v52 }
 0xa06   : > { %v5244_v41 = vmul.f32 %v5212_v36, %v4988_v5  ;;  %v4990_v5 = vmul.f32 0.5, %v4932_v48 }
 0xa07   : > { %v5086_v27 = vmul.f32 %v5054_v11, %v4932_v48 }
 0xa08   : > { %v4933_v30 = vpop.f32.mrf.mxu1 }
 0xa09   : > { %v4934_v32 = vadd.f32 %v11164_v61, %v4933_v30  ;;  %v5118_v54 = vadd.f32 %v5086_v27, %v4932_v48 }
 0xa0b   : > { %v8592_v12 = vpop.eup %8591  ;;  %v5023_v50 = vmul.f32 0.044715, %v4934_v32  ;;  %v5150_v17 = vmul.f32 0.7978846, %v5118_v54 }
 0xa0c   : > { %v5213_v45 = vadd.f32 1.0, %v8592_v12 }
 0xa0d   : > { %v5055_v2 = vmul.f32 %v5023_v50, %v4934_v32  ;;  %8593 = vtanh.f32 %v5150_v17 }
 0xa0e   : > { %v5245_v28 = vmul.f32 %v5213_v45, %v4989_v63  ;;  %v4991_v63 = vmul.f32 0.5, %v4934_v32 }
 0xa0f   : > { %v5087_v34 = vmul.f32 %v5055_v2, %v4934_v32 }
 0xa10   : > { %v4936_v29 = vpop.f32.mrf.mxu1  ;;  %v8318_v52 = vpack.i.bf16 %v5245_v28, %v5244_v41 }
 0xa11   : > { %v4937_v11 = vadd.f32 %v11164_v61, %v4936_v29  ;;  %v5119_v23 = vadd.f32 %v5087_v34, %v4934_v32 }
 0xa12   : > { %8319 = vrot.lane.b32.xlu0 %v8318_v52, %s8770_s27 }
 0xa13   : > { %v5024_v40 = vmul.f32 0.044715, %v4937_v11  ;;  %v5151_v10 = vmul.f32 0.7978846, %v5119_v23  ;;  %v8594_v55 = vpop.eup %8593 }
 0xa14   : > { %v5214_v36 = vadd.f32 1.0, %v8594_v55 }
 0xa15   : > { %v5056_v6 = vmul.f32 %v5024_v40, %v4937_v11  ;;  %8595 = vtanh.f32 %v5151_v10 }
 0xa16   : > { %v5246_v34 = vmul.f32 %v5214_v36, %v4990_v5 }
 0xa17   : > { %v5088_v49 = vmul.f32 %v5056_v6, %v4937_v11 }
 0xa18   : > { %v4938_v27 = vpop.f32.mrf.mxu1 }
 0xa19   : > { %v4939_v30 = vadd.f32 %v11164_v61, %v4938_v27  ;;  %v5120_v54 = vadd.f32 %v5088_v49, %v4937_v11  ;;  %v5270_v49 = vpack.c.bf16 %v5245_v28, %v5244_v41  ;;  %v5269_v41 = vpack.c.bf16 %v11252_v1, %v11250_v44 }
 0xa1b   : > { %v8596_v12 = vpop.eup %8595  ;;  %v5025_v50 = vmul.f32 0.044715, %v4939_v30  ;;  %v5152_v17 = vmul.f32 0.7978846, %v5120_v54 }
 0xa1c   : > { %v5215_v45 = vadd.f32 1.0, %v8596_v12 }
 0xa1d   : > { %v5057_v2 = vmul.f32 %v5025_v50, %v4939_v30  ;;  %8597 = vtanh.f32 %v5152_v17 }
 0xa1e   : > { %v5247_v29 = vmul.f32 %v5215_v45, %v4991_v63 }
 0xa1f   : > { %v5089_v52 = vmul.f32 %v5057_v2, %v4939_v30 }
 0xa20   : > { %v4941_v23 = vpop.f32.mrf.mxu1  ;;  %v8323_v40 = vpack.i.bf16 %v5247_v29, %v5246_v34  ;;  %v5271_v10 = vpack.c.bf16 %v5247_v29, %v5246_v34  ;;  %v5268_v34 = vpack.c.bf16 %v11234_v21, %v11232_v62  ;;  %v4992_v29 = vmul.f32 0.5, %v4937_v11 }
 0xa21   : > { %v11279_v6 = vadd.f32 %v11164_v61, %v4941_v23  ;;  %v5121_v25 = vadd.f32 %v5089_v52, %v4939_v30  ;;  %v4993_v52 = vmul.f32 0.5, %v4939_v30  ;;  %v13350_v11 = vpack.c.bf16 %v11220_v60, %v11218_v56 }
 0xa22   : > { %8324 = vrot.lane.b32.xlu1 %v8323_v40, %s8770_s27  ;;  %5280 = vmatpush.bf16.msra.mxu2 %v5271_v10 }
 0xa23   : > { %v5026_v48 = vmul.f32 0.044715, %v11279_v6  ;;  %v5153_v32 = vmul.f32 0.7978846, %v5121_v25  ;;  %v8598_v12 = vpop.eup %8597 }
 0xa24   : > { %v11283_v55 = vpop.permute.xlu0 %8289  ;;  %v5216_v45 = vadd.f32 1.0, %v8598_v12 }
 0xa25   : > { %v5058_v27 = vmul.f32 %v5026_v48, %v11279_v6  ;;  %v13029_v54 = vunpack.i.h.bf16 %v11283_v55  ;;  %v13030_v36 = vunpack.i.l.bf16 %v11283_v55  ;;  %8599 = vtanh.f32 %v5153_v32 }
 0xa26   : > { %5281 = vmatpush.bf16.msra.mxu2 %v5270_v49  ;;  %v11303_v44 = vmul.f32 %v5216_v45, %v4992_v29  ;;  %v13351_v45 = vpack.c.bf16 %v11206_v0, %v11204_v13 }
 0xa27   : > { %v11292_v50 = vpack.c.bf16 %v13029_v54, %v13030_v36  ;;  %v5090_v25 = vmul.f32 %v5058_v27, %v11279_v6 }
 0xa28   : > { %v4943_v5 = vpop.f32.mrf.mxu1 }
 0xa29   : > { %v4944_v28 = vadd.f32 %v11164_v61, %v4943_v5  ;;  %7956 = vmatmul.msk.bf16.vlgmr.msrb.gmra.mxu1 %vm5776_vm4, %v11292_v50  ;;  %v5122_v63 = vadd.f32 %v5090_v25, %v11279_v6 }
 0xa2a   : > { %5282 = vmatpush.bf16.msra.mxu2 %v5269_v41 }
 0xa2b   : > { %v8600_v2 = vpop.eup %8599  ;;  %v5027_v17 = vmul.f32 0.044715, %v4944_v28  ;;  %v5154_v10 = vmul.f32 0.7978846, %v5122_v63 }
 0xa2c   : > { %v5217_v23 = vadd.f32 1.0, %v8600_v2 }
 0xa2d   : > { %v5059_v40 = vmul.f32 %v5027_v17, %v4944_v28  ;;  %8601 = vtanh.f32 %v5154_v10  ;;  %v4995_v10 = vmul.f32 0.5, %v4944_v28 }
 0xa2e   : > { %5283 = vmatpush.bf16.msra.mxu2 %v5268_v34  ;;  %v11305_v1 = vmul.f32 %v5217_v23, %v4993_v52  ;;  %v13353_v52 = vpack.c.bf16 %v11192_v58, %v11190_v37  ;;  %v11343_v37 = vpop.permute.xlu2 %8299 }
 0xa2f   : > { %v5091_v48 = vmul.f32 %v5059_v40, %v4944_v28  ;;  %v4994_v40 = vmul.f32 0.5, %v11279_v6 }
 0xa30   : > { %v4946_v32 = vpop.f32.mrf.mxu1  ;;  %v8328_v49 = vpack.i.bf16 %v11305_v1, %v11303_v44 }
 0xa31   : > { %v4947_v21 = vadd.f32 %v11164_v61, %v4946_v32  ;;  %v5123_v62 = vadd.f32 %v5091_v48, %v4944_v28 }
 0xa32   : > { %5284 = vmatpush.bf16.msra.mxu2 %v13350_v11  ;;  %8329 = vrot.lane.b32.xlu2 %v8328_v49, %s8770_s27 }
 0xa33   : > { %v5028_v30 = vmul.f32 0.044715, %v4947_v21  ;;  %v5155_v12 = vmul.f32 0.7978846, %v5123_v62  ;;  %v8602_v2 = vpop.eup %8601  ;;  %v13354_v62 = vpack.c.bf16 %v11178_v19, %v11176_v59  ;;  %v13023_v19 = vunpack.i.h.bf16 %v11343_v37 }
 0xa34   : > { %v11316_v25 = vpop.permute.xlu1 %8294  ;;  %v5218_v0 = vadd.f32 1.0, %v8602_v2 }
 0xa35   : > { %v5060_v5 = vmul.f32 %v5028_v30, %v4947_v21  ;;  %v13025_v41 = vunpack.i.h.bf16 %v11316_v25  ;;  %v13028_v63 = vunpack.i.l.bf16 %v11316_v25  ;;  %8603 = vtanh.f32 %v5155_v12 }
 0xa36   : > { %5285 = vmatpush.bf16.msra.mxu2 %v13351_v45  ;;  %v11339_v11 = vmul.f32 %v5218_v0, %v4994_v40  ;;  %v13024_v45 = vunpack.i.l.bf16 %v11343_v37 }
 0xa37   : > { %v11327_v56 = vpack.c.bf16 %v13025_v41, %v13028_v63  ;;  %v5092_v60 = vmul.f32 %v5060_v5, %v4947_v21 }
 0xa38   : > { %v4948_v17 = vpop.f32.mrf.mxu1 }
 0xa39   : > { %13352 = vst [vmem:[#allocation10_spill] sm:$0xff] %v11327_v56  ;;  %v4949_v34 = vadd.f32 %v11164_v61, %v4948_v17  ;;  %7957 = vmatmul.msk.bf16.gmra.mxu1 %vm5776_vm4, %v11327_v56  ;;  %v5124_v29 = vadd.f32 %v5092_v60, %v4947_v21 }
 0xa3a   : > { %5286 = vmatpush.bf16.msra.mxu2 %v13353_v52  ;;  %v11358_v52 = vpack.c.bf16 %v13023_v19, %v13024_v45 }
 0xa3b   : > { %v8604_v13 = vpop.eup %8603  ;;  %v5029_v23 = vmul.f32 0.044715, %v4949_v34  ;;  %v5156_v49 = vmul.f32 0.7978846, %v5124_v29 }
 0xa3c   : > { %v5219_v48 = vadd.f32 1.0, %v8604_v13  ;;  %13355 = vst [vmem:[#allocation11_spill] sm:$0xff] %v11358_v52 }
 0xa3d   : > { %v5061_v32 = vmul.f32 %v5029_v23, %v4949_v34  ;;  %8605 = vtanh.f32 %v5156_v49  ;;  %v4997_v49 = vmul.f32 0.5, %v4949_v34 }
 0xa3e   : > { %5287 = vmatpush.bf16.msra.mxu2 %v13354_v62  ;;  %v11341_v30 = vmul.f32 %v5219_v48, %v4995_v10 }
 0xa3f   : > { %v5093_v12 = vmul.f32 %v5061_v32, %v4949_v34  ;;  %v4996_v32 = vmul.f32 0.5, %v4947_v21 }
 0xa40   : > { %v4951_v58 = vpop.f32.mrf.mxu1  ;;  %v8333_v5 = vpack.i.bf16 %v11341_v30, %v11339_v11 }
 0xa41   : > { %v4952_v28 = vadd.f32 %v11164_v61, %v4951_v58  ;;  %5288 = vmatmul.bf16.vlgmr.msra.gmra.mxu2 %v13314_v33  ;;  %v5125_v59 = vadd.f32 %v5093_v12, %v4949_v34 }
 0xa42   : > { %8334 = vrot.lane.b32.xlu0 %v8333_v5, %s8770_s27 }
 0xa43   : > { %v5030_v2 = vmul.f32 0.044715, %v4952_v28  ;;  %v5157_v60 = vmul.f32 0.7978846, %v5125_v59  ;;  %v8606_v29 = vpop.eup %8605 }
 0xa44   : > { %v5220_v40 = vadd.f32 1.0, %v8606_v29 }
 0xa45   : > { %v5062_v17 = vmul.f32 %v5030_v2, %v4952_v28  ;;  %8607 = vtanh.f32 %v5157_v60 }
 0xa46   : > { %v11363_v5 = vmul.f32 %v5220_v40, %v4996_v32 }
 0xa47   : > { %v5094_v33 = vmul.f32 %v5062_v17, %v4952_v28 }
 0xa48   : > { %v4953_v0 = vpop.f32.mrf.mxu1 }
 0xa49   : > { %v4954_v13 = vadd.f32 %v11164_v61, %v4953_v0  ;;  %7958 = vmatmul.msk.bf16.gmra.mxu1 %vm5776_vm4, %v11358_v52  ;;  %v5126_v23 = vadd.f32 %v5094_v33, %v4952_v28 }
 0xa4b   : > { %v8608_v10 = vpop.eup %8607  ;;  %v5031_v48 = vmul.f32 0.044715, %v4954_v13  ;;  %v5158_v58 = vmul.f32 0.7978846, %v5126_v23 }
 0xa4c   : > { %v5221_v62 = vadd.f32 1.0, %v8608_v10 }
 0xa4d   : > { %v5063_v12 = vmul.f32 %v5031_v48, %v4954_v13  ;;  %8609 = vtanh.f32 %v5158_v58 }
 0xa4e   : > { %v11365_v59 = vmul.f32 %v5221_v62, %v4997_v49 }
 0xa4f   : > { %v5095_v2 = vmul.f32 %v5063_v12, %v4954_v13 }
 0xa50   : > { %v4956_v60 = vpop.f32.mrf.mxu1  ;;  %v8338_v17 = vpack.i.bf16 %v11365_v59, %v11363_v5 }
 0xa51   : > { %v4957_v29 = vadd.f32 %v11164_v61, %v4956_v60  ;;  %5293 = vmatmul.bf16.gmra.mxu2 %v13315_v8  ;;  %v5127_v21 = vadd.f32 %v5095_v2, %v4954_v13 }
 0xa52   : > { %8339 = vrot.lane.b32.xlu1 %v8338_v17, %s8770_s27 }
 0xa53   : > { %v5032_v34 = vmul.f32 0.044715, %v4957_v29  ;;  %v5159_v0 = vmul.f32 0.7978846, %v5127_v21  ;;  %v8610_v32 = vpop.eup %8609  ;;  %v4998_v21 = vmul.f32 0.5, %v4952_v28 }
 0xa54   : > { %v11374_v23 = vpop.permute.xlu0 %8304  ;;  %v5222_v2 = vadd.f32 1.0, %v8610_v32 }
 0xa55   : > { %v5064_v40 = vmul.f32 %v5032_v34, %v4957_v29  ;;  %v13026_v10 = vunpack.i.h.bf16 %v11374_v23  ;;  %v13027_v48 = vunpack.i.l.bf16 %v11374_v23  ;;  %8611 = vtanh.f32 %v5159_v0 }
 0xa56   : > { %v4999_v34 = vmul.f32 0.5, %v4954_v13  ;;  %v11387_v41 = vmul.f32 %v5222_v2, %v4998_v21 }
 0xa57   : > { %v11382_v8 = vpack.c.bf16 %v13026_v10, %v13027_v48  ;;  %v5096_v49 = vmul.f32 %v5064_v40, %v4957_v29 }
 0xa58   : > { %v4958_v62 = vpop.f32.mrf.mxu1 }
 0xa59   : > { %13356 = vst [vmem:[#allocation12_spill] sm:$0xff] %v11382_v8  ;;  %v4959_v12 = vadd.f32 %v11164_v61, %v4958_v62  ;;  %7959 = vmatmul.msk.bf16.gmra.mxu1 %vm5776_vm4, %v11382_v8  ;;  %v5128_v58 = vadd.f32 %v5096_v49, %v4957_v29 }
 0xa5b   : > { %v8612_v60 = vpop.eup %8611  ;;  %v5033_v17 = vmul.f32 0.044715, %v4959_v12  ;;  %v5160_v45 = vmul.f32 0.7978846, %v5128_v58 }
 0xa5c   : > { %v5223_v0 = vadd.f32 1.0, %v8612_v60 }
 0xa5d   : > { %v5065_v19 = vmul.f32 %v5033_v17, %v4959_v12  ;;  %8613 = vtanh.f32 %v5160_v45 }
 0xa5e   : > { %v11389_v10 = vmul.f32 %v5223_v0, %v4999_v34 }
 0xa5f   : > { %v5097_v40 = vmul.f32 %v5065_v19, %v4959_v12 }
 0xa60   : > { %v4961_v48 = vpop.f32.mrf.mxu1  ;;  %v8343_v62 = vpack.i.bf16 %v11389_v10, %v11387_v41 }
 0xa61   : > { %v4962_v32 = vadd.f32 %v11164_v61, %v4961_v48  ;;  %5298 = vmatmul.bf16.gmra.mxu2 %v13316_v4  ;;  %v5129_v28 = vadd.f32 %v5097_v40, %v4959_v12 }
 0xa62   : > { %8344 = vrot.lane.b32.xlu2 %v8343_v62, %s8770_s27 }
 0xa63   : > { %v5034_v13 = vmul.f32 0.044715, %v4962_v32  ;;  %v5161_v58 = vmul.f32 0.7978846, %v5129_v28  ;;  %v8614_v21 = vpop.eup %8613 }
 0xa64   : > { %v11398_v2 = vpop.permute.xlu1 %8309  ;;  %v5224_v40 = vadd.f32 1.0, %v8614_v21 }
 0xa65   : > { %v5066_v19 = vmul.f32 %v5034_v13, %v4962_v32  ;;  %v13031_v60 = vunpack.i.h.bf16 %v11398_v2  ;;  %v13032_v17 = vunpack.i.l.bf16 %v11398_v2  ;;  %8615 = vtanh.f32 %v5161_v58 }
 0xa66   : > { %v5000_v13 = vmul.f32 0.5, %v4957_v29  ;;  %v5001_v58 = vmul.f32 0.5, %v4959_v12 }
 0xa67   : > { %v11406_v4 = vpack.c.bf16 %v13031_v60, %v13032_v17  ;;  %v5098_v45 = vmul.f32 %v5066_v19, %v4962_v32  ;;  %v11415_v17 = vpop.permute.xlu2 %8314 }
 0xa68   : > { %v4963_v48 = vpop.f32.mrf.mxu1  ;;  %v11411_v27 = vmul.f32 %v5224_v40, %v5000_v13  ;;  %v13033_v12 = vunpack.i.h.bf16 %v11415_v17 }
 0xa69   : > { %13357 = vst [vmem:[#allocation13_spill] sm:$0xff] %v11406_v4  ;;  %v4964_v34 = vadd.f32 %v11164_v61, %v4963_v48  ;;  %7960 = vmatmul.msk.bf16.gmra.mxu1 %vm5776_vm4, %v11406_v4  ;;  %v5130_v0 = vadd.f32 %v5098_v45, %v4962_v32 }
 0xa6b   : > { %v8616_v62 = vpop.eup %8615  ;;  %v5035_v28 = vmul.f32 0.044715, %v4964_v34  ;;  %v5162_v36 = vmul.f32 0.7978846, %v5130_v0 }
 0xa6c   : > { %v5225_v63 = vadd.f32 1.0, %v8616_v62 }
 0xa6d   : > { %v5067_v54 = vmul.f32 %v5035_v28, %v4964_v34  ;;  %8617 = vtanh.f32 %v5162_v36  ;;  %v8757_v36 = vld [vmem:[%s12918_s10] ss:$0 sm:$0xff] }
 0xa6e   : > { %v11413_v60 = vmul.f32 %v5225_v63, %v5001_v58  ;;  %v13034_v63 = vunpack.i.l.bf16 %v11415_v17 }
 0xa6f   : > { %v5099_v19 = vmul.f32 %v5067_v54, %v4964_v34 }
 0xa70   : > { %v4966_v48 = vpop.f32.mrf.mxu1  ;;  %v8348_v6 = vpack.i.bf16 %v11413_v60, %v11411_v27 }
 0xa71   : > { %v4967_v21 = vadd.f32 %v11164_v61, %v4966_v48  ;;  %5303 = vmatmul.bf16.gmra.mxu2 %v9813_v24  ;;  %v5131_v29 = vadd.f32 %v5099_v19, %v4964_v34  ;;  %v11428_v61 = vpack.c.bf16 %v13033_v12, %v13034_v63  ;;  %v5002_v48 = vmul.f32 0.5, %v4962_v32 }
 0xa72   : > { %8349 = vrot.lane.b32.xlu0 %v8348_v6, %s8770_s27 }
 0xa73   : > { %v5036_v45 = vmul.f32 0.044715, %v4967_v21  ;;  %v5163_v54 = vmul.f32 0.7978846, %v5131_v29  ;;  %v8618_v40 = vpop.eup %8617  ;;  %13358 = vst [vmem:[#allocation14_spill] sm:$0xff] %v11428_v61  ;;  %v5003_v29 = vmul.f32 0.5, %v4964_v34 }
 0xa74   : > { %v5226_v13 = vadd.f32 1.0, %v8618_v40 }
 0xa75   : > { %v5068_v0 = vmul.f32 %v5036_v45, %v4967_v21  ;;  %8619 = vtanh.f32 %v5163_v54 }
 0xa76   : > { %v11435_v63 = vmul.f32 %v5226_v13, %v5002_v48 }
 0xa77   : > { %v5100_v24 = vmul.f32 %v5068_v0, %v4967_v21 }
 0xa78   : > { %v4968_v62 = vpop.f32.mrf.mxu1 }
 0xa79   : > { %v4969_v6 = vadd.f32 %v8757_v36, %v4968_v62  ;;  %7961 = vmatmul.msk.bf16.gmra.mxu1 %vm5776_vm4, %v11428_v61  ;;  %v5132_v28 = vadd.f32 %v5100_v24, %v4967_v21 }
 0xa7b   : > { %v8620_v58 = vpop.eup %8619  ;;  %v5037_v19 = vmul.f32 0.044715, %v4969_v6  ;;  %v5164_v12 = vmul.f32 0.7978846, %v5132_v28 }
 0xa7c   : > { %v5227_v45 = vadd.f32 1.0, %v8620_v58 }
 0xa7d   : > { %v5069_v54 = vmul.f32 %v5037_v19, %v4969_v6  ;;  %8621 = vtanh.f32 %v5164_v12 }
 0xa7e   : > { %v11437_v0 = vmul.f32 %v5227_v45, %v5003_v29 }
 0xa7f   : > { %v5101_v33 = vmul.f32 %v5069_v54, %v4969_v6 }
 0xa80   : > { %v4971_v49 = vpop.f32.mrf.mxu1  ;;  %v8353_v62 = vpack.i.bf16 %v11437_v0, %v11435_v63 }
 0xa81   : > { %v4972_v4 = vadd.f32 %v8757_v36, %v4971_v49  ;;  %5308 = vmatmul.bf16.gmra.mxu2 %v13329_v57  ;;  %v5133_v40 = vadd.f32 %v5101_v33, %v4969_v6 }
 0xa82   : > { %8354 = vrot.lane.b32.xlu1 %v8353_v62, %s8770_s27  ;;  %v5004_v62 = vmul.f32 0.5, %v4967_v21 }
 0xa83   : > { %v5038_v32 = vmul.f32 0.044715, %v4972_v4  ;;  %v5165_v34 = vmul.f32 0.7978846, %v5133_v40  ;;  %v8622_v19 = vpop.eup %8621  ;;  %v5005_v40 = vmul.f32 0.5, %v4969_v6 }
 0xa84   : > { %v11443_v24 = vpop.permute.xlu0 %8319  ;;  %v5228_v29 = vadd.f32 1.0, %v8622_v19 }
 0xa85   : > { %v5070_v28 = vmul.f32 %v5038_v32, %v4972_v4  ;;  %v13040_v13 = vunpack.i.h.bf16 %v11443_v24  ;;  %v8321_v58 = vunpack.i.l.bf16 %v11443_v24  ;;  %8623 = vtanh.f32 %v5165_v34 }
 0xa86   : > { %v5260_v8 = vmul.f32 %v5228_v29, %v5004_v62 }
 0xa87   : > { %v11451_v57 = vpack.c.bf16 %v13040_v13, %v8321_v58  ;;  %v5102_v33 = vmul.f32 %v5070_v28, %v4972_v4 }
 0xa88   : > { %v4973_v49 = vpop.f32.mrf.mxu1 }
 0xa89   : > { %v4974_v12 = vadd.f32 %v8757_v36, %v4973_v49  ;;  %7962 = vmatmul.msk.bf16.gmra.mxu1 %vm5776_vm4, %v11451_v57  ;;  %v5134_v48 = vadd.f32 %v5102_v33, %v4972_v4 }
 0xa8b   : > { %v8624_v45 = vpop.eup %8623  ;;  %v5039_v54 = vmul.f32 0.044715, %v4974_v12  ;;  %v5166_v61 = vmul.f32 0.7978846, %v5134_v48 }
 0xa8c   : > { %v5229_v32 = vadd.f32 1.0, %v8624_v45 }
 0xa8d   : > { %v5071_v34 = vmul.f32 %v5039_v54, %v4974_v12  ;;  %8625 = vtanh.f32 %v5166_v61  ;;  %v5006_v61 = vmul.f32 0.5, %v4972_v4  ;;  %v11469_v54 = vpop.permute.xlu2 %8329 }
 0xa8e   : > { %v5261_v52 = vmul.f32 %v5229_v32, %v5005_v40  ;;  %v13055_v32 = vunpack.i.h.bf16 %v11469_v54 }
 0xa8f   : > { %v5103_v56 = vmul.f32 %v5071_v34, %v4974_v12  ;;  %v13056_v34 = vunpack.i.l.bf16 %v11469_v54 }
 0xa90   : > { %v8358_v13 = vpack.i.bf16 %v5261_v52, %v5260_v8 }
 0xa91   : > { %5313 = vmatmul.bf16.gmra.mxu2 %v10044_v9  ;;  %v5135_v28 = vadd.f32 %v5103_v56, %v4974_v12  ;;  %v11479_v4 = vpack.c.bf16 %v13055_v32, %v13056_v34  ;;  %v8023_v34 = vld [vmem:[%s12919_s11 + $0x44] sm:$0xf] }
 0xa92   : > { %8359 = vrot.lane.b32.xlu2 %v8358_v13, %s8770_s27  ;;  %v5007_v13 = vmul.f32 0.5, %v4974_v12  ;;  %v5277_v12 = vpack.c.bf16 %v11437_v0, %v11435_v63  ;;  %v13360_v0 = vpack.c.bf16 %v11365_v59, %v11363_v5 }
 0xa93   : > { %v5167_v36 = vmul.f32 0.7978846, %v5135_v28  ;;  %v8626_v6 = vpop.eup %8625  ;;  %v5278_v28 = vpack.c.bf16 %v5261_v52, %v5260_v8  ;;  %v13359_v52 = vpack.c.bf16 %v11389_v10, %v11387_v41  ;;  %v13362_v41 = vpack.c.bf16 %v11305_v1, %v11303_v44 }
 0xa94   : > { %v11457_v33 = vpop.permute.xlu1 %8324  ;;  %v5230_v9 = vadd.f32 1.0, %v8626_v6 }
 0xa95   : > { %v13057_v19 = vunpack.i.h.bf16 %v11457_v33  ;;  %v8326_v21 = vunpack.i.l.bf16 %v11457_v33  ;;  %8627 = vtanh.f32 %v5167_v36 }
 0xa96   : > { %v5262_v29 = vmul.f32 %v5230_v9, %v5006_v61 }
 0xa97   : > { %v11465_v49 = vpack.c.bf16 %v13057_v19, %v8326_v21 }
 0xa99   : > { %7963 = vmatmul.msk.bf16.gmra.mxu1 %vm5776_vm4, %v11465_v49 }
 0xa9b   : > { %v8628_v56 = vpop.eup %8627 }
 0xa9c   : > { %v5231_v48 = vadd.f32 1.0, %v8628_v56 }
 0xa9e   : > { %v5263_v45 = vmul.f32 %v5231_v48, %v5007_v13 }
 0xaa0   : > { %v8363_v62 = vpack.i.bf16 %v5263_v45, %v5262_v29  ;;  %v5279_v40 = vpack.c.bf16 %v5263_v45, %v5262_v29 }
 0xaa1   : > { %5318 = vmatmul.bf16.gmra.mxu2 %v10058_v18  ;;  %v5276_v18 = vpack.c.bf16 %v11413_v60, %v11411_v27 }
 0xaa2   : > { %8364 = vrot.lane.b32.xlu0 %v8363_v62, %s8770_s27  ;;  %5369 = vmatpush.bf16.msra.mxu3 %v5279_v40 }
 0xaa6   : > { %5370 = vmatpush.bf16.msra.mxu3 %v5278_v28  ;;  %v11534_v44 = vpop.f32.mrf.mxu1 }
 0xaa9   : > { %7964 = vmatmul.msk.bf16.gmra.mxu1 %vm5776_vm4, %v11479_v4 }
 0xaaa   : > { %5371 = vmatpush.bf16.msra.mxu3 %v5277_v12 }
 0xaae   : > { %5372 = vmatpush.bf16.msra.mxu3 %v5276_v18 }
 0xab1   : > { %5323 = vmatmul.bf16.gmra.mxu2 %v10072_v26  ;;  %v13361_v26 = vpack.c.bf16 %v11341_v30, %v11339_v11 }
 0xab2   : > { %5373 = vmatpush.bf16.msra.mxu3 %v13359_v52 }
 0xab4   : > { %v11491_v8 = vpop.permute.xlu0 %8334 }
 0xab5   : > { %v13051_v36 = vunpack.i.h.bf16 %v11491_v8  ;;  %v13052_v63 = vunpack.i.l.bf16 %v11491_v8 }
 0xab6   : > { %5374 = vmatpush.bf16.msra.mxu3 %v13360_v0 }
 0xab7   : > { %v11502_v27 = vpack.c.bf16 %v13051_v36, %v13052_v63 }
 0xab9   : > { %7965 = vmatmul.msk.bf16.gmra.mxu1 %vm5776_vm4, %v11502_v27 }
 0xaba   : > { %5375 = vmatpush.bf16.msra.mxu3 %v13361_v26 }
 0xabe   : > { %5376 = vmatpush.bf16.msra.mxu3 %v13362_v41 }
 0xac1   : > { %5328 = vmatmul.bf16.gmra.mxu2 %v10086_v31  ;;  %5377 = vmatmul.bf16.vlgmr.msra.gmra.mxu3 %v10198_v38  ;;  %v11530_v38 = vpop.permute.xlu2 %8344 }
 0xac2   : > { %v13047_v1 = vunpack.i.h.bf16 %v11530_v38  ;;  %v13048_v30 = vunpack.i.l.bf16 %v11530_v38 }
 0xac4   : > { %v11514_v5 = vpop.f32.mrf.mxu2  ;;  %v11516_v59 = vpop.permute.xlu1 %8339  ;;  %v11544_v9 = vpack.c.bf16 %v13047_v1, %v13048_v30 }
 0xac5   : > { %v13049_v10 = vunpack.i.h.bf16 %v11516_v59  ;;  %v13050_v60 = vunpack.i.l.bf16 %v11516_v59 }
 0xac7   : > { %v11524_v11 = vpack.c.bf16 %v13049_v10, %v13050_v60  ;;  %v7926_v10 = vld [vmem:[%s12919_s11 + $0x60] sm:$0xf]  ;;  %v8026_v60 = vld [vmem:[%s12919_s11 + $0x54] sm:$0xf0] }
 0xac9   : > { %7966 = vmatmul.msk.bf16.gmra.mxu1 %vm5776_vm4, %v11524_v11 }
 0xacc   : > { %v11528_v31 = vpop.f32.mrf.mxu2 }
 0xad1   : > { %5333 = vmatmul.bf16.gmra.mxu2 %v10100_v35  ;;  %5382 = vmatmul.bf16.gmra.mxu3 %v10212_v15  ;;  %v11550_v15 = vpop.f32.mrf.mxu1 }
 0xad4   : > { %v11538_v6 = vpop.f32.mrf.mxu2 }
 0xad9   : > { %7967 = vmatmul.msk.bf16.gmra.mxu1 %vm5776_vm4, %v11544_v9  ;;  %v11560_v29 = vpop.f32.mrf.mxu1 }
 0xadc   : > { %v11548_v35 = vpop.f32.mrf.mxu2 }
 0xae1   : > { %5338 = vmatmul.bf16.gmra.mxu2 %v10114_v39  ;;  %5387 = vmatmul.bf16.gmra.mxu3 %v10226_v7  ;;  %v11572_v7 = vpop.f32.mrf.mxu1 }
 0xae4   : > { %v11554_v56 = vpop.permute.xlu0 %8349  ;;  %v11558_v48 = vpop.f32.mrf.mxu2 }
 0xae5   : > { %v13045_v61 = vunpack.i.h.bf16 %v11554_v56  ;;  %v13046_v13 = vunpack.i.l.bf16 %v11554_v56 }
 0xae7   : > { %v11566_v45 = vpack.c.bf16 %v13045_v61, %v13046_v13  ;;  %v7936_v13 = vld [vmem:[%s12919_s11 + $0x78] sm:$0xf0] }
 0xae9   : > { %7968 = vmatmul.msk.bf16.gmra.mxu1 %vm5776_vm4, %v11566_v45 }
 0xaec   : > { %v11570_v39 = vpop.f32.mrf.mxu2 }
 0xaf1   : > { %5343 = vmatmul.bf16.gmra.mxu2 %v10128_v43  ;;  %5392 = vmatmul.bf16.gmra.mxu3 %v10240_v53  ;;  %v11590_v43 = vpop.f32.mrf.mxu1  ;;  %v11592_v53 = vpop.permute.xlu2 %8359 }
 0xaf2   : > { %v13043_v52 = vunpack.i.h.bf16 %v11592_v53  ;;  %v13044_v0 = vunpack.i.l.bf16 %v11592_v53 }
 0xaf4   : > { %v11576_v62 = vpop.permute.xlu1 %8354  ;;  %v11588_v18 = vpop.f32.mrf.mxu2 }
 0xaf5   : > { %v13041_v40 = vunpack.i.h.bf16 %v11576_v62  ;;  %v13042_v28 = vunpack.i.l.bf16 %v11576_v62 }
 0xaf7   : > { %v11584_v12 = vpack.c.bf16 %v13041_v40, %v13042_v28  ;;  %v11606_v40 = vpack.c.bf16 %v13043_v52, %v13044_v0  ;;  %v7934_v28 = vld [vmem:[%s12919_s11 + $0x70] sm:$0xf]  ;;  %v8030_v52 = vld [vmem:[%s12919_s11 + $0x74] sm:$0xf0]  ;;  %v8029_v0 = vld [vmem:[%s12919_s11 + $0x74] sm:$0xf] }
 0xaf8   : > { %v7935_v61 = vor.u32 %v8030_v52, %v7934_v28  ;;  %v8028_v28 = vld [vmem:[%s12919_s11 + $0x64] sm:$0xf0] }
 0xaf9   : > { %7969 = vmatmul.msk.bf16.gmra.mxu1 %vm5776_vm4, %v11584_v12  ;;  %v11600_v41 = vpop.f32.mrf.mxu1  ;;  %v7927_v52 = vor.u32 %v8028_v28, %v7926_v10  ;;  %v7920_v10 = vld [vmem:[%s12919_s11 + $0x58] sm:$0xf0] }
 0xafa   : > { %5825 = vmatpush.bf16.msrb.mxu0 %v7935_v61 }
 0xafc   : > { %v11598_v26 = vpop.f32.mrf.mxu2 }
 0xafe   : > { %5826 = vmatpush.bf16.msrb.mxu0 %v7927_v52 }
 0xb01   : > { %5348 = vmatmul.bf16.gmra.mxu2 %v10142_v47  ;;  %5397 = vmatmul.bf16.gmra.mxu3 %v10257_v3  ;;  %v11612_v3 = vpop.f32.mrf.mxu1 }
 0xb04   : > { %v11610_v47 = vpop.f32.mrf.mxu2 }
 0xb09   : > { %7970 = vmatmul.msk.bf16.gmra.mxu1 %vm5776_vm4, %v11606_v40  ;;  %v11664_v28 = vpop.f32.mrf.mxu1 }
 0xb0c   : > { %v11656_v36 = vpop.f32.mrf.mxu2 }
 0xb11   : > { %5353 = vmatmul.bf16.gmra.mxu2 %v10156_v51  ;;  %5402 = vmatmul.bf16.gmra.mxu3 %v10271_v22  ;;  %v7939_v51 = vor.u32 %v8029_v0, %v7936_v13  ;;  %v8027_v13 = vld [vmem:[%s12919_s11 + $0x64] sm:$0xf]  ;;  %v7928_v0 = vld [vmem:[%s12919_s11 + $0x68] sm:$0xf0] }
 0xb12   : > { %v7931_v63 = vor.u32 %v8027_v13, %v7928_v0  ;;  %v7910_v13 = vld [vmem:[%s12919_s11 + $0x40] sm:$0xf]  ;;  %v8024_v0 = vld [vmem:[%s12919_s11 + $0x44] sm:$0xf0] }
 0xb13   : > { %6003 = vmatpush.bf16.msrb.mxu2 %v7939_v51  ;;  %v7918_v51 = vld [vmem:[%s12919_s11 + $0x50] sm:$0xf]  ;;  %v7911_v19 = vor.u32 %v8024_v0, %v7910_v13  ;;  %v7896_v0 = vld [vmem:[%s12919_s11 + $0x28] sm:$0xf0] }
 0xb14   : > { %v11628_v1 = vpop.permute.xlu0 %8364  ;;  %v11691_v52 = vpop.f32.mrf.mxu2 }
 0xb15   : > { %v13053_v22 = vunpack.i.h.bf16 %v11628_v1  ;;  %v13054_v30 = vunpack.i.l.bf16 %v11628_v1 }
 0xb17   : > { %v11645_v61 = vpack.c.bf16 %v13053_v22, %v13054_v30  ;;  %v8025_v22 = vld [vmem:[%s12919_s11 + $0x54] sm:$0xf]  ;;  %v7919_v30 = vor.u32 %v8026_v60, %v7918_v51  ;;  %6004 = vmatpush.bf16.msrb.mxu2 %v7931_v63  ;;  %v7912_v63 = vld [vmem:[%s12919_s11 + $0x48] sm:$0xf0]  ;;  %v7894_v51 = vld [vmem:[%s12919_s11 + $0x20] sm:$0xf] }
 0xb18   : > { %v7923_v32 = vor.u32 %v8025_v22, %v7920_v10  ;;  %v7915_v60 = vor.u32 %v8023_v34, %v7912_v63  ;;  %v8021_v22 = vld [vmem:[%s12919_s11 + $0x34] sm:$0xf]  ;;  %v8020_v10 = vld [vmem:[%s12919_s11 + $0x24] sm:$0xf0]  ;;  %v7886_v63 = vld [vmem:[%s12919_s11 + $0x10] sm:$0xf] }
 0xb19   : > { %7971 = vmatmul.msk.bf16.gmra.mxu1 %vm5776_vm4, %v11645_v61  ;;  %5827 = vmatpush.bf16.msrb.mxu0 %v7919_v30  ;;  %v8022_v30 = vld [vmem:[%s12919_s11 + $0x34] sm:$0xf0]  ;;  %v7895_v13 = vor.u32 %v8020_v10, %v7894_v51  ;;  %v7878_v51 = vld [vmem:[%s12919_s11] sm:$0xf]  ;;  %v8016_v10 = vld [vmem:[%s12919_s11 + $0x4] sm:$0xf0] }
 0xb1b   : > { %6005 = vmatpush.bf16.msrb.mxu2 %v7923_v32  ;;  %v7902_v32 = vld [vmem:[%s12919_s11 + $0x30] sm:$0xf] }
 0xb1c   : > { %v7903_v34 = vor.u32 %v8022_v30, %v7902_v32  ;;  %v8017_v30 = vld [vmem:[%s12919_s11 + $0x14] sm:$0xf] }
 0xb1d   : > { %5828 = vmatpush.bf16.msrb.mxu0 %v7911_v19  ;;  %v8019_v19 = vld [vmem:[%s12919_s11 + $0x24] sm:$0xf] }
 0xb1e   : > { %v7899_v32 = vor.u32 %v8019_v19, %v7896_v0  ;;  %v8015_v19 = vld [vmem:[%s12919_s11 + $0x4] sm:$0xf]  ;;  %v7880_v0 = vld [vmem:[%s12919_s11 + $0x8] sm:$0xf0] }
 0xb1f   : > { %6006 = vmatpush.bf16.msrb.mxu2 %v7915_v60  ;;  %v8018_v60 = vld [vmem:[%s12919_s11 + $0x14] sm:$0xf0] }
 0xb21   : > { %5358 = vmatmul.bf16.gmra.mxu2 %v10170_v20  ;;  %5407 = vmatmul.bf16.gmra.mxu3 %v10285_v16  ;;  %v7904_v20 = vld [vmem:[%s12919_s11 + $0x38] sm:$0xf0] }
 0xb22   : > { %v7907_v16 = vor.u32 %v8021_v22, %v7904_v20  ;;  %5829 = vmatpush.bf16.msrb.mxu0 %v7903_v34  ;;  %v7888_v22 = vld [vmem:[%s12919_s11 + $0x18] sm:$0xf0]  ;;  %v7887_v34 = vor.u32 %v8018_v60, %v7886_v63  ;;  %v7883_v63 = vor.u32 %v8015_v19, %v7880_v0  ;;  %v13365_v0 = vld [vmem:[#allocation3_spill] sm:$0xff] }
 0xb23   : > { %v7891_v20 = vor.u32 %v8017_v30, %v7888_v22 }
 0xb24   : > { %6007 = vmatpush.bf16.msrb.mxu2 %v7907_v16  ;;  %v11720_v16 = vpop.f32.mrf.mxu2 }
 0xb26   : > { %5830 = vmatpush.bf16.msrb.mxu0 %v7895_v13  ;;  %v7879_v13 = vor.u32 %v8016_v10, %v7878_v51  ;;  %v13364_v10 = vunpack.i.h.bf16 %v11283_v55 }
 0xb28   : > { %6008 = vmatpush.bf16.msrb.mxu2 %v7899_v32 }
 0xb2a   : > { %5831 = vmatpush.bf16.msrb.mxu0 %v7887_v34 }
 0xb2c   : > { %6009 = vmatpush.bf16.msrb.mxu2 %v7891_v20  ;;  %v11736_v60 = vpop.f32.mrf.mxu2 }
 0xb2e   : > { %5832 = vmatpush.bf16.msrb.mxu0 %v7879_v13 }
 0xb30   : > { %6010 = vmatpush.bf16.msrb.mxu2 %v7883_v63 }
 0xb31   : > { %5363 = vmatmul.bf16.gmra.mxu2 %v10184_v42  ;;  %5412 = vmatmul.bf16.gmra.mxu3 %v10301_v46  ;;  %v13363_v42 = vunpack.i.l.bf16 %v11283_v55 }
 0xb34   : > { %v11738_v32 = vpop.f32.mrf.mxu2 }
 0xb3c   : > { %v11741_v22 = vpop.f32.mrf.mxu2 }
 0xb41   : > { %5417 = vmatmul.bf16.gmra.mxu3 %v10305_v14 }
 0xb44   : > { %v5378_v30 = vpop.f32.mrf.mxu3  ;;  %v11752_v14 = vpop.f32.mrf.mxu2 }
 0xb45   : > { %v5379_v34 = vadd.f32 %v5378_v30, %v11514_v5 }
 0xb47   : > { %v5586_v46 = vsel %vm4838_vm11, %v5379_v34, %v13363_v42  ;;  %v13366_v34 = vunpack.i.l.bf16 %v11316_v25 }
 0xb4c   : > { %v5380_v20 = vpop.f32.mrf.mxu3 }
 0xb4d   : > { %v5381_v51 = vadd.f32 %v5380_v20, %v11528_v31  ;;  %v11756_v20 = vpop.f32.mrf.mxu2 }
 0xb4f   : > { %v5587_v19 = vsel %vm4838_vm11, %v5381_v51, %v13364_v10  ;;  %v13367_v51 = vunpack.i.h.bf16 %v11316_v25  ;;  %v13368_v10 = vld [vmem:[#allocation4_spill] sm:$0xff]  ;;  %v13370_v25 = vunpack.i.h.bf16 %v11343_v37 }
 0xb50   : > { %v5618_v13 = vpack.c.bf16 %v5587_v19, %v5586_v46 }
 0xb51   : > { %5422 = vmatmul.bf16.gmra.mxu3 %v13365_v0 }
 0xb52   : > { %5833 = vmatmul.bf16.vlgmr.msrb.gmra.mxu0 %v5618_v13  ;;  %6011 = vmatmul.bf16.vlgmr.msrb.gmra.mxu2 %v5618_v13 }
 0xb54   : > { %v5383_v63 = vpop.f32.mrf.mxu3 }
 0xb55   : > { %v5384_v5 = vadd.f32 %v5383_v63, %v11538_v6  ;;  %v11765_v6 = vpop.f32.mrf.mxu2  ;;  %v13369_v63 = vunpack.i.l.bf16 %v11343_v37 }
 0xb57   : > { %v5588_v55 = vsel %vm4838_vm11, %v5384_v5, %v13366_v34  ;;  %v13371_v34 = vld [vmem:[#allocation5_spill] sm:$0xff] }
 0xb5c   : > { %v5385_v30 = vpop.f32.mrf.mxu3 }
 0xb5d   : > { %v5386_v31 = vadd.f32 %v5385_v30, %v11548_v35 }
 0xb5f   : > { %v5589_v42 = vsel %vm4838_vm11, %v5386_v31, %v13367_v51 }
 0xb60   : > { %v5620_v46 = vpack.c.bf16 %v5589_v42, %v5588_v55  ;;  %v11776_v55 = vpop.f32.mrf.mxu2 }
 0xb61   : > { %5427 = vmatmul.bf16.gmra.mxu3 %v13368_v10  ;;  %v13372_v10 = vunpack.i.l.bf16 %v11374_v23 }
 0xb62   : > { %5838 = vmatmul.bf16.gmra.mxu0 %v5620_v46  ;;  %6016 = vmatmul.bf16.gmra.mxu2 %v5620_v46 }
 0xb64   : > { %v5388_v19 = vpop.f32.mrf.mxu3 }
 0xb65   : > { %v5389_v35 = vadd.f32 %v5388_v19, %v11558_v48  ;;  %v13373_v19 = vunpack.i.h.bf16 %v11374_v23 }
 0xb67   : > { %v5590_v5 = vsel %vm4838_vm11, %v5389_v35, %v13369_v63 }
 0xb68   : > { %v11779_v42 = vpop.f32.mrf.mxu2 }
 0xb6c   : > { %v5390_v13 = vpop.f32.mrf.mxu3 }
 0xb6d   : > { %v5391_v0 = vadd.f32 %v5390_v13, %v11570_v39 }
 0xb6f   : > { %v5591_v30 = vsel %vm4838_vm11, %v5391_v0, %v13370_v25  ;;  %v13374_v0 = vld [vmem:[#allocation6_spill] sm:$0xff] }
 0xb70   : > { %v5622_v31 = vpack.c.bf16 %v5591_v30, %v5590_v5  ;;  %v11795_v25 = vpop.f32.mrf.mxu2 }
 0xb71   : > { %5432 = vmatmul.bf16.gmra.mxu3 %v13371_v34  ;;  %v13375_v34 = vunpack.i.l.bf16 %v11398_v2 }
 0xb72   : > { %5843 = vmatmul.bf16.gmra.mxu0 %v5622_v31  ;;  %6021 = vmatmul.bf16.gmra.mxu2 %v5622_v31 }
 0xb74   : > { %v5393_v51 = vpop.f32.mrf.mxu3 }
 0xb75   : > { %v5394_v48 = vadd.f32 %v5393_v51, %v11588_v18  ;;  %v8033_v18 = vld [vmem:[%s12919_s11 + $0x94] sm:$0xf] }
 0xb77   : > { %v5592_v37 = vsel %vm4838_vm11, %v5394_v48, %v13372_v10  ;;  %v13376_v48 = vunpack.i.h.bf16 %v11398_v2  ;;  %v8031_v2 = vld [vmem:[%s12919_s11 + $0x84] sm:$0xf] }
 0xb7c   : > { %v5395_v39 = vpop.f32.mrf.mxu3 }
 0xb7d   : > { %v5396_v46 = vadd.f32 %v5395_v39, %v11598_v26  ;;  %v7952_v26 = vld [vmem:[%s12919_s11 + $0x98] sm:$0xf0] }
 0xb7e   : > { %v7955_v63 = vor.u32 %v8033_v18, %v7952_v26  ;;  %v13378_v26 = vunpack.i.l.bf16 %v11415_v17 }
 0xb7f   : > { %v5593_v35 = vsel %vm4838_vm11, %v5396_v46, %v13373_v19  ;;  %v11805_v46 = vpop.f32.mrf.mxu2 }
 0xb80   : > { %v5624_v13 = vpack.c.bf16 %v5593_v35, %v5592_v37  ;;  %6098 = vmatpush.bf16.msrb.mxu3 %v7955_v63  ;;  %v13377_v37 = vld [vmem:[#allocation7_spill] sm:$0xff] }
 0xb81   : > { %5437 = vmatmul.bf16.gmra.mxu3 %v13374_v0  ;;  %v7944_v0 = vld [vmem:[%s12919_s11 + $0x88] sm:$0xf0] }
 0xb82   : > { %5848 = vmatmul.bf16.gmra.mxu0 %v5624_v13  ;;  %6026 = vmatmul.bf16.gmra.mxu2 %v5624_v13  ;;  %v7947_v18 = vor.u32 %v8031_v2, %v7944_v0 }
 0xb84   : > { %v5398_v5 = vpop.f32.mrf.mxu3  ;;  %6099 = vmatpush.bf16.msrb.mxu3 %v7947_v18 }
 0xb85   : > { %v5399_v23 = vadd.f32 %v5398_v5, %v11610_v47  ;;  %v13379_v5 = vunpack.i.h.bf16 %v11415_v17 }
 0xb87   : > { %v5594_v51 = vsel %vm4838_vm11, %v5399_v23, %v13375_v34  ;;  %v11808_v47 = vpop.f32.mrf.mxu2 }
 0xb8c   : > { %v5400_v30 = vpop.f32.mrf.mxu3 }
 0xb8d   : > { %v5401_v31 = vadd.f32 %v5400_v30, %v11656_v36 }
 0xb8f   : > { %v5595_v39 = vsel %vm4838_vm11, %v5401_v31, %v13376_v48  ;;  %v11825_v30 = vpop.f32.mrf.mxu2 }
 0xb90   : > { %v5626_v10 = vpack.c.bf16 %v5595_v39, %v5594_v51 }
 0xb91   : > { %5442 = vmatmul.bf16.gmra.mxu3 %v13377_v37 }
 0xb92   : > { %5853 = vmatmul.bf16.gmra.mxu0 %v5626_v10  ;;  %6031 = vmatmul.bf16.gmra.mxu2 %v5626_v10  ;;  %v13381_v10 = vunpack.i.h.bf16 %v11443_v24  ;;  %v13383_v24 = vunpack.i.h.bf16 %v11457_v33 }
 0xb94   : > { %v5403_v19 = vpop.f32.mrf.mxu3 }
 0xb95   : > { %v5404_v36 = vadd.f32 %v5403_v19, %v11691_v52 }
 0xb97   : > { %v5596_v63 = vsel %vm4838_vm11, %v5404_v36, %v13378_v26  ;;  %v11829_v39 = vpop.f32.mrf.mxu2  ;;  %v13382_v36 = vld [vmem:[#allocation9_spill] sm:$0xff] }
 0xb9c   : > { %v5405_v35 = vpop.f32.mrf.mxu3 }
 0xb9d   : > { %v5406_v13 = vadd.f32 %v5405_v35, %v11720_v16  ;;  %v13380_v16 = vld [vmem:[#allocation8_spill] sm:$0xff] }
 0xb9f   : > { %v5597_v52 = vsel %vm4838_vm11, %v5406_v13, %v13379_v5 }
 0xba0   : > { %v5628_v23 = vpack.c.bf16 %v5597_v52, %v5596_v63 }
 0xba1   : > { %5447 = vmatmul.bf16.gmra.mxu3 %v13380_v16 }
 0xba2   : > { %5858 = vmatmul.bf16.gmra.mxu0 %v5628_v23  ;;  %6036 = vmatmul.bf16.gmra.mxu2 %v5628_v23  ;;  %v13384_v23 = vunpack.i.l.bf16 %v11469_v54 }
 0xba4   : > { %v5408_v31 = vpop.f32.mrf.mxu3 }
 0xba5   : > { %v5409_v34 = vadd.f32 %v5408_v31, %v11736_v60  ;;  %v11838_v60 = vpop.f32.mrf.mxu2  ;;  %v13385_v31 = vunpack.i.h.bf16 %v11469_v54 }
 0xba7   : > { %v5598_v17 = vsel %vm4838_vm11, %v5409_v34, %v8321_v58 }
 0xbac   : > { %v5410_v51 = vpop.f32.mrf.mxu3 }
 0xbad   : > { %v5411_v48 = vadd.f32 %v5410_v51, %v11738_v32  ;;  %v11850_v26 = vpop.f32.mrf.mxu2 }
 0xbaf   : > { %v5599_v37 = vsel %vm4838_vm11, %v5411_v48, %v13381_v10  ;;  %v13386_v48 = vld [vmem:[#allocation10_spill] sm:$0xff] }
 0xbb0   : > { %v5630_v19 = vpack.c.bf16 %v5599_v37, %v5598_v17 }
 0xbb1   : > { %5452 = vmatmul.bf16.gmra.mxu3 %v13382_v36 }
 0xbb2   : > { %5863 = vmatmul.bf16.gmra.mxu0 %v5630_v19  ;;  %6041 = vmatmul.bf16.gmra.mxu2 %v5630_v19 }
 0xbb4   : > { %v5413_v35 = vpop.f32.mrf.mxu3 }
 0xbb5   : > { %v5414_v32 = vadd.f32 %v5413_v35, %v11741_v22  ;;  %v11858_v63 = vpop.f32.mrf.mxu2 }
 0xbb7   : > { %v5600_v58 = vsel %vm4838_vm11, %v5414_v32, %v8326_v21 }
 0xbbc   : > { %v5415_v13 = vpop.f32.mrf.mxu3 }
 0xbbd   : > { %v5416_v2 = vadd.f32 %v5415_v13, %v11752_v14  ;;  %v11855_v14 = vld [vmem:[%s12920_s12] sm:$0x3]  ;;  %v11874_v37 = vpop.f32.mrf.mxu2 }
 0xbbe   : > { %v11861_v5 = vperm.slane %v11855_v14, 0 }
 0xbbf   : > { %v5601_v0 = vsel %vm4838_vm11, %v5416_v2, %v13383_v24 }
 0xbc0   : > { %v5632_v18 = vpack.c.bf16 %v5601_v0, %v5600_v58 }
 0xbc1   : > { %7972 = vmatmul.msk.bf16.vlgmr.msrb.gmra.mxu3 %vm5776_vm4, %v11292_v50 }
 0xbc2   : > { %5868 = vmatmul.bf16.gmra.mxu0 %v5632_v18  ;;  %6046 = vmatmul.bf16.gmra.mxu2 %v5632_v18 }
 0xbc4   : > { %v5418_v22 = vpop.f32.mrf.mxu3 }
 0xbc5   : > { %v5419_v21 = vadd.f32 %v5418_v22, %v11756_v20 }
 0xbc7   : > { %v5602_v16 = vsel %vm4838_vm11, %v5419_v21, %v13384_v23  ;;  %v13387_v21 = vunpack.i.l.bf16 %v11491_v8  ;;  %v11886_v23 = vpop.f32.mrf.mxu2 }
 0xbcc   : > { %v5420_v33 = vpop.f32.mrf.mxu3 }
 0xbcd   : > { %v5421_v50 = vadd.f32 %v5420_v33, %v11765_v6 }
 0xbcf   : > { %v5834_v52 = vpop.f32.mrf.mxu0  ;;  %v5603_v34 = vsel %vm4838_vm11, %v5421_v50, %v13385_v31  ;;  %v13388_v50 = vunpack.i.h.bf16 %v11491_v8  ;;  %v13389_v31 = vld [vmem:[#allocation11_spill] sm:$0xff] }
 0xbd0   : > { %v5835_v51 = vadd.f32 %v5834_v52, %v11861_v5  ;;  %v5634_v20 = vpack.c.bf16 %v5603_v34, %v5602_v16 }
 0xbd1   : > { %7973 = vmatmul.msk.bf16.gmra.mxu3 %vm5776_vm4, %v13386_v48 }
 0xbd2   : > { %v5924_v17 = vadd.f32 %v11534_v44, %v5835_v51  ;;  %5873 = vmatmul.bf16.gmra.mxu0 %v5634_v20  ;;  %6051 = vmatmul.bf16.gmra.mxu2 %v5634_v20  ;;  %v11894_v51 = vpop.f32.mrf.mxu1 }
 0xbd4   : > { %v6245_v6 = vmul.f32 0.044715, %v5924_v17  ;;  %v5423_v10 = vpop.f32.mrf.mxu3 }
 0xbd5   : > { %v5424_v2 = vadd.f32 %v5423_v10, %v11776_v55 }
 0xbd6   : > { %v6309_v19 = vmul.f32 %v6245_v6, %v5924_v17 }
 0xbd7   : > { %v5836_v36 = vpop.f32.mrf.mxu0  ;;  %v5604_v33 = vsel %vm4838_vm11, %v5424_v2, %v13387_v21 }
 0xbd8   : > { %v5837_v54 = vadd.f32 %v5836_v36, %v11861_v5  ;;  %v6373_v35 = vmul.f32 %v6309_v19, %v5924_v17 }
 0xbda   : > { %v5926_v32 = vadd.f32 %v11550_v15, %v5837_v54  ;;  %v6437_v13 = vadd.f32 %v6373_v35, %v5924_v17  ;;  %v11900_v35 = vpop.f32.mrf.mxu2  ;;  %v11905_v21 = vpop.f32.mrf.mxu1 }
 0xbdc   : > { %v6247_v58 = vmul.f32 0.044715, %v5926_v32  ;;  %v5425_v24 = vpop.f32.mrf.mxu3  ;;  %v6501_v0 = vmul.f32 0.7978846, %v6437_v13 }
 0xbdd   : > { %v5426_v44 = vadd.f32 %v5425_v24, %v11779_v42  ;;  %v6181_v24 = vmul.f32 0.5, %v5924_v17 }
 0xbde   : > { %v6311_v18 = vmul.f32 %v6247_v58, %v5926_v32  ;;  %8629 = vtanh.f32 %v6501_v0 }
 0xbdf   : > { %v5839_v22 = vpop.f32.mrf.mxu0  ;;  %v5605_v52 = vsel %vm4838_vm11, %v5426_v44, %v13388_v50  ;;  %v6183_v50 = vmul.f32 0.5, %v5926_v32 }
 0xbe0   : > { %v5840_v15 = vadd.f32 %v5839_v22, %v11861_v5  ;;  %v5636_v55 = vpack.c.bf16 %v5605_v52, %v5604_v33  ;;  %v6375_v16 = vmul.f32 %v6311_v18, %v5926_v32 }
 0xbe1   : > { %7974 = vmatmul.msk.bf16.gmra.mxu3 %vm5776_vm4, %v13389_v31 }
 0xbe2   : > { %v11892_v42 = vadd.f32 %v11560_v29, %v5840_v15  ;;  %5878 = vmatmul.bf16.gmra.mxu0 %v5636_v55  ;;  %6056 = vmatmul.bf16.gmra.mxu2 %v5636_v55  ;;  %v6439_v34 = vadd.f32 %v6375_v16, %v5926_v32  ;;  %v13390_v16 = vunpack.i.l.bf16 %v11516_v59 }
 0xbe4   : > { %v6249_v8 = vmul.f32 0.044715, %v11892_v42  ;;  %v5428_v20 = vpop.f32.mrf.mxu3  ;;  %v6503_v48 = vmul.f32 0.7978846, %v6439_v34  ;;  %v8630_v6 = vpop.eup %8629  ;;  %v13391_v34 = vunpack.i.h.bf16 %v11516_v59 }
 0xbe5   : > { %v6629_v29 = vadd.f32 1.0, %v8630_v6  ;;  %v5429_v58 = vadd.f32 %v5428_v20, %v11795_v25  ;;  %v6759_v25 = vld [vmem:[%s12921_s13 + $0x10] sm:$0xff] }
 0xbe6   : > { %v6313_v10 = vmul.f32 %v6249_v8, %v11892_v42  ;;  %8631 = vtanh.f32 %v6503_v48  ;;  %v13392_v6 = vld [vmem:[#allocation12_spill] sm:$0xff] }
 0xbe7   : > { %v5841_v19 = vpop.f32.mrf.mxu0  ;;  %v6693_v15 = vmul.f32 %v6629_v29, %v6181_v24  ;;  %v5606_v31 = vsel %vm4838_vm11, %v5429_v58, %v13390_v16  ;;  %v11932_v29 = vpop.f32.mrf.mxu2 }
 0xbe8   : > { %v5842_v36 = vadd.f32 %v5841_v19, %v11861_v5  ;;  %v6377_v54 = vmul.f32 %v6313_v10, %v11892_v42 }
 0xbea   : > { %v5931_v13 = vadd.f32 %v11572_v7, %v5842_v36  ;;  %v6441_v2 = vadd.f32 %v6377_v54, %v11892_v42  ;;  %v6757_v7 = vld [vmem:[%s12921_s13] sm:$0xff] }
 0xbeb   : > { %v11923_v10 = vmul.f32 %v6757_v7, %v6693_v15  ;;  %v6185_v7 = vmul.f32 0.5, %v11892_v42 }
 0xbec   : > { %v8632_v0 = vpop.eup %8631  ;;  %v6251_v44 = vmul.f32 0.044715, %v5931_v13  ;;  %v5430_v18 = vpop.f32.mrf.mxu3  ;;  %v6505_v22 = vmul.f32 0.7978846, %v6441_v2 }
 0xbed   : > { %v5431_v33 = vadd.f32 %v5430_v18, %v11805_v46  ;;  %v6631_v52 = vadd.f32 1.0, %v8632_v0  ;;  %v11936_v18 = vpop.f32.mrf.mxu1 }
 0xbee   : > { %v6315_v55 = vmul.f32 %v6251_v44, %v5931_v13  ;;  %8633 = vtanh.f32 %v6505_v22 }
 0xbef   : > { %v5844_v17 = vpop.f32.mrf.mxu0  ;;  %v5607_v46 = vsel %vm4838_vm11, %v5431_v33, %v13391_v34  ;;  %v6695_v32 = vmul.f32 %v6631_v52, %v6183_v50 }
 0xbf0   : > { %v5845_v8 = vadd.f32 %v5844_v17, %v11861_v5  ;;  %v5638_v20 = vpack.c.bf16 %v5607_v46, %v5606_v31  ;;  %v6379_v48 = vmul.f32 %v6315_v55, %v5931_v13  ;;  %v11944_v17 = vpop.f32.mrf.mxu2 }
 0xbf1   : > { %7975 = vmatmul.msk.bf16.gmra.mxu3 %vm5776_vm4, %v13392_v6  ;;  %v11925_v19 = vmul.f32 %v6759_v25, %v6695_v32  ;;  %v6187_v32 = vmul.f32 0.5, %v5931_v13  ;;  %v13393_v6 = vunpack.i.l.bf16 %v11530_v38 }
 0xbf2   : > { %v11928_v36 = vadd.f32 %v11590_v43, %v5845_v8  ;;  %5883 = vmatmul.bf16.gmra.mxu0 %v5638_v20  ;;  %6061 = vmatmul.bf16.gmra.mxu2 %v5638_v20  ;;  %v6443_v59 = vadd.f32 %v6379_v48, %v5931_v13 }
 0xbf4   : > { %v6253_v2 = vmul.f32 0.044715, %v11928_v36  ;;  %v5433_v58 = vpop.f32.mrf.mxu3  ;;  %v6507_v24 = vmul.f32 0.7978846, %v6443_v59  ;;  %v8634_v0 = vpop.eup %8633 }
 0xbf5   : > { %v6633_v50 = vadd.f32 1.0, %v8634_v0  ;;  %v5434_v55 = vadd.f32 %v5433_v58, %v11808_v47  ;;  %v6763_v47 = vld [vmem:[%s12921_s13 + $0x30] sm:$0xff] }
 0xbf6   : > { %v6317_v44 = vmul.f32 %v6253_v2, %v11928_v36  ;;  %8635 = vtanh.f32 %v6507_v24  ;;  %v13394_v2 = vunpack.i.h.bf16 %v11530_v38 }
 0xbf7   : > { %v5846_v43 = vpop.f32.mrf.mxu0  ;;  %v6697_v20 = vmul.f32 %v6633_v50, %v6185_v7  ;;  %v5608_v59 = vsel %vm4838_vm11, %v5434_v55, %v13393_v6 }
 0xbf8   : > { %v5847_v22 = vadd.f32 %v5846_v43, %v11861_v5  ;;  %v6381_v33 = vmul.f32 %v6317_v44, %v11928_v36  ;;  %v11960_v44 = vpop.f32.mrf.mxu1  ;;  %v13395_v43 = vld [vmem:[#allocation13_spill] sm:$0xff] }
 0xbfa   : > { %v5936_v52 = vadd.f32 %v11600_v41, %v5847_v22  ;;  %v6445_v15 = vadd.f32 %v6381_v33, %v11928_v36  ;;  %v6761_v41 = vld [vmem:[%s12921_s13 + $0x20] sm:$0xff] }
 0xbfb   : > { %v11964_v22 = vmul.f32 %v6761_v41, %v6697_v20 }
 0xbfc   : > { %v8636_v25 = vpop.eup %8635  ;;  %v6255_v16 = vmul.f32 0.044715, %v5936_v52  ;;  %v5435_v31 = vpop.f32.mrf.mxu3  ;;  %v6509_v34 = vmul.f32 0.7978846, %v6445_v15 }
 0xbfd   : > { %v5436_v46 = vadd.f32 %v5435_v31, %v11825_v30  ;;  %v6635_v8 = vadd.f32 1.0, %v8636_v25  ;;  %v11971_v31 = vpop.f32.mrf.mxu2 }
 0xbfe   : > { %v6319_v48 = vmul.f32 %v6255_v16, %v5936_v52  ;;  %8637 = vtanh.f32 %v6509_v34 }
 0xbff   : > { %v5849_v42 = vpop.f32.mrf.mxu0  ;;  %v5609_v30 = vsel %vm4838_vm11, %v5436_v46, %v13394_v2  ;;  %v6699_v13 = vmul.f32 %v6635_v8, %v6187_v32 }
 0xc00   : > { %v5850_v58 = vadd.f32 %v5849_v42, %v11861_v5  ;;  %v5640_v24 = vpack.c.bf16 %v5609_v30, %v5608_v59  ;;  %v6383_v0 = vmul.f32 %v6319_v48, %v5936_v52  ;;  %v11975_v41 = vpop.f32.mrf.mxu1  ;;  %v6189_v42 = vmul.f32 0.5, %v11928_v36 }
 0xc01   : > { %7976 = vmatmul.msk.bf16.gmra.mxu3 %vm5776_vm4, %v13395_v43  ;;  %v11966_v33 = vmul.f32 %v6763_v47, %v6699_v13  ;;  %v13396_v36 = vunpack.i.l.bf16 %v11554_v56 }
 0xc02   : > { %v5939_v50 = vadd.f32 %v11612_v3, %v5850_v58  ;;  %5888 = vmatmul.bf16.gmra.mxu0 %v5640_v24  ;;  %6066 = vmatmul.bf16.gmra.mxu2 %v5640_v24  ;;  %v6447_v38 = vadd.f32 %v6383_v0, %v5936_v52  ;;  %v6191_v58 = vmul.f32 0.5, %v5936_v52 }
 0xc04   : > { %v6257_v55 = vmul.f32 0.044715, %v5939_v50  ;;  %v5438_v7 = vpop.f32.mrf.mxu3  ;;  %v6511_v25 = vmul.f32 0.7978846, %v6447_v38  ;;  %v8638_v16 = vpop.eup %8637 }
 0xc05   : > { %v6637_v20 = vadd.f32 1.0, %v8638_v16  ;;  %v5439_v47 = vadd.f32 %v5438_v7, %v11829_v39  ;;  %v6767_v39 = vld [vmem:[%s12921_s13 + $0x50] sm:$0xff]  ;;  %v13397_v7 = vunpack.i.h.bf16 %v11554_v56 }
 0xc06   : > { %v6321_v34 = vmul.f32 %v6257_v55, %v5939_v50  ;;  %8639 = vtanh.f32 %v6511_v25  ;;  %v11992_v25 = vpop.f32.mrf.mxu2 }
 0xc07   : > { %v5851_v46 = vpop.f32.mrf.mxu0  ;;  %v6701_v0 = vmul.f32 %v6637_v20, %v6189_v42  ;;  %v5610_v55 = vsel %vm4838_vm11, %v5439_v47, %v13396_v36 }
 0xc08   : > { %v5852_v32 = vadd.f32 %v5851_v46, %v11861_v5  ;;  %v6385_v8 = vmul.f32 %v6321_v34, %v5939_v50 }
 0xc0a   : > { %v5941_v3 = vadd.f32 %v11664_v28, %v5852_v32  ;;  %v6449_v48 = vadd.f32 %v6385_v8, %v5939_v50  ;;  %v6765_v28 = vld [vmem:[%s12921_s13 + $0x40] sm:$0xff] }
 0xc0b   : > { %v13398_v32 = vld [vmem:[#allocation14_spill] sm:$0xff]  ;;  %v11997_v8 = vmul.f32 %v6765_v28, %v6701_v0  ;;  %v6193_v0 = vmul.f32 0.5, %v5939_v50 }
 0xc0c   : > { %v8640_v6 = vpop.eup %8639  ;;  %v6259_v59 = vmul.f32 0.044715, %v5941_v3  ;;  %v5440_v2 = vpop.f32.mrf.mxu3  ;;  %v6513_v30 = vmul.f32 0.7978846, %v6449_v48 }
 0xc0d   : > { %v5441_v13 = vadd.f32 %v5440_v2, %v11838_v60  ;;  %v6639_v24 = vadd.f32 1.0, %v8640_v6 }
 0xc0e   : > { %v6323_v43 = vmul.f32 %v6259_v59, %v5941_v3  ;;  %8641 = vtanh.f32 %v6513_v30  ;;  %v5955_v59 = vpop.f32.mrf.mxu1 }
 0xc0f   : > { %v5854_v38 = vpop.f32.mrf.mxu0  ;;  %v5611_v60 = vsel %vm4838_vm11, %v5441_v13, %v13397_v7  ;;  %v6703_v52 = vmul.f32 %v6639_v24, %v6191_v58  ;;  %v12006_v58 = vpop.f32.mrf.mxu2  ;;  %v6771_v7 = vld [vmem:[%s12921_s13 + $0x70] sm:$0xff] }
 0xc10   : > { %v5855_v16 = vadd.f32 %v5854_v38, %v11861_v5  ;;  %v5642_v34 = vpack.c.bf16 %v5611_v60, %v5610_v55  ;;  %v6387_v46 = vmul.f32 %v6323_v43, %v5941_v3  ;;  %v6769_v55 = vld [vmem:[%s12921_s13 + $0x60] sm:$0xff] }
 0xc11   : > { %7977 = vmatmul.msk.bf16.gmra.mxu3 %vm5776_vm4, %v13398_v32  ;;  %v11999_v20 = vmul.f32 %v6767_v39, %v6703_v52  ;;  %v6195_v39 = vmul.f32 0.5, %v5941_v3 }
 0xc12   : > { %v12002_v48 = vadd.f32 %v11894_v51, %v5855_v16  ;;  %5893 = vmatmul.bf16.gmra.mxu0 %v5642_v34  ;;  %6071 = vmatmul.bf16.gmra.mxu2 %v5642_v34  ;;  %v6451_v56 = vadd.f32 %v6387_v46, %v5941_v3 }
 0xc14   : > { %v5443_v42 = vpop.f32.mrf.mxu3  ;;  %v6515_v6 = vmul.f32 0.7978846, %v6451_v56  ;;  %v8642_v2 = vpop.eup %8641 }
 0xc15   : > { %v6641_v13 = vadd.f32 1.0, %v8642_v2  ;;  %v5444_v24 = vadd.f32 %v5443_v42, %v11850_v26  ;;  %v13399_v26 = vunpack.i.l.bf16 %v11576_v62 }
 0xc16   : > { %8643 = vtanh.f32 %v6515_v6  ;;  %v12016_v60 = vpop.f32.mrf.mxu1 }
 0xc17   : > { %v5856_v30 = vpop.f32.mrf.mxu0  ;;  %v6705_v36 = vmul.f32 %v6641_v13, %v6193_v0  ;;  %v5612_v50 = vsel %vm4838_vm11, %v5444_v24, %v13399_v26  ;;  %v12032_v42 = vpop.f32.mrf.mxu2 }
 0xc19   : > { %v12026_v46 = vmul.f32 %v6769_v55, %v6705_v36  ;;  %v5857_v36 = vadd.f32 %v5856_v30, %v11861_v5 }
 0xc1b   : > { %v12054_v26 = vadd.f32 %v11905_v21, %v5857_v36 }
 0xc1c   : > { %v8644_v51 = vpop.eup %8643  ;;  %v5445_v43 = vpop.f32.mrf.mxu3 }
 0xc1d   : > { %v5446_v28 = vadd.f32 %v5445_v43, %v11858_v63  ;;  %v6643_v38 = vadd.f32 1.0, %v8644_v51  ;;  %v13400_v63 = vunpack.i.h.bf16 %v11576_v62  ;;  %v13401_v43 = vunpack.i.l.bf16 %v11592_v53 }
 0xc1e   : > { %v12034_v2 = vpop.f32.mrf.mxu1 }
 0xc1f   : > { %v5859_v52 = vpop.f32.mrf.mxu0  ;;  %v5613_v3 = vsel %vm4838_vm11, %v5446_v28, %v13400_v63  ;;  %v6707_v16 = vmul.f32 %v6643_v38, %v6195_v39  ;;  %v12038_v0 = vpop.f32.mrf.mxu2  ;;  %v13402_v39 = vunpack.i.h.bf16 %v11592_v53 }
 0xc20   : > { %v5644_v34 = vpack.c.bf16 %v5613_v3, %v5612_v50  ;;  %v6261_v50 = vmul.f32 0.044715, %v12002_v48  ;;  %v6263_v3 = vmul.f32 0.044715, %v12054_v26 }
 0xc21   : > { %7978 = vmatmul.msk.bf16.gmra.mxu3 %vm5776_vm4, %v11451_v57  ;;  %v12028_v32 = vmul.f32 %v6771_v7, %v6707_v16 }
 0xc22   : > { %5898 = vmatmul.bf16.gmra.mxu0 %v5644_v34  ;;  %6076 = vmatmul.bf16.gmra.mxu2 %v5644_v34  ;;  %v6325_v21 = vmul.f32 %v6261_v50, %v12002_v48 }
 0xc24   : > { %v5448_v6 = vpop.f32.mrf.mxu3 }
 0xc25   : > { %v5449_v13 = vadd.f32 %v5448_v6, %v11874_v37  ;;  %v5860_v37 = vadd.f32 %v5859_v52, %v11861_v5 }
 0xc27   : > { %v5861_v62 = vpop.f32.mrf.mxu0  ;;  %v5614_v28 = vsel %vm4838_vm11, %v5449_v13, %v13401_v43  ;;  %v12058_v30 = vadd.f32 %v11936_v18, %v5860_v37  ;;  %v12063_v52 = vpop.f32.mrf.mxu2 }
 0xc28   : > { %v5862_v34 = vadd.f32 %v5861_v62, %v11861_v5 }
 0xc29   : > { %v6265_v6 = vmul.f32 0.044715, %v12058_v30 }
 0xc2a   : > { %v12078_v43 = vadd.f32 %v11960_v44, %v5862_v34  ;;  %v13404_v44 = vunpack.i.h.bf16 %v11628_v1 }
 0xc2c   : > { %v5450_v24 = vpop.f32.mrf.mxu3 }
 0xc2d   : > { %v5451_v57 = vadd.f32 %v5450_v24, %v11886_v23  ;;  %v12050_v23 = vpop.f32.mrf.mxu1  ;;  %v6327_v24 = vmul.f32 %v6263_v3, %v12054_v26 }
 0xc2f   : > { %v5864_v51 = vpop.f32.mrf.mxu0  ;;  %v5615_v38 = vsel %vm4838_vm11, %v5451_v57, %v13402_v39  ;;  %v6329_v39 = vmul.f32 %v6265_v6, %v12058_v30  ;;  %v6391_v50 = vmul.f32 %v6327_v24, %v12054_v26  ;;  %v12100_v3 = vpop.f32.mrf.mxu2 }
 0xc30   : > { %v5646_v55 = vpack.c.bf16 %v5615_v38, %v5614_v28  ;;  %v5865_v7 = vadd.f32 %v5864_v51, %v11861_v5  ;;  %v12085_v38 = vperm.slane %v11855_v14, 1 }
 0xc31   : > { %7979 = vmatmul.msk.bf16.gmra.mxu3 %vm5776_vm4, %v11465_v49 }
 0xc32   : > { %5903 = vmatmul.bf16.gmra.mxu0 %v5646_v55  ;;  %6081 = vmatmul.bf16.gmra.mxu2 %v5646_v55  ;;  %v12061_v63 = vadd.f32 %v11975_v41, %v5865_v7  ;;  %v13403_v55 = vunpack.i.l.bf16 %v11628_v1  ;;  %v6393_v1 = vmul.f32 %v6329_v39, %v12058_v30 }
 0xc34   : > { %v5453_v53 = vpop.f32.mrf.mxu3  ;;  %v6269_v18 = vmul.f32 0.044715, %v12061_v63 }
 0xc35   : > { %v5454_v41 = vadd.f32 %v5453_v53, %v11900_v35  ;;  %v12075_v51 = vpop.f32.mrf.mxu1 }
 0xc36   : > { %v6333_v35 = vmul.f32 %v6269_v18, %v12061_v63 }
 0xc37   : > { %v5866_v49 = vpop.f32.mrf.mxu0  ;;  %v5616_v37 = vsel %vm4838_vm11, %v5454_v41, %v13403_v55 }
 0xc38   : > { %v5867_v16 = vadd.f32 %v5866_v49, %v11861_v5  ;;  %v6267_v49 = vmul.f32 0.044715, %v12078_v43  ;;  %v6397_v6 = vmul.f32 %v6333_v35, %v12061_v63 }
 0xc3a   : > { %v12070_v13 = vadd.f32 %v5955_v59, %v5867_v16  ;;  %v6389_v59 = vmul.f32 %v6325_v21, %v12002_v48  ;;  %v6013_v21 = vadd.f32 %v11944_v17, %v12085_v38  ;;  %v6331_v24 = vmul.f32 %v6267_v49, %v12078_v43 }
 0xc3c   : > { %v5455_v57 = vpop.f32.mrf.mxu3  ;;  %v6271_v62 = vmul.f32 0.044715, %v12070_v13  ;;  %v6453_v34 = vadd.f32 %v6389_v59, %v12002_v48 }
 0xc3d   : > { %v5456_v28 = vadd.f32 %v5455_v57, %v11932_v29  ;;  %v12118_v59 = vpop.f32.mrf.mxu1 }
 0xc3e   : > { %v6335_v14 = vmul.f32 %v6271_v62, %v12070_v13  ;;  %v6517_v39 = vmul.f32 0.7978846, %v6453_v34 }
 0xc3f   : > { %v5869_v36 = vpop.f32.mrf.mxu0  ;;  %v5617_v7 = vsel %vm4838_vm11, %v5456_v28, %v13404_v44  ;;  %v6457_v28 = vadd.f32 %v6393_v1, %v12058_v30  ;;  %v6015_v1 = vadd.f32 %v11971_v31, %v12085_v38 }
 0xc40   : > { %v5870_v29 = vadd.f32 %v5869_v36, %v11861_v5  ;;  %v5648_v53 = vpack.c.bf16 %v5617_v7, %v5616_v37  ;;  %v6399_v57 = vmul.f32 %v6335_v14, %v12070_v13  ;;  %v6461_v36 = vadd.f32 %v6397_v6, %v12061_v63 }
 0xc41   : > { %7980 = vmatmul.msk.bf16.gmra.mxu3 %vm5776_vm4, %v11479_v4  ;;  %v6455_v4 = vadd.f32 %v6391_v50, %v12054_v26  ;;  %v6521_v14 = vmul.f32 0.7978846, %v6457_v28  ;;  %8645 = vtanh.f32 %v6517_v39 }
 0xc42   : > { %v12103_v16 = vadd.f32 %v12016_v60, %v5870_v29  ;;  %5908 = vmatmul.bf16.gmra.mxu0 %v5648_v53  ;;  %6086 = vmatmul.bf16.gmra.mxu2 %v5648_v53  ;;  %v6463_v29 = vadd.f32 %v6399_v57, %v12070_v13  ;;  %v6395_v53 = vmul.f32 %v6331_v24, %v12078_v43 }
 0xc43   : > { %v6519_v44 = vmul.f32 0.7978846, %v6455_v4 }
 0xc44   : > { %v6273_v18 = vmul.f32 0.044715, %v12103_v16  ;;  %v6101_v41 = vpop.f32.mrf.mxu3  ;;  %v6527_v24 = vmul.f32 0.7978846, %v6463_v29  ;;  %v6459_v57 = vadd.f32 %v6395_v53, %v12078_v43  ;;  %v12148_v29 = vpop.f32.mrf.mxu2 }
 0xc45   : > { %v12113_v60 = vadd.f32 %v6101_v41, %v6013_v21  ;;  %v6525_v21 = vmul.f32 0.7978846, %v6461_v36  ;;  %8647 = vtanh.f32 %v6519_v44 }
 0xc46   : > { %v6337_v62 = vmul.f32 %v6273_v18, %v12103_v16  ;;  %8649 = vtanh.f32 %v6521_v14  ;;  %v6523_v44 = vmul.f32 0.7978846, %v6459_v57  ;;  %v6018_v14 = vadd.f32 %v11992_v25, %v12085_v38 }
 0xc47   : > { %v6246_v17 = vmul.f32 0.044715, %v12113_v60  ;;  %v5871_v35 = vpop.f32.mrf.mxu0  ;;  %8651 = vtanh.f32 %v6525_v21  ;;  %v6197_v25 = vmul.f32 0.5, %v12002_v48 }
 0xc48   : > { %v6401_v55 = vmul.f32 %v6337_v62, %v12103_v16  ;;  %v5872_v37 = vadd.f32 %v5871_v35, %v11861_v5 }
 0xc49   : > { %v6310_v7 = vmul.f32 %v6246_v17, %v12113_v60  ;;  %v8646_v17 = vpop.eup %8645 }
 0xc4a   : > { %v6465_v50 = vadd.f32 %v6401_v55, %v12103_v16  ;;  %v12129_v49 = vadd.f32 %v12034_v2, %v5872_v37  ;;  %v12143_v55 = vpop.f32.mrf.mxu1 }
 0xc4b   : > { %v6374_v34 = vmul.f32 %v6310_v7, %v12113_v60  ;;  %v8648_v7 = vpop.eup %8647 }
 0xc4c   : > { %v6529_v6 = vmul.f32 0.7978846, %v6465_v50  ;;  %v6275_v18 = vmul.f32 0.044715, %v12129_v49  ;;  %v6103_v41 = vpop.f32.mrf.mxu3  ;;  %v8650_v21 = vpop.eup %8649 }
 0xc4d   : > { %v12135_v4 = vadd.f32 %v6103_v41, %v6015_v1  ;;  %v6438_v2 = vadd.f32 %v6374_v34, %v12113_v60  ;;  %v6645_v34 = vadd.f32 1.0, %v8646_v17 }
 0xc4e   : > { %v6339_v62 = vmul.f32 %v6275_v18, %v12129_v49  ;;  %8653 = vtanh.f32 %v6529_v6  ;;  %v12161_v6 = vadd.f32 %v12032_v42, %v12085_v38  ;;  %v12173_v42 = vmul.f32 0.5, %v12054_v26 }
 0xc4f   : > { %v6248_v31 = vmul.f32 0.044715, %v12135_v4  ;;  %v5874_v28 = vpop.f32.mrf.mxu0  ;;  %v6502_v39 = vmul.f32 0.7978846, %v6438_v2  ;;  %8655 = vtanh.f32 %v6527_v24  ;;  %v8652_v24 = vpop.eup %8651  ;;  %v12179_v48 = vmul.f32 %v6645_v34, %v6197_v25 }
 0xc50   : > { %v6403_v35 = vmul.f32 %v6339_v62, %v12129_v49  ;;  %v5875_v36 = vadd.f32 %v5874_v28, %v11861_v5  ;;  %v6207_v34 = vmul.f32 0.5, %v12070_v13  ;;  %v6211_v13 = vmul.f32 0.5, %v12129_v49 }
 0xc51   : > { %v6312_v37 = vmul.f32 %v6248_v31, %v12135_v4  ;;  %7981 = vmatmul.msk.bf16.gmra.mxu3 %vm5776_vm4, %v11502_v27  ;;  %8657 = vtanh.f32 %v6502_v39  ;;  %v6020_v27 = vadd.f32 %v12006_v58, %v12085_v38  ;;  %v12170_v58 = vmul.f32 0.5, %v12058_v30 }
 0xc52   : > { %v6467_v53 = vadd.f32 %v6403_v35, %v12129_v49  ;;  %v12152_v50 = vadd.f32 %v12050_v23, %v5875_v36  ;;  %8659 = vtanh.f32 %v6523_v44  ;;  %v12177_v35 = vmul.f32 0.5, %v12078_v43 }
 0xc53   : > { %v6376_v1 = vmul.f32 %v6312_v37, %v12135_v4  ;;  %v12183_v30 = vadd.f32 1.0, %v8648_v7 }
 0xc54   : > { %v6531_v18 = vmul.f32 0.7978846, %v6467_v53  ;;  %v6277_v41 = vmul.f32 0.044715, %v12152_v50  ;;  %v6106_v23 = vpop.f32.mrf.mxu3  ;;  %v8654_v62 = vpop.eup %8653  ;;  %v6205_v53 = vmul.f32 0.5, %v12061_v63 }
 0xc55   : > { %v12164_v57 = vadd.f32 %v6106_v23, %v6018_v14  ;;  %v6440_v2 = vadd.f32 %v6376_v1, %v12135_v4  ;;  %v8656_v28 = vpop.eup %8655  ;;  %v6657_v1 = vadd.f32 1.0, %v8654_v62  ;;  %v12194_v63 = vpop.f32.mrf.mxu1 }
 0xc56   : > { %v6341_v31 = vmul.f32 %v6277_v41, %v12152_v50  ;;  %8661 = vtanh.f32 %v6531_v18  ;;  %v12187_v18 = vadd.f32 1.0, %v8650_v21  ;;  %v6655_v41 = vadd.f32 1.0, %v8656_v28 }
 0xc57   : > { %v6250_v39 = vmul.f32 0.044715, %v12164_v57  ;;  %v5876_v17 = vpop.f32.mrf.mxu0  ;;  %v6504_v36 = vmul.f32 0.7978846, %v6440_v2  ;;  %v8658_v37 = vpop.eup %8657  ;;  %v6209_v2 = vmul.f32 0.5, %v12103_v16  ;;  %v6182_v28 = vmul.f32 0.5, %v12113_v60 }
 0xc58   : > { %v5877_v44 = vadd.f32 %v5876_v17, %v11861_v5  ;;  %v6405_v26 = vmul.f32 %v6341_v31, %v12152_v50  ;;  %v8660_v25 = vpop.eup %8659  ;;  %v6653_v31 = vadd.f32 1.0, %v8652_v24  ;;  %v6630_v62 = vadd.f32 1.0, %v8658_v37  ;;  %v6785_v24 = vld [vmem:[%s12921_s13 + $0xe0] sm:$0xff]  ;;  %v6787_v37 = vld [vmem:[%s12921_s13 + $0xf0] sm:$0xff] }
 0xc59   : > { %v6314_v14 = vmul.f32 %v6250_v39, %v12164_v57  ;;  %8663 = vtanh.f32 %v6504_v36  ;;  %v12198_v39 = vpop.f32.mrf.mxu2  ;;  %v6721_v54 = vmul.f32 %v6657_v1, %v6209_v2  ;;  %v6719_v49 = vmul.f32 %v6655_v41, %v6207_v34 }
 0xc5a   : > { %v12190_v43 = vadd.f32 %v12075_v51, %v5877_v44  ;;  %v6469_v23 = vadd.f32 %v6405_v26, %v12152_v50  ;;  %v6651_v15 = vadd.f32 1.0, %v8660_v25  ;;  %v6184_v60 = vmul.f32 0.5, %v12135_v4 }
 0xc5b   : > { %v6378_v7 = vmul.f32 %v6314_v14, %v12164_v57  ;;  %v6849_v4 = vmul.f32 %v6785_v24, %v6721_v54  ;;  %v6717_v25 = vmul.f32 %v6653_v31, %v6205_v53 }
 0xc5c   : > { %v8662_v21 = vpop.eup %8661  ;;  %v6279_v51 = vmul.f32 0.044715, %v12190_v43  ;;  %v6108_v17 = vpop.f32.mrf.mxu3  ;;  %v6533_v36 = vmul.f32 0.7978846, %v6469_v23 }
 0xc5d   : > { %v12203_v44 = vadd.f32 %v6108_v17, %v6020_v27  ;;  %v6659_v26 = vadd.f32 1.0, %v8662_v21  ;;  %v6442_v14 = vadd.f32 %v6378_v7, %v12164_v57  ;;  %v6694_v21 = vmul.f32 %v6630_v62, %v6182_v28  ;;  %v6783_v17 = vld [vmem:[%s12921_s13 + $0xd0] sm:$0xff]  ;;  %v6758_v62 = vld [vmem:[%s12921_s13 + $0x8] sm:$0xff] }
 0xc5e   : > { %v6343_v16 = vmul.f32 %v6279_v51, %v12190_v43  ;;  %8665 = vtanh.f32 %v6533_v36  ;;  %v6781_v36 = vld [vmem:[%s12921_s13 + $0xc0] sm:$0xff] }
 0xc5f   : > { %v8664_v27 = vpop.eup %8663  ;;  %v6252_v23 = vmul.f32 0.044715, %v12203_v44  ;;  %v5879_v1 = vpop.f32.mrf.mxu0  ;;  %v6723_v2 = vmul.f32 %v6659_v26, %v6211_v13  ;;  %v6506_v7 = vmul.f32 0.7978846, %v6442_v14  ;;  %v6760_v13 = vld [vmem:[%s12921_s13 + $0x18] sm:$0xff]  ;;  %v6847_v26 = vmul.f32 %v6783_v17, %v6719_v49 }
 0xc60   : > { %v5880_v51 = vadd.f32 %v5879_v1, %v11861_v5  ;;  %v6632_v47 = vadd.f32 1.0, %v8664_v27  ;;  %v6407_v56 = vmul.f32 %v6343_v16, %v12190_v43  ;;  %v6715_v14 = vmul.f32 %v6651_v15, %v12177_v35 }
 0xc61   : > { %v6316_v34 = vmul.f32 %v6252_v23, %v12203_v44  ;;  %7982 = vmatmul.msk.bf16.gmra.mxu3 %vm5776_vm4, %v11524_v11  ;;  %v6851_v41 = vmul.f32 %v6787_v37, %v6723_v2  ;;  %8667 = vtanh.f32 %v6506_v7  ;;  %v12242_v37 = vmul.f32 %v6758_v62, %v6694_v21  ;;  %v12254_v1 = vpop.f32.mrf.mxu2  ;;  %v6777_v7 = vld [vmem:[%s12921_s13 + $0xa0] sm:$0xff] }
 0xc62   : > { %v12230_v28 = vadd.f32 %v12118_v59, %v5880_v51  ;;  %v6696_v11 = vmul.f32 %v6632_v47, %v6184_v60  ;;  %v6471_v54 = vadd.f32 %v6407_v56, %v12190_v43  ;;  %v6779_v59 = vld [vmem:[%s12921_s13 + $0xb0] sm:$0xff]  ;;  %v12246_v60 = vpop.f32.mrf.mxu1  ;;  %v6845_v49 = vmul.f32 %v6781_v36, %v6717_v25 }
 0xc63   : > { %v6380_v53 = vmul.f32 %v6316_v34, %v12203_v44  ;;  %v6899_v31 = vpack.c.bf16 %v6851_v41, %v6849_v4  ;;  %v6713_v15 = vmul.f32 %v12187_v18, %v12170_v58  ;;  %v6843_v17 = vmul.f32 %v6779_v59, %v6715_v14  ;;  %v6773_v34 = vld [vmem:[%s12921_s13 + $0x80] sm:$0xff]  ;;  %v6775_v4 = vld [vmem:[%s12921_s13 + $0x90] sm:$0xff] }
 0xc64   : > { %v6281_v16 = vmul.f32 0.044715, %v12230_v28  ;;  %v6111_v24 = vpop.f32.mrf.mxu3  ;;  %v12244_v27 = vmul.f32 %v6760_v13, %v6696_v11  ;;  %v6535_v47 = vmul.f32 0.7978846, %v6471_v54  ;;  %v8666_v23 = vpop.eup %8665  ;;  %v6897_v51 = vpack.c.bf16 %v6847_v26, %v6845_v49 }
 0xc65   : > { %v12249_v56 = vadd.f32 %v6111_v24, %v12161_v6  ;;  %6924 = vmatpush.bf16.msra.mxu0 %v6899_v31  ;;  %v6444_v35 = vadd.f32 %v6380_v53, %v12203_v44  ;;  %v6711_v6 = vmul.f32 %v12183_v30, %v12173_v42  ;;  %v6025_v42 = vadd.f32 %v12038_v0, %v12085_v38 }
 0xc66   : > { %v6345_v2 = vmul.f32 %v6281_v16, %v12230_v28  ;;  %8669 = vtanh.f32 %v6535_v47  ;;  %v6841_v36 = vmul.f32 %v6777_v7, %v6713_v15  ;;  %v6661_v11 = vadd.f32 1.0, %v8666_v23 }
 0xc67   : > { %v6254_v58 = vmul.f32 0.044715, %v12249_v56  ;;  %v5881_v18 = vpop.f32.mrf.mxu0  ;;  %v6508_v41 = vmul.f32 0.7978846, %v6444_v35  ;;  %v8668_v25 = vpop.eup %8667  ;;  %v6837_v53 = vmul.f32 %v6773_v34, %v12179_v48  ;;  %v6839_v31 = vmul.f32 %v6775_v4, %v6711_v6 }
 0xc68   : > { %v5882_v30 = vadd.f32 %v5881_v18, %v11861_v5  ;;  %v6409_v62 = vmul.f32 %v6345_v2, %v12230_v28  ;;  %v6895_v14 = vpack.c.bf16 %v6843_v17, %v6841_v36  ;;  %v6634_v16 = vadd.f32 1.0, %v8668_v25  ;;  %v6789_v18 = vld [vmem:[%s12921_s13 + $0x100] sm:$0xff]  ;;  %v6762_v36 = vld [vmem:[%s12921_s13 + $0x28] sm:$0xff] }
 0xc69   : > { %v6318_v13 = vmul.f32 %v6254_v58, %v12249_v56  ;;  %6925 = vmatpush.bf16.msra.mxu0 %v6897_v51  ;;  %8671 = vtanh.f32 %v6508_v41  ;;  %v6213_v24 = vmul.f32 0.5, %v12152_v50  ;;  %v6186_v15 = vmul.f32 0.5, %v12164_v57  ;;  %v6791_v57 = vld [vmem:[%s12921_s13 + $0x110] sm:$0xff] }
 0xc6a   : > { %v12277_v54 = vadd.f32 %v12143_v55, %v5882_v30  ;;  %v6473_v26 = vadd.f32 %v6409_v62, %v12230_v28  ;;  %v6215_v55 = vmul.f32 0.5, %v12190_v43  ;;  %v6893_v58 = vpack.c.bf16 %v6839_v31, %v6837_v53  ;;  %v12297_v51 = vpop.f32.mrf.mxu1 }
 0xc6b   : > { %v6382_v0 = vmul.f32 %v6318_v13, %v12249_v56  ;;  %v6725_v7 = vmul.f32 %v6661_v11, %v6213_v24  ;;  %v6188_v50 = vmul.f32 0.5, %v12203_v44  ;;  %v6698_v41 = vmul.f32 %v6634_v16, %v6186_v15  ;;  %v6764_v11 = vld [vmem:[%s12921_s13 + $0x38] sm:$0xff] }
 0xc6c   : > { %v8670_v59 = vpop.eup %8669  ;;  %v6283_v47 = vmul.f32 0.044715, %v12277_v54  ;;  %v6113_v49 = vpop.f32.mrf.mxu3  ;;  %v6537_v35 = vmul.f32 0.7978846, %v6473_v26 }
 0xc6d   : > { %v12286_v23 = vadd.f32 %v6113_v49, %v6025_v42  ;;  %6926 = vmatpush.bf16.msra.mxu0 %v6895_v14  ;;  %v6446_v48 = vadd.f32 %v6382_v0, %v12249_v56  ;;  %v6663_v2 = vadd.f32 1.0, %v8670_v59  ;;  %v12300_v42 = vpop.f32.mrf.mxu2  ;;  %v12313_v53 = vmul.f32 %v6789_v18, %v6725_v7 }
 0xc6e   : > { %v6347_v6 = vmul.f32 %v6283_v47, %v12277_v54  ;;  %8673 = vtanh.f32 %v6537_v35  ;;  %v6028_v14 = vadd.f32 %v12063_v52, %v12085_v38  ;;  %v12327_v49 = vmul.f32 %v6762_v36, %v6698_v41 }
 0xc6f   : > { %v8672_v43 = vpop.eup %8671  ;;  %v6256_v17 = vmul.f32 0.044715, %v12286_v23  ;;  %v5884_v34 = vpop.f32.mrf.mxu0  ;;  %v6510_v4 = vmul.f32 0.7978846, %v6446_v48  ;;  %v6727_v25 = vmul.f32 %v6663_v2, %v6215_v55  ;;  %13405 = vst [vmem:[#allocation16_spill] sm:$0xff] %v12313_v53  ;;  %v13407_v55 = vpack.c.bf16 %v12028_v32, %v12026_v46 }
 0xc70   : > { %v5885_v44 = vadd.f32 %v5884_v34, %v11861_v5  ;;  %v6636_v30 = vadd.f32 1.0, %v8672_v43  ;;  %v6411_v62 = vmul.f32 %v6347_v6, %v12277_v54 }
 0xc71   : > { %v6320_v13 = vmul.f32 %v6256_v17, %v12286_v23  ;;  %7983 = vmatmul.msk.bf16.gmra.mxu3 %vm5776_vm4, %v11544_v9  ;;  %6927 = vmatpush.bf16.msra.mxu0 %v6893_v58  ;;  %v12315_v31 = vmul.f32 %v6791_v57, %v6727_v25  ;;  %8675 = vtanh.f32 %v6510_v4  ;;  %v13408_v17 = vpack.c.bf16 %v11999_v20, %v11997_v8 }
 0xc72   : > { %v12318_v26 = vadd.f32 %v12194_v63, %v5885_v44  ;;  %v6700_v0 = vmul.f32 %v6636_v30, %v6188_v50  ;;  %v6475_v9 = vadd.f32 %v6411_v62, %v12277_v54  ;;  %v12343_v46 = vpop.f32.mrf.mxu1  ;;  %v6030_v44 = vadd.f32 %v12100_v3, %v12085_v38 }
 0xc73   : > { %13406 = vst [vmem:[#allocation17_spill] sm:$0xff] %v12315_v31  ;;  %v6384_v16 = vmul.f32 %v6320_v13, %v12286_v23  ;;  %v6217_v13 = vmul.f32 0.5, %v12230_v28 }
 0xc74   : > { %v6285_v59 = vmul.f32 0.044715, %v12318_v26  ;;  %v6116_v47 = vpop.f32.mrf.mxu3  ;;  %v12329_v15 = vmul.f32 %v6764_v11, %v6700_v0  ;;  %v6539_v63 = vmul.f32 0.7978846, %v6475_v9  ;;  %v8674_v48 = vpop.eup %8673  ;;  %v6190_v11 = vmul.f32 0.5, %v12249_v56  ;;  %v6793_v56 = vld [vmem:[%s12921_s13 + $0x120] sm:$0xff] }
 0xc75   : > { %v12331_v35 = vadd.f32 %v6116_v47, %v6028_v14  ;;  %6928 = vmatpush.bf16.msra.mxu0 %v13407_v55  ;;  %v6448_v52 = vadd.f32 %v6384_v16, %v12286_v23  ;;  %v6665_v34 = vadd.f32 1.0, %v8674_v48  ;;  %v12349_v4 = vpop.f32.mrf.mxu2  ;;  %v13409_v14 = vpack.c.bf16 %v11966_v33, %v11964_v22 }
 0xc76   : > { %v6349_v2 = vmul.f32 %v6285_v59, %v12318_v26  ;;  %8677 = vtanh.f32 %v6539_v63  ;;  %v6192_v47 = vmul.f32 0.5, %v12286_v23 }
 0xc77   : > { %v6258_v6 = vmul.f32 0.044715, %v12331_v35  ;;  %v5886_v58 = vpop.f32.mrf.mxu0  ;;  %v6512_v50 = vmul.f32 0.7978846, %v6448_v52  ;;  %v8676_v18 = vpop.eup %8675  ;;  %v6729_v59 = vmul.f32 %v6665_v34, %v6217_v13  ;;  %v6033_v34 = vadd.f32 %v12148_v29, %v12085_v38 }
 0xc78   : > { %v5887_v57 = vadd.f32 %v5886_v58, %v11861_v5  ;;  %v6413_v43 = vmul.f32 %v6349_v2, %v12318_v26  ;;  %v6638_v62 = vadd.f32 1.0, %v8676_v18  ;;  %v6766_v18 = vld [vmem:[%s12921_s13 + $0x48] sm:$0xff] }
 0xc79   : > { %v6322_v32 = vmul.f32 %v6258_v6, %v12331_v35  ;;  %6929 = vmatpush.bf16.msra.mxu0 %v13408_v17  ;;  %8679 = vtanh.f32 %v6512_v50  ;;  %v13410_v50 = vpack.c.bf16 %v11925_v19, %v11923_v10 }
 0xc7a   : > { %v12352_v41 = vadd.f32 %v12246_v60, %v5887_v57  ;;  %v6477_v25 = vadd.f32 %v6413_v43, %v12318_v26  ;;  %v6219_v60 = vmul.f32 0.5, %v12277_v54  ;;  %v6795_v54 = vld [vmem:[%s12921_s13 + $0x130] sm:$0xff]  ;;  %v6702_v52 = vmul.f32 %v6638_v62, %v6190_v11  ;;  %v6768_v57 = vld [vmem:[%s12921_s13 + $0x58] sm:$0xff]  ;;  %v5983_v19 = vpop.f32.mrf.mxu1 }
 0xc7b   : > { %v6386_v30 = vmul.f32 %v6322_v32, %v12331_v35  ;;  %v12391_v43 = vmul.f32 %v6793_v56, %v6729_v59 }
 0xc7c   : > { %v8678_v36 = vpop.eup %8677  ;;  %v6287_v8 = vmul.f32 0.044715, %v12352_v41  ;;  %v6118_v20 = vpop.f32.mrf.mxu3  ;;  %v6541_v0 = vmul.f32 0.7978846, %v6477_v25 }
 0xc7d   : > { %v12362_v9 = vadd.f32 %v6118_v20, %v6030_v44  ;;  %6930 = vmatpush.bf16.msra.mxu0 %v13409_v14  ;;  %v6450_v3 = vadd.f32 %v6386_v30, %v12331_v35  ;;  %v6667_v16 = vadd.f32 1.0, %v8678_v36  ;;  %v12404_v30 = vpop.f32.mrf.mxu2 }
 0xc7e   : > { %v6351_v28 = vmul.f32 %v6287_v8, %v12352_v41  ;;  %8681 = vtanh.f32 %v6541_v0 }
 0xc7f   : > { %v8680_v63 = vpop.eup %8679  ;;  %v6260_v22 = vmul.f32 0.044715, %v12362_v9  ;;  %v5889_v33 = vpop.f32.mrf.mxu0  ;;  %v6514_v55 = vmul.f32 0.7978846, %v6450_v3  ;;  %v6731_v48 = vmul.f32 %v6667_v16, %v6219_v60 }
 0xc80   : > { %v5890_v2 = vadd.f32 %v5889_v33, %v11861_v5  ;;  %v6640_v6 = vadd.f32 1.0, %v8680_v63  ;;  %v6415_v23 = vmul.f32 %v6351_v28, %v12352_v41 }
 0xc81   : > { %v6324_v58 = vmul.f32 %v6260_v22, %v12362_v9  ;;  %7984 = vmatmul.msk.bf16.gmra.mxu3 %vm5776_vm4, %v11566_v45  ;;  %6931 = vmatpush.bf16.msra.mxu0 %v13410_v50  ;;  %v12393_v32 = vmul.f32 %v6795_v54, %v6731_v48  ;;  %8683 = vtanh.f32 %v6514_v55  ;;  %v6221_v22 = vmul.f32 0.5, %v12318_v26  ;;  %v6799_v26 = vld [vmem:[%s12921_s13 + $0x150] sm:$0xff] }
 0xc82   : > { %v12396_v17 = vadd.f32 %v12297_v51, %v5890_v2  ;;  %v6704_v45 = vmul.f32 %v6640_v6, %v6192_v47  ;;  %v6479_v10 = vadd.f32 %v6415_v23, %v12352_v41  ;;  %v12407_v51 = vmul.f32 %v6766_v18, %v6702_v52  ;;  %v12422_v2 = vpop.f32.mrf.mxu1 }
 0xc83   : > { %v6388_v25 = vmul.f32 %v6324_v58, %v12362_v9  ;;  %v6194_v6 = vmul.f32 0.5, %v12331_v35  ;;  %v6223_v23 = vmul.f32 0.5, %v12352_v41 }
 0xc84   : > { %v6289_v62 = vmul.f32 0.044715, %v12396_v17  ;;  %v6121_v13 = vpop.f32.mrf.mxu3  ;;  %v12409_v36 = vmul.f32 %v6768_v57, %v6704_v45  ;;  %v6543_v8 = vmul.f32 0.7978846, %v6479_v10  ;;  %v8682_v29 = vpop.eup %8681  ;;  %v6797_v57 = vld [vmem:[%s12921_s13 + $0x140] sm:$0xff] }
 0xc85   : > { %v12411_v20 = vadd.f32 %v6121_v13, %v6033_v34  ;;  %v6452_v11 = vadd.f32 %v6388_v25, %v12362_v9  ;;  %v6669_v47 = vadd.f32 1.0, %v8682_v29  ;;  %v12426_v18 = vpop.f32.mrf.mxu2  ;;  %v6196_v34 = vmul.f32 0.5, %v12362_v9 }
 0xc86   : > { %v6353_v0 = vmul.f32 %v6289_v62, %v12396_v17  ;;  %8685 = vtanh.f32 %v6543_v8  ;;  %v6770_v8 = vld [vmem:[%s12921_s13 + $0x68] sm:$0xff] }
 0xc87   : > { %v5891_v14 = vpop.f32.mrf.mxu0  ;;  %v6516_v3 = vmul.f32 0.7978846, %v6452_v11  ;;  %v8684_v16 = vpop.eup %8683  ;;  %v6733_v50 = vmul.f32 %v6669_v47, %v6221_v22  ;;  %v6772_v11 = vld [vmem:[%s12921_s13 + $0x78] sm:$0xff] }
 0xc88   : > { %v5892_v59 = vadd.f32 %v5891_v14, %v11861_v5  ;;  %v6417_v28 = vmul.f32 %v6353_v0, %v12396_v17  ;;  %v6642_v63 = vadd.f32 1.0, %v8684_v16 }
 0xc89   : > { %8687 = vtanh.f32 %v6516_v3  ;;  %v12444_v29 = vmul.f32 %v6797_v57, %v6733_v50  ;;  %v6801_v57 = vld [vmem:[%s12921_s13 + $0x160] sm:$0xff] }
 0xc8a   : > { %v5981_v56 = vadd.f32 %v12343_v46, %v5892_v59  ;;  %v6481_v54 = vadd.f32 %v6417_v28, %v12396_v17  ;;  %v6706_v35 = vmul.f32 %v6642_v63, %v6194_v6  ;;  %v12458_v22 = vpop.f32.mrf.mxu1 }
 0xc8c   : > { %v8686_v33 = vpop.eup %8685  ;;  %v6291_v55 = vmul.f32 0.044715, %v5981_v56  ;;  %v6123_v52 = vpop.f32.mrf.mxu3  ;;  %v6545_v48 = vmul.f32 0.7978846, %v6481_v54  ;;  %v12452_v59 = vmul.f32 %v6770_v8, %v6706_v35  ;;  %v6262_v35 = vmul.f32 0.044715, %v12411_v20 }
 0xc8d   : > { %v6671_v58 = vadd.f32 1.0, %v8686_v33  ;;  %v6049_v33 = vpop.f32.mrf.mxu2 }
 0xc8e   : > { %v6355_v46 = vmul.f32 %v6291_v55, %v5981_v56  ;;  %8689 = vtanh.f32 %v6545_v48  ;;  %v6225_v48 = vmul.f32 0.5, %v12396_v17  ;;  %v6035_v17 = vadd.f32 %v12198_v39, %v12085_v38 }
 0xc8f   : > { %v8688_v45 = vpop.eup %8687  ;;  %v5894_v10 = vpop.f32.mrf.mxu0  ;;  %v6735_v25 = vmul.f32 %v6671_v58, %v6223_v23  ;;  %v6227_v58 = vmul.f32 0.5, %v5981_v56 }
 0xc90   : > { %v5895_v41 = vadd.f32 %v5894_v10, %v11861_v5  ;;  %v6644_v62 = vadd.f32 1.0, %v8688_v45  ;;  %v6419_v13 = vmul.f32 %v6355_v46, %v5981_v56 }
 0xc91   : > { %7985 = vmatmul.msk.bf16.gmra.mxu3 %vm5776_vm4, %v11584_v12  ;;  %v12446_v9 = vmul.f32 %v6799_v26, %v6735_v25  ;;  %v6803_v26 = vld [vmem:[%s12921_s13 + $0x170] sm:$0xff] }
 0xc92   : > { %v12448_v0 = vadd.f32 %v5983_v19, %v5895_v41  ;;  %v6708_v14 = vmul.f32 %v6644_v62, %v6196_v34  ;;  %v6483_v3 = vadd.f32 %v6419_v13, %v5981_v56  ;;  %v12467_v34 = vpop.f32.mrf.mxu1  ;;  %v12478_v62 = vadd.f32 %v6123_v52, %v6035_v17 }
 0xc93   : > { %v6045_v52 = vadd.f32 %v12404_v30, %v12085_v38 }
 0xc94   : > { %v6126_v12 = vpop.f32.mrf.mxu3  ;;  %v12454_v28 = vmul.f32 %v6772_v11, %v6708_v14  ;;  %v6547_v47 = vmul.f32 0.7978846, %v6483_v3  ;;  %v8690_v54 = vpop.eup %8689  ;;  %v6326_v11 = vmul.f32 %v6262_v35, %v12411_v20  ;;  %v6264_v39 = vmul.f32 0.044715, %v12478_v62 }
 0xc95   : > { %v6673_v55 = vadd.f32 1.0, %v8690_v54  ;;  %v6052_v41 = vpop.f32.mrf.mxu2  ;;  %v6038_v3 = vadd.f32 %v12254_v1, %v12085_v38 }
 0xc96   : > { %8691 = vtanh.f32 %v6547_v47 }
 0xc97   : > { %v5896_v19 = vpop.f32.mrf.mxu0  ;;  %v6737_v46 = vmul.f32 %v6673_v55, %v6225_v48  ;;  %v6127_v47 = vadd.f32 %v6126_v12, %v6038_v3  ;;  %v6328_v55 = vmul.f32 %v6264_v39, %v12478_v62  ;;  %v6043_v48 = vadd.f32 %v12349_v4, %v12085_v38 }
 0xc98   : > { %v6040_v12 = vadd.f32 %v12300_v42, %v12085_v38  ;;  %v6048_v42 = vadd.f32 %v12426_v18, %v12085_v38  ;;  %v12520_v18 = vadd.f32 %v6052_v41, %v12085_v38 }
 0xc99   : > { %v12474_v56 = vmul.f32 %v6801_v57, %v6737_v46  ;;  %v6266_v57 = vmul.f32 0.044715, %v6127_v47  ;;  %v6392_v30 = vmul.f32 %v6328_v55, %v12478_v62 }
 0xc9a   : > { %v5993_v54 = vpop.f32.mrf.mxu1 }
 0xc9b   : > { %v6330_v39 = vmul.f32 %v6266_v57, %v6127_v47 }
 0xc9c   : > { %v8692_v6 = vpop.eup %8691  ;;  %v6128_v23 = vpop.f32.mrf.mxu3 }
 0xc9d   : > { %v6675_v50 = vadd.f32 1.0, %v8692_v6  ;;  %v6054_v6 = vpop.f32.mrf.mxu2  ;;  %v12502_v4 = vadd.f32 %v6128_v23, %v6040_v12  ;;  %v6394_v12 = vmul.f32 %v6330_v39, %v6127_v47 }
 0xc9f   : > { %v5899_v45 = vpop.f32.mrf.mxu0  ;;  %v6739_v10 = vmul.f32 %v6675_v50, %v6227_v58  ;;  %v6293_v58 = vmul.f32 0.044715, %v12448_v0  ;;  %v6268_v23 = vmul.f32 0.044715, %v12502_v4 }
 0xca1   : > { %7986 = vmatmul.msk.bf16.gmra.mxu3 %vm5776_vm4, %v11606_v40  ;;  %v12476_v25 = vmul.f32 %v6803_v26, %v6739_v10  ;;  %v6390_v40 = vmul.f32 %v6326_v11, %v12411_v20  ;;  %v6357_v17 = vmul.f32 %v6293_v58, %v12448_v0 }
 0xca2   : > { %v5995_v58 = vpop.f32.mrf.mxu1 }
 0xca3   : > { %v6454_v1 = vadd.f32 %v6390_v40, %v12411_v20  ;;  %v6456_v40 = vadd.f32 %v6392_v30, %v12478_v62 }
 0xca4   : > { %v6131_v8 = vpop.f32.mrf.mxu3 }
 0xca5   : > { %v12498_v26 = vadd.f32 %v6131_v8, %v6043_v48  ;;  %v6518_v11 = vmul.f32 0.7978846, %v6454_v1  ;;  %v5897_v8 = vadd.f32 %v5896_v19, %v11861_v5  ;;  %v6421_v48 = vmul.f32 %v6357_v17, %v12448_v0 }
 0xca6   : > { %v12523_v19 = vadd.f32 %v6054_v6, %v12085_v38  ;;  %v5900_v17 = vadd.f32 %v5899_v45, %v11861_v5  ;;  %v6198_v45 = vmul.f32 0.5, %v12411_v20 }
 0xca7   : > { %v5901_v14 = vpop.f32.mrf.mxu0  ;;  %v6270_v3 = vmul.f32 0.044715, %v12498_v26  ;;  %8693 = vtanh.f32 %v6518_v11  ;;  %v12527_v30 = vadd.f32 %v12422_v2, %v5897_v8  ;;  %v6332_v11 = vmul.f32 %v6268_v23, %v12502_v4 }
 0xca8   : > { %v5902_v41 = vadd.f32 %v5901_v14, %v11861_v5  ;;  %v12544_v23 = vmul.f32 0.5, %v12478_v62 }
 0xca9   : > { %v6334_v57 = vmul.f32 %v6270_v3, %v12498_v26  ;;  %v6396_v20 = vmul.f32 %v6332_v11, %v12502_v4 }
 0xcaa   : > { %v5998_v11 = vpop.f32.mrf.mxu1 }
 0xcab   : > { %v6398_v8 = vmul.f32 %v6334_v57, %v12498_v26 }
 0xcac   : > { %v6133_v50 = vpop.f32.mrf.mxu3 }
 0xcad   : > { %v12493_v46 = vadd.f32 %v6133_v50, %v6045_v52  ;;  %v6050_v52 = vadd.f32 %v6049_v33, %v12085_v38  ;;  %v6057_v33 = vpop.f32.mrf.mxu2  ;;  %v8694_v14 = vpop.eup %8693 }
 0xcaf   : > { %v5904_v10 = vpop.f32.mrf.mxu0  ;;  %v6272_v35 = vmul.f32 0.044715, %v12493_v46 }
 0xcb0   : > { %v5905_v50 = vadd.f32 %v5904_v10, %v11861_v5 }
 0xcb1   : > { %7987 = vmatmul.msk.bf16.gmra.mxu3 %vm5776_vm4, %v11645_v61  ;;  %v6336_v61 = vmul.f32 %v6272_v35, %v12493_v46 }
 0xcb2   : > { %v12536_v3 = vadd.f32 %v5993_v54, %v5905_v50  ;;  %v12550_v54 = vmul.f32 0.5, %v6127_v47 }
 0xcb3   : > { %v6400_v39 = vmul.f32 %v6336_v61, %v12493_v46  ;;  %v6295_v61 = vmul.f32 0.044715, %v12527_v30 }
 0xcb4   : > { %v6136_v55 = vpop.f32.mrf.mxu3  ;;  %v6301_v62 = vmul.f32 0.044715, %v12536_v3 }
 0xcb5   : > { %v12517_v1 = vadd.f32 %v6136_v55, %v6048_v42  ;;  %v6520_v42 = vmul.f32 0.7978846, %v6456_v40  ;;  %v6485_v55 = vadd.f32 %v6421_v48, %v12448_v0  ;;  %v6458_v40 = vadd.f32 %v6394_v12, %v6127_v47 }
 0xcb7   : > { %v6274_v10 = vmul.f32 0.044715, %v12517_v1  ;;  %v5906_v35 = vpop.f32.mrf.mxu0  ;;  %8695 = vtanh.f32 %v6520_v42  ;;  %v6549_v12 = vmul.f32 0.7978846, %v6485_v55  ;;  %v6522_v42 = vmul.f32 0.7978846, %v6458_v40 }
 0xcb8   : > { %v5907_v6 = vadd.f32 %v5906_v35, %v11861_v5  ;;  %v12547_v35 = vadd.f32 %v12458_v22, %v5900_v17  ;;  %v6464_v17 = vadd.f32 %v6400_v39, %v12493_v46  ;;  %v6359_v39 = vmul.f32 %v6295_v61, %v12527_v30 }
 0xcb9   : > { %v6338_v2 = vmul.f32 %v6274_v10, %v12517_v1  ;;  %v6462_v10 = vadd.f32 %v6398_v8, %v12498_v26  ;;  %v6460_v40 = vadd.f32 %v6396_v20, %v12502_v4  ;;  %8697 = vtanh.f32 %v6549_v12 }
 0xcba   : > { %v12541_v24 = vadd.f32 %v5995_v58, %v5907_v6  ;;  %v12555_v58 = vadd.f32 %v12467_v34, %v5902_v41  ;;  %v6646_v6 = vadd.f32 1.0, %v8694_v14  ;;  %v12565_v34 = vadd.f32 %v6057_v33, %v12085_v38 }
 0xcbb   : > { %v6402_v48 = vmul.f32 %v6338_v2, %v12517_v1  ;;  %v6297_v41 = vmul.f32 0.044715, %v12547_v35  ;;  %v6365_v33 = vmul.f32 %v6301_v62, %v12536_v3  ;;  %v6528_v16 = vmul.f32 0.7978846, %v6464_v17 }
 0xcbc   : > { %v6138_v50 = vpop.f32.mrf.mxu3  ;;  %v6303_v47 = vmul.f32 0.044715, %v12541_v24  ;;  %v6526_v21 = vmul.f32 0.7978846, %v6462_v10  ;;  %8699 = vtanh.f32 %v6522_v42  ;;  %v12582_v7 = vmul.f32 %v6646_v6, %v6198_v45 }
 0xcbd   : > { %v6466_v57 = vadd.f32 %v6402_v48, %v12517_v1  ;;  %v12559_v22 = vadd.f32 %v6138_v50, %v6050_v52  ;;  %v12569_v52 = vpop.f32.mrf.mxu2  ;;  %v6299_v50 = vmul.f32 0.044715, %v12555_v58  ;;  %v8696_v14 = vpop.eup %8695  ;;  %v6361_v61 = vmul.f32 %v6297_v41, %v12547_v35 }
 0xcbe   : > { %v6524_v17 = vmul.f32 0.7978846, %v6460_v40  ;;  %v6648_v12 = vadd.f32 1.0, %v8696_v14  ;;  %v6429_v10 = vmul.f32 %v6365_v33, %v12536_v3  ;;  %v6423_v45 = vmul.f32 %v6359_v39, %v12527_v30  ;;  %v6000_v33 = vpop.f32.mrf.mxu1 }
 0xcbf   : > { %v6530_v55 = vmul.f32 0.7978846, %v6466_v57  ;;  %v6276_v2 = vmul.f32 0.044715, %v12559_v22  ;;  %v5909_v48 = vpop.f32.mrf.mxu0  ;;  %v6367_v57 = vmul.f32 %v6303_v47, %v12541_v24  ;;  %v6363_v20 = vmul.f32 %v6299_v50, %v12555_v58  ;;  %v12594_v6 = vpop.eup %8697 }
 0xcc0   : > { %v5910_v8 = vadd.f32 %v5909_v48, %v11861_v5  ;;  %v12604_v14 = vmul.f32 %v6648_v12, %v12544_v23  ;;  %v6487_v23 = vadd.f32 %v6423_v45, %v12527_v30 }
 0xcc1   : > { %v6340_v44 = vmul.f32 %v6276_v2, %v12559_v22  ;;  %8701 = vtanh.f32 %v6530_v55 }
 0xcc2   : > { %v12578_v13 = vadd.f32 %v5998_v11, %v5910_v8  ;;  %8703 = vtanh.f32 %v6528_v16  ;;  %v12598_v8 = vmul.f32 0.5, %v12502_v4  ;;  %v6425_v16 = vmul.f32 %v6361_v61, %v12547_v35 }
 0xcc3   : > { %v6404_v48 = vmul.f32 %v6340_v44, %v12559_v22  ;;  %8705 = vtanh.f32 %v6526_v21  ;;  %v6431_v44 = vmul.f32 %v6367_v57, %v12541_v24  ;;  %v6427_v4 = vmul.f32 %v6363_v20, %v12555_v58 }
 0xcc4   : > { %v6305_v62 = vmul.f32 0.044715, %v12578_v13  ;;  %v6141_v2 = vpop.f32.mrf.mxu3  ;;  %8707 = vtanh.f32 %v6524_v17 }
 0xcc5   : > { %v6468_v47 = vadd.f32 %v6404_v48, %v12559_v22  ;;  %v12588_v11 = vadd.f32 %v6141_v2, %v12520_v18  ;;  %v8700_v18 = vpop.eup %8699  ;;  %v6493_v48 = vadd.f32 %v6429_v10, %v12536_v3  ;;  %v6489_v10 = vadd.f32 %v6425_v16, %v12547_v35 }
 0xcc6   : > { %v6369_v42 = vmul.f32 %v6305_v62, %v12578_v13  ;;  %v12609_v62 = vpop.f32.mrf.mxu2 }
 0xcc7   : > { %v6532_v41 = vmul.f32 0.7978846, %v6468_v47  ;;  %v6278_v55 = vmul.f32 0.044715, %v12588_v11  ;;  %v5911_v50 = vpop.f32.mrf.mxu0  ;;  %v8702_v39 = vpop.eup %8701  ;;  %v6206_v47 = vmul.f32 0.5, %v12498_v26 }
 0xcc8   : > { %v6433_v40 = vmul.f32 %v6369_v42, %v12578_v13  ;;  %v5912_v21 = vadd.f32 %v5911_v50, %v11861_v5  ;;  %v6495_v5 = vadd.f32 %v6431_v44, %v12541_v24  ;;  %v8704_v17 = vpop.eup %8703  ;;  %v6650_v42 = vadd.f32 1.0, %v8700_v18 }
 0xcc9   : > { %8709 = vtanh.f32 %v6532_v41  ;;  %v6342_v57 = vmul.f32 %v6278_v55, %v12588_v11  ;;  %v8706_v41 = vpop.eup %8705  ;;  %v6557_v45 = vmul.f32 0.7978846, %v6493_v48  ;;  %v6210_v18 = vmul.f32 0.5, %v12517_v1  ;;  %v6786_v1 = vld [vmem:[%s12921_s13 + $0xe8] sm:$0xff] }
 0xcca   : > { %v6497_v61 = vadd.f32 %v6433_v40, %v12578_v13  ;;  %v12612_v2 = vadd.f32 %v6000_v33, %v5912_v21  ;;  %v6658_v40 = vadd.f32 1.0, %v8702_v39  ;;  %v6208_v21 = vmul.f32 0.5, %v12493_v46  ;;  %v8708_v26 = vpop.eup %8707 }
 0xccb   : > { %v6406_v12 = vmul.f32 %v6342_v57, %v12588_v11  ;;  %v6491_v33 = vadd.f32 %v6427_v4, %v12555_v58  ;;  %v6559_v60 = vmul.f32 0.7978846, %v6495_v5  ;;  %v6212_v39 = vmul.f32 0.5, %v12559_v22  ;;  %v6788_v5 = vld [vmem:[%s12921_s13 + $0xf8] sm:$0xff] }
 0xccc   : > { %v6561_v20 = vmul.f32 0.7978846, %v6497_v61  ;;  %v6307_v55 = vmul.f32 0.044715, %v12612_v2  ;;  %v6143_v50 = vpop.f32.mrf.mxu3  ;;  %v6656_v61 = vadd.f32 1.0, %v8704_v17  ;;  %v6654_v53 = vadd.f32 1.0, %v8706_v41 }
 0xccd   : > { %v12622_v44 = vadd.f32 %v6143_v50, %v12523_v19  ;;  %v6470_v57 = vadd.f32 %v6406_v12, %v12588_v11  ;;  %v6722_v4 = vmul.f32 %v6658_v40, %v6210_v18  ;;  %v6652_v22 = vadd.f32 1.0, %v8708_v26 }
 0xcce   : > { %v6371_v16 = vmul.f32 %v6307_v55, %v12612_v2  ;;  %8711 = vtanh.f32 %v6561_v20  ;;  %v6555_v17 = vmul.f32 0.7978846, %v6491_v33  ;;  %v6784_v20 = vld [vmem:[%s12921_s13 + $0xd8] sm:$0xff]  ;;  %v6553_v40 = vmul.f32 0.7978846, %v6489_v10 }
 0xccf   : > { %v8710_v63 = vpop.eup %8709  ;;  %v6280_v46 = vmul.f32 0.044715, %v12622_v44  ;;  %v6534_v19 = vmul.f32 0.7978846, %v6470_v57  ;;  %8713 = vtanh.f32 %v6557_v45  ;;  %v6720_v57 = vmul.f32 %v6656_v61, %v6208_v21 }
 0xcd0   : > { %v6435_v48 = vmul.f32 %v6371_v16, %v12612_v2  ;;  %v6660_v50 = vadd.f32 1.0, %v8710_v63  ;;  %8715 = vtanh.f32 %v6559_v60  ;;  %v6551_v18 = vmul.f32 0.7978846, %v6487_v23  ;;  %v12643_v16 = vpop.f32.mrf.mxu2  ;;  %v6782_v60 = vld [vmem:[%s12921_s13 + $0xc8] sm:$0xff] }
 0xcd1   : > { %v6344_v12 = vmul.f32 %v6280_v46, %v12622_v44  ;;  %8717 = vtanh.f32 %v6534_v19  ;;  %v6850_v45 = vmul.f32 %v6786_v1, %v6722_v4  ;;  %v6718_v31 = vmul.f32 %v6654_v53, %v6206_v47  ;;  %v6774_v23 = vld [vmem:[%s12921_s13 + $0x88] sm:$0xff]  ;;  %v6780_v4 = vld [vmem:[%s12921_s13 + $0xb8] sm:$0xff] }
 0xcd2   : > { %v6499_v41 = vadd.f32 %v6435_v48, %v12612_v2  ;;  %v6724_v55 = vmul.f32 %v6660_v50, %v6212_v39  ;;  %v6714_v21 = vmul.f32 %v6650_v42, %v12550_v54  ;;  %8719 = vtanh.f32 %v6555_v17  ;;  %v6778_v50 = vld [vmem:[%s12921_s13 + $0xa8] sm:$0xff] }
 0xcd3   : > { %v6408_v63 = vmul.f32 %v6344_v12, %v12622_v44  ;;  %v6848_v48 = vmul.f32 %v6784_v20, %v6720_v57  ;;  %v6716_v53 = vmul.f32 %v6652_v22, %v12598_v8  ;;  %v6060_v54 = vadd.f32 %v12569_v52, %v12085_v38 }
 0xcd4   : > { %v6563_v46 = vmul.f32 0.7978846, %v6499_v41  ;;  %v6146_v26 = vpop.f32.mrf.mxu3  ;;  %v6852_v33 = vmul.f32 %v6788_v5, %v6724_v55  ;;  %v8712_v61 = vpop.eup %8711  ;;  %v12671_v1 = vadd.f32 %v12609_v62, %v12085_v38  ;;  %v6846_v5 = vmul.f32 %v6782_v60, %v6718_v31 }
 0xcd5   : > { %v12646_v39 = vadd.f32 %v6146_v26, %v12565_v34  ;;  %v6472_v10 = vadd.f32 %v6408_v63, %v12622_v44  ;;  %v6776_v34 = vld [vmem:[%s12921_s13 + $0x98] sm:$0xff]  ;;  %v8714_v47 = vpop.eup %8713  ;;  %v12674_v52 = vmul.f32 %v6774_v23, %v12582_v7  ;;  %v6689_v55 = vadd.f32 1.0, %v8712_v61 }
 0xcd6   : > { %v6900_v19 = vpack.c.bf16 %v6852_v33, %v6850_v45  ;;  %8721 = vtanh.f32 %v6563_v46  ;;  %v8716_v12 = vpop.eup %8715  ;;  %v6840_v41 = vmul.f32 %v6776_v34, %v12604_v14  ;;  %v6898_v57 = vpack.c.bf16 %v6848_v48, %v6846_v5 }
 0xcd7   : > { %v6282_v42 = vmul.f32 0.044715, %v12646_v39  ;;  %8723 = vtanh.f32 %v6553_v40  ;;  %v6536_v8 = vmul.f32 0.7978846, %v6472_v10  ;;  %v8718_v22 = vpop.eup %8717  ;;  %v6842_v63 = vmul.f32 %v6778_v50, %v6714_v21 }
 0xcd8   : > { %6950 = vmatpush.bf16.msra.mxu2 %v6900_v19  ;;  %8725 = vtanh.f32 %v6551_v18  ;;  %v6844_v20 = vmul.f32 %v6780_v4, %v6716_v53  ;;  %v6233_v40 = vmul.f32 0.5, %v12547_v35  ;;  %v8720_v62 = vpop.eup %8719  ;;  %v6241_v31 = vmul.f32 0.5, %v12578_v13  ;;  %v12687_v48 = vpop.f32.mrf.mxu2  ;;  %v6817_v53 = vld [vmem:[%s12921_s13 + $0x1e0] sm:$0xff] }
 0xcd9   : > { %v6346_v17 = vmul.f32 %v6282_v42, %v12646_v39  ;;  %8727 = vtanh.f32 %v6536_v8  ;;  %v6687_v7 = vadd.f32 1.0, %v8716_v12  ;;  %v6235_v18 = vmul.f32 0.5, %v12555_v58  ;;  %v6815_v12 = vld [vmem:[%s12921_s13 + $0x1d0] sm:$0xff] }
 0xcda   : > { %v6243_v14 = vmul.f32 0.5, %v12612_v2  ;;  %v6239_v33 = vmul.f32 0.5, %v12541_v24  ;;  %v6685_v60 = vadd.f32 1.0, %v8714_v47  ;;  %v6662_v21 = vadd.f32 1.0, %v8718_v22  ;;  %v6819_v24 = vld [vmem:[%s12921_s13 + $0x1f0] sm:$0xff] }
 0xcdb   : > { %v6410_v46 = vmul.f32 %v6346_v17, %v12646_v39  ;;  %v6753_v61 = vmul.f32 %v6689_v55, %v6241_v31  ;;  %v6896_v58 = vpack.c.bf16 %v6844_v20, %v6842_v63  ;;  %v6237_v2 = vmul.f32 0.5, %v12536_v3  ;;  %v6790_v20 = vld [vmem:[%s12921_s13 + $0x108] sm:$0xff] }
 0xcdc   : > { %v8722_v26 = vpop.eup %8721  ;;  %v6148_v45 = vpop.f32.mrf.mxu3  ;;  %6951 = vmatpush.bf16.msra.mxu2 %v6898_v57  ;;  %v6683_v34 = vadd.f32 1.0, %v8720_v62  ;;  %v6214_v47 = vmul.f32 0.5, %v12588_v11  ;;  %v6751_v4 = vmul.f32 %v6687_v7, %v6239_v33  ;;  %v6216_v22 = vmul.f32 0.5, %v12622_v44  ;;  %v6792_v62 = vld [vmem:[%s12921_s13 + $0x118] sm:$0xff]  ;;  %v6813_v44 = vld [vmem:[%s12921_s13 + $0x1c0] sm:$0xff] }
 0xcdd   : > { %v8724_v23 = vpop.eup %8723  ;;  %v12684_v10 = vadd.f32 %v6148_v45, %v6060_v54  ;;  %v6691_v35 = vadd.f32 1.0, %v8722_v26  ;;  %v6474_v19 = vadd.f32 %v6410_v46, %v12646_v39  ;;  %v6881_v57 = vmul.f32 %v6817_v53, %v6753_v61 }
 0xcde   : > { %v8726_v13 = vpop.eup %8725  ;;  %v6681_v5 = vadd.f32 1.0, %v8724_v23  ;;  %v6726_v55 = vmul.f32 %v6662_v21, %v6214_v47  ;;  %v6749_v63 = vmul.f32 %v6685_v60, %v6237_v2  ;;  %v6894_v46 = vpack.c.bf16 %v6840_v41, %v12674_v52  ;;  %v6811_v21 = vld [vmem:[%s12921_s13 + $0x1b0] sm:$0xff] }
 0xcdf   : > { %v8728_v54 = vpop.eup %8727  ;;  %v6284_v42 = vmul.f32 0.044715, %v12684_v10  ;;  %v6755_v50 = vmul.f32 %v6691_v35, %v6243_v14  ;;  %v6538_v8 = vmul.f32 0.7978846, %v6474_v19  ;;  %v6747_v31 = vmul.f32 %v6683_v34, %v6235_v18 }
 0xce0   : > { %6952 = vmatpush.bf16.msra.mxu2 %v6896_v58  ;;  %v6664_v17 = vadd.f32 1.0, %v8728_v54  ;;  %v6679_v7 = vadd.f32 1.0, %v8726_v13  ;;  %v6879_v33 = vmul.f32 %v6815_v12, %v6751_v4  ;;  %v6231_v52 = vmul.f32 0.5, %v12527_v30  ;;  %v6809_v58 = vld [vmem:[%s12921_s13 + $0x1a0] sm:$0xff]  ;;  %v6069_v47 = vpop.f32.mrf.mxu2  ;;  %v6807_v54 = vld [vmem:[%s12921_s13 + $0x190] sm:$0xff] }
 0xce1   : > { %v6348_v3 = vmul.f32 %v6284_v42, %v12684_v10  ;;  %v6883_v11 = vmul.f32 %v6819_v24, %v6755_v50  ;;  %8729 = vtanh.f32 %v6538_v8  ;;  %v6677_v41 = vadd.f32 1.0, %v12594_v6  ;;  %v6805_v8 = vld [vmem:[%s12921_s13 + $0x180] sm:$0xff] }
 0xce2   : > { %v6728_v26 = vmul.f32 %v6664_v17, %v6216_v22  ;;  %v12719_v23 = vmul.f32 %v6790_v20, %v6726_v55  ;;  %v6877_v61 = vmul.f32 %v6813_v44, %v6749_v63  ;;  %v6745_v19 = vmul.f32 %v6681_v5, %v6233_v40 }
 0xce3   : > { %v6412_v45 = vmul.f32 %v6348_v3, %v12684_v10  ;;  %v6915_v14 = vpack.c.bf16 %v6883_v11, %v6881_v57  ;;  %v6229_v30 = vmul.f32 0.5, %v12448_v0  ;;  %v6743_v53 = vmul.f32 %v6679_v7, %v6231_v52 }
 0xce4   : > { %v6151_v60 = vpop.f32.mrf.mxu3  ;;  %6953 = vmatpush.bf16.msra.mxu2 %v6894_v46  ;;  %v12721_v18 = vmul.f32 %v6792_v62, %v6728_v26  ;;  %v6913_v2 = vpack.c.bf16 %v6879_v33, %v6877_v61  ;;  %v13411_v40 = vpack.c.bf16 %v12454_v28, %v12452_v59  ;;  %v6873_v50 = vmul.f32 %v6809_v58, %v6745_v19  ;;  %v6794_v26 = vld [vmem:[%s12921_s13 + $0x128] sm:$0xff] }
 0xce5   : > { %v12724_v35 = vadd.f32 %v6151_v60, %v12671_v1  ;;  %6937 = vmatpush.bf16.msra.mxu1 %v6915_v14  ;;  %v6476_v13 = vadd.f32 %v6412_v45, %v12684_v10  ;;  %v6875_v1 = vmul.f32 %v6811_v21, %v6747_v31  ;;  %v6741_v4 = vmul.f32 %v6677_v41, %v6229_v30 }
 0xce6   : > { %v6902_v6 = vpack.c.bf16 %v12721_v18, %v12719_v23  ;;  %v6065_v12 = vadd.f32 %v12643_v16, %v12085_v38  ;;  %v6871_v5 = vmul.f32 %v6807_v54, %v6743_v53  ;;  %v13412_v17 = vpack.c.bf16 %v12409_v36, %v12407_v51  ;;  %v8372_v23 = vld [vmem:[#allocation2] ss:$0 sm:$0xff] }
 0xce7   : > { %v6286_v24 = vmul.f32 0.044715, %v12724_v35  ;;  %v6540_v34 = vmul.f32 0.7978846, %v6476_v13  ;;  %v8730_v42 = vpop.eup %8729  ;;  %v6911_v28 = vpack.c.bf16 %v6875_v1, %v6873_v50  ;;  %v6869_v57 = vmul.f32 %v6805_v8, %v6741_v4  ;;  %v13419_v8 = vld [vmem:[#allocation16_spill] sm:$0xff] }
 0xce8   : > { %6954 = vmatpush.bf16.msra.mxu2 %v13411_v40  ;;  %v6666_v55 = vadd.f32 1.0, %v8730_v42  ;;  %v6218_v63 = vmul.f32 0.5, %v12646_v39  ;;  %v13413_v44 = vpack.c.bf16 %v12329_v15, %v12327_v49  ;;  %v6220_v31 = vmul.f32 0.5, %v12684_v10  ;;  %v6796_v39 = vld [vmem:[%s12921_s13 + $0x138] sm:$0xff]  ;;  %v6072_v45 = vpop.f32.mrf.mxu2 }
 0xce9   : > { %v6350_v0 = vmul.f32 %v6286_v24, %v12724_v35  ;;  %6938 = vmatpush.bf16.msra.mxu1 %v6913_v2  ;;  %8731 = vtanh.f32 %v6540_v34  ;;  %v6909_v16 = vpack.c.bf16 %v6871_v5, %v6869_v57  ;;  %v6068_v49 = vadd.f32 %v12687_v48, %v12085_v38 }
 0xcea   : > { %v6730_v36 = vmul.f32 %v6666_v55, %v6218_v63  ;;  %v13414_v33 = vpack.c.bf16 %v12244_v27, %v12242_v37  ;;  %v13415_v41 = vpack.c.bf16 %v12476_v25, %v12474_v56  ;;  %v13416_v37 = vpack.c.bf16 %v12446_v9, %v12444_v29 }
 0xceb   : > { %v6414_v59 = vmul.f32 %v6350_v0, %v12724_v35  ;;  %v6070_v27 = vadd.f32 %v6069_v47, %v12085_v38  ;;  %v13417_v1 = vpack.c.bf16 %v12393_v32, %v12391_v43  ;;  %v6222_v40 = vmul.f32 0.5, %v12724_v35  ;;  %v13418_v47 = vld [vmem:[#allocation17_spill] sm:$0xff] }
 0xcec   : > { %v6153_v22 = vpop.f32.mrf.mxu3  ;;  %6955 = vmatpush.bf16.msra.mxu2 %v13412_v17  ;;  %v12767_v60 = vmul.f32 %v6794_v26, %v6730_v36  ;;  %v6800_v43 = vld [vmem:[%s12921_s13 + $0x158] sm:$0xff]  ;;  %v6802_v26 = vld [vmem:[%s12921_s13 + $0x168] sm:$0xff] }
 0xced   : > { %v6154_v3 = vadd.f32 %v6153_v22, %v6065_v12  ;;  %6939 = vmatpush.bf16.msra.mxu1 %v6911_v28  ;;  %v6478_v11 = vadd.f32 %v6414_v59, %v12724_v35  ;;  %v13420_v12 = vpack.c.bf16 %v13418_v47, %v13419_v8  ;;  %v6798_v59 = vld [vmem:[%s12921_s13 + $0x148] sm:$0xff]  ;;  %v6073_v35 = vadd.f32 %v6072_v45, %v12085_v38 }
 0xcef   : > { %v8732_v20 = vpop.eup %8731  ;;  %v6288_v62 = vmul.f32 0.044715, %v6154_v3  ;;  %v6542_v46 = vmul.f32 0.7978846, %v6478_v11  ;;  %v6224_v29 = vmul.f32 0.5, %v6154_v3 }
 0xcf0   : > { %6956 = vmatpush.bf16.msra.mxu2 %v13413_v44  ;;  %v6668_v51 = vadd.f32 1.0, %v8732_v20  ;;  %v6074_v24 = vpop.f32.mrf.mxu2 }
 0xcf1   : > { %v6352_v7 = vmul.f32 %v6288_v62, %v6154_v3  ;;  %6940 = vmatpush.bf16.msra.mxu1 %v6909_v16  ;;  %8733 = vtanh.f32 %v6542_v46 }
 0xcf2   : > { %v6732_v14 = vmul.f32 %v6668_v51, %v6220_v31 }
 0xcf3   : > { %v6416_v15 = vmul.f32 %v6352_v7, %v6154_v3 }
 0xcf4   : > { %v6156_v10 = vpop.f32.mrf.mxu3  ;;  %6957 = vmatpush.bf16.msra.mxu2 %v13414_v33  ;;  %v12769_v21 = vmul.f32 %v6796_v39, %v6732_v14  ;;  %v6804_v39 = vld [vmem:[%s12921_s13 + $0x178] sm:$0xff] }
 0xcf5   : > { %v6157_v52 = vadd.f32 %v6156_v10, %v6068_v49  ;;  %6941 = vmatpush.bf16.msra.mxu1 %v13415_v41  ;;  %v6480_v61 = vadd.f32 %v6416_v15, %v6154_v3 }
 0xcf6   : > { %v6904_v48 = vpack.c.bf16 %v12769_v21, %v12767_v60 }
 0xcf7   : > { %v6290_v19 = vmul.f32 0.044715, %v6157_v52  ;;  %v6544_v13 = vmul.f32 0.7978846, %v6480_v61  ;;  %v8734_v58 = vpop.eup %8733  ;;  %v6226_v46 = vmul.f32 0.5, %v6157_v52 }
 0xcf8   : > { %v6670_v56 = vadd.f32 1.0, %v8734_v58  ;;  %v6077_v57 = vpop.f32.mrf.mxu2 }
 0xcf9   : > { %v6354_v30 = vmul.f32 %v6290_v19, %v6157_v52  ;;  %6942 = vmatpush.bf16.msra.mxu1 %v13416_v37  ;;  %8735 = vtanh.f32 %v6544_v13 }
 0xcfa   : > { %v6734_v50 = vmul.f32 %v6670_v56, %v6222_v40  ;;  %v6078_v56 = vadd.f32 %v6077_v57, %v12085_v38 }
 0xcfb   : > { %v6418_v53 = vmul.f32 %v6354_v30, %v6157_v52 }
 0xcfc   : > { %v6158_v2 = vpop.f32.mrf.mxu3  ;;  %v12794_v22 = vmul.f32 %v6798_v59, %v6734_v50 }
 0xcfd   : > { %v6159_v25 = vadd.f32 %v6158_v2, %v6070_v27  ;;  %6943 = vmatpush.bf16.msra.mxu1 %v13417_v1  ;;  %v6482_v34 = vadd.f32 %v6418_v53, %v6157_v52  ;;  %v6075_v1 = vadd.f32 %v6074_v24, %v12085_v38 }
 0xcff   : > { %v8736_v54 = vpop.eup %8735  ;;  %v6292_v42 = vmul.f32 0.044715, %v6159_v25  ;;  %v6546_v0 = vmul.f32 0.7978846, %v6482_v34  ;;  %v6228_v51 = vmul.f32 0.5, %v6159_v25 }
 0xd00   : > { %v6672_v9 = vadd.f32 1.0, %v8736_v54  ;;  %v6079_v31 = vpop.f32.mrf.mxu2 }
 0xd01   : > { %v6356_v4 = vmul.f32 %v6292_v42, %v6159_v25  ;;  %6944 = vmatpush.bf16.msra.mxu1 %v13420_v12  ;;  %8737 = vtanh.f32 %v6546_v0  ;;  %v6080_v37 = vadd.f32 %v6079_v31, %v12085_v38 }
 0xd02   : > { %v6736_v32 = vmul.f32 %v6672_v9, %v6224_v29 }
 0xd03   : > { %v6420_v28 = vmul.f32 %v6356_v4, %v6159_v25 }
 0xd04   : > { %v6161_v5 = vpop.f32.mrf.mxu3  ;;  %v12796_v17 = vmul.f32 %v6800_v43, %v6736_v32 }
 0xd05   : > { %v12798_v55 = vadd.f32 %v6161_v5, %v6073_v35  ;;  %v6484_v3 = vadd.f32 %v6420_v28, %v6159_v25 }
 0xd06   : > { %v6906_v11 = vpack.c.bf16 %v12796_v17, %v12794_v22 }
 0xd07   : > { %v6548_v63 = vmul.f32 0.7978846, %v6484_v3  ;;  %v8738_v20 = vpop.eup %8737  ;;  %v6294_v35 = vmul.f32 0.044715, %v12798_v55 }
 0xd08   : > { %v6674_v16 = vadd.f32 1.0, %v8738_v20  ;;  %v6082_v33 = vpop.f32.mrf.mxu2 }
 0xd09   : > { %8739 = vtanh.f32 %v6548_v63  ;;  %v6083_v58 = vadd.f32 %v6082_v33, %v12085_v38  ;;  %v6358_v31 = vmul.f32 %v6294_v35, %v12798_v55 }
 0xd0a   : > { %v6738_v7 = vmul.f32 %v6674_v16, %v6226_v46 }
 0xd0b   : > { %v6422_v33 = vmul.f32 %v6358_v31, %v12798_v55 }
 0xd0c   : > { %v6163_v62 = vpop.f32.mrf.mxu3  ;;  %v12808_v49 = vmul.f32 %v6802_v26, %v6738_v7 }
 0xd0d   : > { %v12831_v29 = vadd.f32 %v6163_v62, %v6075_v1 }
 0xd0f   : > { %v8740_v44 = vpop.eup %8739  ;;  %v6296_v59 = vmul.f32 0.044715, %v12831_v29 }
 0xd10   : > { %v6676_v36 = vadd.f32 1.0, %v8740_v44  ;;  %v6084_v41 = vpop.f32.mrf.mxu2 }
 0xd11   : > { %v6085_v19 = vadd.f32 %v6084_v41, %v12085_v38  ;;  %v6360_v62 = vmul.f32 %v6296_v59, %v12831_v29 }
 0xd12   : > { %v6740_v45 = vmul.f32 %v6676_v36, %v6228_v51 }
 0xd14   : > { %v6166_v14 = vpop.f32.mrf.mxu3  ;;  %v12810_v15 = vmul.f32 %v6804_v39, %v6740_v45  ;;  %v6424_v39 = vmul.f32 %v6360_v62, %v12831_v29 }
 0xd15   : > { %v12827_v40 = vadd.f32 %v6166_v14, %v6078_v56  ;;  %v6486_v56 = vadd.f32 %v6422_v33, %v12798_v55 }
 0xd16   : > { %v6908_v10 = vpack.c.bf16 %v12810_v15, %v12808_v49 }
 0xd17   : > { %v6298_v4 = vmul.f32 0.044715, %v12827_v40 }
 0xd18   : > { %v6087_v27 = vpop.f32.mrf.mxu2 }
 0xd19   : > { %v6088_v34 = vadd.f32 %v6087_v27, %v12085_v38  ;;  %v6362_v5 = vmul.f32 %v6298_v4, %v12827_v40 }
 0xd1b   : > { %v6426_v51 = vmul.f32 %v6362_v5, %v12827_v40 }
 0xd1c   : > { %v6168_v52 = vpop.f32.mrf.mxu3 }
 0xd1d   : > { %v12821_v2 = vadd.f32 %v6168_v52, %v6080_v37 }
 0xd1f   : > { %v6300_v42 = vmul.f32 0.044715, %v12821_v2 }
 0xd20   : > { %v6089_v24 = vpop.f32.mrf.mxu2 }
 0xd21   : > { %v6364_v12 = vmul.f32 %v6300_v42, %v12821_v2  ;;  %v6090_v28 = vadd.f32 %v6089_v24, %v12085_v38  ;;  %v6550_v42 = vmul.f32 0.7978846, %v6486_v56  ;;  %v6808_v56 = vld [vmem:[%s12921_s13 + $0x198] sm:$0xff] }
 0xd23   : > { %v6428_v63 = vmul.f32 %v6364_v12, %v12821_v2 }
 0xd24   : > { %v6171_v61 = vpop.f32.mrf.mxu3 }
 0xd25   : > { %v12819_v53 = vadd.f32 %v6171_v61, %v6083_v58  ;;  %v6492_v26 = vadd.f32 %v6428_v63, %v12821_v2  ;;  %v6490_v61 = vadd.f32 %v6426_v51, %v12827_v40  ;;  %v6488_v58 = vadd.f32 %v6424_v39, %v12831_v29 }
 0xd27   : > { %v6302_v54 = vmul.f32 0.044715, %v12819_v53  ;;  %v6554_v27 = vmul.f32 0.7978846, %v6490_v61  ;;  %v6232_v61 = vmul.f32 0.5, %v12831_v29  ;;  %v6806_v29 = vld [vmem:[%s12921_s13 + $0x188] sm:$0xff] }
 0xd29   : > { %v6366_v47 = vmul.f32 %v6302_v54, %v12819_v53 }
 0xd2b   : > { %v6430_v3 = vmul.f32 %v6366_v47, %v12819_v53 }
 0xd2c   : > { %v6173_v13 = vpop.f32.mrf.mxu3 }
 0xd2d   : > { %v12816_v30 = vadd.f32 %v6173_v13, %v6085_v19  ;;  %v6494_v7 = vadd.f32 %v6430_v3, %v12819_v53  ;;  %v6556_v19 = vmul.f32 0.7978846, %v6492_v26  ;;  %v6818_v3 = vld [vmem:[%s12921_s13 + $0x1e8] sm:$0xff] }
 0xd2e   : > { %v6814_v26 = vld [vmem:[%s12921_s13 + $0x1c8] sm:$0xff] }
 0xd2f   : > { %v6304_v25 = vmul.f32 0.044715, %v12816_v30  ;;  %v6558_v41 = vmul.f32 0.7978846, %v6494_v7  ;;  %v6240_v12 = vmul.f32 0.5, %v12816_v30 }
 0xd31   : > { %v6368_v9 = vmul.f32 %v6304_v25, %v12816_v30  ;;  %v6917_v25 = vld [vmem:[%s12922_s14] sm:$0xf] }
 0xd32   : > { %6919 = vst [vmem:[#allocation1] ss:$4 sm:$0xff] %v6917_v25 }
 0xd33   : > { %v6432_v43 = vmul.f32 %v6368_v9, %v12816_v30 }
 0xd34   : > { %v6176_v0 = vpop.f32.mrf.mxu3 }
 0xd35   : > { %v6177_v50 = vadd.f32 %v6176_v0, %v6088_v34  ;;  %v6496_v44 = vadd.f32 %v6432_v43, %v12816_v30  ;;  %v6552_v34 = vmul.f32 0.7978846, %v6488_v58  ;;  %v6238_v30 = vmul.f32 0.5, %v12819_v53 }
 0xd36   : > { %v6234_v53 = vmul.f32 0.5, %v12827_v40 }
 0xd37   : > { %v6306_v8 = vmul.f32 0.044715, %v6177_v50  ;;  %v6560_v14 = vmul.f32 0.7978846, %v6496_v44  ;;  %v6242_v47 = vmul.f32 0.5, %v6177_v50 }
 0xd39   : > { %v6370_v32 = vmul.f32 %v6306_v8, %v6177_v50 }
 0xd3b   : > { %v6434_v57 = vmul.f32 %v6370_v32, %v6177_v50 }
 0xd3c   : > { %v6178_v20 = vpop.f32.mrf.mxu3 }
 0xd3d   : > { %v6498_v16 = vadd.f32 %v6434_v57, %v6177_v50  ;;  %v6179_v46 = vadd.f32 %v6178_v20, %v6090_v28  ;;  %v6920_v28 = vld.sshfl [vmem:[#allocation1] sm:$0xff pattern:$0x73625140]  ;;  %v6820_v57 = vld [vmem:[%s12921_s13 + $0x1f8] sm:$0xff] }
 0xd3e   : > { %6958 = vmatmul.bf16.vlgmr.msra.gmra.mxu2 %v6920_v28  ;;  %6932 = vmatmul.bf16.vlgmr.msra.gmra.mxu0 %v6920_v28 }
 0xd3f   : > { %v6562_v36 = vmul.f32 0.7978846, %v6498_v16  ;;  %v6308_v38 = vmul.f32 0.044715, %v6179_v46  ;;  %v6244_v59 = vmul.f32 0.5, %v6179_v46  ;;  %v6816_v16 = vld [vmem:[%s12921_s13 + $0x1d8] sm:$0xff] }
 0xd41   : > { %v6372_v45 = vmul.f32 %v6308_v38, %v6179_v46  ;;  %8741 = vtanh.f32 %v6562_v36  ;;  %v6921_v38 = vld.sshfl [vmem:[#allocation1 + $0x8] sm:$0xff pattern:$0x73625140] }
 0xd42   : > { %8743 = vtanh.f32 %v6560_v14  ;;  %6945 = vmatmul.bf16.vlgmr.msra.gmra.mxu1 %v6921_v38 }
 0xd43   : > { %v6436_v52 = vmul.f32 %v6372_v45, %v6179_v46  ;;  %8745 = vtanh.f32 %v6558_v41 }
 0xd44   : > { %8747 = vtanh.f32 %v6556_v19 }
 0xd45   : > { %v6500_v13 = vadd.f32 %v6436_v52, %v6179_v46  ;;  %v6236_v46 = vmul.f32 0.5, %v12821_v2  ;;  %v6812_v2 = vld [vmem:[%s12921_s13 + $0x1b8] sm:$0xff] }
 0xd47   : > { %v6564_v37 = vmul.f32 0.7978846, %v6500_v13  ;;  %v8742_v1 = vpop.eup %8741  ;;  %v6810_v13 = vld [vmem:[%s12921_s13 + $0x1a8] sm:$0xff] }
 0xd48   : > { %v8744_v54 = vpop.eup %8743  ;;  %v6690_v0 = vadd.f32 1.0, %v8742_v1 }
 0xd49   : > { %8749 = vtanh.f32 %v6564_v37  ;;  %v8746_v9 = vpop.eup %8745  ;;  %v6688_v8 = vadd.f32 1.0, %v8744_v54  ;;  %v6230_v37 = vmul.f32 0.5, %v12798_v55 }
 0xd4a   : > { %8751 = vtanh.f32 %v6554_v27  ;;  %v8748_v4 = vpop.eup %8747  ;;  %v6754_v32 = vmul.f32 %v6690_v0, %v6242_v47  ;;  %v6686_v35 = vadd.f32 1.0, %v8746_v9 }
 0xd4b   : > { %8753 = vtanh.f32 %v6552_v34  ;;  %v6752_v63 = vmul.f32 %v6688_v8, %v6240_v12  ;;  %v6684_v20 = vadd.f32 1.0, %v8748_v4 }
 0xd4c   : > { %8755 = vtanh.f32 %v6550_v42  ;;  %v6882_v44 = vmul.f32 %v6818_v3, %v6754_v32  ;;  %v6750_v51 = vmul.f32 %v6686_v35, %v6238_v30 }
 0xd4d   : > { %v6880_v45 = vmul.f32 %v6816_v16, %v6752_v63  ;;  %v6748_v14 = vmul.f32 %v6684_v20, %v6236_v46 }
 0xd4e   : > { %v6878_v52 = vmul.f32 %v6814_v26, %v6750_v51 }
 0xd4f   : > { %v8750_v24 = vpop.eup %8749  ;;  %v6876_v58 = vmul.f32 %v6812_v2, %v6748_v14 }
 0xd50   : > { %v6692_v43 = vadd.f32 1.0, %v8750_v24  ;;  %v8752_v5 = vpop.eup %8751  ;;  %v6914_v40 = vpack.c.bf16 %v6880_v45, %v6878_v52 }
 0xd51   : > { %v8754_v62 = vpop.eup %8753  ;;  %v6682_v36 = vadd.f32 1.0, %v8752_v5 }
 0xd52   : > { %v6756_v50 = vmul.f32 %v6692_v43, %v6244_v59  ;;  %v8756_v7 = vpop.eup %8755  ;;  %v6680_v33 = vadd.f32 1.0, %v8754_v62 }
 0xd53   : > { %v6746_v41 = vmul.f32 %v6682_v36, %v6234_v53  ;;  %v6678_v19 = vadd.f32 1.0, %v8756_v7 }
 0xd54   : > { %v6884_v31 = vmul.f32 %v6820_v57, %v6756_v50  ;;  %v6744_v27 = vmul.f32 %v6680_v33, %v6232_v61 }
 0xd55   : > { %v6874_v25 = vmul.f32 %v6810_v13, %v6746_v41  ;;  %v6742_v1 = vmul.f32 %v6678_v19, %v6230_v37 }
 0xd56   : > { %v6916_v39 = vpack.c.bf16 %v6884_v31, %v6882_v44  ;;  %v6872_v54 = vmul.f32 %v6808_v56, %v6744_v27 }
 0xd57   : > { %v6912_v34 = vpack.c.bf16 %v6876_v58, %v6874_v25  ;;  %v6870_v42 = vmul.f32 %v6806_v29, %v6742_v1 }
 0xd58   : > { %6963 = vmatpush.bf16.msra.mxu3 %v6916_v39 }
 0xd59   : > { %v6910_v0 = vpack.c.bf16 %v6872_v54, %v6870_v42 }
 0xd5c   : > { %6964 = vmatpush.bf16.msra.mxu3 %v6914_v40 }
 0xd60   : > { %6965 = vmatpush.bf16.msra.mxu3 %v6912_v34 }
 0xd64   : > { %6966 = vmatpush.bf16.msra.mxu3 %v6910_v0 }
 0xd68   : > { %6967 = vmatpush.bf16.msra.mxu3 %v6908_v10 }
 0xd6c   : > { %6968 = vmatpush.bf16.msra.mxu3 %v6906_v11 }
 0xd70   : > { %6969 = vmatpush.bf16.msra.mxu3 %v6904_v48 }
 0xd74   : > { %6970 = vmatpush.bf16.msra.mxu3 %v6902_v6 }
 0xd77   : > { %6971 = vmatmul.bf16.vlgmr.msra.gmra.mxu3 %v6921_v38 }
 0xdbb   : > { %v6933_v55 = vpop.f32.mrf.mxu0 }
 0xdbf   : > { %v6946_v9 = vpop.f32.mrf.mxu1 }
 0xdc0   : > { %v6947_v10 = vadd.f32 %v6946_v9, %v6933_v55 }
 0xdc1   : > { %v6959_v4 = vpop.f32.mrf.mxu2 }
 0xdc2   : > { %v6976_v17 = vsel %vm4043_vm13, %v6947_v10, 0.0 }
 0xdc3   : > { %v6935_v47 = vpop.f32.mrf.mxu0 }
 0xdc7   : > { %v6948_v49 = vpop.f32.mrf.mxu1 }
 0xdc9   : > { %v6961_v15 = vpop.f32.mrf.mxu2 }
 0xdfa   : > { %v6972_v8 = vpop.f32.mrf.mxu3 }
 0xdfb   : > { %v6973_v22 = vadd.f32 %v6972_v8, %v6959_v4 }
 0xdfd   : > { %v6978_v60 = vsel %vm6977_vm5, %v6973_v22, 0.0 }
 0xdfe   : > { %v6979_v21 = vadd.f32 %v6978_v60, %v6976_v17 }
 0xe00   : > { %6980 = vadd.xlane.f32.xlu1 %v6979_v21 }
 0xe02   : > { %v6974_v48 = vpop.f32.mrf.mxu3 }
 0xe73   : > { %v6981_v18 = vpop.xlane.xlu1 %6980 }
 0xe74   : > { %v6986_v6 = vadd.f32 %v8372_v23, %v6981_v18 }
 0xe76   : > { %6988 = vst.msk [vmem:[%s555_s19] sm:$0xf] %vm6987_vm12, %v6986_v6 }
 0xe77 PF: > { %s28_s23 = sadd.s32 1, %s8764_s23  }
 0xe78   : > { %p25_p4 = scmp.ge.s32.totalorder %s28_s23, 4  }
 0xe7a   :  { %27 = sbr.rel (!%p25_p4) target bundleno = 3 (0x3), region = 120 }

</bundles_post_ra>
